<compile_context>
chip_gen: v6e
topology: v6e:2x2x1
jax: 0.10.0
libtpu: 0.0.40
codegen_flags: <defaults>
</compile_context>

<pallas_src>
import jax
import jax.numpy as jnp
from jax.experimental import pallas as pl
from jax.experimental.pallas import tpu as pltpu

D_IN = 28 * 28            # 784: multiple of 8, kept unpadded for I/O
H1, H2 = 400, 20          # logical hidden dims
H1_P, H2_P = 512, 128     # lane-padded hidden dims (multiples of 128)


def _round_up(v, m):
    return ((v + m - 1) // m) * m


def dae_kernel(x_ref,
               w1_ref, b1_ref,
               w2_ref, b2_ref,
               w3_ref, b3_ref,
               w4_ref, b4_ref,
               o_ref):
    cdt = w1_ref.dtype                       # MXU operand dtype (bf16 default)

    x = x_ref[...].astype(cdt)                                            # (TB, 784)

    h = jnp.dot(x, w1_ref[...], preferred_element_type=jnp.float32)      # (TB, 512) f32
    h = jnp.maximum(h + b1_ref[...], 0.0)

    h = jnp.dot(h.astype(cdt), w2_ref[...],
                preferred_element_type=jnp.float32)                       # (TB, 128) f32
    h = jnp.maximum(h + b2_ref[...], 0.0)

    h = jnp.dot(h.astype(cdt), w3_ref[...],
                preferred_element_type=jnp.float32)                       # (TB, 512) f32
    h = jnp.maximum(h + b3_ref[...], 0.0)

    z = jnp.dot(h.astype(cdt), w4_ref[...],
                preferred_element_type=jnp.float32) + b4_ref[...]         # (TB, 784) f32

    # sigmoid(z) = 1 / (1 + exp(-z)): exp + approx reciprocal both on the EUP slot.
    e = jnp.exp(-z)
    o_ref[...] = pl.reciprocal(1.0 + e, approx=True).astype(o_ref.dtype)


def prepare_params(params, compute_dtype=jnp.bfloat16):
    """Zero-pad hidden dims to lane multiples; cast weights ONCE to the MXU dtype.

    Padding is exact: padded weight rows/cols are zero, so padded hidden lanes
    stay 0 through ReLU and contribute 0 to later matmuls. Biases stay f32.
    """
    (w1, b1), (w2, b2), (w3, b3), (w4, b4) = params

    def pad_w(w, rows, cols):
        w = jnp.pad(w, ((0, rows - w.shape[0]), (0, cols - w.shape[1])))
        return w.astype(compute_dtype)

    def pad_b(b, cols):
        return jnp.pad(b, ((0, 0), (0, cols - b.shape[1]))).astype(jnp.float32)

    return (
        (pad_w(w1, D_IN, H1_P), pad_b(b1, H1_P)),
        (pad_w(w2, H1_P, H2_P), pad_b(b2, H2_P)),
        (pad_w(w3, H2_P, H1_P), pad_b(b3, H1_P)),
        (pad_w(w4, H1_P, D_IN), pad_b(b4, D_IN)),
    )


def _forward_call(x, prepared_params, *, tb, grid, out_dtype, single_buffer_weights):
    (w1, b1), (w2, b2), (w3, b3), (w4, b4) = prepared_params
    b_pad = x.shape[0]

    act_in_spec = pl.BlockSpec((tb, D_IN), lambda i: (i, 0))
    act_out_spec = pl.BlockSpec((tb, D_IN), lambda i: (i, 0))

    def resident(a):
        # Constant index_map => loaded once, VMEM-resident across grid steps.
        if single_buffer_weights:
            return pl.BlockSpec(a.shape, lambda i: (0, 0),
                                pipeline_mode=pl.Buffered(1))
        return pl.BlockSpec(a.shape, lambda i: (0, 0))

    param_bytes = sum(int(v.size) * v.dtype.itemsize
                      for pair in prepared_params for v in pair)
    flops = 2 * b_pad * (D_IN * H1_P + H1_P * H2_P + H2_P * H1_P + H1_P * D_IN)
    cost = pl.CostEstimate(
        flops=flops,
        transcendentals=2 * b_pad * D_IN,     # exp + reciprocal per output element
        bytes_accessed=(param_bytes
                        + int(x.size) * x.dtype.itemsize
                        + b_pad * D_IN * jnp.dtype(out_dtype).itemsize),
    )

    return pl.pallas_call(
        dae_kernel,
        out_shape=jax.ShapeDtypeStruct((b_pad, D_IN), out_dtype),
        grid=grid,
        in_specs=[act_in_spec,
                  resident(w1), resident(b1),
                  resident(w2), resident(b2),
                  resident(w3), resident(b3),
                  resident(w4), resident(b4)],
        out_specs=act_out_spec,
        compiler_params=pltpu.CompilerParams(
            dimension_semantics=("parallel",),       # megacore sharding on v7x
            vmem_limit_bytes=48 * 1024 * 1024,       # <= 56 MiB budget (v7x: 64 MiB/TC)
        ),
        cost_estimate=cost,
    )(x, w1, b1, w2, b2, w3, b3, w4, b4)


def net_forward(x_nchw, prepared_params, *, tile_b=1024, out_dtype=jnp.float32):
    """x_nchw: (B, 1, 28, 28) float32 -> (B, 784) in [0, 1] (dtype = out_dtype)."""
    B = x_nchw.shape[0]
    x = x_nchw.reshape(B, D_IN)              # same as torch .view(-1, 784); stays f32

    # >= 2 grid steps (both TCs busy on v7x) and near-even, 8-aligned batch tiles.
    n_tiles = max(pl.cdiv(B, tile_b), 2)
    tb = _round_up(pl.cdiv(B, n_tiles), 8)
    b_pad = n_tiles * tb
    if b_pad != B:
        x = jnp.pad(x, ((0, b_pad - B), (0, 0)))   # batch pad only; no lane pad/cast

    try:
        out = _forward_call(x, prepared_params, tb=tb, grid=(n_tiles,),
                            out_dtype=out_dtype, single_buffer_weights=True)
    except Exception:
        # Fallback: default double-buffered weight specs (previous, known-good path).
        out = _forward_call(x, prepared_params, tb=tb, grid=(n_tiles,),
                            out_dtype=out_dtype, single_buffer_weights=False)

    return out[:B] if b_pad != B else out


def init_params(key):
    """Deterministic init. Weights stored as (in, out); biases as (1, out)."""
    dims = [(D_IN, H1), (H1, H2), (H2, H1), (H1, D_IN)]
    params = []
    for d_in, d_out in dims:
        key, kw, kb = jax.random.split(key, 3)
        bound = 1.0 / jnp.sqrt(jnp.float32(d_in))    # torch nn.Linear default bound
        w = jax.random.uniform(kw, (d_in, d_out), jnp.float32, -bound, bound)
        b = jax.random.uniform(kb, (1, d_out), jnp.float32, -bound, bound)
        params.append((w, b))
    return params


def reference_forward(x_nchw, params):
    x = x_nchw.reshape(x_nchw.shape[0], -1)
    (w1, b1), (w2, b2), (w3, b3), (w4, b4) = params
    h = jnp.maximum(x @ w1 + b1, 0.0)
    h = jnp.maximum(h @ w2 + b2, 0.0)
    h = jnp.maximum(h @ w3 + b3, 0.0)
    return jax.nn.sigmoid(h @ w4 + b4)


if __name__ == "__main__":
    key = jax.random.PRNGKey(0)
    key, kx = jax.random.split(key)

    B = 4
    x = jax.random.normal(kx, (B, 1, 28, 28), dtype=jnp.float32)
    params = init_params(key)
    ref = reference_forward(x, params)

    # f32-weight path: tight check (only the approx-reciprocal sigmoid deviates).
    out_f32 = jax.block_until_ready(
        net_forward(x, prepare_params(params, jnp.float32), out_dtype=jnp.float32))
    assert out_f32.shape == (B, D_IN), out_f32.shape
    assert jnp.allclose(out_f32, ref, atol=2e-3), "f32 mismatch vs reference"

    # Default fast path: bf16 MXU operands, f32 accumulation, f32 output.
    prepared_bf16 = prepare_params(params)          # bf16 weights by default
    out_bf16 = jax.block_until_ready(net_forward(x, prepared_bf16))
    assert out_bf16.shape == (B, D_IN), out_bf16.shape
    assert jnp.allclose(out_bf16, ref, atol=5e-2), "bf16 mismatch vs reference"

    # bf16 output variant (halves HBM writeback; biggest win on v6e).
    out_bf16_o = jax.block_until_ready(
        net_forward(x, prepared_bf16, out_dtype=jnp.bfloat16))
    assert out_bf16_o.shape == (B, D_IN), out_bf16_o.shape
    assert jnp.allclose(out_bf16_o.astype(jnp.float32), ref, atol=5e-2), \
        "bf16-output mismatch vs reference"

    print("KERNEL_OK")
</pallas_src>

<mosaic_0001>
module attributes {stable_mosaic.version = 11 : i64} {
  func.func @dae_kernel(%arg0: i32, %arg1: memref<8x784xf32, #tpu.memory_space<vmem>>, %arg2: memref<784x512xf32, #tpu.memory_space<vmem>>, %arg3: memref<1x512xf32, #tpu.memory_space<vmem>>, %arg4: memref<512x128xf32, #tpu.memory_space<vmem>>, %arg5: memref<1x128xf32, #tpu.memory_space<vmem>>, %arg6: memref<128x512xf32, #tpu.memory_space<vmem>>, %arg7: memref<1x512xf32, #tpu.memory_space<vmem>>, %arg8: memref<512x784xf32, #tpu.memory_space<vmem>>, %arg9: memref<1x784xf32, #tpu.memory_space<vmem>>, %arg10: memref<8x784xf32, #tpu.memory_space<vmem>>) attributes {dimension_semantics = [#tpu.dimension_semantics<parallel>], iteration_bounds = array<i64: 2>, scalar_prefetch = 0 : i64, scratch_operands = 0 : i64, tpu.core_type = #tpu.core_type<tc>, window_params = [{transform_indices = @transform_0, window_bounds = array<i64: 8, 784>}, {pipeline_mode = #tpu.pipeline_mode<synchronous>, transform_indices = @transform_1, window_bounds = array<i64: 784, 512>}, {pipeline_mode = #tpu.pipeline_mode<synchronous>, transform_indices = @transform_2, window_bounds = array<i64: 1, 512>}, {pipeline_mode = #tpu.pipeline_mode<synchronous>, transform_indices = @transform_3, window_bounds = array<i64: 512, 128>}, {pipeline_mode = #tpu.pipeline_mode<synchronous>, transform_indices = @transform_4, window_bounds = array<i64: 1, 128>}, {pipeline_mode = #tpu.pipeline_mode<synchronous>, transform_indices = @transform_5, window_bounds = array<i64: 128, 512>}, {pipeline_mode = #tpu.pipeline_mode<synchronous>, transform_indices = @transform_6, window_bounds = array<i64: 1, 512>}, {pipeline_mode = #tpu.pipeline_mode<synchronous>, transform_indices = @transform_7, window_bounds = array<i64: 512, 784>}, {pipeline_mode = #tpu.pipeline_mode<synchronous>, transform_indices = @transform_8, window_bounds = array<i64: 1, 784>}, {transform_indices = @transform_9, window_bounds = array<i64: 8, 784>}]} {
    %c0 = arith.constant 0 : index
    %c0_0 = arith.constant 0 : index
    %0 = vector.load %arg1[%c0, %c0_0] : memref<8x784xf32, #tpu.memory_space<vmem>>, vector<8x784xf32>
    %c0_1 = arith.constant 0 : index
    %c0_2 = arith.constant 0 : index
    %1 = vector.load %arg2[%c0_1, %c0_2] : memref<784x512xf32, #tpu.memory_space<vmem>>, vector<784x512xf32>
    %cst = arith.constant dense<0.000000e+00> : vector<8x512xf32>
    %2 = tpu.matmul %0, %1, %cst {dimension_numbers = #tpu.dot_dimension_numbers<[1], [0], [0], [1], [0, 0, 1, 1], [], []>} : vector<8x784xf32>, vector<784x512xf32>, vector<8x512xf32> -> vector<8x512xf32>
    %c0_3 = arith.constant 0 : index
    %c0_4 = arith.constant 0 : index
    %3 = vector.load %arg3[%c0_3, %c0_4] : memref<1x512xf32, #tpu.memory_space<vmem>>, vector<1x512xf32>
    %4 = vector.broadcast %3 : vector<1x512xf32> to vector<8x512xf32>
    %5 = arith.addf %2, %4 : vector<8x512xf32>
    %cst_5 = arith.constant 0.000000e+00 : f32
    %6 = vector.broadcast %cst_5 : f32 to vector<8x512xf32>
    %7 = arith.maximumf %5, %6 : vector<8x512xf32>
    %c0_6 = arith.constant 0 : index
    %c0_7 = arith.constant 0 : index
    %8 = vector.load %arg4[%c0_6, %c0_7] : memref<512x128xf32, #tpu.memory_space<vmem>>, vector<512x128xf32>
    %cst_8 = arith.constant dense<0.000000e+00> : vector<8x128xf32>
    %9 = tpu.matmul %7, %8, %cst_8 {dimension_numbers = #tpu.dot_dimension_numbers<[1], [0], [0], [1], [0, 0, 1, 1], [], []>} : vector<8x512xf32>, vector<512x128xf32>, vector<8x128xf32> -> vector<8x128xf32>
    %c0_9 = arith.constant 0 : index
    %c0_10 = arith.constant 0 : index
    %10 = vector.load %arg5[%c0_9, %c0_10] : memref<1x128xf32, #tpu.memory_space<vmem>>, vector<1x128xf32>
    %11 = vector.broadcast %10 : vector<1x128xf32> to vector<8x128xf32>
    %12 = arith.addf %9, %11 : vector<8x128xf32>
    %cst_11 = arith.constant 0.000000e+00 : f32
    %13 = vector.broadcast %cst_11 : f32 to vector<8x128xf32>
    %14 = arith.maximumf %12, %13 : vector<8x128xf32>
    %c0_12 = arith.constant 0 : index
    %c0_13 = arith.constant 0 : index
    %15 = vector.load %arg6[%c0_12, %c0_13] : memref<128x512xf32, #tpu.memory_space<vmem>>, vector<128x512xf32>
    %cst_14 = arith.constant dense<0.000000e+00> : vector<8x512xf32>
    %16 = tpu.matmul %14, %15, %cst_14 {dimension_numbers = #tpu.dot_dimension_numbers<[1], [0], [0], [1], [0, 0, 1, 1], [], []>} : vector<8x128xf32>, vector<128x512xf32>, vector<8x512xf32> -> vector<8x512xf32>
    %c0_15 = arith.constant 0 : index
    %c0_16 = arith.constant 0 : index
    %17 = vector.load %arg7[%c0_15, %c0_16] : memref<1x512xf32, #tpu.memory_space<vmem>>, vector<1x512xf32>
    %18 = vector.broadcast %17 : vector<1x512xf32> to vector<8x512xf32>
    %19 = arith.addf %16, %18 : vector<8x512xf32>
    %cst_17 = arith.constant 0.000000e+00 : f32
    %20 = vector.broadcast %cst_17 : f32 to vector<8x512xf32>
    %21 = arith.maximumf %19, %20 : vector<8x512xf32>
    %c0_18 = arith.constant 0 : index
    %c0_19 = arith.constant 0 : index
    %22 = vector.load %arg8[%c0_18, %c0_19] : memref<512x784xf32, #tpu.memory_space<vmem>>, vector<512x784xf32>
    %cst_20 = arith.constant dense<0.000000e+00> : vector<8x784xf32>
    %23 = tpu.matmul %21, %22, %cst_20 {dimension_numbers = #tpu.dot_dimension_numbers<[1], [0], [0], [1], [0, 0, 1, 1], [], []>} : vector<8x512xf32>, vector<512x784xf32>, vector<8x784xf32> -> vector<8x784xf32>
    %c0_21 = arith.constant 0 : index
    %c0_22 = arith.constant 0 : index
    %24 = vector.load %arg9[%c0_21, %c0_22] : memref<1x784xf32, #tpu.memory_space<vmem>>, vector<1x784xf32>
    %25 = vector.broadcast %24 : vector<1x784xf32> to vector<8x784xf32>
    %26 = arith.addf %23, %25 : vector<8x784xf32>
    %cst_23 = arith.constant 0.000000e+00 : f32
    %27 = vector.broadcast %cst_23 : f32 to vector<8x784xf32>
    %28 = arith.subf %27, %26 : vector<8x784xf32>
    %29 = math.exp %28 : vector<8x784xf32>
    %cst_24 = arith.constant 1.000000e+00 : f32
    %30 = vector.broadcast %cst_24 : f32 to vector<8x784xf32>
    %31 = arith.addf %30, %29 : vector<8x784xf32>
    %32 = tpu.reciprocal %31 {approx = true} : vector<8x784xf32> -> vector<8x784xf32>
    %c0_25 = arith.constant 0 : index
    %c0_26 = arith.constant 0 : index
    %33 = vector.load %arg10[%c0_25, %c0_26] : memref<8x784xf32, #tpu.memory_space<vmem>>, vector<8x784xf32>
    tpu.vector_store %arg10[%c0_25, %c0_26], %32 {strides = array<i32>} : memref<8x784xf32, #tpu.memory_space<vmem>>, vector<8x784xf32>,
    return
  }
  func.func @transform_0(%arg0: i32) -> (i32, i32) {
    %c0_i32 = arith.constant 0 : i32
    %c0_i32_0 = arith.constant 0 : i32
    return %arg0, %c0_i32 : i32, i32
  }
  func.func @transform_1(%arg0: i32) -> (i32, i32) {
    %c0_i32 = arith.constant 0 : i32
    %c0_i32_0 = arith.constant 0 : i32
    %c0_i32_1 = arith.constant 0 : i32
    return %c0_i32, %c0_i32_0 : i32, i32
  }
  func.func @transform_2(%arg0: i32) -> (i32, i32) {
    %c0_i32 = arith.constant 0 : i32
    %c0_i32_0 = arith.constant 0 : i32
    %c0_i32_1 = arith.constant 0 : i32
    return %c0_i32, %c0_i32_0 : i32, i32
  }
  func.func @transform_3(%arg0: i32) -> (i32, i32) {
    %c0_i32 = arith.constant 0 : i32
    %c0_i32_0 = arith.constant 0 : i32
    %c0_i32_1 = arith.constant 0 : i32
    return %c0_i32, %c0_i32_0 : i32, i32
  }
  func.func @transform_4(%arg0: i32) -> (i32, i32) {
    %c0_i32 = arith.constant 0 : i32
    %c0_i32_0 = arith.constant 0 : i32
    %c0_i32_1 = arith.constant 0 : i32
    return %c0_i32, %c0_i32_0 : i32, i32
  }
  func.func @transform_5(%arg0: i32) -> (i32, i32) {
    %c0_i32 = arith.constant 0 : i32
    %c0_i32_0 = arith.constant 0 : i32
    %c0_i32_1 = arith.constant 0 : i32
    return %c0_i32, %c0_i32_0 : i32, i32
  }
  func.func @transform_6(%arg0: i32) -> (i32, i32) {
    %c0_i32 = arith.constant 0 : i32
    %c0_i32_0 = arith.constant 0 : i32
    %c0_i32_1 = arith.constant 0 : i32
    return %c0_i32, %c0_i32_0 : i32, i32
  }
  func.func @transform_7(%arg0: i32) -> (i32, i32) {
    %c0_i32 = arith.constant 0 : i32
    %c0_i32_0 = arith.constant 0 : i32
    %c0_i32_1 = arith.constant 0 : i32
    return %c0_i32, %c0_i32_0 : i32, i32
  }
  func.func @transform_8(%arg0: i32) -> (i32, i32) {
    %c0_i32 = arith.constant 0 : i32
    %c0_i32_0 = arith.constant 0 : i32
    %c0_i32_1 = arith.constant 0 : i32
    return %c0_i32, %c0_i32_0 : i32, i32
  }
  func.func @transform_9(%arg0: i32) -> (i32, i32) {
    %c0_i32 = arith.constant 0 : i32
    %c0_i32_0 = arith.constant 0 : i32
    return %arg0, %c0_i32 : i32, i32
  }
}

module attributes {stable_mosaic.version = 11 : i64} {
  func.func @dae_kernel(%arg0: i32, %arg1: memref<8x784xf32, #tpu.memory_space<vmem>>, %arg2: memref<784x512xf32, #tpu.memory_space<vmem>>, %arg3: memref<1x512xf32, #tpu.memory_space<vmem>>, %arg4: memref<512x128xf32, #tpu.memory_space<vmem>>, %arg5: memref<1x128xf32, #tpu.memory_space<vmem>>, %arg6: memref<128x512xf32, #tpu.memory_space<vmem>>, %arg7: memref<1x512xf32, #tpu.memory_space<vmem>>, %arg8: memref<512x784xf32, #tpu.memory_space<vmem>>, %arg9: memref<1x784xf32, #tpu.memory_space<vmem>>, %arg10: memref<8x784xf32, #tpu.memory_space<vmem>>) attributes {dimension_semantics = [#tpu.dimension_semantics<parallel>], iteration_bounds = array<i64: 2>, scalar_prefetch = 0 : i64, scratch_operands = 0 : i64, tpu.core_type = #tpu.core_type<tc>, window_params = [{transform_indices = @transform_0, window_bounds = array<i64: 8, 784>}, {pipeline_mode = #tpu.pipeline_mode<synchronous>, transform_indices = @transform_1, window_bounds = array<i64: 784, 512>}, {pipeline_mode = #tpu.pipeline_mode<synchronous>, transform_indices = @transform_2, window_bounds = array<i64: 1, 512>}, {pipeline_mode = #tpu.pipeline_mode<synchronous>, transform_indices = @transform_3, window_bounds = array<i64: 512, 128>}, {pipeline_mode = #tpu.pipeline_mode<synchronous>, transform_indices = @transform_4, window_bounds = array<i64: 1, 128>}, {pipeline_mode = #tpu.pipeline_mode<synchronous>, transform_indices = @transform_5, window_bounds = array<i64: 128, 512>}, {pipeline_mode = #tpu.pipeline_mode<synchronous>, transform_indices = @transform_6, window_bounds = array<i64: 1, 512>}, {pipeline_mode = #tpu.pipeline_mode<synchronous>, transform_indices = @transform_7, window_bounds = array<i64: 512, 784>}, {pipeline_mode = #tpu.pipeline_mode<synchronous>, transform_indices = @transform_8, window_bounds = array<i64: 1, 784>}, {transform_indices = @transform_9, window_bounds = array<i64: 8, 784>}]} {
    %c0 = arith.constant 0 : index
    %c0_0 = arith.constant 0 : index
    %0 = vector.load %arg1[%c0, %c0_0] : memref<8x784xf32, #tpu.memory_space<vmem>>, vector<8x784xf32>
    %c0_1 = arith.constant 0 : index
    %c0_2 = arith.constant 0 : index
    %1 = vector.load %arg2[%c0_1, %c0_2] : memref<784x512xf32, #tpu.memory_space<vmem>>, vector<784x512xf32>
    %cst = arith.constant dense<0.000000e+00> : vector<8x512xf32>
    %2 = tpu.matmul %0, %1, %cst {dimension_numbers = #tpu.dot_dimension_numbers<[1], [0], [0], [1], [0, 0, 1, 1], [], []>} : vector<8x784xf32>, vector<784x512xf32>, vector<8x512xf32> -> vector<8x512xf32>
    %c0_3 = arith.constant 0 : index
    %c0_4 = arith.constant 0 : index
    %3 = vector.load %arg3[%c0_3, %c0_4] : memref<1x512xf32, #tpu.memory_space<vmem>>, vector<1x512xf32>
    %4 = vector.broadcast %3 : vector<1x512xf32> to vector<8x512xf32>
    %5 = arith.addf %2, %4 : vector<8x512xf32>
    %cst_5 = arith.constant 0.000000e+00 : f32
    %6 = vector.broadcast %cst_5 : f32 to vector<8x512xf32>
    %7 = arith.maximumf %5, %6 : vector<8x512xf32>
    %c0_6 = arith.constant 0 : index
    %c0_7 = arith.constant 0 : index
    %8 = vector.load %arg4[%c0_6, %c0_7] : memref<512x128xf32, #tpu.memory_space<vmem>>, vector<512x128xf32>
    %cst_8 = arith.constant dense<0.000000e+00> : vector<8x128xf32>
    %9 = tpu.matmul %7, %8, %cst_8 {dimension_numbers = #tpu.dot_dimension_numbers<[1], [0], [0], [1], [0, 0, 1, 1], [], []>} : vector<8x512xf32>, vector<512x128xf32>, vector<8x128xf32> -> vector<8x128xf32>
    %c0_9 = arith.constant 0 : index
    %c0_10 = arith.constant 0 : index
    %10 = vector.load %arg5[%c0_9, %c0_10] : memref<1x128xf32, #tpu.memory_space<vmem>>, vector<1x128xf32>
    %11 = vector.broadcast %10 : vector<1x128xf32> to vector<8x128xf32>
    %12 = arith.addf %9, %11 : vector<8x128xf32>
    %cst_11 = arith.constant 0.000000e+00 : f32
    %13 = vector.broadcast %cst_11 : f32 to vector<8x128xf32>
    %14 = arith.maximumf %12, %13 : vector<8x128xf32>
    %c0_12 = arith.constant 0 : index
    %c0_13 = arith.constant 0 : index
    %15 = vector.load %arg6[%c0_12, %c0_13] : memref<128x512xf32, #tpu.memory_space<vmem>>, vector<128x512xf32>
    %cst_14 = arith.constant dense<0.000000e+00> : vector<8x512xf32>
    %16 = tpu.matmul %14, %15, %cst_14 {dimension_numbers = #tpu.dot_dimension_numbers<[1], [0], [0], [1], [0, 0, 1, 1], [], []>} : vector<8x128xf32>, vector<128x512xf32>, vector<8x512xf32> -> vector<8x512xf32>
    %c0_15 = arith.constant 0 : index
    %c0_16 = arith.constant 0 : index
    %17 = vector.load %arg7[%c0_15, %c0_16] : memref<1x512xf32, #tpu.memory_space<vmem>>, vector<1x512xf32>
    %18 = vector.broadcast %17 : vector<1x512xf32> to vector<8x512xf32>
    %19 = arith.addf %16, %18 : vector<8x512xf32>
    %cst_17 = arith.constant 0.000000e+00 : f32
    %20 = vector.broadcast %cst_17 : f32 to vector<8x512xf32>
    %21 = arith.maximumf %19, %20 : vector<8x512xf32>
    %c0_18 = arith.constant 0 : index
    %c0_19 = arith.constant 0 : index
    %22 = vector.load %arg8[%c0_18, %c0_19] : memref<512x784xf32, #tpu.memory_space<vmem>>, vector<512x784xf32>
    %cst_20 = arith.constant dense<0.000000e+00> : vector<8x784xf32>
    %23 = tpu.matmul %21, %22, %cst_20 {dimension_numbers = #tpu.dot_dimension_numbers<[1], [0], [0], [1], [0, 0, 1, 1], [], []>} : vector<8x512xf32>, vector<512x784xf32>, vector<8x784xf32> -> vector<8x784xf32>
    %c0_21 = arith.constant 0 : index
    %c0_22 = arith.constant 0 : index
    %24 = vector.load %arg9[%c0_21, %c0_22] : memref<1x784xf32, #tpu.memory_space<vmem>>, vector<1x784xf32>
    %25 = vector.broadcast %24 : vector<1x784xf32> to vector<8x784xf32>
    %26 = arith.addf %23, %25 : vector<8x784xf32>
    %cst_23 = arith.constant 0.000000e+00 : f32
    %27 = vector.broadcast %cst_23 : f32 to vector<8x784xf32>
    %28 = arith.subf %27, %26 : vector<8x784xf32>
    %29 = math.exp %28 : vector<8x784xf32>
    %cst_24 = arith.constant 1.000000e+00 : f32
    %30 = vector.broadcast %cst_24 : f32 to vector<8x784xf32>
    %31 = arith.addf %30, %29 : vector<8x784xf32>
    %32 = tpu.reciprocal %31 {approx = true} : vector<8x784xf32> -> vector<8x784xf32>
    %c0_25 = arith.constant 0 : index
    %c0_26 = arith.constant 0 : index
    %33 = vector.load %arg10[%c0_25, %c0_26] : memref<8x784xf32, #tpu.memory_space<vmem>>, vector<8x784xf32>
    tpu.vector_store %arg10[%c0_25, %c0_26], %32 {strides = array<i32>} : memref<8x784xf32, #tpu.memory_space<vmem>>, vector<8x784xf32>,
    return
  }
  func.func @transform_0(%arg0: i32) -> (i32, i32) {
    %c0_i32 = arith.constant 0 : i32
    %c0_i32_0 = arith.constant 0 : i32
    return %arg0, %c0_i32 : i32, i32
  }
  func.func @transform_1(%arg0: i32) -> (i32, i32) {
    %c0_i32 = arith.constant 0 : i32
    %c0_i32_0 = arith.constant 0 : i32
    %c0_i32_1 = arith.constant 0 : i32
    return %c0_i32, %c0_i32_0 : i32, i32
  }
  func.func @transform_2(%arg0: i32) -> (i32, i32) {
    %c0_i32 = arith.constant 0 : i32
    %c0_i32_0 = arith.constant 0 : i32
    %c0_i32_1 = arith.constant 0 : i32
    return %c0_i32, %c0_i32_0 : i32, i32
  }
  func.func @transform_3(%arg0: i32) -> (i32, i32) {
    %c0_i32 = arith.constant 0 : i32
    %c0_i32_0 = arith.constant 0 : i32
    %c0_i32_1 = arith.constant 0 : i32
    return %c0_i32, %c0_i32_0 : i32, i32
  }
  func.func @transform_4(%arg0: i32) -> (i32, i32) {
    %c0_i32 = arith.constant 0 : i32
    %c0_i32_0 = arith.constant 0 : i32
    %c0_i32_1 = arith.constant 0 : i32
    return %c0_i32, %c0_i32_0 : i32, i32
  }
  func.func @transform_5(%arg0: i32) -> (i32, i32) {
    %c0_i32 = arith.constant 0 : i32
    %c0_i32_0 = arith.constant 0 : i32
    %c0_i32_1 = arith.constant 0 : i32
    return %c0_i32, %c0_i32_0 : i32, i32
  }
  func.func @transform_6(%arg0: i32) -> (i32, i32) {
    %c0_i32 = arith.constant 0 : i32
    %c0_i32_0 = arith.constant 0 : i32
    %c0_i32_1 = arith.constant 0 : i32
    return %c0_i32, %c0_i32_0 : i32, i32
  }
  func.func @transform_7(%arg0: i32) -> (i32, i32) {
    %c0_i32 = arith.constant 0 : i32
    %c0_i32_0 = arith.constant 0 : i32
    %c0_i32_1 = arith.constant 0 : i32
    return %c0_i32, %c0_i32_0 : i32, i32
  }
  func.func @transform_8(%arg0: i32) -> (i32, i32) {
    %c0_i32 = arith.constant 0 : i32
    %c0_i32_0 = arith.constant 0 : i32
    %c0_i32_1 = arith.constant 0 : i32
    return %c0_i32, %c0_i32_0 : i32, i32
  }
  func.func @transform_9(%arg0: i32) -> (i32, i32) {
    %c0_i32 = arith.constant 0 : i32
    %c0_i32_0 = arith.constant 0 : i32
    return %arg0, %c0_i32 : i32, i32
  }
}

</mosaic_0001>

<bundles_post_ra>
// kernel: tpu_custom_call.1
= control target key start
LH: loop header
LB: loop body
LE: loop exit
PB: predicated region body
PF: predicated region fallthrough
CT: control target
= control target key end

     0   :  { %14 = vsyncpa [#allocation3], 0  ;;  %s6403_s0 = inlined_call_operand.vmem [shape: f32[16,784], index: 0, kind: input, shape index: {}]   ;;  %s6404_s1 = inlined_call_operand.vmem [shape: f32[784,512], index: 1, kind: input, shape index: {}]   ;;  %s6405_s2 = inlined_call_operand.vmem [shape: f32[1,512], index: 2, kind: input, shape index: {}]   ;;  %s6406_s3 = inlined_call_operand.vmem [shape: f32[512,128], index: 3, kind: input, shape index: {}]   ;;  %s6407_s4 = inlined_call_operand.vmem [shape: f32[1,128], index: 4, kind: input, shape index: {}]   ;;  %s6408_s5 = inlined_call_operand.vmem [shape: f32[128,512], index: 5, kind: input, shape index: {}]   ;;  %s6409_s6 = inlined_call_operand.vmem [shape: f32[1,512], index: 6, kind: input, shape index: {}]   ;;  %s6410_s7 = inlined_call_operand.vmem [shape: f32[512,784], index: 7, kind: input, shape index: {}]   ;;  %s6411_s8 = inlined_call_operand.vmem [shape: f32[1,784], index: 8, kind: input, shape index: {}]   ;;  %s6412_s9 = inlined_call_operand.hbm [shape: f32[16,784], index: 9, kind: output, shape index: {}]  }
   0x1   :  { %16 = vsyncpa [#allocation3 + $0x1], 0  ;;  %s3278_s30 = smov 0   ;;  %s3280_s10 = smov 0  }
   0x2   :  { %s3282_s11 = smov 0   ;;  %s3284_s12 = smov 0  }
   0x3 LB: > { %s3299_s13 = sadd.s32 4294967295, %s3224_s12   ;;  %s2939_s14 = sadd.s32 4294967294, %s3224_s12   ;;  %s3224_s12 = sphi %s3284_s12, %s6418_s12   ;;  %s3220_s11 = sphi %s3282_s11, %s6417_s11   ;;  %s3216_s10 = sphi %s3280_s10, %s6416_s10   ;;  %s3212_s30 = sphi %s3278_s30, %s6415_s30  }
   0x4   : > { %s3303_s15 = sadd.s32 1, %s3224_s12   ;;  %s223_s16 = sadd.s32 1, %s3220_s11 }
   0x5   : > { %s220_s17 = ssub.s32 %s3224_s12, %s3303_s15  ;;  %p233_p0 = scmp.ne.s32.totalorder %s3220_s11, %s3216_s10 }
   0x6   : > { %p221_p1 = scmp.eq.s32.totalorder %s220_s17, 0  ;;  %p234_p2 = scmp.eq.s32.totalorder %s3299_s13, 1 }
   0x7   : > { %p239_p3 = scmp.ne.s32.totalorder %s3216_s10, %s3212_s30  ;;  %p240_p4 = scmp.eq.s32.totalorder %s2939_s14, 1 }
   0x8   : > { %s3314_s18 = scalar_select %p221_p1, %s3220_s11, %s223_s16  }
   0x9   : > { %p3316_p5 = por %p234_p2, %p233_p0  ;;  %p3320_p6 = por %p240_p4, %p239_p3 }
   0xa   : > { %p2942_p7 = scmp.ge.s32.totalorder %s3224_s12, 1  ;;  %p290_p8 = scmp.lt.s32.totalorder %s3224_s12, 3 }
   0xc   : > { %p291_p9 = pnand %p2942_p7, %p290_p8 }
   0xd   : > { %p326_p10 = scmp.lt.s32.totalorder (!%p291_p9), %s3299_s13, 1  ;;  %s323_s14 = sand.u32 (!%p291_p9), 1, %s3216_s10  }
   0xe   : > { %294 = sbr.rel (%p291_p9) target bundleno = 1239 (0x4d7), region = 56  ;;  %s2866_s26 = scalar_lea.sflag (!%p291_p9), [#allocation3], %s323_s14 }
   0xf   : > { %s3090_s16 = smul.u32 (!%p291_p9), 56, %s323_s14  ;;  %s3227_s27 = smov (!%p291_p9), [#allocation2]  }
  0x10   : > { %s3092_s21 = smul.u32 (!%p291_p9), 896, %s3299_s13  ;;  %s3168_s28 = sshll.u32 (!%p291_p9), %s3227_s27, 4  ;;  %s3169_s28 = int_to_ptr.vmem [resolvable:$false] %s3168_s28 }
  0x12   : > { %s6364_s25 = scalar_lea.hbm (!%p291_p9), %s6412_s9, %s3092_s21 }
  0x13   : > { %v399_v0 = vld [vmem:[%s6404_s1 + $0x1e8] sm:$0xff]  ;;  %v398_v2 = vld [vmem:[%s6404_s1 + $0x1e0] sm:$0xff]  ;;  %s3648_s29 = scalar_select %p326_p10, %s3299_s13, 1  ;;  %vm752_vm0 = vcmask 130048  }
  0x14   : > { %v527_v1 = vld [vmem:[%s6404_s1 + $0x5e8] sm:$0xff]  ;;  %756 = vmatprep.subr.mxu0 %v399_v0  ;;  %v526_v3 = vld [vmem:[%s6404_s1 + $0x5e0] sm:$0xff]  ;;  %s3170_s13 = scalar_lea.vmem %s3169_s28, 1792 }
  0x15   : > { %827 = vmatprep.subr.mxu1 %v527_v1  ;;  %v395_v4 = vld [vmem:[%s6404_s1 + $0x1c8] sm:$0xff]  ;;  %757 = vmatpush1.msra.mxu0 %v398_v2  ;;  %v394_v6 = vld [vmem:[%s6404_s1 + $0x1c0] sm:$0xff]  ;;  %s3091_s23 = smul.u32 56, %s3648_s29  ;;  %s6341_s29 = scalar_lea.vmem [#allocation2], %s3090_s16 }
  0x16   : > { %v523_v5 = vld [vmem:[%s6404_s1 + $0x5c8] sm:$0xff]  ;;  %828 = vmatpush1.msra.mxu1 %v526_v3  ;;  %v522_v7 = vld [vmem:[%s6404_s1 + $0x5c0] sm:$0xff]  ;;  %758 = vmatprep.subr.mxu0 %v395_v4 }
  0x17   : > { %v391_v8 = vld [vmem:[%s6404_s1 + $0x1a8] sm:$0xff]  ;;  %829 = vmatprep.subr.mxu1 %v523_v5  ;;  %v390_v10 = vld [vmem:[%s6404_s1 + $0x1a0] sm:$0xff]  ;;  %759 = vmatpush1.msra.mxu0 %v394_v6  ;;  %s3702_s17 = scalar_lea.vmem %s6403_s0, %s3091_s23 }
  0x18   : > { %v519_v9 = vld [vmem:[%s6404_s1 + $0x5a8] sm:$0xff]  ;;  %v518_v11 = vld [vmem:[%s6404_s1 + $0x5a0] sm:$0xff]  ;;  %830 = vmatpush1.msra.mxu1 %v522_v7  ;;  %760 = vmatprep.subr.mxu0 %v391_v8 }
  0x19   : > { %v387_v12 = vld [vmem:[%s6404_s1 + $0x188] sm:$0xff]  ;;  %831 = vmatprep.subr.mxu1 %v519_v9  ;;  %v386_v14 = vld [vmem:[%s6404_s1 + $0x180] sm:$0xff]  ;;  %761 = vmatpush1.msra.mxu0 %v390_v10 }
  0x1a   : > { %v515_v13 = vld [vmem:[%s6404_s1 + $0x588] sm:$0xff]  ;;  %v514_v15 = vld [vmem:[%s6404_s1 + $0x580] sm:$0xff]  ;;  %832 = vmatpush1.msra.mxu1 %v518_v11  ;;  %762 = vmatprep.subr.mxu0 %v387_v12 }
  0x1b   : > { %v383_v16 = vld [vmem:[%s6404_s1 + $0x168] sm:$0xff]  ;;  %833 = vmatprep.subr.mxu1 %v515_v13  ;;  %v382_v18 = vld [vmem:[%s6404_s1 + $0x160] sm:$0xff]  ;;  %763 = vmatpush1.msra.mxu0 %v386_v14 }
  0x1c   : > { %v511_v17 = vld [vmem:[%s6404_s1 + $0x568] sm:$0xff]  ;;  %v510_v19 = vld [vmem:[%s6404_s1 + $0x560] sm:$0xff]  ;;  %834 = vmatpush1.msra.mxu1 %v514_v15  ;;  %764 = vmatprep.subr.mxu0 %v383_v16 }
  0x1d   : > { %v379_v20 = vld [vmem:[%s6404_s1 + $0x148] sm:$0xff]  ;;  %835 = vmatprep.subr.mxu1 %v511_v17  ;;  %v378_v22 = vld [vmem:[%s6404_s1 + $0x140] sm:$0xff]  ;;  %765 = vmatpush1.msra.mxu0 %v382_v18 }
  0x1e   : > { %v507_v21 = vld [vmem:[%s6404_s1 + $0x548] sm:$0xff]  ;;  %v506_v23 = vld [vmem:[%s6404_s1 + $0x540] sm:$0xff]  ;;  %836 = vmatpush1.msra.mxu1 %v510_v19  ;;  %766 = vmatprep.subr.mxu0 %v379_v20 }
  0x1f   : > { %v375_v24 = vld [vmem:[%s6404_s1 + $0x128] sm:$0xff]  ;;  %837 = vmatprep.subr.mxu1 %v507_v21  ;;  %v374_v26 = vld [vmem:[%s6404_s1 + $0x120] sm:$0xff]  ;;  %767 = vmatpush1.msra.mxu0 %v378_v22 }
  0x20   : > { %v503_v25 = vld [vmem:[%s6404_s1 + $0x528] sm:$0xff]  ;;  %v502_v27 = vld [vmem:[%s6404_s1 + $0x520] sm:$0xff]  ;;  %838 = vmatpush1.msra.mxu1 %v506_v23  ;;  %768 = vmatprep.subr.mxu0 %v375_v24 }
  0x21   : > { %v371_v28 = vld [vmem:[%s6404_s1 + $0x108] sm:$0xff]  ;;  %839 = vmatprep.subr.mxu1 %v503_v25  ;;  %v370_v30 = vld [vmem:[%s6404_s1 + $0x100] sm:$0xff]  ;;  %769 = vmatpush1.msra.mxu0 %v374_v26 }
  0x22   : > { %v499_v29 = vld [vmem:[%s6404_s1 + $0x508] sm:$0xff]  ;;  %v498_v31 = vld [vmem:[%s6404_s1 + $0x500] sm:$0xff]  ;;  %840 = vmatpush1.msra.mxu1 %v502_v27  ;;  %770 = vmatprep.subr.mxu0 %v371_v28 }
  0x23   : > { %v367_v32 = vld [vmem:[%s6404_s1 + $0xe8] sm:$0xff]  ;;  %841 = vmatprep.subr.mxu1 %v499_v29  ;;  %v366_v34 = vld [vmem:[%s6404_s1 + $0xe0] sm:$0xff]  ;;  %771 = vmatpush1.msra.mxu0 %v370_v30 }
  0x24   : > { %v495_v33 = vld [vmem:[%s6404_s1 + $0x4e8] sm:$0xff]  ;;  %v494_v35 = vld [vmem:[%s6404_s1 + $0x4e0] sm:$0xff]  ;;  %842 = vmatpush1.msra.mxu1 %v498_v31  ;;  %772 = vmatprep.subr.mxu0 %v367_v32 }
  0x25   : > { %v363_v36 = vld [vmem:[%s6404_s1 + $0xc8] sm:$0xff]  ;;  %843 = vmatprep.subr.mxu1 %v495_v33  ;;  %v362_v38 = vld [vmem:[%s6404_s1 + $0xc0] sm:$0xff]  ;;  %773 = vmatpush1.msra.mxu0 %v366_v34 }
  0x26   : > { %v491_v37 = vld [vmem:[%s6404_s1 + $0x4c8] sm:$0xff]  ;;  %v490_v39 = vld [vmem:[%s6404_s1 + $0x4c0] sm:$0xff]  ;;  %844 = vmatpush1.msra.mxu1 %v494_v35  ;;  %774 = vmatprep.subr.mxu0 %v363_v36 }
  0x27   : > { %v359_v40 = vld [vmem:[%s6404_s1 + $0xa8] sm:$0xff]  ;;  %845 = vmatprep.subr.mxu1 %v491_v37  ;;  %v358_v42 = vld [vmem:[%s6404_s1 + $0xa0] sm:$0xff]  ;;  %775 = vmatpush1.msra.mxu0 %v362_v38 }
  0x28   : > { %v487_v41 = vld [vmem:[%s6404_s1 + $0x4a8] sm:$0xff]  ;;  %v486_v43 = vld [vmem:[%s6404_s1 + $0x4a0] sm:$0xff]  ;;  %846 = vmatpush1.msra.mxu1 %v490_v39  ;;  %776 = vmatprep.subr.mxu0 %v359_v40 }
  0x29   : > { %v355_v44 = vld [vmem:[%s6404_s1 + $0x88] sm:$0xff]  ;;  %847 = vmatprep.subr.mxu1 %v487_v41  ;;  %v354_v46 = vld [vmem:[%s6404_s1 + $0x80] sm:$0xff]  ;;  %777 = vmatpush1.msra.mxu0 %v358_v42 }
  0x2a   : > { %v483_v45 = vld [vmem:[%s6404_s1 + $0x488] sm:$0xff]  ;;  %v482_v47 = vld [vmem:[%s6404_s1 + $0x480] sm:$0xff]  ;;  %848 = vmatpush1.msra.mxu1 %v486_v43  ;;  %778 = vmatprep.subr.mxu0 %v355_v44 }
  0x2b   : > { %v351_v48 = vld [vmem:[%s6404_s1 + $0x68] sm:$0xff]  ;;  %849 = vmatprep.subr.mxu1 %v483_v45  ;;  %v350_v50 = vld [vmem:[%s6404_s1 + $0x60] sm:$0xff]  ;;  %779 = vmatpush1.msra.mxu0 %v354_v46 }
  0x2c   : > { %v479_v49 = vld [vmem:[%s6404_s1 + $0x468] sm:$0xff]  ;;  %v478_v51 = vld [vmem:[%s6404_s1 + $0x460] sm:$0xff]  ;;  %850 = vmatpush1.msra.mxu1 %v482_v47  ;;  %780 = vmatprep.subr.mxu0 %v351_v48 }
  0x2d   : > { %v347_v52 = vld [vmem:[%s6404_s1 + $0x48] sm:$0xff]  ;;  %851 = vmatprep.subr.mxu1 %v479_v49  ;;  %v346_v54 = vld [vmem:[%s6404_s1 + $0x40] sm:$0xff]  ;;  %781 = vmatpush1.msra.mxu0 %v350_v50 }
  0x2e   : > { %v475_v53 = vld [vmem:[%s6404_s1 + $0x448] sm:$0xff]  ;;  %v474_v55 = vld [vmem:[%s6404_s1 + $0x440] sm:$0xff]  ;;  %852 = vmatpush1.msra.mxu1 %v478_v51  ;;  %782 = vmatprep.subr.mxu0 %v347_v52 }
  0x2f   : > { %v343_v56 = vld [vmem:[%s6404_s1 + $0x28] sm:$0xff]  ;;  %853 = vmatprep.subr.mxu1 %v475_v53  ;;  %v342_v58 = vld [vmem:[%s6404_s1 + $0x20] sm:$0xff]  ;;  %783 = vmatpush1.msra.mxu0 %v346_v54 }
  0x30   : > { %v471_v57 = vld [vmem:[%s6404_s1 + $0x428] sm:$0xff]  ;;  %v470_v59 = vld [vmem:[%s6404_s1 + $0x420] sm:$0xff]  ;;  %854 = vmatpush1.msra.mxu1 %v474_v55  ;;  %784 = vmatprep.subr.mxu0 %v343_v56 }
  0x31   : > { %v339_v60 = vld [vmem:[%s6404_s1 + $0x8] sm:$0xff]  ;;  %855 = vmatprep.subr.mxu1 %v471_v57  ;;  %v338_v62 = vld [vmem:[%s6404_s1] sm:$0xff]  ;;  %785 = vmatpush1.msra.mxu0 %v342_v58 }
  0x32   : > { %v467_v61 = vld [vmem:[%s6404_s1 + $0x408] sm:$0xff]  ;;  %v466_v63 = vld [vmem:[%s6404_s1 + $0x400] sm:$0xff]  ;;  %856 = vmatpush1.msra.mxu1 %v470_v59  ;;  %786 = vmatprep.subr.mxu0 %v339_v60 }
  0x33   : > { %v463_v0 = vld [vmem:[%s6404_s1 + $0x3e8] sm:$0xff]  ;;  %857 = vmatprep.subr.mxu1 %v467_v61  ;;  %v462_v2 = vld [vmem:[%s6404_s1 + $0x3e0] sm:$0xff]  ;;  %787 = vmatpush1.msra.mxu0 %v338_v62 }
  0x34   : > { %v591_v1 = vld [vmem:[%s6404_s1 + $0x7e8] sm:$0xff]  ;;  %v590_v3 = vld [vmem:[%s6404_s1 + $0x7e0] sm:$0xff]  ;;  %858 = vmatpush1.msra.mxu1 %v466_v63  ;;  %788 = vmatprep.subr.mxu0 %v463_v0 }
  0x35   : > { %v459_v4 = vld [vmem:[%s6404_s1 + $0x3c8] sm:$0xff]  ;;  %859 = vmatprep.subr.mxu1 %v591_v1  ;;  %v458_v6 = vld [vmem:[%s6404_s1 + $0x3c0] sm:$0xff]  ;;  %789 = vmatpush2.msra.mxu0 %v462_v2  ;;  %v334_v1 = vld [vmem:[%s3702_s17 + $0x18] sm:$0xff] }
  0x36   : > { %v587_v5 = vld [vmem:[%s6404_s1 + $0x7c8] sm:$0xff]  ;;  %v586_v7 = vld [vmem:[%s6404_s1 + $0x7c0] sm:$0xff]  ;;  %860 = vmatpush2.msra.mxu1 %v590_v3  ;;  %790 = vmatprep.subr.mxu0 %v459_v4  ;;  %v333_v3 = vld [vmem:[%s3702_s17 + $0x10] sm:$0xff] }
  0x37   : > { %v455_v8 = vld [vmem:[%s6404_s1 + $0x3a8] sm:$0xff]  ;;  %861 = vmatprep.subr.mxu1 %v587_v5  ;;  %v454_v10 = vld [vmem:[%s6404_s1 + $0x3a0] sm:$0xff]  ;;  %791 = vmatpush2.msra.mxu0 %v458_v6 }
  0x38   : > { %v583_v9 = vld [vmem:[%s6404_s1 + $0x7a8] sm:$0xff]  ;;  %v582_v11 = vld [vmem:[%s6404_s1 + $0x7a0] sm:$0xff]  ;;  %862 = vmatpush2.msra.mxu1 %v586_v7  ;;  %792 = vmatprep.subr.mxu0 %v455_v8 }
  0x39   : > { %v451_v12 = vld [vmem:[%s6404_s1 + $0x388] sm:$0xff]  ;;  %863 = vmatprep.subr.mxu1 %v583_v9  ;;  %v450_v14 = vld [vmem:[%s6404_s1 + $0x380] sm:$0xff]  ;;  %793 = vmatpush2.msra.mxu0 %v454_v10 }
  0x3a   : > { %v579_v13 = vld [vmem:[%s6404_s1 + $0x788] sm:$0xff]  ;;  %v578_v15 = vld [vmem:[%s6404_s1 + $0x780] sm:$0xff]  ;;  %864 = vmatpush2.msra.mxu1 %v582_v11  ;;  %794 = vmatprep.subr.mxu0 %v451_v12 }
  0x3b   : > { %v447_v16 = vld [vmem:[%s6404_s1 + $0x368] sm:$0xff]  ;;  %865 = vmatprep.subr.mxu1 %v579_v13  ;;  %v446_v18 = vld [vmem:[%s6404_s1 + $0x360] sm:$0xff]  ;;  %795 = vmatpush2.msra.mxu0 %v450_v14  ;;  %v337_v13 = vld [vmem:[%s3702_s17 + $0x30] sm:$0xff] }
  0x3c   : > { %v575_v17 = vld [vmem:[%s6404_s1 + $0x768] sm:$0xff]  ;;  %v574_v19 = vld [vmem:[%s6404_s1 + $0x760] sm:$0xff]  ;;  %866 = vmatpush2.msra.mxu1 %v578_v15  ;;  %796 = vmatprep.subr.mxu0 %v447_v16  ;;  %v401_v14 = vld [vmem:[%s6404_s1 + $0x1f8] sm:$0xff] }
  0x3d   : > { %v443_v20 = vld [vmem:[%s6404_s1 + $0x348] sm:$0xff]  ;;  %867 = vmatprep.subr.mxu1 %v575_v17  ;;  %v442_v22 = vld [vmem:[%s6404_s1 + $0x340] sm:$0xff]  ;;  %797 = vmatpush2.msra.mxu0 %v446_v18  ;;  %v400_v16 = vld [vmem:[%s6404_s1 + $0x1f0] sm:$0xff]  ;;  %v3226_v17 = vmov 0.0  }
  0x3e   : > { %v571_v21 = vld [vmem:[%s6404_s1 + $0x748] sm:$0xff]  ;;  %v570_v23 = vld [vmem:[%s6404_s1 + $0x740] sm:$0xff]  ;;  %868 = vmatpush2.msra.mxu1 %v574_v19  ;;  %798 = vmatprep.subr.mxu0 %v443_v20  ;;  %v397_v19 = vld [vmem:[%s6404_s1 + $0x1d8] sm:$0xff] }
  0x3f   : > { %v439_v24 = vld [vmem:[%s6404_s1 + $0x328] sm:$0xff]  ;;  %869 = vmatprep.subr.mxu1 %v571_v21  ;;  %v438_v26 = vld [vmem:[%s6404_s1 + $0x320] sm:$0xff]  ;;  %799 = vmatpush2.msra.mxu0 %v442_v22  ;;  %v396_v21 = vld [vmem:[%s6404_s1 + $0x1d0] sm:$0xff] }
  0x40   : > { %v567_v25 = vld [vmem:[%s6404_s1 + $0x728] sm:$0xff]  ;;  %v566_v27 = vld [vmem:[%s6404_s1 + $0x720] sm:$0xff]  ;;  %870 = vmatpush2.msra.mxu1 %v570_v23  ;;  %800 = vmatprep.subr.mxu0 %v439_v24  ;;  %v393_v23 = vld [vmem:[%s6404_s1 + $0x1b8] sm:$0xff] }
  0x41   : > { %v435_v28 = vld [vmem:[%s6404_s1 + $0x308] sm:$0xff]  ;;  %871 = vmatprep.subr.mxu1 %v567_v25  ;;  %v434_v30 = vld [vmem:[%s6404_s1 + $0x300] sm:$0xff]  ;;  %801 = vmatpush2.msra.mxu0 %v438_v26  ;;  %v392_v25 = vld [vmem:[%s6404_s1 + $0x1b0] sm:$0xff] }
  0x42   : > { %v563_v29 = vld [vmem:[%s6404_s1 + $0x708] sm:$0xff]  ;;  %v562_v31 = vld [vmem:[%s6404_s1 + $0x700] sm:$0xff]  ;;  %872 = vmatpush2.msra.mxu1 %v566_v27  ;;  %802 = vmatprep.subr.mxu0 %v435_v28  ;;  %v389_v27 = vld [vmem:[%s6404_s1 + $0x198] sm:$0xff] }
  0x43   : > { %v431_v32 = vld [vmem:[%s6404_s1 + $0x2e8] sm:$0xff]  ;;  %873 = vmatprep.subr.mxu1 %v563_v29  ;;  %v430_v34 = vld [vmem:[%s6404_s1 + $0x2e0] sm:$0xff]  ;;  %803 = vmatpush2.msra.mxu0 %v434_v30  ;;  %v388_v29 = vld [vmem:[%s6404_s1 + $0x190] sm:$0xff] }
  0x44   : > { %v559_v33 = vld [vmem:[%s6404_s1 + $0x6e8] sm:$0xff]  ;;  %v558_v35 = vld [vmem:[%s6404_s1 + $0x6e0] sm:$0xff]  ;;  %874 = vmatpush2.msra.mxu1 %v562_v31  ;;  %804 = vmatprep.subr.mxu0 %v431_v32  ;;  %v385_v31 = vld [vmem:[%s6404_s1 + $0x178] sm:$0xff] }
  0x45   : > { %v427_v36 = vld [vmem:[%s6404_s1 + $0x2c8] sm:$0xff]  ;;  %875 = vmatprep.subr.mxu1 %v559_v33  ;;  %v426_v38 = vld [vmem:[%s6404_s1 + $0x2c0] sm:$0xff]  ;;  %805 = vmatpush2.msra.mxu0 %v430_v34  ;;  %v384_v33 = vld [vmem:[%s6404_s1 + $0x170] sm:$0xff] }
  0x46   : > { %v555_v37 = vld [vmem:[%s6404_s1 + $0x6c8] sm:$0xff]  ;;  %v554_v39 = vld [vmem:[%s6404_s1 + $0x6c0] sm:$0xff]  ;;  %876 = vmatpush2.msra.mxu1 %v558_v35  ;;  %806 = vmatprep.subr.mxu0 %v427_v36  ;;  %v381_v35 = vld [vmem:[%s6404_s1 + $0x158] sm:$0xff] }
  0x47   : > { %v423_v40 = vld [vmem:[%s6404_s1 + $0x2a8] sm:$0xff]  ;;  %877 = vmatprep.subr.mxu1 %v555_v37  ;;  %v422_v42 = vld [vmem:[%s6404_s1 + $0x2a0] sm:$0xff]  ;;  %807 = vmatpush2.msra.mxu0 %v426_v38  ;;  %v380_v37 = vld [vmem:[%s6404_s1 + $0x150] sm:$0xff] }
  0x48   : > { %v551_v41 = vld [vmem:[%s6404_s1 + $0x6a8] sm:$0xff]  ;;  %v550_v43 = vld [vmem:[%s6404_s1 + $0x6a0] sm:$0xff]  ;;  %878 = vmatpush2.msra.mxu1 %v554_v39  ;;  %808 = vmatprep.subr.mxu0 %v423_v40  ;;  %v377_v39 = vld [vmem:[%s6404_s1 + $0x138] sm:$0xff] }
  0x49   : > { %v419_v44 = vld [vmem:[%s6404_s1 + $0x288] sm:$0xff]  ;;  %879 = vmatprep.subr.mxu1 %v551_v41  ;;  %v418_v46 = vld [vmem:[%s6404_s1 + $0x280] sm:$0xff]  ;;  %809 = vmatpush2.msra.mxu0 %v422_v42  ;;  %v376_v41 = vld [vmem:[%s6404_s1 + $0x130] sm:$0xff] }
  0x4a   : > { %v547_v45 = vld [vmem:[%s6404_s1 + $0x688] sm:$0xff]  ;;  %v546_v47 = vld [vmem:[%s6404_s1 + $0x680] sm:$0xff]  ;;  %880 = vmatpush2.msra.mxu1 %v550_v43  ;;  %810 = vmatprep.subr.mxu0 %v419_v44  ;;  %v373_v43 = vld [vmem:[%s6404_s1 + $0x118] sm:$0xff] }
  0x4b   : > { %v415_v48 = vld [vmem:[%s6404_s1 + $0x268] sm:$0xff]  ;;  %881 = vmatprep.subr.mxu1 %v547_v45  ;;  %v414_v50 = vld [vmem:[%s6404_s1 + $0x260] sm:$0xff]  ;;  %811 = vmatpush2.msra.mxu0 %v418_v46  ;;  %v372_v45 = vld [vmem:[%s6404_s1 + $0x110] sm:$0xff] }
  0x4c   : > { %v543_v49 = vld [vmem:[%s6404_s1 + $0x668] sm:$0xff]  ;;  %v542_v51 = vld [vmem:[%s6404_s1 + $0x660] sm:$0xff]  ;;  %882 = vmatpush2.msra.mxu1 %v546_v47  ;;  %812 = vmatprep.subr.mxu0 %v415_v48  ;;  %v369_v47 = vld [vmem:[%s6404_s1 + $0xf8] sm:$0xff] }
  0x4d   : > { %v411_v52 = vld [vmem:[%s6404_s1 + $0x248] sm:$0xff]  ;;  %883 = vmatprep.subr.mxu1 %v543_v49  ;;  %v410_v54 = vld [vmem:[%s6404_s1 + $0x240] sm:$0xff]  ;;  %813 = vmatpush2.msra.mxu0 %v414_v50  ;;  %v368_v49 = vld [vmem:[%s6404_s1 + $0xf0] sm:$0xff] }
  0x4e   : > { %v539_v53 = vld [vmem:[%s6404_s1 + $0x648] sm:$0xff]  ;;  %v538_v55 = vld [vmem:[%s6404_s1 + $0x640] sm:$0xff]  ;;  %884 = vmatpush2.msra.mxu1 %v542_v51  ;;  %814 = vmatprep.subr.mxu0 %v411_v52  ;;  %v365_v51 = vld [vmem:[%s6404_s1 + $0xd8] sm:$0xff] }
  0x4f   : > { %v407_v56 = vld [vmem:[%s6404_s1 + $0x228] sm:$0xff]  ;;  %885 = vmatprep.subr.mxu1 %v539_v53  ;;  %v406_v58 = vld [vmem:[%s6404_s1 + $0x220] sm:$0xff]  ;;  %815 = vmatpush2.msra.mxu0 %v410_v54  ;;  %v364_v53 = vld [vmem:[%s6404_s1 + $0xd0] sm:$0xff] }
  0x50   : > { %v535_v57 = vld [vmem:[%s6404_s1 + $0x628] sm:$0xff]  ;;  %v534_v59 = vld [vmem:[%s6404_s1 + $0x620] sm:$0xff]  ;;  %886 = vmatpush2.msra.mxu1 %v538_v55  ;;  %816 = vmatprep.subr.mxu0 %v407_v56  ;;  %v361_v55 = vld [vmem:[%s6404_s1 + $0xb8] sm:$0xff] }
  0x51   : > { %v403_v60 = vld [vmem:[%s6404_s1 + $0x208] sm:$0xff]  ;;  %887 = vmatprep.subr.mxu1 %v535_v57  ;;  %v402_v62 = vld [vmem:[%s6404_s1 + $0x200] sm:$0xff]  ;;  %817 = vmatpush2.msra.mxu0 %v406_v58  ;;  %v360_v57 = vld [vmem:[%s6404_s1 + $0xb0] sm:$0xff] }
  0x52   : > { %v531_v61 = vld [vmem:[%s6404_s1 + $0x608] sm:$0xff]  ;;  %888 = vmatpush2.msra.mxu1 %v534_v59  ;;  %v530_v0 = vld [vmem:[%s6404_s1 + $0x600] sm:$0xff]  ;;  %818 = vmatprep.subr.mxu0 %v403_v60  ;;  %v357_v59 = vld [vmem:[%s6404_s1 + $0x98] sm:$0xff] }
  0x53   : > { %v3720_v63 = vld [vmem:[%s3702_s17 + $0x8] sm:$0xff]  ;;  %889 = vmatprep.subr.mxu1 %v531_v61  ;;  %v3727_v2 = vld [vmem:[%s3702_s17] sm:$0xff]  ;;  %819 = vmatpush2.msra.mxu0 %v402_v62  ;;  %v356_v61 = vld [vmem:[%s6404_s1 + $0x90] sm:$0xff] }
  0x54   : > { %820 = vmatprep.mubr.f32.mxu0 %v3720_v63  ;;  %v655_v4 = vld [vmem:[%s6404_s1 + $0x9e8] sm:$0xff]  ;;  %890 = vmatpush2.msra.mxu1 %v530_v0  ;;  %v654_v6 = vld [vmem:[%s6404_s1 + $0x9e0] sm:$0xff]  ;;  %v353_v0 = vld [vmem:[%s6404_s1 + $0x78] sm:$0xff] }
  0x55   : > { %v727_v5 = vld [vmem:[%s6404_s1 + $0xc28] sm:$0xff]  ;;  %891 = vmatprep.mubr.f32.mxu1 %v334_v1  ;;  %v726_v7 = vld [vmem:[%s6404_s1 + $0xc20] sm:$0xff]  ;;  %821 = vmatmul.mubr.f32.vlgmr.msra.gmra.mxu0 %v3727_v2 }
  0x56   : > { %892 = vmatmul.mubr.f32.vlgmr.msra.gmra.mxu1 %v333_v3  ;;  %v651_v8 = vld [vmem:[%s6404_s1 + $0x9c8] sm:$0xff]  ;;  %898 = vmatprep.subr.mxu0 %v655_v4  ;;  %v650_v10 = vld [vmem:[%s6404_s1 + $0x9c0] sm:$0xff]  ;;  %v352_v3 = vld [vmem:[%s6404_s1 + $0x70] sm:$0xff] }
  0x57   : > { %v723_v9 = vld [vmem:[%s6404_s1 + $0xc08] sm:$0xff]  ;;  %997 = vmatprep.subr.mxu1 %v727_v5  ;;  %v722_v11 = vld [vmem:[%s6404_s1 + $0xc00] sm:$0xff]  ;;  %899 = vmatpush1.msra.mxu0 %v654_v6  ;;  %v349_v5 = vld [vmem:[%s6404_s1 + $0x58] sm:$0xff] }
  0x58   : > { %998 = vmatpush1.msra.mxu1 %v726_v7  ;;  %v647_v12 = vld [vmem:[%s6404_s1 + $0x9a8] sm:$0xff]  ;;  %900 = vmatprep.subr.mxu0 %v651_v8  ;;  %v646_v15 = vld [vmem:[%s6404_s1 + $0x9a0] sm:$0xff]  ;;  %v348_v7 = vld [vmem:[%s6404_s1 + $0x50] sm:$0xff] }
  0x59   : > { %999 = vmatprep.subr.mxu1 %v723_v9  ;;  %901 = vmatpush1.msra.mxu0 %v650_v10  ;;  %v643_v18 = vld [vmem:[%s6404_s1 + $0x988] sm:$0xff]  ;;  %v642_v20 = vld [vmem:[%s6404_s1 + $0x980] sm:$0xff]  ;;  %v345_v9 = vld [vmem:[%s6404_s1 + $0x38] sm:$0xff] }
  0x5a   : > { %1000 = vmatpush1.msra.mxu1 %v722_v11  ;;  %1033 = vmatprep.mubr.f32.mxu1 %v3226_v17  ;;  %v639_v22 = vld [vmem:[%s6404_s1 + $0x968] sm:$0xff]  ;;  %v638_v24 = vld [vmem:[%s6404_s1 + $0x960] sm:$0xff]  ;;  %v344_v11 = vld [vmem:[%s6404_s1 + $0x30] sm:$0xff] }
  0x5b   : > { %902 = vmatprep.subr.mxu0 %v647_v12  ;;  %2944 = vmatmul.mubr.msk.f32.vlgmr.msra.gmra.mxu1 %vm752_vm0, %v337_v13  ;;  %v635_v26 = vld [vmem:[%s6404_s1 + $0x948] sm:$0xff]  ;;  %v634_v28 = vld [vmem:[%s6404_s1 + $0x940] sm:$0xff]  ;;  %v341_v13 = vld [vmem:[%s6404_s1 + $0x18] sm:$0xff] }
  0x5c   : > { %1040 = vmatprep.subr.mxu1 %v401_v14  ;;  %903 = vmatpush1.msra.mxu0 %v646_v15  ;;  %v631_v30 = vld [vmem:[%s6404_s1 + $0x928] sm:$0xff]  ;;  %v630_v32 = vld [vmem:[%s6404_s1 + $0x920] sm:$0xff]  ;;  %v340_v15 = vld [vmem:[%s6404_s1 + $0x10] sm:$0xff] }
  0x5d   : > { %1041 = vmatpush1.msra.mxu1 %v400_v16  ;;  %904 = vmatprep.subr.mxu0 %v643_v18  ;;  %v627_v34 = vld [vmem:[%s6404_s1 + $0x908] sm:$0xff]  ;;  %v626_v36 = vld [vmem:[%s6404_s1 + $0x900] sm:$0xff]  ;;  %v465_v18 = vld [vmem:[%s6404_s1 + $0x3f8] sm:$0xff] }
  0x5e   : > { %1042 = vmatprep.subr.mxu1 %v397_v19  ;;  %905 = vmatpush1.msra.mxu0 %v642_v20  ;;  %v623_v38 = vld [vmem:[%s6404_s1 + $0x8e8] sm:$0xff]  ;;  %v622_v40 = vld [vmem:[%s6404_s1 + $0x8e0] sm:$0xff]  ;;  %v464_v20 = vld [vmem:[%s6404_s1 + $0x3f0] sm:$0xff] }
  0x5f   : > { %1043 = vmatpush1.msra.mxu1 %v396_v21  ;;  %906 = vmatprep.subr.mxu0 %v639_v22  ;;  %v619_v42 = vld [vmem:[%s6404_s1 + $0x8c8] sm:$0xff]  ;;  %v618_v44 = vld [vmem:[%s6404_s1 + $0x8c0] sm:$0xff]  ;;  %v461_v22 = vld [vmem:[%s6404_s1 + $0x3d8] sm:$0xff] }
  0x60   : > { %1044 = vmatprep.subr.mxu1 %v393_v23  ;;  %907 = vmatpush1.msra.mxu0 %v638_v24  ;;  %v615_v46 = vld [vmem:[%s6404_s1 + $0x8a8] sm:$0xff]  ;;  %v614_v48 = vld [vmem:[%s6404_s1 + $0x8a0] sm:$0xff]  ;;  %v460_v24 = vld [vmem:[%s6404_s1 + $0x3d0] sm:$0xff] }
  0x61   : > { %1045 = vmatpush1.msra.mxu1 %v392_v25  ;;  %908 = vmatprep.subr.mxu0 %v635_v26  ;;  %v611_v50 = vld [vmem:[%s6404_s1 + $0x888] sm:$0xff]  ;;  %v610_v52 = vld [vmem:[%s6404_s1 + $0x880] sm:$0xff]  ;;  %v457_v26 = vld [vmem:[%s6404_s1 + $0x3b8] sm:$0xff] }
  0x62   : > { %1046 = vmatprep.subr.mxu1 %v389_v27  ;;  %909 = vmatpush1.msra.mxu0 %v634_v28  ;;  %v607_v54 = vld [vmem:[%s6404_s1 + $0x868] sm:$0xff]  ;;  %v606_v56 = vld [vmem:[%s6404_s1 + $0x860] sm:$0xff]  ;;  %v456_v28 = vld [vmem:[%s6404_s1 + $0x3b0] sm:$0xff] }
  0x63   : > { %1047 = vmatpush1.msra.mxu1 %v388_v29  ;;  %910 = vmatprep.subr.mxu0 %v631_v30  ;;  %v603_v58 = vld [vmem:[%s6404_s1 + $0x848] sm:$0xff]  ;;  %v602_v60 = vld [vmem:[%s6404_s1 + $0x840] sm:$0xff]  ;;  %v453_v30 = vld [vmem:[%s6404_s1 + $0x398] sm:$0xff] }
  0x64   : > { %1048 = vmatprep.subr.mxu1 %v385_v31  ;;  %911 = vmatpush1.msra.mxu0 %v630_v32  ;;  %v599_v62 = vld [vmem:[%s6404_s1 + $0x828] sm:$0xff]  ;;  %v598_v1 = vld [vmem:[%s6404_s1 + $0x820] sm:$0xff]  ;;  %v452_v32 = vld [vmem:[%s6404_s1 + $0x390] sm:$0xff] }
  0x65   : > { %1049 = vmatpush1.msra.mxu1 %v384_v33  ;;  %912 = vmatprep.subr.mxu0 %v627_v34  ;;  %v595_v4 = vld [vmem:[%s6404_s1 + $0x808] sm:$0xff]  ;;  %v594_v6 = vld [vmem:[%s6404_s1 + $0x800] sm:$0xff]  ;;  %v449_v34 = vld [vmem:[%s6404_s1 + $0x378] sm:$0xff] }
  0x66   : > { %1050 = vmatprep.subr.mxu1 %v381_v35  ;;  %913 = vmatpush1.msra.mxu0 %v626_v36  ;;  %v719_v8 = vld [vmem:[%s6404_s1 + $0xbe8] sm:$0xff]  ;;  %v718_v10 = vld [vmem:[%s6404_s1 + $0xbe0] sm:$0xff]  ;;  %v448_v36 = vld [vmem:[%s6404_s1 + $0x370] sm:$0xff] }
  0x67   : > { %1051 = vmatpush1.msra.mxu1 %v380_v37  ;;  %914 = vmatprep.subr.mxu0 %v623_v38  ;;  %v715_v12 = vld [vmem:[%s6404_s1 + $0xbc8] sm:$0xff]  ;;  %v714_v14 = vld [vmem:[%s6404_s1 + $0xbc0] sm:$0xff]  ;;  %v445_v38 = vld [vmem:[%s6404_s1 + $0x358] sm:$0xff] }
  0x68   : > { %1052 = vmatprep.subr.mxu1 %v377_v39  ;;  %915 = vmatpush1.msra.mxu0 %v622_v40  ;;  %v711_v16 = vld [vmem:[%s6404_s1 + $0xba8] sm:$0xff]  ;;  %v710_v19 = vld [vmem:[%s6404_s1 + $0xba0] sm:$0xff]  ;;  %v444_v40 = vld [vmem:[%s6404_s1 + $0x350] sm:$0xff] }
  0x69   : > { %1053 = vmatpush1.msra.mxu1 %v376_v41  ;;  %916 = vmatprep.subr.mxu0 %v619_v42  ;;  %v707_v21 = vld [vmem:[%s6404_s1 + $0xb88] sm:$0xff]  ;;  %v706_v23 = vld [vmem:[%s6404_s1 + $0xb80] sm:$0xff]  ;;  %v441_v42 = vld [vmem:[%s6404_s1 + $0x338] sm:$0xff] }
  0x6a   : > { %1054 = vmatprep.subr.mxu1 %v373_v43  ;;  %917 = vmatpush1.msra.mxu0 %v618_v44  ;;  %v703_v25 = vld [vmem:[%s6404_s1 + $0xb68] sm:$0xff]  ;;  %v702_v27 = vld [vmem:[%s6404_s1 + $0xb60] sm:$0xff]  ;;  %v440_v44 = vld [vmem:[%s6404_s1 + $0x330] sm:$0xff] }
  0x6b   : > { %1055 = vmatpush1.msra.mxu1 %v372_v45  ;;  %918 = vmatprep.subr.mxu0 %v615_v46  ;;  %v699_v29 = vld [vmem:[%s6404_s1 + $0xb48] sm:$0xff]  ;;  %v698_v31 = vld [vmem:[%s6404_s1 + $0xb40] sm:$0xff]  ;;  %v437_v46 = vld [vmem:[%s6404_s1 + $0x318] sm:$0xff] }
  0x6c   : > { %1056 = vmatprep.subr.mxu1 %v369_v47  ;;  %919 = vmatpush1.msra.mxu0 %v614_v48  ;;  %v695_v33 = vld [vmem:[%s6404_s1 + $0xb28] sm:$0xff]  ;;  %v694_v35 = vld [vmem:[%s6404_s1 + $0xb20] sm:$0xff]  ;;  %v436_v48 = vld [vmem:[%s6404_s1 + $0x310] sm:$0xff] }
  0x6d   : > { %1057 = vmatpush1.msra.mxu1 %v368_v49  ;;  %920 = vmatprep.subr.mxu0 %v611_v50  ;;  %v691_v37 = vld [vmem:[%s6404_s1 + $0xb08] sm:$0xff]  ;;  %v690_v39 = vld [vmem:[%s6404_s1 + $0xb00] sm:$0xff]  ;;  %v433_v50 = vld [vmem:[%s6404_s1 + $0x2f8] sm:$0xff] }
  0x6e   : > { %1058 = vmatprep.subr.mxu1 %v365_v51  ;;  %921 = vmatpush1.msra.mxu0 %v610_v52  ;;  %v687_v41 = vld [vmem:[%s6404_s1 + $0xae8] sm:$0xff]  ;;  %v686_v43 = vld [vmem:[%s6404_s1 + $0xae0] sm:$0xff]  ;;  %v432_v52 = vld [vmem:[%s6404_s1 + $0x2f0] sm:$0xff] }
  0x6f   : > { %1059 = vmatpush1.msra.mxu1 %v364_v53  ;;  %922 = vmatprep.subr.mxu0 %v607_v54  ;;  %v683_v45 = vld [vmem:[%s6404_s1 + $0xac8] sm:$0xff]  ;;  %v682_v47 = vld [vmem:[%s6404_s1 + $0xac0] sm:$0xff]  ;;  %v429_v54 = vld [vmem:[%s6404_s1 + $0x2d8] sm:$0xff] }
  0x70   : > { %1060 = vmatprep.subr.mxu1 %v361_v55  ;;  %923 = vmatpush1.msra.mxu0 %v606_v56  ;;  %v679_v49 = vld [vmem:[%s6404_s1 + $0xaa8] sm:$0xff]  ;;  %v678_v51 = vld [vmem:[%s6404_s1 + $0xaa0] sm:$0xff]  ;;  %v428_v56 = vld [vmem:[%s6404_s1 + $0x2d0] sm:$0xff] }
  0x71   : > { %1061 = vmatpush1.msra.mxu1 %v360_v57  ;;  %924 = vmatprep.subr.mxu0 %v603_v58  ;;  %v675_v53 = vld [vmem:[%s6404_s1 + $0xa88] sm:$0xff]  ;;  %v674_v55 = vld [vmem:[%s6404_s1 + $0xa80] sm:$0xff]  ;;  %v425_v58 = vld [vmem:[%s6404_s1 + $0x2b8] sm:$0xff] }
  0x72   : > { %1062 = vmatprep.subr.mxu1 %v357_v59  ;;  %925 = vmatpush1.msra.mxu0 %v602_v60  ;;  %v671_v57 = vld [vmem:[%s6404_s1 + $0xa68] sm:$0xff]  ;;  %v670_v59 = vld [vmem:[%s6404_s1 + $0xa60] sm:$0xff]  ;;  %v424_v60 = vld [vmem:[%s6404_s1 + $0x2b0] sm:$0xff] }
  0x73   : > { %1063 = vmatpush1.msra.mxu1 %v356_v61  ;;  %926 = vmatprep.subr.mxu0 %v599_v62  ;;  %v667_v61 = vld [vmem:[%s6404_s1 + $0xa48] sm:$0xff]  ;;  %v421_v62 = vld [vmem:[%s6404_s1 + $0x298] sm:$0xff] }
  0x74   : > { %1064 = vmatprep.subr.mxu1 %v353_v0  ;;  %927 = vmatpush1.msra.mxu0 %v598_v1  ;;  %v666_v0 = vld [vmem:[%s6404_s1 + $0xa40] sm:$0xff]  ;;  %v420_v1 = vld [vmem:[%s6404_s1 + $0x290] sm:$0xff] }
  0x75   : > { %1065 = vmatpush1.msra.mxu1 %v352_v3  ;;  %928 = vmatprep.subr.mxu0 %v595_v4  ;;  %v663_v3 = vld [vmem:[%s6404_s1 + $0xa28] sm:$0xff]  ;;  %v417_v4 = vld [vmem:[%s6404_s1 + $0x278] sm:$0xff] }
  0x76   : > { %1066 = vmatprep.subr.mxu1 %v349_v5  ;;  %929 = vmatpush1.msra.mxu0 %v594_v6  ;;  %v662_v5 = vld [vmem:[%s6404_s1 + $0xa20] sm:$0xff]  ;;  %v416_v6 = vld [vmem:[%s6404_s1 + $0x270] sm:$0xff] }
  0x77   : > { %1067 = vmatpush1.msra.mxu1 %v348_v7  ;;  %930 = vmatprep.subr.mxu0 %v719_v8  ;;  %v659_v7 = vld [vmem:[%s6404_s1 + $0xa08] sm:$0xff]  ;;  %v413_v8 = vld [vmem:[%s6404_s1 + $0x258] sm:$0xff] }
  0x78   : > { %1068 = vmatprep.subr.mxu1 %v345_v9  ;;  %931 = vmatpush2.msra.mxu0 %v718_v10  ;;  %v658_v9 = vld [vmem:[%s6404_s1 + $0xa00] sm:$0xff]  ;;  %v4117_v10 = vld [vmem:[%s3702_s17 + $0x28] sm:$0xff] }
  0x79   : > { %1069 = vmatpush1.msra.mxu1 %v344_v11  ;;  %932 = vmatprep.subr.mxu0 %v715_v12  ;;  %v412_v11 = vld [vmem:[%s6404_s1 + $0x250] sm:$0xff]  ;;  %v4123_v12 = vld [vmem:[%s3702_s17 + $0x20] sm:$0xff] }
  0x7a   : > { %1070 = vmatprep.subr.mxu1 %v341_v13  ;;  %933 = vmatpush2.msra.mxu0 %v714_v14  ;;  %v409_v13 = vld [vmem:[%s6404_s1 + $0x238] sm:$0xff] }
  0x7b   : > { %1071 = vmatpush1.msra.mxu1 %v340_v15  ;;  %934 = vmatprep.subr.mxu0 %v711_v16  ;;  %v529_v14 = vld [vmem:[%s6404_s1 + $0x5f8] sm:$0xff]  ;;  %v408_v15 = vld [vmem:[%s6404_s1 + $0x230] sm:$0xff] }
  0x7c   : > { %1072 = vmatprep.subr.mxu1 %v465_v18  ;;  %935 = vmatpush2.msra.mxu0 %v710_v19  ;;  %v528_v16 = vld [vmem:[%s6404_s1 + $0x5f0] sm:$0xff]  ;;  %v405_v18 = vld [vmem:[%s6404_s1 + $0x218] sm:$0xff] }
  0x7d   : > { %1073 = vmatpush2.msra.mxu1 %v464_v20  ;;  %936 = vmatprep.subr.mxu0 %v707_v21  ;;  %v525_v19 = vld [vmem:[%s6404_s1 + $0x5d8] sm:$0xff]  ;;  %v404_v20 = vld [vmem:[%s6404_s1 + $0x210] sm:$0xff] }
  0x7e   : > { %1074 = vmatprep.subr.mxu1 %v461_v22  ;;  %937 = vmatpush2.msra.mxu0 %v706_v23  ;;  %v524_v21 = vld [vmem:[%s6404_s1 + $0x5d0] sm:$0xff]  ;;  %v521_v22 = vld [vmem:[%s6404_s1 + $0x5b8] sm:$0xff] }
  0x7f   : > { %1075 = vmatpush2.msra.mxu1 %v460_v24  ;;  %938 = vmatprep.subr.mxu0 %v703_v25  ;;  %v657_v23 = vld [vmem:[%s6404_s1 + $0x9f8] sm:$0xff]  ;;  %v520_v24 = vld [vmem:[%s6404_s1 + $0x5b0] sm:$0xff] }
  0x80   : > { %1076 = vmatprep.subr.mxu1 %v457_v26  ;;  %939 = vmatpush2.msra.mxu0 %v702_v27  ;;  %v656_v25 = vld [vmem:[%s6404_s1 + $0x9f0] sm:$0xff]  ;;  %v517_v26 = vld [vmem:[%s6404_s1 + $0x598] sm:$0xff] }
  0x81   : > { %1077 = vmatpush2.msra.mxu1 %v456_v28  ;;  %940 = vmatprep.subr.mxu0 %v699_v29  ;;  %v653_v27 = vld [vmem:[%s6404_s1 + $0x9d8] sm:$0xff]  ;;  %v652_v28 = vld [vmem:[%s6404_s1 + $0x9d0] sm:$0xff] }
  0x82   : > { %1078 = vmatprep.subr.mxu1 %v453_v30  ;;  %941 = vmatpush2.msra.mxu0 %v698_v31  ;;  %v649_v29 = vld [vmem:[%s6404_s1 + $0x9b8] sm:$0xff]  ;;  %v512_v30 = vld [vmem:[%s6404_s1 + $0x570] sm:$0xff] }
  0x83   : > { %1079 = vmatpush2.msra.mxu1 %v452_v32  ;;  %942 = vmatprep.subr.mxu0 %v695_v33  ;;  %v648_v31 = vld [vmem:[%s6404_s1 + $0x9b0] sm:$0xff]  ;;  %v509_v32 = vld [vmem:[%s6404_s1 + $0x558] sm:$0xff] }
  0x84   : > { %1080 = vmatprep.subr.mxu1 %v449_v34  ;;  %943 = vmatpush2.msra.mxu0 %v694_v35  ;;  %v645_v33 = vld [vmem:[%s6404_s1 + $0x998] sm:$0xff]  ;;  %v508_v34 = vld [vmem:[%s6404_s1 + $0x550] sm:$0xff] }
  0x85   : > { %1081 = vmatpush2.msra.mxu1 %v448_v36  ;;  %944 = vmatprep.subr.mxu0 %v691_v37  ;;  %v644_v35 = vld [vmem:[%s6404_s1 + $0x990] sm:$0xff]  ;;  %v505_v36 = vld [vmem:[%s6404_s1 + $0x538] sm:$0xff] }
  0x86   : > { %1082 = vmatprep.subr.mxu1 %v445_v38  ;;  %945 = vmatpush2.msra.mxu0 %v690_v39  ;;  %v641_v37 = vld [vmem:[%s6404_s1 + $0x978] sm:$0xff]  ;;  %v504_v38 = vld [vmem:[%s6404_s1 + $0x530] sm:$0xff] }
  0x87   : > { %1083 = vmatpush2.msra.mxu1 %v444_v40  ;;  %946 = vmatprep.subr.mxu0 %v687_v41  ;;  %v640_v39 = vld [vmem:[%s6404_s1 + $0x970] sm:$0xff]  ;;  %v501_v40 = vld [vmem:[%s6404_s1 + $0x518] sm:$0xff] }
  0x88   : > { %1084 = vmatprep.subr.mxu1 %v441_v42  ;;  %947 = vmatpush2.msra.mxu0 %v686_v43  ;;  %v637_v41 = vld [vmem:[%s6404_s1 + $0x958] sm:$0xff]  ;;  %v500_v42 = vld [vmem:[%s6404_s1 + $0x510] sm:$0xff] }
  0x89   : > { %1085 = vmatpush2.msra.mxu1 %v440_v44  ;;  %948 = vmatprep.subr.mxu0 %v683_v45  ;;  %v636_v43 = vld [vmem:[%s6404_s1 + $0x950] sm:$0xff]  ;;  %v497_v44 = vld [vmem:[%s6404_s1 + $0x4f8] sm:$0xff] }
  0x8a   : > { %1086 = vmatprep.subr.mxu1 %v437_v46  ;;  %949 = vmatpush2.msra.mxu0 %v682_v47  ;;  %v633_v45 = vld [vmem:[%s6404_s1 + $0x938] sm:$0xff]  ;;  %v496_v46 = vld [vmem:[%s6404_s1 + $0x4f0] sm:$0xff] }
  0x8b   : > { %1087 = vmatpush2.msra.mxu1 %v436_v48  ;;  %950 = vmatprep.subr.mxu0 %v679_v49  ;;  %v632_v47 = vld [vmem:[%s6404_s1 + $0x930] sm:$0xff]  ;;  %v493_v48 = vld [vmem:[%s6404_s1 + $0x4d8] sm:$0xff] }
  0x8c   : > { %1088 = vmatprep.subr.mxu1 %v433_v50  ;;  %951 = vmatpush2.msra.mxu0 %v678_v51  ;;  %v629_v49 = vld [vmem:[%s6404_s1 + $0x918] sm:$0xff]  ;;  %v492_v50 = vld [vmem:[%s6404_s1 + $0x4d0] sm:$0xff] }
  0x8d   : > { %1089 = vmatpush2.msra.mxu1 %v432_v52  ;;  %952 = vmatprep.subr.mxu0 %v675_v53  ;;  %v628_v51 = vld [vmem:[%s6404_s1 + $0x910] sm:$0xff]  ;;  %v489_v52 = vld [vmem:[%s6404_s1 + $0x4b8] sm:$0xff] }
  0x8e   : > { %1090 = vmatprep.subr.mxu1 %v429_v54  ;;  %953 = vmatpush2.msra.mxu0 %v674_v55  ;;  %v625_v53 = vld [vmem:[%s6404_s1 + $0x8f8] sm:$0xff]  ;;  %v488_v54 = vld [vmem:[%s6404_s1 + $0x4b0] sm:$0xff] }
  0x8f   : > { %1091 = vmatpush2.msra.mxu1 %v428_v56  ;;  %954 = vmatprep.subr.mxu0 %v671_v57  ;;  %v624_v55 = vld [vmem:[%s6404_s1 + $0x8f0] sm:$0xff]  ;;  %v485_v56 = vld [vmem:[%s6404_s1 + $0x498] sm:$0xff] }
  0x90   : > { %1092 = vmatprep.subr.mxu1 %v425_v58  ;;  %955 = vmatpush2.msra.mxu0 %v670_v59  ;;  %v621_v57 = vld [vmem:[%s6404_s1 + $0x8d8] sm:$0xff]  ;;  %v484_v58 = vld [vmem:[%s6404_s1 + $0x490] sm:$0xff] }
  0x91   : > { %1093 = vmatpush2.msra.mxu1 %v424_v60  ;;  %956 = vmatprep.subr.mxu0 %v667_v61  ;;  %v620_v59 = vld [vmem:[%s6404_s1 + $0x8d0] sm:$0xff]  ;;  %v481_v60 = vld [vmem:[%s6404_s1 + $0x478] sm:$0xff] }
  0x92   : > { %1094 = vmatprep.subr.mxu1 %v421_v62  ;;  %957 = vmatpush2.msra.mxu0 %v666_v0  ;;  %v617_v61 = vld [vmem:[%s6404_s1 + $0x8b8] sm:$0xff]  ;;  %v480_v62 = vld [vmem:[%s6404_s1 + $0x470] sm:$0xff] }
  0x93   : > { %1095 = vmatpush2.msra.mxu1 %v420_v1  ;;  %958 = vmatprep.subr.mxu0 %v663_v3  ;;  %v616_v0 = vld [vmem:[%s6404_s1 + $0x8b0] sm:$0xff]  ;;  %v477_v1 = vld [vmem:[%s6404_s1 + $0x458] sm:$0xff] }
  0x94   : > { %1096 = vmatprep.subr.mxu1 %v417_v4  ;;  %959 = vmatpush2.msra.mxu0 %v662_v5  ;;  %v613_v3 = vld [vmem:[%s6404_s1 + $0x898] sm:$0xff]  ;;  %v476_v4 = vld [vmem:[%s6404_s1 + $0x450] sm:$0xff] }
  0x95   : > { %1097 = vmatpush2.msra.mxu1 %v416_v6  ;;  %960 = vmatprep.subr.mxu0 %v659_v7  ;;  %v612_v5 = vld [vmem:[%s6404_s1 + $0x890] sm:$0xff]  ;;  %v473_v6 = vld [vmem:[%s6404_s1 + $0x438] sm:$0xff] }
  0x96   : > { %1098 = vmatprep.subr.mxu1 %v413_v8  ;;  %961 = vmatpush2.msra.mxu0 %v658_v9  ;;  %v609_v7 = vld [vmem:[%s6404_s1 + $0x878] sm:$0xff]  ;;  %v472_v8 = vld [vmem:[%s6404_s1 + $0x430] sm:$0xff] }
  0x97   : > { %962 = vmatprep.mubr.f32.mxu0 %v4117_v10  ;;  %1099 = vmatpush2.msra.mxu1 %v412_v11  ;;  %v608_v9 = vld [vmem:[%s6404_s1 + $0x870] sm:$0xff]  ;;  %v469_v11 = vld [vmem:[%s6404_s1 + $0x418] sm:$0xff] }
  0x98   : > { %963 = vmatmul.mubr.f32.vlgmr.msra.gmra.mxu0 %v4123_v12  ;;  %1100 = vmatprep.subr.mxu1 %v409_v13  ;;  %v605_v13 = vld [vmem:[%s6404_s1 + $0x858] sm:$0xff] }
  0x99   : > { %1111 = vmatprep.subr.mxu0 %v529_v14  ;;  %1101 = vmatpush2.msra.mxu1 %v408_v15  ;;  %v468_v14 = vld [vmem:[%s6404_s1 + $0x410] sm:$0xff] }
  0x9a   : > { %1112 = vmatpush1.msra.mxu0 %v528_v16  ;;  %1102 = vmatprep.subr.mxu1 %v405_v18  ;;  %v604_v15 = vld [vmem:[%s6404_s1 + $0x850] sm:$0xff]  ;;  %v593_v16 = vld [vmem:[%s6404_s1 + $0x7f8] sm:$0xff] }
  0x9b   : > { %1113 = vmatprep.subr.mxu0 %v525_v19  ;;  %1103 = vmatpush2.msra.mxu1 %v404_v20  ;;  %v601_v18 = vld [vmem:[%s6404_s1 + $0x838] sm:$0xff]  ;;  %v592_v19 = vld [vmem:[%s6404_s1 + $0x7f0] sm:$0xff] }
  0x9c   : > { %1104 = vmatprep.mubr.f32.mxu1 %v3720_v63  ;;  %1114 = vmatpush1.msra.mxu0 %v524_v21  ;;  %v516_v63 = vld [vmem:[%s6404_s1 + $0x590] sm:$0xff]  ;;  %v589_v21 = vld [vmem:[%s6404_s1 + $0x7d8] sm:$0xff] }
  0x9d   : > { %1105 = vmatmul.mubr.f32.vlgmr.msra.gmra.mxu1 %v3727_v2  ;;  %1115 = vmatprep.subr.mxu0 %v521_v22  ;;  %v513_v2 = vld [vmem:[%s6404_s1 + $0x578] sm:$0xff]  ;;  %v600_v20 = vld [vmem:[%s6404_s1 + $0x830] sm:$0xff] }
  0x9e   : > { %1182 = vmatprep.subr.mxu1 %v657_v23  ;;  %1116 = vmatpush1.msra.mxu0 %v520_v24  ;;  %v597_v22 = vld [vmem:[%s6404_s1 + $0x818] sm:$0xff]  ;;  %v588_v23 = vld [vmem:[%s6404_s1 + $0x7d0] sm:$0xff] }
  0x9f   : > { %1183 = vmatpush1.msra.mxu1 %v656_v25  ;;  %1117 = vmatprep.subr.mxu0 %v517_v26  ;;  %v596_v24 = vld [vmem:[%s6404_s1 + $0x810] sm:$0xff]  ;;  %v585_v25 = vld [vmem:[%s6404_s1 + $0x7b8] sm:$0xff] }
  0xa0   : > { %1184 = vmatprep.subr.mxu1 %v653_v27  ;;  %1118 = vmatpush1.msra.mxu0 %v516_v63  ;;  %v721_v26 = vld [vmem:[%s6404_s1 + $0xbf8] sm:$0xff]  ;;  %v584_v27 = vld [vmem:[%s6404_s1 + $0x7b0] sm:$0xff] }
  0xa1   : > { %1185 = vmatpush1.msra.mxu1 %v652_v28  ;;  %1119 = vmatprep.subr.mxu0 %v513_v2  ;;  %v720_v63 = vld [vmem:[%s6404_s1 + $0xbf0] sm:$0xff]  ;;  %v581_v28 = vld [vmem:[%s6404_s1 + $0x798] sm:$0xff] }
  0xa2   : > { %1186 = vmatprep.subr.mxu1 %v649_v29  ;;  %1120 = vmatpush1.msra.mxu0 %v512_v30  ;;  %v717_v2 = vld [vmem:[%s6404_s1 + $0xbd8] sm:$0xff]  ;;  %v580_v29 = vld [vmem:[%s6404_s1 + $0x790] sm:$0xff] }
  0xa3   : > { %1187 = vmatpush1.msra.mxu1 %v648_v31  ;;  %1121 = vmatprep.subr.mxu0 %v509_v32  ;;  %v716_v30 = vld [vmem:[%s6404_s1 + $0xbd0] sm:$0xff]  ;;  %v577_v31 = vld [vmem:[%s6404_s1 + $0x778] sm:$0xff] }
  0xa4   : > { %1188 = vmatprep.subr.mxu1 %v645_v33  ;;  %1122 = vmatpush1.msra.mxu0 %v508_v34  ;;  %v713_v32 = vld [vmem:[%s6404_s1 + $0xbb8] sm:$0xff]  ;;  %v576_v33 = vld [vmem:[%s6404_s1 + $0x770] sm:$0xff] }
  0xa5   : > { %1189 = vmatpush1.msra.mxu1 %v644_v35  ;;  %1123 = vmatprep.subr.mxu0 %v505_v36  ;;  %v712_v34 = vld [vmem:[%s6404_s1 + $0xbb0] sm:$0xff]  ;;  %v573_v35 = vld [vmem:[%s6404_s1 + $0x758] sm:$0xff] }
  0xa6   : > { %1190 = vmatprep.subr.mxu1 %v641_v37  ;;  %1124 = vmatpush1.msra.mxu0 %v504_v38  ;;  %v709_v36 = vld [vmem:[%s6404_s1 + $0xb98] sm:$0xff]  ;;  %v572_v37 = vld [vmem:[%s6404_s1 + $0x750] sm:$0xff] }
  0xa7   : > { %1191 = vmatpush1.msra.mxu1 %v640_v39  ;;  %1125 = vmatprep.subr.mxu0 %v501_v40  ;;  %v708_v38 = vld [vmem:[%s6404_s1 + $0xb90] sm:$0xff]  ;;  %v569_v39 = vld [vmem:[%s6404_s1 + $0x738] sm:$0xff] }
  0xa8   : > { %1192 = vmatprep.subr.mxu1 %v637_v41  ;;  %1126 = vmatpush1.msra.mxu0 %v500_v42  ;;  %v705_v40 = vld [vmem:[%s6404_s1 + $0xb78] sm:$0xff]  ;;  %v568_v41 = vld [vmem:[%s6404_s1 + $0x730] sm:$0xff] }
  0xa9   : > { %1193 = vmatpush1.msra.mxu1 %v636_v43  ;;  %1127 = vmatprep.subr.mxu0 %v497_v44  ;;  %v704_v42 = vld [vmem:[%s6404_s1 + $0xb70] sm:$0xff]  ;;  %v565_v43 = vld [vmem:[%s6404_s1 + $0x718] sm:$0xff] }
  0xaa   : > { %1194 = vmatprep.subr.mxu1 %v633_v45  ;;  %1128 = vmatpush1.msra.mxu0 %v496_v46  ;;  %v701_v44 = vld [vmem:[%s6404_s1 + $0xb58] sm:$0xff]  ;;  %v564_v45 = vld [vmem:[%s6404_s1 + $0x710] sm:$0xff] }
  0xab   : > { %1195 = vmatpush1.msra.mxu1 %v632_v47  ;;  %1129 = vmatprep.subr.mxu0 %v493_v48  ;;  %v700_v46 = vld [vmem:[%s6404_s1 + $0xb50] sm:$0xff]  ;;  %v561_v47 = vld [vmem:[%s6404_s1 + $0x6f8] sm:$0xff] }
  0xac   : > { %1196 = vmatprep.subr.mxu1 %v629_v49  ;;  %1130 = vmatpush1.msra.mxu0 %v492_v50  ;;  %v697_v48 = vld [vmem:[%s6404_s1 + $0xb38] sm:$0xff]  ;;  %v560_v49 = vld [vmem:[%s6404_s1 + $0x6f0] sm:$0xff] }
  0xad   : > { %1197 = vmatpush1.msra.mxu1 %v628_v51  ;;  %1131 = vmatprep.subr.mxu0 %v489_v52  ;;  %v696_v50 = vld [vmem:[%s6404_s1 + $0xb30] sm:$0xff]  ;;  %v557_v51 = vld [vmem:[%s6404_s1 + $0x6d8] sm:$0xff] }
  0xae   : > { %1198 = vmatprep.subr.mxu1 %v625_v53  ;;  %1132 = vmatpush1.msra.mxu0 %v488_v54  ;;  %v693_v52 = vld [vmem:[%s6404_s1 + $0xb18] sm:$0xff]  ;;  %v556_v53 = vld [vmem:[%s6404_s1 + $0x6d0] sm:$0xff] }
  0xaf   : > { %1199 = vmatpush1.msra.mxu1 %v624_v55  ;;  %1133 = vmatprep.subr.mxu0 %v485_v56  ;;  %v692_v54 = vld [vmem:[%s6404_s1 + $0xb10] sm:$0xff]  ;;  %v553_v55 = vld [vmem:[%s6404_s1 + $0x6b8] sm:$0xff] }
  0xb0   : > { %1200 = vmatprep.subr.mxu1 %v621_v57  ;;  %1134 = vmatpush1.msra.mxu0 %v484_v58  ;;  %v689_v56 = vld [vmem:[%s6404_s1 + $0xaf8] sm:$0xff]  ;;  %v552_v57 = vld [vmem:[%s6404_s1 + $0x6b0] sm:$0xff] }
  0xb1   : > { %1201 = vmatpush1.msra.mxu1 %v620_v59  ;;  %1135 = vmatprep.subr.mxu0 %v481_v60  ;;  %v688_v58 = vld [vmem:[%s6404_s1 + $0xaf0] sm:$0xff]  ;;  %v549_v59 = vld [vmem:[%s6404_s1 + $0x698] sm:$0xff] }
  0xb2   : > { %1202 = vmatprep.subr.mxu1 %v617_v61  ;;  %1136 = vmatpush1.msra.mxu0 %v480_v62  ;;  %v685_v60 = vld [vmem:[%s6404_s1 + $0xad8] sm:$0xff]  ;;  %v548_v61 = vld [vmem:[%s6404_s1 + $0x690] sm:$0xff] }
  0xb3   : > { %1203 = vmatpush1.msra.mxu1 %v616_v0  ;;  %1137 = vmatprep.subr.mxu0 %v477_v1  ;;  %v684_v62 = vld [vmem:[%s6404_s1 + $0xad0] sm:$0xff]  ;;  %v545_v0 = vld [vmem:[%s6404_s1 + $0x678] sm:$0xff] }
  0xb4   : > { %1204 = vmatprep.subr.mxu1 %v613_v3  ;;  %1138 = vmatpush1.msra.mxu0 %v476_v4  ;;  %v681_v1 = vld [vmem:[%s6404_s1 + $0xab8] sm:$0xff]  ;;  %v544_v3 = vld [vmem:[%s6404_s1 + $0x670] sm:$0xff] }
  0xb5   : > { %1205 = vmatpush1.msra.mxu1 %v612_v5  ;;  %1139 = vmatprep.subr.mxu0 %v473_v6  ;;  %v680_v4 = vld [vmem:[%s6404_s1 + $0xab0] sm:$0xff]  ;;  %v541_v5 = vld [vmem:[%s6404_s1 + $0x658] sm:$0xff] }
  0xb6   : > { %1206 = vmatprep.subr.mxu1 %v609_v7  ;;  %1140 = vmatpush1.msra.mxu0 %v472_v8  ;;  %v677_v6 = vld [vmem:[%s6404_s1 + $0xa98] sm:$0xff]  ;;  %v540_v7 = vld [vmem:[%s6404_s1 + $0x650] sm:$0xff] }
  0xb7   : > { %1207 = vmatpush1.msra.mxu1 %v608_v9  ;;  %1141 = vmatprep.subr.mxu0 %v469_v11  ;;  %v676_v8 = vld [vmem:[%s6404_s1 + $0xa90] sm:$0xff]  ;;  %v537_v9 = vld [vmem:[%s6404_s1 + $0x638] sm:$0xff] }
  0xb8   : > { %1208 = vmatprep.subr.mxu1 %v605_v13  ;;  %1142 = vmatpush1.msra.mxu0 %v468_v14  ;;  %v673_v11 = vld [vmem:[%s6404_s1 + $0xa78] sm:$0xff]  ;;  %v536_v13 = vld [vmem:[%s6404_s1 + $0x630] sm:$0xff] }
  0xb9   : > { %1209 = vmatpush1.msra.mxu1 %v604_v15  ;;  %1143 = vmatprep.subr.mxu0 %v593_v16  ;;  %v672_v14 = vld [vmem:[%s6404_s1 + $0xa70] sm:$0xff]  ;;  %v533_v15 = vld [vmem:[%s6404_s1 + $0x618] sm:$0xff] }
  0xba   : > { %1210 = vmatprep.subr.mxu1 %v601_v18  ;;  %1144 = vmatpush2.msra.mxu0 %v592_v19  ;;  %v669_v16 = vld [vmem:[%s6404_s1 + $0xa58] sm:$0xff]  ;;  %v532_v18 = vld [vmem:[%s6404_s1 + $0x610] sm:$0xff] }
  0xbb   : > { %1211 = vmatpush1.msra.mxu1 %v600_v20  ;;  %1145 = vmatprep.subr.mxu0 %v589_v21  ;;  %v668_v19 = vld [vmem:[%s6404_s1 + $0xa50] sm:$0xff]  ;;  %v665_v20 = vld [vmem:[%s6404_s1 + $0xa38] sm:$0xff] }
  0xbc   : > { %1212 = vmatprep.subr.mxu1 %v597_v22  ;;  %1146 = vmatpush2.msra.mxu0 %v588_v23  ;;  %v729_v21 = vld [vmem:[%s6404_s1 + $0xc38] sm:$0xff]  ;;  %v664_v23 = vld [vmem:[%s6404_s1 + $0xa30] sm:$0xff] }
  0xbd   : > { %1213 = vmatpush1.msra.mxu1 %v596_v24  ;;  %1147 = vmatprep.subr.mxu0 %v585_v25  ;;  %v3161_v22 = vld [vmem:[%s3702_s17 + $0x18] sm:$0xff]  ;;  %v728_v24 = vld [vmem:[%s6404_s1 + $0xc30] sm:$0xff] }
  0xbe   : > { %1214 = vmatprep.subr.mxu1 %v721_v26  ;;  %1148 = vmatpush2.msra.mxu0 %v584_v27  ;;  %v3162_v25 = vld [vmem:[%s3702_s17 + $0x10] sm:$0xff]  ;;  %v661_v26 = vld [vmem:[%s6404_s1 + $0xa18] sm:$0xff] }
  0xbf   : > { %1215 = vmatpush2.msra.mxu1 %v720_v63  ;;  %1149 = vmatprep.subr.mxu0 %v581_v28  ;;  %v725_v27 = vld [vmem:[%s6404_s1 + $0xc18] sm:$0xff]  ;;  %v660_v63 = vld [vmem:[%s6404_s1 + $0xa10] sm:$0xff] }
  0xc0   : > { %1216 = vmatprep.subr.mxu1 %v717_v2  ;;  %1150 = vmatpush2.msra.mxu0 %v580_v29  ;;  %v724_v28 = vld [vmem:[%s6404_s1 + $0xc10] sm:$0xff]  ;;  %v1359_v2 = vld [vmem:[%s6406_s3 + $0xf8] sm:$0xff] }
  0xc1   : > { %1217 = vmatpush2.msra.mxu1 %v716_v30  ;;  %1151 = vmatprep.subr.mxu0 %v577_v31  ;;  %v1343_v29 = vld [vmem:[%s6406_s3 + $0x78] sm:$0xff]  ;;  %v3163_v30 = vld [vmem:[%s3702_s17 + $0x30] sm:$0xff]  ;;  %s2880_s17 = sshll.u32 %s6341_s29, 4  ;;  %s2881_s17 = int_to_ptr.vmem [resolvable:$true] %s2880_s17 }
  0xc2   : > { %1218 = vmatprep.subr.mxu1 %v713_v32  ;;  %1152 = vmatpush2.msra.mxu0 %v576_v33  ;;  %v1342_v31 = vld [vmem:[%s6406_s3 + $0x70] sm:$0xff]  ;;  %v1357_v32 = vld [vmem:[%s6406_s3 + $0xe8] sm:$0xff]  ;;  %v1375_v33 = vld [vmem:[%s6406_s3 + $0x178] sm:$0xff]  ;;  %s3164_s23 = scalar_lea.vmem %s2881_s17, 896  ;;  %p3171_p0 = scmp.lt.s32.totalorder %s2881_s17, %s3169_s28 }
  0xc3   : > { %1219 = vmatpush2.msra.mxu1 %v712_v34  ;;  %1153 = vmatprep.subr.mxu0 %v573_v35  ;;  %v1390_v34 = vld [vmem:[%s6406_s3 + $0x1f0] sm:$0xff]  ;;  %v1341_v35 = vld [vmem:[%s6406_s3 + $0x68] sm:$0xff]  ;;  %p3165_p11 = scmp.ne.s32.totalorder %s2881_s17, %s3164_s23  ;;  %p3172_p1 = scmp.lt.s32.totalorder %s3170_s13, %s3164_s23 }
  0xc4   : > { %1220 = vmatprep.subr.mxu1 %v709_v36  ;;  %1154 = vmatpush2.msra.mxu0 %v572_v37  ;;  %v1374_v36 = vld [vmem:[%s6406_s3 + $0x170] sm:$0xff]  ;;  %v1356_v37 = vld [vmem:[%s6406_s3 + $0xe0] sm:$0xff] }
  0xc5   : > { %1221 = vmatpush2.msra.mxu1 %v708_v38  ;;  %1155 = vmatprep.subr.mxu0 %v569_v39  ;;  %v1389_v38 = vld [vmem:[%s6406_s3 + $0x1e8] sm:$0xff]  ;;  %v1340_v39 = vld [vmem:[%s6406_s3 + $0x60] sm:$0xff]  ;;  %p3166_p12 = pnand %p3165_p11, %p3316_p5  ;;  %p3173_p2 = por %p3172_p1, %p3171_p0 }
  0xc6   : > { %1222 = vmatprep.subr.mxu1 %v705_v40  ;;  %1156 = vmatpush2.msra.mxu0 %v568_v41  ;;  %v1373_v40 = vld [vmem:[%s6406_s3 + $0x168] sm:$0xff]  ;;  %v1355_v41 = vld [vmem:[%s6406_s3 + $0xd8] sm:$0xff] }
  0xc7   : > { %1223 = vmatpush2.msra.mxu1 %v704_v42  ;;  %1157 = vmatprep.subr.mxu0 %v565_v43  ;;  %v1388_v42 = vld [vmem:[%s6406_s3 + $0x1e0] sm:$0xff]  ;;  %v1339_v43 = vld [vmem:[%s6406_s3 + $0x58] sm:$0xff]  ;;  %p3167_p13 = pneg %p3166_p12 }
  0xc8   : > { %1224 = vmatprep.subr.mxu1 %v701_v44  ;;  %1158 = vmatpush2.msra.mxu0 %v564_v45  ;;  %v1372_v44 = vld [vmem:[%s6406_s3 + $0x160] sm:$0xff]  ;;  %v1354_v45 = vld [vmem:[%s6406_s3 + $0xd0] sm:$0xff] }
  0xc9   : > { %1225 = vmatpush2.msra.mxu1 %v700_v46  ;;  %1159 = vmatprep.subr.mxu0 %v561_v47  ;;  %v1387_v46 = vld [vmem:[%s6406_s3 + $0x1d8] sm:$0xff]  ;;  %v1338_v47 = vld [vmem:[%s6406_s3 + $0x50] sm:$0xff]  ;;  %p3174_p3 = pnand %p3173_p2, %p3167_p13 }
  0xca   : > { %1226 = vmatprep.subr.mxu1 %v697_v48  ;;  %1160 = vmatpush2.msra.mxu0 %v560_v49  ;;  %v1371_v48 = vld [vmem:[%s6406_s3 + $0x158] sm:$0xff]  ;;  %v1353_v49 = vld [vmem:[%s6406_s3 + $0xc8] sm:$0xff] }
  0xcb   : > { %1227 = vmatpush2.msra.mxu1 %v696_v50  ;;  %1161 = vmatprep.subr.mxu0 %v557_v51  ;;  %v1386_v50 = vld [vmem:[%s6406_s3 + $0x1d0] sm:$0xff]  ;;  %v1337_v51 = vld [vmem:[%s6406_s3 + $0x48] sm:$0xff] }
  0xcc   : > { %1228 = vmatprep.subr.mxu1 %v693_v52  ;;  %1162 = vmatpush2.msra.mxu0 %v556_v53  ;;  %v1370_v52 = vld [vmem:[%s6406_s3 + $0x150] sm:$0xff]  ;;  %v1352_v53 = vld [vmem:[%s6406_s3 + $0xc0] sm:$0xff] }
  0xcd   : > { %1229 = vmatpush2.msra.mxu1 %v692_v54  ;;  %1163 = vmatprep.subr.mxu0 %v553_v55  ;;  %v1385_v54 = vld [vmem:[%s6406_s3 + $0x1c8] sm:$0xff]  ;;  %v1336_v55 = vld [vmem:[%s6406_s3 + $0x40] sm:$0xff] }
  0xce   : > { %1230 = vmatprep.subr.mxu1 %v689_v56  ;;  %1164 = vmatpush2.msra.mxu0 %v552_v57  ;;  %v1369_v56 = vld [vmem:[%s6406_s3 + $0x148] sm:$0xff]  ;;  %v1351_v57 = vld [vmem:[%s6406_s3 + $0xb8] sm:$0xff] }
  0xcf   : > { %1231 = vmatpush2.msra.mxu1 %v688_v58  ;;  %1165 = vmatprep.subr.mxu0 %v549_v59  ;;  %v1384_v58 = vld [vmem:[%s6406_s3 + $0x1c0] sm:$0xff]  ;;  %v1335_v59 = vld [vmem:[%s6406_s3 + $0x38] sm:$0xff] }
  0xd0   : > { %1232 = vmatprep.subr.mxu1 %v685_v60  ;;  %1166 = vmatpush2.msra.mxu0 %v548_v61  ;;  %v1368_v60 = vld [vmem:[%s6406_s3 + $0x140] sm:$0xff]  ;;  %v1350_v61 = vld [vmem:[%s6406_s3 + $0xb0] sm:$0xff] }
  0xd1   : > { %1233 = vmatpush2.msra.mxu1 %v684_v62  ;;  %1167 = vmatprep.subr.mxu0 %v545_v0  ;;  %v1383_v62 = vld [vmem:[%s6406_s3 + $0x1b8] sm:$0xff]  ;;  %v1334_v0 = vld [vmem:[%s6406_s3 + $0x30] sm:$0xff] }
  0xd2   : > { %1234 = vmatprep.subr.mxu1 %v681_v1  ;;  %1168 = vmatpush2.msra.mxu0 %v544_v3  ;;  %v1367_v1 = vld [vmem:[%s6406_s3 + $0x138] sm:$0xff]  ;;  %v1349_v3 = vld [vmem:[%s6406_s3 + $0xa8] sm:$0xff] }
  0xd3   : > { %1235 = vmatpush2.msra.mxu1 %v680_v4  ;;  %1169 = vmatprep.subr.mxu0 %v541_v5  ;;  %v1333_v4 = vld [vmem:[%s6406_s3 + $0x28] sm:$0xff]  ;;  %v1348_v5 = vld [vmem:[%s6406_s3 + $0xa0] sm:$0xff] }
  0xd4   : > { %1236 = vmatprep.subr.mxu1 %v677_v6  ;;  %1170 = vmatpush2.msra.mxu0 %v540_v7  ;;  %v1332_v6 = vld [vmem:[%s6406_s3 + $0x20] sm:$0xff]  ;;  %v1347_v7 = vld [vmem:[%s6406_s3 + $0x98] sm:$0xff] }
  0xd5   : > { %1237 = vmatpush2.msra.mxu1 %v676_v8  ;;  %1171 = vmatprep.subr.mxu0 %v537_v9  ;;  %v1331_v8 = vld [vmem:[%s6406_s3 + $0x18] sm:$0xff]  ;;  %v1346_v9 = vld [vmem:[%s6406_s3 + $0x90] sm:$0xff] }
  0xd6   : > { %1238 = vmatprep.subr.mxu1 %v673_v11  ;;  %1172 = vmatpush2.msra.mxu0 %v536_v13  ;;  %v1330_v11 = vld [vmem:[%s6406_s3 + $0x10] sm:$0xff]  ;;  %v1345_v13 = vld [vmem:[%s6406_s3 + $0x88] sm:$0xff] }
  0xd7   : > { %1239 = vmatpush2.msra.mxu1 %v672_v14  ;;  %1173 = vmatprep.subr.mxu0 %v533_v15  ;;  %v1329_v14 = vld [vmem:[%s6406_s3 + $0x8] sm:$0xff]  ;;  %v1344_v15 = vld [vmem:[%s6406_s3 + $0x80] sm:$0xff] }
  0xd8   : > { %1240 = vmatprep.subr.mxu1 %v669_v16  ;;  %1174 = vmatpush2.msra.mxu0 %v532_v18  ;;  %v1328_v16 = vld [vmem:[%s6406_s3] sm:$0xff]  ;;  %v1382_v18 = vld [vmem:[%s6406_s3 + $0x1b0] sm:$0xff] }
  0xd9   : > { %1175 = vmatprep.mubr.f32.mxu0 %v3161_v22  ;;  %1241 = vmatpush2.msra.mxu1 %v668_v19  ;;  %v1366_v19 = vld [vmem:[%s6406_s3 + $0x130] sm:$0xff]  ;;  %v1380_v22 = vld [vmem:[%s6406_s3 + $0x1a0] sm:$0xff] }
  0xda   : > { %1176 = vmatmul.mubr.f32.vlgmr.msra.gmra.mxu0 %v3162_v25  ;;  %1242 = vmatprep.subr.mxu1 %v665_v20  ;;  %v1381_v20 = vld [vmem:[%s6406_s3 + $0x1a8] sm:$0xff]  ;;  %v1363_v25 = vld [vmem:[%s6406_s3 + $0x118] sm:$0xff] }
  0xdb   : > { %1281 = vmatprep.subr.mxu0 %v729_v21  ;;  %1243 = vmatpush2.msra.mxu1 %v664_v23  ;;  %v1365_v21 = vld [vmem:[%s6406_s3 + $0x128] sm:$0xff]  ;;  %v1364_v23 = vld [vmem:[%s6406_s3 + $0x120] sm:$0xff] }
  0xdc   : > { %1282 = vmatpush1.msra.mxu0 %v728_v24  ;;  %1244 = vmatprep.subr.mxu1 %v661_v26  ;;  %v1379_v24 = vld [vmem:[%s6406_s3 + $0x198] sm:$0xff]  ;;  %v1378_v26 = vld [vmem:[%s6406_s3 + $0x190] sm:$0xff] }
  0xdd   : > { %1283 = vmatprep.subr.mxu0 %v725_v27  ;;  %1245 = vmatpush2.msra.mxu1 %v660_v63  ;;  %v1362_v27 = vld [vmem:[%s6406_s3 + $0x110] sm:$0xff]  ;;  %v1377_v63 = vld [vmem:[%s6406_s3 + $0x188] sm:$0xff] }
  0xde   : > { %1246 = vmatprep.mubr.f32.mxu1 %v4117_v10  ;;  %1284 = vmatpush1.msra.mxu0 %v724_v28  ;;  %v1358_v10 = vld [vmem:[%s6406_s3 + $0xf0] sm:$0xff]  ;;  %v1361_v28 = vld [vmem:[%s6406_s3 + $0x108] sm:$0xff] }
  0xdf   : > { %1317 = vmatprep.mubr.f32.mxu0 %v3226_v17  ;;  %1247 = vmatmul.mubr.f32.vlgmr.msra.gmra.mxu1 %v4123_v12  ;;  %v1391_v12 = vld [vmem:[%s6406_s3 + $0x1f8] sm:$0xff] }
  0xe0   : > { %2945 = vmatmul.mubr.msk.f32.vlgmr.msra.gmra.mxu0 %vm752_vm0, %v3163_v30  ;;  %2950 = vmatprep.subr.mxu0 %v1359_v2  ;;  %v1376_v2 = vld [vmem:[%s6406_s3 + $0x180] sm:$0xff]  ;;  %v732_v30 = vlaneseq }
  0xe1   : > { %2951 = vmatpush3.msra.mxu0 %v1343_v29  ;;  %2985 = vmatprep.subr.mxu1 %v1391_v12  ;;  %v1360_v29 = vld [vmem:[%s6406_s3 + $0x100] sm:$0xff] }
  0xe2   : > { %2952 = vmatprep.subr.mxu0 %v1358_v10  ;;  %2986 = vmatpush3.msra.mxu1 %v1375_v33  ;;  %v4736_v10 = vshrl.u32 %v732_v30, 7  ;;  %v1590_v30 = vld [vmem:[%s6408_s5 + $0x190] sm:$0xff] }
  0xe3   : > { %2953 = vmatpush3.msra.mxu0 %v1342_v31  ;;  %2987 = vmatprep.subr.mxu1 %v1390_v34 }
  0xe4   : > { %2954 = vmatprep.subr.mxu0 %v1357_v32  ;;  %2988 = vmatpush3.msra.mxu1 %v1374_v36  ;;  %v4739_v31 = vsub.s32 0, %v4736_v10  ;;  %v730_v32 = vld [vmem:[%s6405_s2] sm:$0xf]  ;;  %v4745_v12 = vsub.s32 1, %v4736_v10 }
  0xe5   : > { %2955 = vmatpush3.msra.mxu0 %v1341_v35  ;;  %2989 = vmatprep.subr.mxu1 %v1389_v38 }
  0xe6   : > { %2956 = vmatprep.subr.mxu0 %v1356_v37  ;;  %2990 = vmatpush3.msra.mxu1 %v1373_v40  ;;  %v735_v34 = vrot.slane %v730_v32, %v4739_v31  ;;  %v739_v36 = vrot.slane %v730_v32, %v4745_v12 }
  0xe7   : > { %2957 = vmatpush3.msra.mxu0 %v1340_v39  ;;  %2991 = vmatprep.subr.mxu1 %v1388_v42 }
  0xe8   : > { %2958 = vmatprep.subr.mxu0 %v1355_v41  ;;  %2992 = vmatpush3.msra.mxu1 %v1372_v44 }
  0xe9   : > { %2959 = vmatpush3.msra.mxu0 %v1339_v43  ;;  %2993 = vmatprep.subr.mxu1 %v1387_v46 }
  0xea   : > { %2960 = vmatprep.subr.mxu0 %v1354_v45  ;;  %2994 = vmatpush3.msra.mxu1 %v1371_v48 }
  0xeb   : > { %2961 = vmatpush3.msra.mxu0 %v1338_v47  ;;  %2995 = vmatprep.subr.mxu1 %v1386_v50 }
  0xec   : > { %2962 = vmatprep.subr.mxu0 %v1353_v49  ;;  %2996 = vmatpush3.msra.mxu1 %v1370_v52 }
  0xed   : > { %2963 = vmatpush3.msra.mxu0 %v1337_v51  ;;  %2997 = vmatprep.subr.mxu1 %v1385_v54  ;;  %v4754_v54 = vsub.s32 3, %v4736_v10 }
  0xee   : > { %2964 = vmatprep.subr.mxu0 %v1352_v53  ;;  %2998 = vmatpush3.msra.mxu1 %v1369_v56  ;;  %v4751_v53 = vsub.s32 2, %v4736_v10 }
  0xef   : > { %2965 = vmatpush3.msra.mxu0 %v1336_v55  ;;  %2999 = vmatprep.subr.mxu1 %v1384_v58  ;;  %v747_v58 = vrot.slane %v730_v32, %v4754_v54 }
  0xf0   : > { %2966 = vmatprep.subr.mxu0 %v1351_v57  ;;  %3000 = vmatpush3.msra.mxu1 %v1368_v60  ;;  %v743_v56 = vrot.slane %v730_v32, %v4751_v53  ;;  %v1584_v32 = vld [vmem:[%s6408_s5 + $0x160] sm:$0xff] }
  0xf1   : > { %2967 = vmatpush3.msra.mxu0 %v1335_v59  ;;  %3001 = vmatprep.subr.mxu1 %v1383_v62 }
  0xf2   : > { %2968 = vmatprep.subr.mxu0 %v1350_v61  ;;  %3002 = vmatpush3.msra.mxu1 %v1367_v1 }
  0xf3   : > { %2969 = vmatpush3.msra.mxu0 %v1334_v0  ;;  %3003 = vmatprep.subr.mxu1 %v1382_v18 }
  0xf4   : > { %2970 = vmatprep.subr.mxu0 %v1349_v3  ;;  %3004 = vmatpush3.msra.mxu1 %v1366_v19  ;;  %v1602_v19 = vld [vmem:[%s6408_s5 + $0x1f0] sm:$0xff] }
  0xf5   : > { %2971 = vmatpush3.msra.mxu0 %v1333_v4  ;;  %3005 = vmatprep.subr.mxu1 %v1381_v20  ;;  %v1597_v20 = vld [vmem:[%s6408_s5 + $0x1c8] sm:$0xff] }
  0xf6   : > { %2972 = vmatprep.subr.mxu0 %v1348_v5  ;;  %3006 = vmatpush3.msra.mxu1 %v1365_v21  ;;  %v1599_v21 = vld [vmem:[%s6408_s5 + $0x1d8] sm:$0xff] }
  0xf7   : > { %2973 = vmatpush3.msra.mxu0 %v1332_v6  ;;  %3007 = vmatprep.subr.mxu1 %v1380_v22  ;;  %v1596_v22 = vld [vmem:[%s6408_s5 + $0x1c0] sm:$0xff] }
  0xf8   : > { %2974 = vmatprep.subr.mxu0 %v1347_v7  ;;  %3008 = vmatpush3.msra.mxu1 %v1364_v23  ;;  %v1593_v23 = vld [vmem:[%s6408_s5 + $0x1a8] sm:$0xff] }
  0xf9   : > { %2975 = vmatpush3.msra.mxu0 %v1331_v8  ;;  %3009 = vmatprep.subr.mxu1 %v1379_v24  ;;  %v1598_v24 = vld [vmem:[%s6408_s5 + $0x1d0] sm:$0xff] }
  0xfa   : > { %2976 = vmatprep.subr.mxu0 %v1346_v9  ;;  %3010 = vmatpush3.msra.mxu1 %v1363_v25  ;;  %v1592_v25 = vld [vmem:[%s6408_s5 + $0x1a0] sm:$0xff] }
  0xfb   : > { %2977 = vmatpush3.msra.mxu0 %v1330_v11  ;;  %3011 = vmatprep.subr.mxu1 %v1378_v26  ;;  %v1595_v26 = vld [vmem:[%s6408_s5 + $0x1b8] sm:$0xff] }
  0xfc   : > { %2978 = vmatprep.subr.mxu0 %v1345_v13  ;;  %3012 = vmatpush3.msra.mxu1 %v1362_v27  ;;  %v1589_v27 = vld [vmem:[%s6408_s5 + $0x188] sm:$0xff] }
  0xfd   : > { %2979 = vmatpush3.msra.mxu0 %v1329_v14  ;;  %3013 = vmatprep.subr.mxu1 %v1377_v63  ;;  %v1601_v14 = vld [vmem:[%s6408_s5 + $0x1e8] sm:$0xff]  ;;  %v1594_v63 = vld [vmem:[%s6408_s5 + $0x1b0] sm:$0xff] }
  0xfe   : > { %2980 = vmatprep.subr.mxu0 %v1344_v15  ;;  %3014 = vmatpush3.msra.mxu1 %v1361_v28  ;;  %v1603_v15 = vld [vmem:[%s6408_s5 + $0x1f8] sm:$0xff]  ;;  %v1588_v28 = vld [vmem:[%s6408_s5 + $0x180] sm:$0xff] }
  0xff   : > { %2981 = vmatpush3.msra.mxu0 %v1328_v16  ;;  %3015 = vmatprep.subr.mxu1 %v1376_v2  ;;  %v1600_v16 = vld [vmem:[%s6408_s5 + $0x1e0] sm:$0xff]  ;;  %v1591_v2 = vld [vmem:[%s6408_s5 + $0x198] sm:$0xff] }
 0x100   : > { %3016 = vmatpush3.msra.mxu1 %v1360_v29  ;;  %1626 = vmatprep.subr.mxu0 %v1601_v14  ;;  %v1585_v29 = vld [vmem:[%s6408_s5 + $0x168] sm:$0xff]  ;;  %v1544_v14 = vld [vmem:[%s6408_s5 + $0x20] sm:$0xff] }
 0x101   : > { %1697 = vmatprep.subr.mxu1 %v1603_v15  ;;  %v1546_v15 = vld [vmem:[%s6408_s5 + $0x30] sm:$0xff] }
 0x115   : > { %v822_v33 = vpop.f32.mrf.mxu0 }
 0x116   : > { %v893_v35 = vpop.f32.mrf.mxu1  ;;  %v823_v38 = vadd.f32 %v822_v33, %v735_v34  ;;  %v1587_v33 = vld [vmem:[%s6408_s5 + $0x178] sm:$0xff]  ;;  %v1581_v34 = vld [vmem:[%s6408_s5 + $0x148] sm:$0xff] }
 0x117   : > { %v824_v37 = vpop.f32.mrf.mxu0 }
 0x118   : > { %v895_v39 = vpop.f32.mrf.mxu1  ;;  %v825_v40 = vadd.f32 %v824_v37, %v739_v36  ;;  %v894_v41 = vadd.f32 %v893_v35, %v823_v38  ;;  %v1586_v35 = vld [vmem:[%s6408_s5 + $0x170] sm:$0xff]  ;;  %v1580_v36 = vld [vmem:[%s6408_s5 + $0x140] sm:$0xff]  ;;  %v1583_v37 = vld [vmem:[%s6408_s5 + $0x158] sm:$0xff] }
 0x119   : > { %v1577_v38 = vld [vmem:[%s6408_s5 + $0x128] sm:$0xff] }
 0x11a   : > { %v896_v44 = vadd.f32 %v895_v39, %v825_v40  ;;  %v1582_v39 = vld [vmem:[%s6408_s5 + $0x150] sm:$0xff]  ;;  %v1576_v40 = vld [vmem:[%s6408_s5 + $0x120] sm:$0xff] }
 0x11b   : > { %v1035_v42 = vpop.f32.mrf.mxu1 }
 0x11d   : > { %v1037_v48 = vpop.f32.mrf.mxu1 }
 0x158   : > { %v964_v43 = vpop.f32.mrf.mxu0 }
 0x159   : > { %v965_v45 = vadd.f32 %v964_v43, %v894_v41  ;;  %v1579_v41 = vld [vmem:[%s6408_s5 + $0x138] sm:$0xff]  ;;  %v1578_v43 = vld [vmem:[%s6408_s5 + $0x130] sm:$0xff] }
 0x15a   : > { %v966_v46 = vpop.f32.mrf.mxu0 }
 0x15b   : > { %v967_v47 = vadd.f32 %v966_v46, %v896_v44  ;;  %v1036_v49 = vadd.f32 %v1035_v42, %v965_v45  ;;  %v1573_v42 = vld [vmem:[%s6408_s5 + $0x108] sm:$0xff]  ;;  %v1572_v44 = vld [vmem:[%s6408_s5 + $0x100] sm:$0xff]  ;;  %v1575_v45 = vld [vmem:[%s6408_s5 + $0x118] sm:$0xff] }
 0x15c   : > { %v1569_v46 = vld [vmem:[%s6408_s5 + $0xe8] sm:$0xff] }
 0x15d   : > { %v1038_v50 = vadd.f32 %v1037_v48, %v967_v47  ;;  %v1324_v52 = vmax.f32 %v1036_v49, 0.0  ;;  %v1106_v55 = vpop.f32.mrf.mxu1  ;;  %v1574_v47 = vld [vmem:[%s6408_s5 + $0x110] sm:$0xff]  ;;  %v1568_v48 = vld [vmem:[%s6408_s5 + $0xe0] sm:$0xff]  ;;  %v1571_v49 = vld [vmem:[%s6408_s5 + $0xf8] sm:$0xff] }
 0x15e   : > { %v1107_v61 = vadd.f32 %v1106_v55, %v743_v56  ;;  %v1567_v55 = vld [vmem:[%s6408_s5 + $0xd8] sm:$0xff]  ;;  %v1561_v56 = vld [vmem:[%s6408_s5 + $0xa8] sm:$0xff] }
 0x15f   : > { %v1325_v51 = vmax.f32 %v1038_v50, 0.0  ;;  %v1108_v59 = vpop.f32.mrf.mxu1  ;;  %v1565_v50 = vld [vmem:[%s6408_s5 + $0xc8] sm:$0xff] }
 0x160   : > { %v1109_v62 = vadd.f32 %v1108_v59, %v747_v58  ;;  %v1560_v58 = vld [vmem:[%s6408_s5 + $0xa0] sm:$0xff]  ;;  %v1563_v59 = vld [vmem:[%s6408_s5 + $0xb8] sm:$0xff] }
 0x161   : > { %1463 = vmatprep.mubr.f32.mxu0 %v1325_v51  ;;  %v1570_v51 = vld [vmem:[%s6408_s5 + $0xf0] sm:$0xff] }
 0x162   : > { %1464 = vmatmul.mubr.f32.vlgmr.msra.gmra.mxu0 %v1324_v52  ;;  %v1564_v52 = vld [vmem:[%s6408_s5 + $0xc0] sm:$0xff] }
 0x163   : > { %1690 = vmatprep.mubr.f32.mxu0 %v3226_v17  ;;  %1627 = vmatpush1.msra.mxu0 %v1600_v16  ;;  %v1541_v16 = vld [vmem:[%s6408_s5 + $0x8] sm:$0xff] }
 0x164   : > { %1628 = vmatprep.subr.mxu0 %v1597_v20  ;;  %v1542_v20 = vld [vmem:[%s6408_s5 + $0x10] sm:$0xff] }
 0x165   : > { %1629 = vmatpush1.msra.mxu0 %v1596_v22  ;;  %v2102_v22 = vld [vmem:[%s6410_s7 + $0xa50] sm:$0xff] }
 0x166   : > { %1630 = vmatprep.subr.mxu0 %v1593_v23 }
 0x167   : > { %1631 = vmatpush1.msra.mxu0 %v1592_v25 }
 0x168   : > { %1632 = vmatprep.subr.mxu0 %v1589_v27 }
 0x169   : > { %1633 = vmatpush1.msra.mxu0 %v1588_v28 }
 0x16a   : > { %1634 = vmatprep.subr.mxu0 %v1585_v29 }
 0x16b   : > { %1635 = vmatpush1.msra.mxu0 %v1584_v32  ;;  %v1877_v32 = vld [vmem:[%s6410_s7 + $0x348] sm:$0xff] }
 0x16c   : > { %1636 = vmatprep.subr.mxu0 %v1581_v34  ;;  %v1871_v34 = vld [vmem:[%s6410_s7 + $0x318] sm:$0xff] }
 0x16d   : > { %1637 = vmatpush1.msra.mxu0 %v1580_v36  ;;  %v1870_v36 = vld [vmem:[%s6410_s7 + $0x310] sm:$0xff] }
 0x16e   : > { %1638 = vmatprep.subr.mxu0 %v1577_v38  ;;  %v1864_v38 = vld [vmem:[%s6410_s7 + $0x2e0] sm:$0xff] }
 0x16f   : > { %1639 = vmatpush1.msra.mxu0 %v1576_v40  ;;  %v1863_v40 = vld [vmem:[%s6410_s7 + $0x2d8] sm:$0xff] }
 0x170   : > { %1640 = vmatprep.subr.mxu0 %v1573_v42  ;;  %v1857_v42 = vld [vmem:[%s6410_s7 + $0x2a8] sm:$0xff] }
 0x171   : > { %1641 = vmatpush1.msra.mxu0 %v1572_v44  ;;  %v1856_v44 = vld [vmem:[%s6410_s7 + $0x2a0] sm:$0xff] }
 0x172   : > { %1642 = vmatprep.subr.mxu0 %v1569_v46  ;;  %v1850_v46 = vld [vmem:[%s6410_s7 + $0x270] sm:$0xff] }
 0x173   : > { %1643 = vmatpush1.msra.mxu0 %v1568_v48  ;;  %v1849_v48 = vld [vmem:[%s6410_s7 + $0x268] sm:$0xff] }
 0x174   : > { %1644 = vmatprep.subr.mxu0 %v1565_v50  ;;  %v1843_v50 = vld [vmem:[%s6410_s7 + $0x238] sm:$0xff] }
 0x175   : > { %1645 = vmatpush1.msra.mxu0 %v1564_v52  ;;  %v1842_v52 = vld [vmem:[%s6410_s7 + $0x230] sm:$0xff] }
 0x176   : > { %1646 = vmatprep.subr.mxu0 %v1561_v56  ;;  %v1836_v56 = vld [vmem:[%s6410_s7 + $0x200] sm:$0xff] }
 0x177   : > { %1647 = vmatpush1.msra.mxu0 %v1560_v58  ;;  %v1835_v58 = vld [vmem:[%s6410_s7 + $0x1f8] sm:$0xff] }
 0x19a   : > { %v1177_v57 = vpop.f32.mrf.mxu0 }
 0x19b   : > { %v1178_v0 = vadd.f32 %v1177_v57, %v1107_v61  ;;  %v1566_v57 = vld [vmem:[%s6408_s5 + $0xd0] sm:$0xff] }
 0x19c   : > { %v1179_v60 = vpop.f32.mrf.mxu0  ;;  %v1562_v61 = vld [vmem:[%s6408_s5 + $0xb0] sm:$0xff] }
 0x19d   : > { %v1180_v4 = vadd.f32 %v1179_v60, %v1109_v62  ;;  %v1557_v60 = vld [vmem:[%s6408_s5 + $0x88] sm:$0xff]  ;;  %v1559_v62 = vld [vmem:[%s6408_s5 + $0x98] sm:$0xff] }
 0x19e   : > { %1648 = vmatprep.subr.mxu0 %v1557_v60  ;;  %v1829_v60 = vld [vmem:[%s6410_s7 + $0x1c8] sm:$0xff] }
 0x19f   : > { %v1248_v1 = vpop.f32.mrf.mxu1 }
 0x1a0   : > { %v1319_v3 = vpop.f32.mrf.mxu0  ;;  %v1249_v5 = vadd.f32 %v1248_v1, %v1178_v0  ;;  %v1556_v0 = vld [vmem:[%s6408_s5 + $0x80] sm:$0xff]  ;;  %v1558_v1 = vld [vmem:[%s6408_s5 + $0x90] sm:$0xff] }
 0x1a1   : > { %v1250_v6 = vpop.f32.mrf.mxu1  ;;  %1649 = vmatpush1.msra.mxu0 %v1556_v0  ;;  %v2052_v0 = vld [vmem:[%s6410_s7 + $0x8c0] sm:$0xff] }
 0x1a2   : > { %v1251_v7 = vadd.f32 %v1250_v6, %v1180_v4  ;;  %v1320_v8 = vadd.f32 %v1319_v3, %v1249_v5  ;;  %v1321_v9 = vpop.f32.mrf.mxu0  ;;  %v1553_v3 = vld [vmem:[%s6408_s5 + $0x68] sm:$0xff]  ;;  %v1555_v4 = vld [vmem:[%s6408_s5 + $0x78] sm:$0xff]  ;;  %v1554_v5 = vld [vmem:[%s6408_s5 + $0x70] sm:$0xff] }
 0x1a3   : > { %1650 = vmatprep.subr.mxu0 %v1553_v3  ;;  %v1549_v6 = vld [vmem:[%s6408_s5 + $0x48] sm:$0xff]  ;;  %v2046_v3 = vld [vmem:[%s6410_s7 + $0x890] sm:$0xff] }
 0x1a4   : > { %v1322_v11 = vadd.f32 %v1321_v9, %v1251_v7  ;;  %v1326_v18 = vmax.f32 %v1320_v8, 0.0  ;;  %v1551_v7 = vld [vmem:[%s6408_s5 + $0x58] sm:$0xff]  ;;  %v1548_v8 = vld [vmem:[%s6408_s5 + $0x40] sm:$0xff]  ;;  %v1550_v9 = vld [vmem:[%s6408_s5 + $0x50] sm:$0xff] }
 0x1a6   : > { %v1327_v13 = vmax.f32 %v1322_v11, 0.0  ;;  %v1545_v11 = vld [vmem:[%s6408_s5 + $0x28] sm:$0xff] }
 0x1a8   : > { %1533 = vmatprep.mubr.f32.mxu1 %v1327_v13  ;;  %v1547_v13 = vld [vmem:[%s6408_s5 + $0x38] sm:$0xff] }
 0x1a9   : > { %1534 = vmatmul.mubr.f32.vlgmr.msra.gmra.mxu1 %v1326_v18  ;;  %v1543_v18 = vld [vmem:[%s6408_s5 + $0x18] sm:$0xff] }
 0x1aa   : > { %1698 = vmatpush1.msra.mxu1 %v1602_v19  ;;  %1761 = vmatprep.mubr.f32.mxu1 %v3226_v17  ;;  %v1552_v17 = vld [vmem:[%s6408_s5 + $0x60] sm:$0xff] }
 0x1ab   : > { %1699 = vmatprep.subr.mxu1 %v1599_v21  ;;  %1651 = vmatpush1.msra.mxu0 %v1552_v17  ;;  %v1540_v19 = vld [vmem:[%s6408_s5] sm:$0xff]  ;;  %v1878_v21 = vld [vmem:[%s6410_s7 + $0x350] sm:$0xff]  ;;  %v2045_v17 = vld [vmem:[%s6410_s7 + $0x888] sm:$0xff] }
 0x1ac   : > { %1700 = vmatpush1.msra.mxu1 %v1598_v24  ;;  %1652 = vmatprep.subr.mxu0 %v1549_v6  ;;  %v2039_v6 = vld [vmem:[%s6410_s7 + $0x858] sm:$0xff] }
 0x1ad   : > { %1701 = vmatprep.subr.mxu1 %v1595_v26  ;;  %1653 = vmatpush1.msra.mxu0 %v1548_v8  ;;  %v2946_v26 = vld [vmem:[%s6407_s4] ss:$0 sm:$0xff]  ;;  %v2038_v8 = vld [vmem:[%s6410_s7 + $0x850] sm:$0xff] }
 0x1ae   : > { %1702 = vmatpush1.msra.mxu1 %v1594_v63  ;;  %1654 = vmatprep.subr.mxu0 %v1545_v11  ;;  %v2032_v11 = vld [vmem:[%s6410_s7 + $0x820] sm:$0xff] }
 0x1af   : > { %1703 = vmatprep.subr.mxu1 %v1591_v2  ;;  %1655 = vmatpush1.msra.mxu0 %v1544_v14  ;;  %v2031_v14 = vld [vmem:[%s6410_s7 + $0x818] sm:$0xff] }
 0x1b0   : > { %1704 = vmatpush1.msra.mxu1 %v1590_v30  ;;  %1656 = vmatprep.subr.mxu0 %v1541_v16  ;;  %v2025_v16 = vld [vmem:[%s6410_s7 + $0x7e8] sm:$0xff] }
 0x1b1   : > { %1705 = vmatprep.subr.mxu1 %v1587_v33  ;;  %1657 = vmatpush1.msra.mxu0 %v1540_v19  ;;  %v2101_v33 = vld [vmem:[%s6410_s7 + $0xa48] sm:$0xff]  ;;  %v2024_v19 = vld [vmem:[%s6410_s7 + $0x7e0] sm:$0xff] }
 0x1b2   : > { %1706 = vmatpush1.msra.mxu1 %v1586_v35  ;;  %2257 = vmatprep.subr.mxu0 %v1878_v21  ;;  %v2095_v35 = vld [vmem:[%s6410_s7 + $0xa18] sm:$0xff]  ;;  %v2018_v21 = vld [vmem:[%s6410_s7 + $0x7b0] sm:$0xff] }
 0x1b3   : > { %1707 = vmatprep.subr.mxu1 %v1583_v37  ;;  %v2094_v37 = vld [vmem:[%s6410_s7 + $0xa10] sm:$0xff] }
 0x1b4   : > { %1708 = vmatpush1.msra.mxu1 %v1582_v39  ;;  %v2088_v39 = vld [vmem:[%s6410_s7 + $0x9e0] sm:$0xff] }
 0x1b5   : > { %1709 = vmatprep.subr.mxu1 %v1579_v41  ;;  %v2087_v41 = vld [vmem:[%s6410_s7 + $0x9d8] sm:$0xff] }
 0x1b6   : > { %1710 = vmatpush1.msra.mxu1 %v1578_v43  ;;  %v2081_v43 = vld [vmem:[%s6410_s7 + $0x9a8] sm:$0xff] }
 0x1b7   : > { %1711 = vmatprep.subr.mxu1 %v1575_v45  ;;  %v2080_v45 = vld [vmem:[%s6410_s7 + $0x9a0] sm:$0xff] }
 0x1b8   : > { %1712 = vmatpush1.msra.mxu1 %v1574_v47  ;;  %v2074_v47 = vld [vmem:[%s6410_s7 + $0x970] sm:$0xff] }
 0x1b9   : > { %1713 = vmatprep.subr.mxu1 %v1571_v49  ;;  %v2073_v49 = vld [vmem:[%s6410_s7 + $0x968] sm:$0xff] }
 0x1ba   : > { %1714 = vmatpush1.msra.mxu1 %v1570_v51  ;;  %v2067_v51 = vld [vmem:[%s6410_s7 + $0x938] sm:$0xff] }
 0x1bb   : > { %1715 = vmatprep.subr.mxu1 %v1567_v55  ;;  %v2066_v55 = vld [vmem:[%s6410_s7 + $0x930] sm:$0xff] }
 0x1bc   : > { %1716 = vmatpush1.msra.mxu1 %v1566_v57  ;;  %v2060_v57 = vld [vmem:[%s6410_s7 + $0x900] sm:$0xff] }
 0x1bd   : > { %1717 = vmatprep.subr.mxu1 %v1563_v59  ;;  %v2059_v59 = vld [vmem:[%s6410_s7 + $0x8f8] sm:$0xff] }
 0x1be   : > { %1718 = vmatpush1.msra.mxu1 %v1562_v61  ;;  %v2053_v61 = vld [vmem:[%s6410_s7 + $0x8c8] sm:$0xff] }
 0x1bf   : > { %1719 = vmatprep.subr.mxu1 %v1559_v62  ;;  %v1828_v62 = vld [vmem:[%s6410_s7 + $0x1c0] sm:$0xff] }
 0x1c0   : > { %1720 = vmatpush1.msra.mxu1 %v1558_v1  ;;  %v1822_v1 = vld [vmem:[%s6410_s7 + $0x190] sm:$0xff] }
 0x1c1   : > { %1721 = vmatprep.subr.mxu1 %v1555_v4  ;;  %v1821_v4 = vld [vmem:[%s6410_s7 + $0x188] sm:$0xff] }
 0x1c2   : > { %1722 = vmatpush1.msra.mxu1 %v1554_v5  ;;  %v1815_v5 = vld [vmem:[%s6410_s7 + $0x158] sm:$0xff] }
 0x1c3   : > { %1723 = vmatprep.subr.mxu1 %v1551_v7  ;;  %v1814_v7 = vld [vmem:[%s6410_s7 + $0x150] sm:$0xff] }
 0x1c4   : > { %1724 = vmatpush1.msra.mxu1 %v1550_v9  ;;  %v1808_v9 = vld [vmem:[%s6410_s7 + $0x120] sm:$0xff] }
 0x1c5   : > { %1725 = vmatprep.subr.mxu1 %v1547_v13  ;;  %v1807_v13 = vld [vmem:[%s6410_s7 + $0x118] sm:$0xff] }
 0x1c6   : > { %1726 = vmatpush1.msra.mxu1 %v1546_v15  ;;  %v1801_v15 = vld [vmem:[%s6410_s7 + $0xe8] sm:$0xff] }
 0x1c7   : > { %1727 = vmatprep.subr.mxu1 %v1543_v18  ;;  %v1800_v18 = vld [vmem:[%s6410_s7 + $0xe0] sm:$0xff] }
 0x1c8   : > { %1728 = vmatpush1.msra.mxu1 %v1542_v20  ;;  %v1794_v20 = vld [vmem:[%s6410_s7 + $0xb0] sm:$0xff] }
 0x1c9   : > { %2328 = vmatprep.subr.mxu1 %v2102_v22  ;;  %v1793_v22 = vld [vmem:[%s6410_s7 + $0xa8] sm:$0xff] }
 0x222   : > { %v2982_v23 = vpop.f32.mrf.mxu0 }
 0x224   : > { %v2983_v24 = vpop.f32.mrf.mxu0 }
 0x225   : > { %v2984_v25 = vadd.f32 %v2983_v24, %v2982_v23  ;;  %v2017_v23 = vld [vmem:[%s6410_s7 + $0x7a8] sm:$0xff]  ;;  %v1787_v24 = vld [vmem:[%s6410_s7 + $0x78] sm:$0xff] }
 0x227   : > { %v1466_v28 = vadd.f32 %v2984_v25, %v2946_v26  ;;  %v2011_v25 = vld [vmem:[%s6410_s7 + $0x778] sm:$0xff]  ;;  %v1786_v26 = vld [vmem:[%s6410_s7 + $0x70] sm:$0xff] }
 0x269   : > { %v3017_v27 = vpop.f32.mrf.mxu1 }
 0x26b   : > { %v3018_v63 = vpop.f32.mrf.mxu1 }
 0x26c   : > { %v3019_v2 = vadd.f32 %v3018_v63, %v3017_v27  ;;  %v2010_v27 = vld [vmem:[%s6410_s7 + $0x770] sm:$0xff]  ;;  %v1780_v63 = vld [vmem:[%s6410_s7 + $0x40] sm:$0xff] }
 0x26e   : > { %v1536_v29 = vadd.f32 %v3019_v2, %v1466_v28  ;;  %v2004_v28 = vld [vmem:[%s6410_s7 + $0x740] sm:$0xff]  ;;  %v1779_v2 = vld [vmem:[%s6410_s7 + $0x38] sm:$0xff] }
 0x270   : > { %v1539_v30 = vmax.f32 %v1536_v29, 0.0  ;;  %v2003_v29 = vld [vmem:[%s6410_s7 + $0x738] sm:$0xff] }
 0x272   : > { %1691 = vmatmul.mubr.f32.vlgmr.msra.gmra.mxu0 %v1539_v30  ;;  %1762 = vmatmul.mubr.f32.vlgmr.msra.gmra.mxu1 %v1539_v30  ;;  %v1773_v30 = vld [vmem:[%s6410_s7 + $0x8] sm:$0xff] }
 0x273   : > { %2258 = vmatpush1.msra.mxu0 %v1877_v32  ;;  %2329 = vmatpush1.msra.mxu1 %v2101_v33  ;;  %v1997_v32 = vld [vmem:[%s6410_s7 + $0x708] sm:$0xff]  ;;  %v1772_v33 = vld [vmem:[%s6410_s7] sm:$0xff] }
 0x274   : > { %2259 = vmatprep.subr.mxu0 %v1871_v34  ;;  %2330 = vmatprep.subr.mxu1 %v2095_v35  ;;  %v1996_v34 = vld [vmem:[%s6410_s7 + $0x700] sm:$0xff]  ;;  %v1990_v35 = vld [vmem:[%s6410_s7 + $0x6d0] sm:$0xff] }
 0x275   : > { %2260 = vmatpush1.msra.mxu0 %v1870_v36  ;;  %2331 = vmatpush1.msra.mxu1 %v2094_v37  ;;  %v2214_v36 = vld [vmem:[%s6410_s7 + $0xdd0] sm:$0xff]  ;;  %v1989_v37 = vld [vmem:[%s6410_s7 + $0x6c8] sm:$0xff] }
 0x276   : > { %2261 = vmatprep.subr.mxu0 %v1864_v38  ;;  %2332 = vmatprep.subr.mxu1 %v2088_v39  ;;  %v2213_v38 = vld [vmem:[%s6410_s7 + $0xdc8] sm:$0xff]  ;;  %v1983_v39 = vld [vmem:[%s6410_s7 + $0x698] sm:$0xff] }
 0x277   : > { %2262 = vmatpush1.msra.mxu0 %v1863_v40  ;;  %2333 = vmatpush1.msra.mxu1 %v2087_v41  ;;  %v2207_v40 = vld [vmem:[%s6410_s7 + $0xd98] sm:$0xff]  ;;  %v1982_v41 = vld [vmem:[%s6410_s7 + $0x690] sm:$0xff] }
 0x278   : > { %2263 = vmatprep.subr.mxu0 %v1857_v42  ;;  %2334 = vmatprep.subr.mxu1 %v2081_v43  ;;  %v2206_v42 = vld [vmem:[%s6410_s7 + $0xd90] sm:$0xff]  ;;  %v1976_v43 = vld [vmem:[%s6410_s7 + $0x660] sm:$0xff] }
 0x279   : > { %2264 = vmatpush1.msra.mxu0 %v1856_v44  ;;  %2335 = vmatpush1.msra.mxu1 %v2080_v45  ;;  %v2200_v44 = vld [vmem:[%s6410_s7 + $0xd60] sm:$0xff]  ;;  %v1975_v45 = vld [vmem:[%s6410_s7 + $0x658] sm:$0xff] }
 0x27a   : > { %2265 = vmatprep.subr.mxu0 %v1850_v46  ;;  %2336 = vmatprep.subr.mxu1 %v2074_v47  ;;  %v2199_v46 = vld [vmem:[%s6410_s7 + $0xd58] sm:$0xff]  ;;  %v1969_v47 = vld [vmem:[%s6410_s7 + $0x628] sm:$0xff] }
 0x27b   : > { %2266 = vmatpush1.msra.mxu0 %v1849_v48  ;;  %2337 = vmatpush1.msra.mxu1 %v2073_v49  ;;  %v2193_v48 = vld [vmem:[%s6410_s7 + $0xd28] sm:$0xff]  ;;  %v1968_v49 = vld [vmem:[%s6410_s7 + $0x620] sm:$0xff] }
 0x27c   : > { %2267 = vmatprep.subr.mxu0 %v1843_v50  ;;  %2338 = vmatprep.subr.mxu1 %v2067_v51  ;;  %v2192_v50 = vld [vmem:[%s6410_s7 + $0xd20] sm:$0xff]  ;;  %v1962_v51 = vld [vmem:[%s6410_s7 + $0x5f0] sm:$0xff] }
 0x27d   : > { %2268 = vmatpush1.msra.mxu0 %v1842_v52  ;;  %2339 = vmatpush1.msra.mxu1 %v2066_v55  ;;  %v2186_v52 = vld [vmem:[%s6410_s7 + $0xcf0] sm:$0xff]  ;;  %v1961_v55 = vld [vmem:[%s6410_s7 + $0x5e8] sm:$0xff] }
 0x27e   : > { %2269 = vmatprep.subr.mxu0 %v1836_v56  ;;  %2340 = vmatprep.subr.mxu1 %v2060_v57  ;;  %v2185_v56 = vld [vmem:[%s6410_s7 + $0xce8] sm:$0xff]  ;;  %v1955_v57 = vld [vmem:[%s6410_s7 + $0x5b8] sm:$0xff] }
 0x27f   : > { %2270 = vmatpush1.msra.mxu0 %v1835_v58  ;;  %2341 = vmatpush1.msra.mxu1 %v2059_v59  ;;  %v2179_v58 = vld [vmem:[%s6410_s7 + $0xcb8] sm:$0xff]  ;;  %v1954_v59 = vld [vmem:[%s6410_s7 + $0x5b0] sm:$0xff] }
 0x280   : > { %2271 = vmatprep.subr.mxu0 %v1829_v60  ;;  %2342 = vmatprep.subr.mxu1 %v2053_v61  ;;  %v2178_v60 = vld [vmem:[%s6410_s7 + $0xcb0] sm:$0xff]  ;;  %v1948_v61 = vld [vmem:[%s6410_s7 + $0x580] sm:$0xff] }
 0x281   : > { %2272 = vmatpush1.msra.mxu0 %v1828_v62  ;;  %2343 = vmatpush1.msra.mxu1 %v2052_v0  ;;  %v2172_v62 = vld [vmem:[%s6410_s7 + $0xc80] sm:$0xff]  ;;  %v1947_v0 = vld [vmem:[%s6410_s7 + $0x578] sm:$0xff] }
 0x282   : > { %2273 = vmatprep.subr.mxu0 %v1822_v1  ;;  %2344 = vmatprep.subr.mxu1 %v2046_v3  ;;  %v2171_v1 = vld [vmem:[%s6410_s7 + $0xc78] sm:$0xff]  ;;  %v1941_v3 = vld [vmem:[%s6410_s7 + $0x548] sm:$0xff] }
 0x283   : > { %2274 = vmatpush1.msra.mxu0 %v1821_v4  ;;  %2345 = vmatpush1.msra.mxu1 %v2045_v17  ;;  %v2165_v4 = vld [vmem:[%s6410_s7 + $0xc48] sm:$0xff]  ;;  %v1940_v17 = vld [vmem:[%s6410_s7 + $0x540] sm:$0xff] }
 0x284   : > { %2275 = vmatprep.subr.mxu0 %v1815_v5  ;;  %2346 = vmatprep.subr.mxu1 %v2039_v6  ;;  %v2164_v5 = vld [vmem:[%s6410_s7 + $0xc40] sm:$0xff]  ;;  %v1934_v6 = vld [vmem:[%s6410_s7 + $0x510] sm:$0xff] }
 0x285   : > { %2276 = vmatpush1.msra.mxu0 %v1814_v7  ;;  %2347 = vmatpush1.msra.mxu1 %v2038_v8  ;;  %v2158_v7 = vld [vmem:[%s6410_s7 + $0xc10] sm:$0xff]  ;;  %v1933_v8 = vld [vmem:[%s6410_s7 + $0x508] sm:$0xff] }
 0x286   : > { %2277 = vmatprep.subr.mxu0 %v1808_v9  ;;  %2348 = vmatprep.subr.mxu1 %v2032_v11  ;;  %v2157_v9 = vld [vmem:[%s6410_s7 + $0xc08] sm:$0xff]  ;;  %v1927_v11 = vld [vmem:[%s6410_s7 + $0x4d8] sm:$0xff] }
 0x287   : > { %2278 = vmatpush1.msra.mxu0 %v1807_v13  ;;  %2349 = vmatpush1.msra.mxu1 %v2031_v14  ;;  %v2151_v13 = vld [vmem:[%s6410_s7 + $0xbd8] sm:$0xff]  ;;  %v1926_v14 = vld [vmem:[%s6410_s7 + $0x4d0] sm:$0xff] }
 0x288   : > { %2279 = vmatprep.subr.mxu0 %v1801_v15  ;;  %2350 = vmatprep.subr.mxu1 %v2025_v16  ;;  %v2150_v15 = vld [vmem:[%s6410_s7 + $0xbd0] sm:$0xff]  ;;  %v1920_v16 = vld [vmem:[%s6410_s7 + $0x4a0] sm:$0xff] }
 0x289   : > { %2280 = vmatpush1.msra.mxu0 %v1800_v18  ;;  %2351 = vmatpush1.msra.mxu1 %v2024_v19  ;;  %v2144_v18 = vld [vmem:[%s6410_s7 + $0xba0] sm:$0xff]  ;;  %v1919_v19 = vld [vmem:[%s6410_s7 + $0x498] sm:$0xff] }
 0x28a   : > { %2281 = vmatprep.subr.mxu0 %v1794_v20  ;;  %2352 = vmatprep.subr.mxu1 %v2018_v21  ;;  %v2143_v20 = vld [vmem:[%s6410_s7 + $0xb98] sm:$0xff]  ;;  %v1913_v21 = vld [vmem:[%s6410_s7 + $0x468] sm:$0xff] }
 0x28b   : > { %2282 = vmatpush1.msra.mxu0 %v1793_v22  ;;  %2353 = vmatpush1.msra.mxu1 %v2017_v23  ;;  %v2137_v22 = vld [vmem:[%s6410_s7 + $0xb68] sm:$0xff]  ;;  %v1912_v23 = vld [vmem:[%s6410_s7 + $0x460] sm:$0xff] }
 0x28c   : > { %2283 = vmatprep.subr.mxu0 %v1787_v24  ;;  %2354 = vmatprep.subr.mxu1 %v2011_v25  ;;  %v2136_v24 = vld [vmem:[%s6410_s7 + $0xb60] sm:$0xff]  ;;  %v1906_v25 = vld [vmem:[%s6410_s7 + $0x430] sm:$0xff] }
 0x28d   : > { %2284 = vmatpush1.msra.mxu0 %v1786_v26  ;;  %2355 = vmatpush1.msra.mxu1 %v2010_v27  ;;  %v2130_v26 = vld [vmem:[%s6410_s7 + $0xb30] sm:$0xff]  ;;  %v1905_v27 = vld [vmem:[%s6410_s7 + $0x428] sm:$0xff] }
 0x28e   : > { %2285 = vmatprep.subr.mxu0 %v1780_v63  ;;  %2356 = vmatprep.subr.mxu1 %v2004_v28  ;;  %v2129_v63 = vld [vmem:[%s6410_s7 + $0xb28] sm:$0xff]  ;;  %v1899_v28 = vld [vmem:[%s6410_s7 + $0x3f8] sm:$0xff] }
 0x28f   : > { %2286 = vmatpush1.msra.mxu0 %v1779_v2  ;;  %2357 = vmatpush1.msra.mxu1 %v2003_v29  ;;  %v2123_v2 = vld [vmem:[%s6410_s7 + $0xaf8] sm:$0xff]  ;;  %v1898_v29 = vld [vmem:[%s6410_s7 + $0x3f0] sm:$0xff] }
 0x290   : > { %2287 = vmatprep.subr.mxu0 %v1773_v30  ;;  %2358 = vmatprep.subr.mxu1 %v1997_v32  ;;  %v2122_v30 = vld [vmem:[%s6410_s7 + $0xaf0] sm:$0xff]  ;;  %v1892_v32 = vld [vmem:[%s6410_s7 + $0x3c0] sm:$0xff] }
 0x291   : > { %2288 = vmatpush1.msra.mxu0 %v1772_v33  ;;  %2359 = vmatpush1.msra.mxu1 %v1996_v34  ;;  %v2116_v33 = vld [vmem:[%s6410_s7 + $0xac0] sm:$0xff]  ;;  %v1891_v34 = vld [vmem:[%s6410_s7 + $0x3b8] sm:$0xff] }
 0x292   : > { %2289 = vmatprep.subr.mxu0 %v1990_v35  ;;  %2360 = vmatprep.subr.mxu1 %v2214_v36  ;;  %v2115_v35 = vld [vmem:[%s6410_s7 + $0xab8] sm:$0xff]  ;;  %v1885_v36 = vld [vmem:[%s6410_s7 + $0x388] sm:$0xff] }
 0x293   : > { %2290 = vmatpush2.msra.mxu0 %v1989_v37  ;;  %2361 = vmatpush2.msra.mxu1 %v2213_v38  ;;  %v2109_v37 = vld [vmem:[%s6410_s7 + $0xa88] sm:$0xff]  ;;  %v1884_v38 = vld [vmem:[%s6410_s7 + $0x380] sm:$0xff] }
 0x294   : > { %2291 = vmatprep.subr.mxu0 %v1983_v39  ;;  %2362 = vmatprep.subr.mxu1 %v2207_v40  ;;  %v2108_v39 = vld [vmem:[%s6410_s7 + $0xa80] sm:$0xff] }
 0x295   : > { %2292 = vmatpush2.msra.mxu0 %v1982_v41  ;;  %2363 = vmatpush2.msra.mxu1 %v2206_v42  ;;  %v1880_v40 = vld [vmem:[%s6410_s7 + $0x360] sm:$0xff] }
 0x296   : > { %2293 = vmatprep.subr.mxu0 %v1976_v43  ;;  %2364 = vmatprep.subr.mxu1 %v2200_v44  ;;  %v2104_v41 = vld [vmem:[%s6410_s7 + $0xa60] sm:$0xff] }
 0x297   : > { %2294 = vmatpush2.msra.mxu0 %v1975_v45  ;;  %2365 = vmatpush2.msra.mxu1 %v2199_v46  ;;  %v1604_v42 = vld [vmem:[%s6409_s6] sm:$0xf] }
 0x298   : > { %2295 = vmatprep.subr.mxu0 %v1969_v47  ;;  %2366 = vmatprep.subr.mxu1 %v2193_v48  ;;  %v1609_v43 = vrot.slane %v1604_v42, %v4739_v31  ;;  %v1617_v44 = vrot.slane %v1604_v42, %v4751_v53  ;;  %v1613_v45 = vrot.slane %v1604_v42, %v4745_v12 }
 0x299   : > { %2296 = vmatpush2.msra.mxu0 %v1968_v49  ;;  %2367 = vmatpush2.msra.mxu1 %v2192_v50  ;;  %v1621_v46 = vrot.slane %v1604_v42, %v4754_v54  ;;  %v1803_v42 = vld [vmem:[%s6410_s7 + $0xf8] sm:$0xff] }
 0x29a   : > { %2297 = vmatprep.subr.mxu0 %v1962_v51  ;;  %2368 = vmatprep.subr.mxu1 %v2186_v52 }
 0x29b   : > { %2298 = vmatpush2.msra.mxu0 %v1961_v55  ;;  %2369 = vmatpush2.msra.mxu1 %v2185_v56 }
 0x29c   : > { %2299 = vmatprep.subr.mxu0 %v1955_v57  ;;  %2370 = vmatprep.subr.mxu1 %v2179_v58 }
 0x29d   : > { %2300 = vmatpush2.msra.mxu0 %v1954_v59  ;;  %2371 = vmatpush2.msra.mxu1 %v2178_v60 }
 0x29e   : > { %2301 = vmatprep.subr.mxu0 %v1948_v61  ;;  %2372 = vmatprep.subr.mxu1 %v2172_v62  ;;  %v1879_v61 = vld [vmem:[%s6410_s7 + $0x358] sm:$0xff] }
 0x29f   : > { %2302 = vmatpush2.msra.mxu0 %v1947_v0  ;;  %2373 = vmatpush2.msra.mxu1 %v2171_v1  ;;  %v2103_v62 = vld [vmem:[%s6410_s7 + $0xa58] sm:$0xff]  ;;  %v1873_v0 = vld [vmem:[%s6410_s7 + $0x328] sm:$0xff] }
 0x2a0   : > { %2303 = vmatprep.subr.mxu0 %v1941_v3  ;;  %2374 = vmatprep.subr.mxu1 %v2165_v4  ;;  %v2097_v1 = vld [vmem:[%s6410_s7 + $0xa28] sm:$0xff]  ;;  %v1872_v3 = vld [vmem:[%s6410_s7 + $0x320] sm:$0xff] }
 0x2a1   : > { %2304 = vmatpush2.msra.mxu0 %v1940_v17  ;;  %2375 = vmatpush2.msra.mxu1 %v2164_v5  ;;  %v2096_v4 = vld [vmem:[%s6410_s7 + $0xa20] sm:$0xff]  ;;  %v1866_v17 = vld [vmem:[%s6410_s7 + $0x2f0] sm:$0xff] }
 0x2a2   : > { %2305 = vmatprep.subr.mxu0 %v1934_v6  ;;  %2376 = vmatprep.subr.mxu1 %v2158_v7  ;;  %v2090_v5 = vld [vmem:[%s6410_s7 + $0x9f0] sm:$0xff]  ;;  %v1865_v6 = vld [vmem:[%s6410_s7 + $0x2e8] sm:$0xff] }
 0x2a3   : > { %2306 = vmatpush2.msra.mxu0 %v1933_v8  ;;  %2377 = vmatpush2.msra.mxu1 %v2157_v9  ;;  %v2089_v7 = vld [vmem:[%s6410_s7 + $0x9e8] sm:$0xff]  ;;  %v1859_v8 = vld [vmem:[%s6410_s7 + $0x2b8] sm:$0xff] }
 0x2a4   : > { %2307 = vmatprep.subr.mxu0 %v1927_v11  ;;  %2378 = vmatprep.subr.mxu1 %v2151_v13  ;;  %v2083_v9 = vld [vmem:[%s6410_s7 + $0x9b8] sm:$0xff]  ;;  %v1858_v11 = vld [vmem:[%s6410_s7 + $0x2b0] sm:$0xff] }
 0x2a5   : > { %2308 = vmatpush2.msra.mxu0 %v1926_v14  ;;  %2379 = vmatpush2.msra.mxu1 %v2150_v15  ;;  %v2082_v13 = vld [vmem:[%s6410_s7 + $0x9b0] sm:$0xff]  ;;  %v1852_v14 = vld [vmem:[%s6410_s7 + $0x280] sm:$0xff] }
 0x2a6   : > { %2309 = vmatprep.subr.mxu0 %v1920_v16  ;;  %2380 = vmatprep.subr.mxu1 %v2144_v18  ;;  %v2076_v15 = vld [vmem:[%s6410_s7 + $0x980] sm:$0xff]  ;;  %v1851_v16 = vld [vmem:[%s6410_s7 + $0x278] sm:$0xff] }
 0x2a7   : > { %2310 = vmatpush2.msra.mxu0 %v1919_v19  ;;  %2381 = vmatpush2.msra.mxu1 %v2143_v20  ;;  %v2075_v18 = vld [vmem:[%s6410_s7 + $0x978] sm:$0xff]  ;;  %v1845_v19 = vld [vmem:[%s6410_s7 + $0x248] sm:$0xff] }
 0x2a8   : > { %2311 = vmatprep.subr.mxu0 %v1913_v21  ;;  %2382 = vmatprep.subr.mxu1 %v2137_v22  ;;  %v2069_v20 = vld [vmem:[%s6410_s7 + $0x948] sm:$0xff]  ;;  %v1844_v21 = vld [vmem:[%s6410_s7 + $0x240] sm:$0xff] }
 0x2a9   : > { %2312 = vmatpush2.msra.mxu0 %v1912_v23  ;;  %2383 = vmatpush2.msra.mxu1 %v2136_v24  ;;  %v2068_v22 = vld [vmem:[%s6410_s7 + $0x940] sm:$0xff]  ;;  %v1838_v23 = vld [vmem:[%s6410_s7 + $0x210] sm:$0xff] }
 0x2aa   : > { %2313 = vmatprep.subr.mxu0 %v1906_v25  ;;  %2384 = vmatprep.subr.mxu1 %v2130_v26  ;;  %v2062_v24 = vld [vmem:[%s6410_s7 + $0x910] sm:$0xff]  ;;  %v1837_v25 = vld [vmem:[%s6410_s7 + $0x208] sm:$0xff] }
 0x2ab   : > { %2314 = vmatpush2.msra.mxu0 %v1905_v27  ;;  %2385 = vmatpush2.msra.mxu1 %v2129_v63  ;;  %v2061_v26 = vld [vmem:[%s6410_s7 + $0x908] sm:$0xff]  ;;  %v1831_v27 = vld [vmem:[%s6410_s7 + $0x1d8] sm:$0xff] }
 0x2ac   : > { %2315 = vmatprep.subr.mxu0 %v1899_v28  ;;  %2386 = vmatprep.subr.mxu1 %v2123_v2  ;;  %v2055_v63 = vld [vmem:[%s6410_s7 + $0x8d8] sm:$0xff]  ;;  %v1830_v28 = vld [vmem:[%s6410_s7 + $0x1d0] sm:$0xff] }
 0x2ad   : > { %2316 = vmatpush2.msra.mxu0 %v1898_v29  ;;  %2387 = vmatpush2.msra.mxu1 %v2122_v30  ;;  %v2054_v2 = vld [vmem:[%s6410_s7 + $0x8d0] sm:$0xff]  ;;  %v1824_v29 = vld [vmem:[%s6410_s7 + $0x1a0] sm:$0xff] }
 0x2ae   : > { %2317 = vmatprep.subr.mxu0 %v1892_v32  ;;  %2388 = vmatprep.subr.mxu1 %v2116_v33  ;;  %v2048_v30 = vld [vmem:[%s6410_s7 + $0x8a0] sm:$0xff]  ;;  %v1823_v32 = vld [vmem:[%s6410_s7 + $0x198] sm:$0xff] }
 0x2af   : > { %2318 = vmatpush2.msra.mxu0 %v1891_v34  ;;  %2389 = vmatpush2.msra.mxu1 %v2115_v35  ;;  %v2047_v33 = vld [vmem:[%s6410_s7 + $0x898] sm:$0xff]  ;;  %v1817_v34 = vld [vmem:[%s6410_s7 + $0x168] sm:$0xff] }
 0x2b0   : > { %2319 = vmatprep.subr.mxu0 %v1885_v36  ;;  %2390 = vmatprep.subr.mxu1 %v2109_v37  ;;  %v2041_v35 = vld [vmem:[%s6410_s7 + $0x868] sm:$0xff]  ;;  %v1816_v36 = vld [vmem:[%s6410_s7 + $0x160] sm:$0xff] }
 0x2b1   : > { %2320 = vmatpush2.msra.mxu0 %v1884_v38  ;;  %2391 = vmatpush2.msra.mxu1 %v2108_v39  ;;  %v2040_v37 = vld [vmem:[%s6410_s7 + $0x860] sm:$0xff]  ;;  %v1810_v38 = vld [vmem:[%s6410_s7 + $0x130] sm:$0xff] }
 0x2b2   : > { %2399 = vmatprep.subr.mxu0 %v1880_v40  ;;  %2470 = vmatprep.subr.mxu1 %v2104_v41  ;;  %v2034_v39 = vld [vmem:[%s6410_s7 + $0x830] sm:$0xff]  ;;  %v1809_v40 = vld [vmem:[%s6410_s7 + $0x128] sm:$0xff] }
 0x2b3   : > { %v2033_v41 = vld [vmem:[%s6410_s7 + $0x828] sm:$0xff] }
 0x332   : > { %v1692_v47 = vpop.f32.mrf.mxu0  ;;  %v1763_v48 = vpop.f32.mrf.mxu1 }
 0x333   : > { %v1693_v49 = vadd.f32 %v1692_v47, %v1609_v43  ;;  %v1764_v50 = vadd.f32 %v1763_v48, %v1617_v44  ;;  %v2027_v43 = vld [vmem:[%s6410_s7 + $0x7f8] sm:$0xff]  ;;  %v1802_v44 = vld [vmem:[%s6410_s7 + $0xf0] sm:$0xff]  ;;  %v2020_v47 = vld [vmem:[%s6410_s7 + $0x7c0] sm:$0xff] }
 0x334   : > { %v1694_v51 = vpop.f32.mrf.mxu0  ;;  %v1765_v52 = vpop.f32.mrf.mxu1  ;;  %v1795_v48 = vld [vmem:[%s6410_s7 + $0xb8] sm:$0xff] }
 0x335   : > { %v1695_v55 = vadd.f32 %v1694_v51, %v1613_v45  ;;  %v1766_v56 = vadd.f32 %v1765_v52, %v1621_v46  ;;  %v5355_v59 = vmax.f32 %v1693_v49, 0.0  ;;  %v5357_v60 = vmax.f32 %v1764_v50, 0.0  ;;  %v2026_v45 = vld [vmem:[%s6410_s7 + $0x7f0] sm:$0xff]  ;;  %v1796_v46 = vld [vmem:[%s6410_s7 + $0xc0] sm:$0xff]  ;;  %v2019_v49 = vld [vmem:[%s6410_s7 + $0x7b8] sm:$0xff] }
 0x336   : > { %v1789_v50 = vld [vmem:[%s6410_s7 + $0x88] sm:$0xff]  ;;  %v1788_v52 = vld [vmem:[%s6410_s7 + $0x80] sm:$0xff] }
 0x337   : > { %v5351_v57 = vmax.f32 %v1695_v55, 0.0  ;;  %v5353_v58 = vmax.f32 %v1766_v56, 0.0  ;;  %v2013_v51 = vld [vmem:[%s6410_s7 + $0x788] sm:$0xff]  ;;  %v2012_v55 = vld [vmem:[%s6410_s7 + $0x780] sm:$0xff]  ;;  %v1782_v56 = vld [vmem:[%s6410_s7 + $0x50] sm:$0xff] }
 0x339   : > { %2321 = vmatprep.mubr.f32.mxu0 %v5351_v57  ;;  %2392 = vmatprep.mubr.f32.mxu1 %v5353_v58 }
 0x33a   : > { %2322 = vmatmul.mubr.f32.vlgmr.msra.gmra.mxu0 %v5355_v59  ;;  %2393 = vmatmul.mubr.f32.vlgmr.msra.gmra.mxu1 %v5357_v60 }
 0x33b   : > { %2400 = vmatpush1.msra.mxu0 %v1879_v61  ;;  %2471 = vmatpush1.msra.mxu1 %v2103_v62  ;;  %v2006_v61 = vld [vmem:[%s6410_s7 + $0x750] sm:$0xff]  ;;  %v1781_v62 = vld [vmem:[%s6410_s7 + $0x48] sm:$0xff] }
 0x33c   : > { %2401 = vmatprep.subr.mxu0 %v1873_v0  ;;  %2463 = vmatprep.mubr.f32.mxu0 %v5351_v57  ;;  %v2005_v0 = vld [vmem:[%s6410_s7 + $0x748] sm:$0xff] }
 0x33d   : > { %2472 = vmatprep.subr.mxu1 %v2097_v1  ;;  %2534 = vmatprep.mubr.f32.mxu1 %v5353_v58  ;;  %v1775_v1 = vld [vmem:[%s6410_s7 + $0x18] sm:$0xff] }
 0x33e   : > { %2402 = vmatpush1.msra.mxu0 %v1872_v3  ;;  %2473 = vmatpush1.msra.mxu1 %v2096_v4  ;;  %v1999_v3 = vld [vmem:[%s6410_s7 + $0x718] sm:$0xff]  ;;  %v1774_v4 = vld [vmem:[%s6410_s7 + $0x10] sm:$0xff] }
 0x33f   : > { %2403 = vmatprep.subr.mxu0 %v1866_v17  ;;  %2474 = vmatprep.subr.mxu1 %v2090_v5  ;;  %v1998_v17 = vld [vmem:[%s6410_s7 + $0x710] sm:$0xff]  ;;  %v1992_v5 = vld [vmem:[%s6410_s7 + $0x6e0] sm:$0xff] }
 0x340   : > { %2404 = vmatpush1.msra.mxu0 %v1865_v6  ;;  %2475 = vmatpush1.msra.mxu1 %v2089_v7  ;;  %v2216_v6 = vld [vmem:[%s6410_s7 + $0xde0] sm:$0xff]  ;;  %v1991_v7 = vld [vmem:[%s6410_s7 + $0x6d8] sm:$0xff] }
 0x341   : > { %2405 = vmatprep.subr.mxu0 %v1859_v8  ;;  %2476 = vmatprep.subr.mxu1 %v2083_v9  ;;  %v2215_v8 = vld [vmem:[%s6410_s7 + $0xdd8] sm:$0xff]  ;;  %v1985_v9 = vld [vmem:[%s6410_s7 + $0x6a8] sm:$0xff] }
 0x342   : > { %2406 = vmatpush1.msra.mxu0 %v1858_v11  ;;  %2477 = vmatpush1.msra.mxu1 %v2082_v13  ;;  %v2209_v11 = vld [vmem:[%s6410_s7 + $0xda8] sm:$0xff]  ;;  %v1984_v13 = vld [vmem:[%s6410_s7 + $0x6a0] sm:$0xff] }
 0x343   : > { %2407 = vmatprep.subr.mxu0 %v1852_v14  ;;  %2478 = vmatprep.subr.mxu1 %v2076_v15  ;;  %v2208_v14 = vld [vmem:[%s6410_s7 + $0xda0] sm:$0xff]  ;;  %v1978_v15 = vld [vmem:[%s6410_s7 + $0x670] sm:$0xff] }
 0x344   : > { %2408 = vmatpush1.msra.mxu0 %v1851_v16  ;;  %2479 = vmatpush1.msra.mxu1 %v2075_v18  ;;  %v2202_v16 = vld [vmem:[%s6410_s7 + $0xd70] sm:$0xff]  ;;  %v1977_v18 = vld [vmem:[%s6410_s7 + $0x668] sm:$0xff] }
 0x345   : > { %2409 = vmatprep.subr.mxu0 %v1845_v19  ;;  %2480 = vmatprep.subr.mxu1 %v2069_v20  ;;  %v2201_v19 = vld [vmem:[%s6410_s7 + $0xd68] sm:$0xff]  ;;  %v1971_v20 = vld [vmem:[%s6410_s7 + $0x638] sm:$0xff] }
 0x346   : > { %2410 = vmatpush1.msra.mxu0 %v1844_v21  ;;  %2481 = vmatpush1.msra.mxu1 %v2068_v22  ;;  %v2195_v21 = vld [vmem:[%s6410_s7 + $0xd38] sm:$0xff]  ;;  %v1970_v22 = vld [vmem:[%s6410_s7 + $0x630] sm:$0xff] }
 0x347   : > { %2411 = vmatprep.subr.mxu0 %v1838_v23  ;;  %2482 = vmatprep.subr.mxu1 %v2062_v24  ;;  %v2194_v23 = vld [vmem:[%s6410_s7 + $0xd30] sm:$0xff]  ;;  %v1964_v24 = vld [vmem:[%s6410_s7 + $0x600] sm:$0xff] }
 0x348   : > { %2412 = vmatpush1.msra.mxu0 %v1837_v25  ;;  %2483 = vmatpush1.msra.mxu1 %v2061_v26  ;;  %v2188_v25 = vld [vmem:[%s6410_s7 + $0xd00] sm:$0xff]  ;;  %v1963_v26 = vld [vmem:[%s6410_s7 + $0x5f8] sm:$0xff] }
 0x349   : > { %2413 = vmatprep.subr.mxu0 %v1831_v27  ;;  %2484 = vmatprep.subr.mxu1 %v2055_v63  ;;  %v2187_v27 = vld [vmem:[%s6410_s7 + $0xcf8] sm:$0xff]  ;;  %v1957_v63 = vld [vmem:[%s6410_s7 + $0x5c8] sm:$0xff] }
 0x34a   : > { %2414 = vmatpush1.msra.mxu0 %v1830_v28  ;;  %2485 = vmatpush1.msra.mxu1 %v2054_v2  ;;  %v2181_v28 = vld [vmem:[%s6410_s7 + $0xcc8] sm:$0xff]  ;;  %v1956_v2 = vld [vmem:[%s6410_s7 + $0x5c0] sm:$0xff] }
 0x34b   : > { %2415 = vmatprep.subr.mxu0 %v1824_v29  ;;  %2486 = vmatprep.subr.mxu1 %v2048_v30  ;;  %v2180_v29 = vld [vmem:[%s6410_s7 + $0xcc0] sm:$0xff]  ;;  %v1950_v30 = vld [vmem:[%s6410_s7 + $0x590] sm:$0xff] }
 0x34c   : > { %2416 = vmatpush1.msra.mxu0 %v1823_v32  ;;  %2487 = vmatpush1.msra.mxu1 %v2047_v33  ;;  %v2174_v32 = vld [vmem:[%s6410_s7 + $0xc90] sm:$0xff]  ;;  %v1949_v33 = vld [vmem:[%s6410_s7 + $0x588] sm:$0xff] }
 0x34d   : > { %2417 = vmatprep.subr.mxu0 %v1817_v34  ;;  %2488 = vmatprep.subr.mxu1 %v2041_v35  ;;  %v2173_v34 = vld [vmem:[%s6410_s7 + $0xc88] sm:$0xff]  ;;  %v1943_v35 = vld [vmem:[%s6410_s7 + $0x558] sm:$0xff] }
 0x34e   : > { %2418 = vmatpush1.msra.mxu0 %v1816_v36  ;;  %2489 = vmatpush1.msra.mxu1 %v2040_v37  ;;  %v2167_v36 = vld [vmem:[%s6410_s7 + $0xc58] sm:$0xff]  ;;  %v1942_v37 = vld [vmem:[%s6410_s7 + $0x550] sm:$0xff] }
 0x34f   : > { %2419 = vmatprep.subr.mxu0 %v1810_v38  ;;  %2490 = vmatprep.subr.mxu1 %v2034_v39  ;;  %v2166_v38 = vld [vmem:[%s6410_s7 + $0xc50] sm:$0xff]  ;;  %v1936_v39 = vld [vmem:[%s6410_s7 + $0x520] sm:$0xff] }
 0x350   : > { %2420 = vmatpush1.msra.mxu0 %v1809_v40  ;;  %2491 = vmatpush1.msra.mxu1 %v2033_v41  ;;  %v2160_v40 = vld [vmem:[%s6410_s7 + $0xc20] sm:$0xff]  ;;  %v1935_v41 = vld [vmem:[%s6410_s7 + $0x518] sm:$0xff] }
 0x351   : > { %2421 = vmatprep.subr.mxu0 %v1803_v42  ;;  %2492 = vmatprep.subr.mxu1 %v2027_v43  ;;  %v2159_v42 = vld [vmem:[%s6410_s7 + $0xc18] sm:$0xff]  ;;  %v1929_v43 = vld [vmem:[%s6410_s7 + $0x4e8] sm:$0xff] }
 0x352   : > { %2422 = vmatpush1.msra.mxu0 %v1802_v44  ;;  %2493 = vmatpush1.msra.mxu1 %v2026_v45  ;;  %v2153_v44 = vld [vmem:[%s6410_s7 + $0xbe8] sm:$0xff]  ;;  %v1928_v45 = vld [vmem:[%s6410_s7 + $0x4e0] sm:$0xff] }
 0x353   : > { %2423 = vmatprep.subr.mxu0 %v1796_v46  ;;  %2494 = vmatprep.subr.mxu1 %v2020_v47  ;;  %v2152_v46 = vld [vmem:[%s6410_s7 + $0xbe0] sm:$0xff]  ;;  %v1922_v47 = vld [vmem:[%s6410_s7 + $0x4b0] sm:$0xff] }
 0x354   : > { %2424 = vmatpush1.msra.mxu0 %v1795_v48  ;;  %2495 = vmatpush1.msra.mxu1 %v2019_v49  ;;  %v2146_v48 = vld [vmem:[%s6410_s7 + $0xbb0] sm:$0xff]  ;;  %v1921_v49 = vld [vmem:[%s6410_s7 + $0x4a8] sm:$0xff] }
 0x355   : > { %2425 = vmatprep.subr.mxu0 %v1789_v50  ;;  %2496 = vmatprep.subr.mxu1 %v2013_v51  ;;  %v2145_v50 = vld [vmem:[%s6410_s7 + $0xba8] sm:$0xff]  ;;  %v1915_v51 = vld [vmem:[%s6410_s7 + $0x478] sm:$0xff] }
 0x356   : > { %2426 = vmatpush1.msra.mxu0 %v1788_v52  ;;  %2497 = vmatpush1.msra.mxu1 %v2012_v55  ;;  %v2139_v52 = vld [vmem:[%s6410_s7 + $0xb78] sm:$0xff]  ;;  %v1914_v55 = vld [vmem:[%s6410_s7 + $0x470] sm:$0xff] }
 0x357   : > { %2427 = vmatprep.subr.mxu0 %v1782_v56  ;;  %2498 = vmatprep.subr.mxu1 %v2006_v61  ;;  %v2138_v56 = vld [vmem:[%s6410_s7 + $0xb70] sm:$0xff]  ;;  %v1908_v61 = vld [vmem:[%s6410_s7 + $0x440] sm:$0xff] }
 0x358   : > { %2428 = vmatpush1.msra.mxu0 %v1781_v62  ;;  %2499 = vmatpush1.msra.mxu1 %v2005_v0  ;;  %v2132_v62 = vld [vmem:[%s6410_s7 + $0xb40] sm:$0xff]  ;;  %v1907_v0 = vld [vmem:[%s6410_s7 + $0x438] sm:$0xff] }
 0x359   : > { %2429 = vmatprep.subr.mxu0 %v1775_v1  ;;  %2500 = vmatprep.subr.mxu1 %v1999_v3  ;;  %v2131_v1 = vld [vmem:[%s6410_s7 + $0xb38] sm:$0xff]  ;;  %v1901_v3 = vld [vmem:[%s6410_s7 + $0x408] sm:$0xff] }
 0x35a   : > { %2430 = vmatpush1.msra.mxu0 %v1774_v4  ;;  %2501 = vmatpush1.msra.mxu1 %v1998_v17  ;;  %v2125_v4 = vld [vmem:[%s6410_s7 + $0xb08] sm:$0xff]  ;;  %v1900_v17 = vld [vmem:[%s6410_s7 + $0x400] sm:$0xff] }
 0x35b   : > { %2431 = vmatprep.subr.mxu0 %v1992_v5  ;;  %2502 = vmatprep.subr.mxu1 %v2216_v6  ;;  %v2124_v5 = vld [vmem:[%s6410_s7 + $0xb00] sm:$0xff]  ;;  %v1894_v6 = vld [vmem:[%s6410_s7 + $0x3d0] sm:$0xff] }
 0x35c   : > { %2432 = vmatpush2.msra.mxu0 %v1991_v7  ;;  %2503 = vmatpush2.msra.mxu1 %v2215_v8  ;;  %v2118_v7 = vld [vmem:[%s6410_s7 + $0xad0] sm:$0xff]  ;;  %v1893_v8 = vld [vmem:[%s6410_s7 + $0x3c8] sm:$0xff] }
 0x35d   : > { %2433 = vmatprep.subr.mxu0 %v1985_v9  ;;  %2504 = vmatprep.subr.mxu1 %v2209_v11  ;;  %v2117_v9 = vld [vmem:[%s6410_s7 + $0xac8] sm:$0xff]  ;;  %v1887_v11 = vld [vmem:[%s6410_s7 + $0x398] sm:$0xff] }
 0x35e   : > { %2434 = vmatpush2.msra.mxu0 %v1984_v13  ;;  %2505 = vmatpush2.msra.mxu1 %v2208_v14  ;;  %v2111_v13 = vld [vmem:[%s6410_s7 + $0xa98] sm:$0xff]  ;;  %v1886_v14 = vld [vmem:[%s6410_s7 + $0x390] sm:$0xff] }
 0x35f   : > { %2435 = vmatprep.subr.mxu0 %v1978_v15  ;;  %2506 = vmatprep.subr.mxu1 %v2202_v16  ;;  %v2110_v15 = vld [vmem:[%s6410_s7 + $0xa90] sm:$0xff] }
 0x360   : > { %2436 = vmatpush2.msra.mxu0 %v1977_v18  ;;  %2507 = vmatpush2.msra.mxu1 %v2201_v19  ;;  %v1882_v16 = vld [vmem:[%s6410_s7 + $0x370] sm:$0xff]  ;;  %v1881_v19 = vld [vmem:[%s6410_s7 + $0x368] sm:$0xff] }
 0x361   : > { %2437 = vmatprep.subr.mxu0 %v1971_v20  ;;  %2508 = vmatprep.subr.mxu1 %v2195_v21  ;;  %v2106_v18 = vld [vmem:[%s6410_s7 + $0xa70] sm:$0xff]  ;;  %v2105_v20 = vld [vmem:[%s6410_s7 + $0xa68] sm:$0xff]  ;;  %v1875_v21 = vld [vmem:[%s6410_s7 + $0x338] sm:$0xff] }
 0x362   : > { %2438 = vmatpush2.msra.mxu0 %v1970_v22  ;;  %2509 = vmatpush2.msra.mxu1 %v2194_v23  ;;  %v2099_v22 = vld [vmem:[%s6410_s7 + $0xa38] sm:$0xff]  ;;  %v1874_v23 = vld [vmem:[%s6410_s7 + $0x330] sm:$0xff] }
 0x363   : > { %2439 = vmatprep.subr.mxu0 %v1964_v24  ;;  %2510 = vmatprep.subr.mxu1 %v2188_v25  ;;  %v2098_v24 = vld [vmem:[%s6410_s7 + $0xa30] sm:$0xff]  ;;  %v1868_v25 = vld [vmem:[%s6410_s7 + $0x300] sm:$0xff] }
 0x364   : > { %2440 = vmatpush2.msra.mxu0 %v1963_v26  ;;  %2511 = vmatpush2.msra.mxu1 %v2187_v27  ;;  %v2092_v26 = vld [vmem:[%s6410_s7 + $0xa00] sm:$0xff]  ;;  %v1867_v27 = vld [vmem:[%s6410_s7 + $0x2f8] sm:$0xff] }
 0x365   : > { %2441 = vmatprep.subr.mxu0 %v1957_v63  ;;  %2512 = vmatprep.subr.mxu1 %v2181_v28  ;;  %v2091_v63 = vld [vmem:[%s6410_s7 + $0x9f8] sm:$0xff]  ;;  %v1861_v28 = vld [vmem:[%s6410_s7 + $0x2c8] sm:$0xff] }
 0x366   : > { %2442 = vmatpush2.msra.mxu0 %v1956_v2  ;;  %2513 = vmatpush2.msra.mxu1 %v2180_v29  ;;  %v2085_v2 = vld [vmem:[%s6410_s7 + $0x9c8] sm:$0xff]  ;;  %v1860_v29 = vld [vmem:[%s6410_s7 + $0x2c0] sm:$0xff] }
 0x367   : > { %2443 = vmatprep.subr.mxu0 %v1950_v30  ;;  %2514 = vmatprep.subr.mxu1 %v2174_v32  ;;  %v2084_v30 = vld [vmem:[%s6410_s7 + $0x9c0] sm:$0xff]  ;;  %v1854_v32 = vld [vmem:[%s6410_s7 + $0x290] sm:$0xff] }
 0x368   : > { %2444 = vmatpush2.msra.mxu0 %v1949_v33  ;;  %2515 = vmatpush2.msra.mxu1 %v2173_v34  ;;  %v2078_v33 = vld [vmem:[%s6410_s7 + $0x990] sm:$0xff]  ;;  %v1853_v34 = vld [vmem:[%s6410_s7 + $0x288] sm:$0xff] }
 0x369   : > { %2445 = vmatprep.subr.mxu0 %v1943_v35  ;;  %2516 = vmatprep.subr.mxu1 %v2167_v36  ;;  %v2077_v35 = vld [vmem:[%s6410_s7 + $0x988] sm:$0xff]  ;;  %v1847_v36 = vld [vmem:[%s6410_s7 + $0x258] sm:$0xff] }
 0x36a   : > { %2446 = vmatpush2.msra.mxu0 %v1942_v37  ;;  %2517 = vmatpush2.msra.mxu1 %v2166_v38  ;;  %v2071_v37 = vld [vmem:[%s6410_s7 + $0x958] sm:$0xff]  ;;  %v1846_v38 = vld [vmem:[%s6410_s7 + $0x250] sm:$0xff] }
 0x36b   : > { %2447 = vmatprep.subr.mxu0 %v1936_v39  ;;  %2518 = vmatprep.subr.mxu1 %v2160_v40  ;;  %v2070_v39 = vld [vmem:[%s6410_s7 + $0x950] sm:$0xff]  ;;  %v1840_v40 = vld [vmem:[%s6410_s7 + $0x220] sm:$0xff] }
 0x36c   : > { %2448 = vmatpush2.msra.mxu0 %v1935_v41  ;;  %2519 = vmatpush2.msra.mxu1 %v2159_v42  ;;  %v2064_v41 = vld [vmem:[%s6410_s7 + $0x920] sm:$0xff]  ;;  %v1839_v42 = vld [vmem:[%s6410_s7 + $0x218] sm:$0xff] }
 0x36d   : > { %2449 = vmatprep.subr.mxu0 %v1929_v43  ;;  %2520 = vmatprep.subr.mxu1 %v2153_v44  ;;  %v2063_v43 = vld [vmem:[%s6410_s7 + $0x918] sm:$0xff]  ;;  %v1833_v44 = vld [vmem:[%s6410_s7 + $0x1e8] sm:$0xff] }
 0x36e   : > { %2450 = vmatpush2.msra.mxu0 %v1928_v45  ;;  %2521 = vmatpush2.msra.mxu1 %v2152_v46  ;;  %v2057_v45 = vld [vmem:[%s6410_s7 + $0x8e8] sm:$0xff]  ;;  %v1832_v46 = vld [vmem:[%s6410_s7 + $0x1e0] sm:$0xff] }
 0x36f   : > { %2451 = vmatprep.subr.mxu0 %v1922_v47  ;;  %2522 = vmatprep.subr.mxu1 %v2146_v48  ;;  %v2056_v47 = vld [vmem:[%s6410_s7 + $0x8e0] sm:$0xff]  ;;  %v1826_v48 = vld [vmem:[%s6410_s7 + $0x1b0] sm:$0xff] }
 0x370   : > { %2452 = vmatpush2.msra.mxu0 %v1921_v49  ;;  %2523 = vmatpush2.msra.mxu1 %v2145_v50  ;;  %v2050_v49 = vld [vmem:[%s6410_s7 + $0x8b0] sm:$0xff]  ;;  %v1825_v50 = vld [vmem:[%s6410_s7 + $0x1a8] sm:$0xff] }
 0x371   : > { %2453 = vmatprep.subr.mxu0 %v1915_v51  ;;  %2524 = vmatprep.subr.mxu1 %v2139_v52  ;;  %v2049_v51 = vld [vmem:[%s6410_s7 + $0x8a8] sm:$0xff]  ;;  %v1819_v52 = vld [vmem:[%s6410_s7 + $0x178] sm:$0xff] }
 0x372   : > { %2454 = vmatpush2.msra.mxu0 %v1914_v55  ;;  %2525 = vmatpush2.msra.mxu1 %v2138_v56  ;;  %v2043_v55 = vld [vmem:[%s6410_s7 + $0x878] sm:$0xff]  ;;  %v1818_v56 = vld [vmem:[%s6410_s7 + $0x170] sm:$0xff] }
 0x373   : > { %2455 = vmatprep.subr.mxu0 %v1908_v61  ;;  %2526 = vmatprep.subr.mxu1 %v2132_v62  ;;  %v2042_v61 = vld [vmem:[%s6410_s7 + $0x870] sm:$0xff]  ;;  %v1812_v62 = vld [vmem:[%s6410_s7 + $0x140] sm:$0xff] }
 0x374   : > { %2456 = vmatpush2.msra.mxu0 %v1907_v0  ;;  %2527 = vmatpush2.msra.mxu1 %v2131_v1  ;;  %v2036_v0 = vld [vmem:[%s6410_s7 + $0x840] sm:$0xff]  ;;  %v1811_v1 = vld [vmem:[%s6410_s7 + $0x138] sm:$0xff] }
 0x375   : > { %2457 = vmatprep.subr.mxu0 %v1901_v3  ;;  %2528 = vmatprep.subr.mxu1 %v2125_v4  ;;  %v2035_v3 = vld [vmem:[%s6410_s7 + $0x838] sm:$0xff]  ;;  %v1805_v4 = vld [vmem:[%s6410_s7 + $0x108] sm:$0xff] }
 0x376   : > { %2458 = vmatpush2.msra.mxu0 %v1900_v17  ;;  %2529 = vmatpush2.msra.mxu1 %v2124_v5  ;;  %v2029_v17 = vld [vmem:[%s6410_s7 + $0x808] sm:$0xff]  ;;  %v1804_v5 = vld [vmem:[%s6410_s7 + $0x100] sm:$0xff] }
 0x377   : > { %2459 = vmatprep.subr.mxu0 %v1894_v6  ;;  %2530 = vmatprep.subr.mxu1 %v2118_v7  ;;  %v2028_v6 = vld [vmem:[%s6410_s7 + $0x800] sm:$0xff]  ;;  %v1798_v7 = vld [vmem:[%s6410_s7 + $0xd0] sm:$0xff] }
 0x378   : > { %2460 = vmatpush2.msra.mxu0 %v1893_v8  ;;  %2531 = vmatpush2.msra.mxu1 %v2117_v9  ;;  %v2022_v8 = vld [vmem:[%s6410_s7 + $0x7d0] sm:$0xff]  ;;  %v1797_v9 = vld [vmem:[%s6410_s7 + $0xc8] sm:$0xff] }
 0x379   : > { %2461 = vmatprep.subr.mxu0 %v1887_v11  ;;  %2532 = vmatprep.subr.mxu1 %v2111_v13  ;;  %v2021_v11 = vld [vmem:[%s6410_s7 + $0x7c8] sm:$0xff]  ;;  %v1791_v13 = vld [vmem:[%s6410_s7 + $0x98] sm:$0xff] }
 0x37a   : > { %2462 = vmatpush2.msra.mxu0 %v1886_v14  ;;  %2533 = vmatpush2.msra.mxu1 %v2110_v15  ;;  %v2015_v14 = vld [vmem:[%s6410_s7 + $0x798] sm:$0xff]  ;;  %v1790_v15 = vld [vmem:[%s6410_s7 + $0x90] sm:$0xff] }
 0x37b   : > { %2464 = vmatmul.mubr.f32.vlgmr.msra.gmra.mxu0 %v5355_v59  ;;  %2535 = vmatmul.mubr.f32.vlgmr.msra.gmra.mxu1 %v5357_v60 }
 0x37c   : > { %2541 = vmatprep.subr.mxu0 %v1882_v16  ;;  %2612 = vmatprep.subr.mxu1 %v2106_v18  ;;  %v2014_v16 = vld [vmem:[%s6410_s7 + $0x790] sm:$0xff]  ;;  %v1784_v18 = vld [vmem:[%s6410_s7 + $0x60] sm:$0xff] }
 0x37d   : > { %2542 = vmatpush1.msra.mxu0 %v1881_v19  ;;  %2605 = vmatprep.mubr.f32.mxu0 %v5351_v57  ;;  %v2008_v19 = vld [vmem:[%s6410_s7 + $0x760] sm:$0xff] }
 0x37e   : > { %2613 = vmatpush1.msra.mxu1 %v2105_v20  ;;  %2676 = vmatprep.mubr.f32.mxu1 %v5353_v58  ;;  %v1783_v20 = vld [vmem:[%s6410_s7 + $0x58] sm:$0xff] }
 0x37f   : > { %2543 = vmatprep.subr.mxu0 %v1875_v21  ;;  %2614 = vmatprep.subr.mxu1 %v2099_v22  ;;  %v2007_v21 = vld [vmem:[%s6410_s7 + $0x758] sm:$0xff]  ;;  %v1777_v22 = vld [vmem:[%s6410_s7 + $0x28] sm:$0xff] }
 0x380   : > { %2544 = vmatpush1.msra.mxu0 %v1874_v23  ;;  %2615 = vmatpush1.msra.mxu1 %v2098_v24  ;;  %v2001_v23 = vld [vmem:[%s6410_s7 + $0x728] sm:$0xff]  ;;  %v1776_v24 = vld [vmem:[%s6410_s7 + $0x20] sm:$0xff] }
 0x381   : > { %2545 = vmatprep.subr.mxu0 %v1868_v25  ;;  %2616 = vmatprep.subr.mxu1 %v2092_v26  ;;  %v2000_v25 = vld [vmem:[%s6410_s7 + $0x720] sm:$0xff]  ;;  %v1994_v26 = vld [vmem:[%s6410_s7 + $0x6f0] sm:$0xff] }
 0x382   : > { %2546 = vmatpush1.msra.mxu0 %v1867_v27  ;;  %2617 = vmatpush1.msra.mxu1 %v2091_v63  ;;  %v2218_v27 = vld [vmem:[%s6410_s7 + $0xdf0] sm:$0xff]  ;;  %v1993_v63 = vld [vmem:[%s6410_s7 + $0x6e8] sm:$0xff] }
 0x383   : > { %2547 = vmatprep.subr.mxu0 %v1861_v28  ;;  %2618 = vmatprep.subr.mxu1 %v2085_v2  ;;  %v2217_v28 = vld [vmem:[%s6410_s7 + $0xde8] sm:$0xff]  ;;  %v1987_v2 = vld [vmem:[%s6410_s7 + $0x6b8] sm:$0xff] }
 0x384   : > { %2548 = vmatpush1.msra.mxu0 %v1860_v29  ;;  %2619 = vmatpush1.msra.mxu1 %v2084_v30  ;;  %v2211_v29 = vld [vmem:[%s6410_s7 + $0xdb8] sm:$0xff]  ;;  %v1986_v30 = vld [vmem:[%s6410_s7 + $0x6b0] sm:$0xff] }
 0x385   : > { %2549 = vmatprep.subr.mxu0 %v1854_v32  ;;  %2620 = vmatprep.subr.mxu1 %v2078_v33  ;;  %v2210_v32 = vld [vmem:[%s6410_s7 + $0xdb0] sm:$0xff]  ;;  %v1980_v33 = vld [vmem:[%s6410_s7 + $0x680] sm:$0xff] }
 0x386   : > { %2550 = vmatpush1.msra.mxu0 %v1853_v34  ;;  %2621 = vmatpush1.msra.mxu1 %v2077_v35  ;;  %v2204_v34 = vld [vmem:[%s6410_s7 + $0xd80] sm:$0xff]  ;;  %v1979_v35 = vld [vmem:[%s6410_s7 + $0x678] sm:$0xff] }
 0x387   : > { %2551 = vmatprep.subr.mxu0 %v1847_v36  ;;  %2622 = vmatprep.subr.mxu1 %v2071_v37  ;;  %v2203_v36 = vld [vmem:[%s6410_s7 + $0xd78] sm:$0xff]  ;;  %v1973_v37 = vld [vmem:[%s6410_s7 + $0x648] sm:$0xff] }
 0x388   : > { %2552 = vmatpush1.msra.mxu0 %v1846_v38  ;;  %2623 = vmatpush1.msra.mxu1 %v2070_v39  ;;  %v2197_v38 = vld [vmem:[%s6410_s7 + $0xd48] sm:$0xff]  ;;  %v1972_v39 = vld [vmem:[%s6410_s7 + $0x640] sm:$0xff] }
 0x389   : > { %2553 = vmatprep.subr.mxu0 %v1840_v40  ;;  %2624 = vmatprep.subr.mxu1 %v2064_v41  ;;  %v2196_v40 = vld [vmem:[%s6410_s7 + $0xd40] sm:$0xff]  ;;  %v1966_v41 = vld [vmem:[%s6410_s7 + $0x610] sm:$0xff] }
 0x38a   : > { %2554 = vmatpush1.msra.mxu0 %v1839_v42  ;;  %2625 = vmatpush1.msra.mxu1 %v2063_v43  ;;  %v2190_v42 = vld [vmem:[%s6410_s7 + $0xd10] sm:$0xff]  ;;  %v1965_v43 = vld [vmem:[%s6410_s7 + $0x608] sm:$0xff] }
 0x38b   : > { %2555 = vmatprep.subr.mxu0 %v1833_v44  ;;  %2626 = vmatprep.subr.mxu1 %v2057_v45  ;;  %v2189_v44 = vld [vmem:[%s6410_s7 + $0xd08] sm:$0xff]  ;;  %v1959_v45 = vld [vmem:[%s6410_s7 + $0x5d8] sm:$0xff] }
 0x38c   : > { %2556 = vmatpush1.msra.mxu0 %v1832_v46  ;;  %2627 = vmatpush1.msra.mxu1 %v2056_v47  ;;  %v2183_v46 = vld [vmem:[%s6410_s7 + $0xcd8] sm:$0xff]  ;;  %v1958_v47 = vld [vmem:[%s6410_s7 + $0x5d0] sm:$0xff] }
 0x38d   : > { %2557 = vmatprep.subr.mxu0 %v1826_v48  ;;  %2628 = vmatprep.subr.mxu1 %v2050_v49  ;;  %v2182_v48 = vld [vmem:[%s6410_s7 + $0xcd0] sm:$0xff]  ;;  %v1952_v49 = vld [vmem:[%s6410_s7 + $0x5a0] sm:$0xff] }
 0x38e   : > { %2558 = vmatpush1.msra.mxu0 %v1825_v50  ;;  %2629 = vmatpush1.msra.mxu1 %v2049_v51  ;;  %v2176_v50 = vld [vmem:[%s6410_s7 + $0xca0] sm:$0xff]  ;;  %v1951_v51 = vld [vmem:[%s6410_s7 + $0x598] sm:$0xff] }
 0x38f   : > { %2559 = vmatprep.subr.mxu0 %v1819_v52  ;;  %2630 = vmatprep.subr.mxu1 %v2043_v55  ;;  %v2175_v52 = vld [vmem:[%s6410_s7 + $0xc98] sm:$0xff]  ;;  %v1945_v55 = vld [vmem:[%s6410_s7 + $0x568] sm:$0xff] }
 0x390   : > { %2560 = vmatpush1.msra.mxu0 %v1818_v56  ;;  %2631 = vmatpush1.msra.mxu1 %v2042_v61  ;;  %v2169_v56 = vld [vmem:[%s6410_s7 + $0xc68] sm:$0xff]  ;;  %v1944_v61 = vld [vmem:[%s6410_s7 + $0x560] sm:$0xff] }
 0x391   : > { %2561 = vmatprep.subr.mxu0 %v1812_v62  ;;  %2632 = vmatprep.subr.mxu1 %v2036_v0  ;;  %v2168_v62 = vld [vmem:[%s6410_s7 + $0xc60] sm:$0xff]  ;;  %v1938_v0 = vld [vmem:[%s6410_s7 + $0x530] sm:$0xff] }
 0x392   : > { %2562 = vmatpush1.msra.mxu0 %v1811_v1  ;;  %2633 = vmatpush1.msra.mxu1 %v2035_v3  ;;  %v2162_v1 = vld [vmem:[%s6410_s7 + $0xc30] sm:$0xff]  ;;  %v1937_v3 = vld [vmem:[%s6410_s7 + $0x528] sm:$0xff] }
 0x393   : > { %2563 = vmatprep.subr.mxu0 %v1805_v4  ;;  %2634 = vmatprep.subr.mxu1 %v2029_v17  ;;  %v2161_v4 = vld [vmem:[%s6410_s7 + $0xc28] sm:$0xff]  ;;  %v1931_v17 = vld [vmem:[%s6410_s7 + $0x4f8] sm:$0xff] }
 0x394   : > { %2564 = vmatpush1.msra.mxu0 %v1804_v5  ;;  %2635 = vmatpush1.msra.mxu1 %v2028_v6  ;;  %v2155_v5 = vld [vmem:[%s6410_s7 + $0xbf8] sm:$0xff]  ;;  %v1930_v6 = vld [vmem:[%s6410_s7 + $0x4f0] sm:$0xff] }
 0x395   : > { %2565 = vmatprep.subr.mxu0 %v1798_v7  ;;  %2636 = vmatprep.subr.mxu1 %v2022_v8  ;;  %v2154_v7 = vld [vmem:[%s6410_s7 + $0xbf0] sm:$0xff]  ;;  %v1924_v8 = vld [vmem:[%s6410_s7 + $0x4c0] sm:$0xff] }
 0x396   : > { %2566 = vmatpush1.msra.mxu0 %v1797_v9  ;;  %2637 = vmatpush1.msra.mxu1 %v2021_v11  ;;  %v2148_v9 = vld [vmem:[%s6410_s7 + $0xbc0] sm:$0xff]  ;;  %v1923_v11 = vld [vmem:[%s6410_s7 + $0x4b8] sm:$0xff] }
 0x397   : > { %2567 = vmatprep.subr.mxu0 %v1791_v13  ;;  %2638 = vmatprep.subr.mxu1 %v2015_v14  ;;  %v2147_v13 = vld [vmem:[%s6410_s7 + $0xbb8] sm:$0xff]  ;;  %v1917_v14 = vld [vmem:[%s6410_s7 + $0x488] sm:$0xff] }
 0x398   : > { %2568 = vmatpush1.msra.mxu0 %v1790_v15  ;;  %2639 = vmatpush1.msra.mxu1 %v2014_v16  ;;  %v2141_v15 = vld [vmem:[%s6410_s7 + $0xb88] sm:$0xff]  ;;  %v1916_v16 = vld [vmem:[%s6410_s7 + $0x480] sm:$0xff] }
 0x399   : > { %2569 = vmatprep.subr.mxu0 %v1784_v18  ;;  %2640 = vmatprep.subr.mxu1 %v2008_v19  ;;  %v2140_v18 = vld [vmem:[%s6410_s7 + $0xb80] sm:$0xff]  ;;  %v1910_v19 = vld [vmem:[%s6410_s7 + $0x450] sm:$0xff] }
 0x39a   : > { %2570 = vmatpush1.msra.mxu0 %v1783_v20  ;;  %2641 = vmatpush1.msra.mxu1 %v2007_v21  ;;  %v2134_v20 = vld [vmem:[%s6410_s7 + $0xb50] sm:$0xff]  ;;  %v1909_v21 = vld [vmem:[%s6410_s7 + $0x448] sm:$0xff] }
 0x39b   : > { %2571 = vmatprep.subr.mxu0 %v1777_v22  ;;  %2642 = vmatprep.subr.mxu1 %v2001_v23  ;;  %v2133_v22 = vld [vmem:[%s6410_s7 + $0xb48] sm:$0xff]  ;;  %v1903_v23 = vld [vmem:[%s6410_s7 + $0x418] sm:$0xff] }
 0x39c   : > { %2572 = vmatpush1.msra.mxu0 %v1776_v24  ;;  %2643 = vmatpush1.msra.mxu1 %v2000_v25  ;;  %v2127_v24 = vld [vmem:[%s6410_s7 + $0xb18] sm:$0xff]  ;;  %v1902_v25 = vld [vmem:[%s6410_s7 + $0x410] sm:$0xff] }
 0x39d   : > { %2573 = vmatprep.subr.mxu0 %v1994_v26  ;;  %2644 = vmatprep.subr.mxu1 %v2218_v27  ;;  %v2126_v26 = vld [vmem:[%s6410_s7 + $0xb10] sm:$0xff]  ;;  %v1896_v27 = vld [vmem:[%s6410_s7 + $0x3e0] sm:$0xff] }
 0x39e   : > { %2574 = vmatpush2.msra.mxu0 %v1993_v63  ;;  %2645 = vmatpush2.msra.mxu1 %v2217_v28  ;;  %v2120_v63 = vld [vmem:[%s6410_s7 + $0xae0] sm:$0xff]  ;;  %v1895_v28 = vld [vmem:[%s6410_s7 + $0x3d8] sm:$0xff] }
 0x39f   : > { %2575 = vmatprep.subr.mxu0 %v1987_v2  ;;  %2646 = vmatprep.subr.mxu1 %v2211_v29  ;;  %v2119_v2 = vld [vmem:[%s6410_s7 + $0xad8] sm:$0xff]  ;;  %v1889_v29 = vld [vmem:[%s6410_s7 + $0x3a8] sm:$0xff] }
 0x3a0   : > { %2576 = vmatpush2.msra.mxu0 %v1986_v30  ;;  %2647 = vmatpush2.msra.mxu1 %v2210_v32  ;;  %v2113_v30 = vld [vmem:[%s6410_s7 + $0xaa8] sm:$0xff]  ;;  %v1888_v32 = vld [vmem:[%s6410_s7 + $0x3a0] sm:$0xff] }
 0x3a1   : > { %2577 = vmatprep.subr.mxu0 %v1980_v33  ;;  %2648 = vmatprep.subr.mxu1 %v2204_v34  ;;  %v2112_v33 = vld [vmem:[%s6410_s7 + $0xaa0] sm:$0xff]  ;;  %v1995_v34 = vld [vmem:[%s6410_s7 + $0x6f8] sm:$0xff] }
 0x3a2   : > { %2578 = vmatpush2.msra.mxu0 %v1979_v35  ;;  %2649 = vmatpush2.msra.mxu1 %v2203_v36  ;;  %v2219_v35 = vld [vmem:[%s6410_s7 + $0xdf8] sm:$0xff] }
 0x3a3   : > { %2579 = vmatprep.subr.mxu0 %v1973_v37  ;;  %2650 = vmatprep.subr.mxu1 %v2197_v38  ;;  %v1883_v36 = vld [vmem:[%s6410_s7 + $0x378] sm:$0xff]  ;;  %v1988_v38 = vld [vmem:[%s6410_s7 + $0x6c0] sm:$0xff] }
 0x3a4   : > { %2580 = vmatpush2.msra.mxu0 %v1972_v39  ;;  %2651 = vmatpush2.msra.mxu1 %v2196_v40  ;;  %v2107_v37 = vld [vmem:[%s6410_s7 + $0xa78] sm:$0xff]  ;;  %v2212_v39 = vld [vmem:[%s6410_s7 + $0xdc0] sm:$0xff] }
 0x3a5   : > { %2581 = vmatprep.subr.mxu0 %v1966_v41  ;;  %2652 = vmatprep.subr.mxu1 %v2190_v42  ;;  %v1876_v40 = vld [vmem:[%s6410_s7 + $0x340] sm:$0xff]  ;;  %v1981_v42 = vld [vmem:[%s6410_s7 + $0x688] sm:$0xff] }
 0x3a6   : > { %2582 = vmatpush2.msra.mxu0 %v1965_v43  ;;  %2653 = vmatpush2.msra.mxu1 %v2189_v44  ;;  %v2100_v41 = vld [vmem:[%s6410_s7 + $0xa40] sm:$0xff]  ;;  %v2205_v43 = vld [vmem:[%s6410_s7 + $0xd88] sm:$0xff] }
 0x3a7   : > { %2583 = vmatprep.subr.mxu0 %v1959_v45  ;;  %2654 = vmatprep.subr.mxu1 %v2183_v46  ;;  %v2093_v44 = vld [vmem:[%s6410_s7 + $0xa08] sm:$0xff]  ;;  %v2198_v45 = vld [vmem:[%s6410_s7 + $0xd50] sm:$0xff] }
 0x3a8   : > { %2584 = vmatpush2.msra.mxu0 %v1958_v47  ;;  %2655 = vmatpush2.msra.mxu1 %v2182_v48  ;;  %v1862_v46 = vld [vmem:[%s6410_s7 + $0x2d0] sm:$0xff]  ;;  %v1967_v48 = vld [vmem:[%s6410_s7 + $0x618] sm:$0xff] }
 0x3a9   : > { %2585 = vmatprep.subr.mxu0 %v1952_v49  ;;  %2656 = vmatprep.subr.mxu1 %v2176_v50  ;;  %v2086_v47 = vld [vmem:[%s6410_s7 + $0x9d0] sm:$0xff]  ;;  %v2191_v49 = vld [vmem:[%s6410_s7 + $0xd18] sm:$0xff] }
 0x3aa   : > { %2586 = vmatpush2.msra.mxu0 %v1951_v51  ;;  %2657 = vmatpush2.msra.mxu1 %v2175_v52  ;;  %v1855_v50 = vld [vmem:[%s6410_s7 + $0x298] sm:$0xff]  ;;  %v1960_v52 = vld [vmem:[%s6410_s7 + $0x5e0] sm:$0xff] }
 0x3ab   : > { %2587 = vmatprep.subr.mxu0 %v1945_v55  ;;  %2658 = vmatprep.subr.mxu1 %v2169_v56  ;;  %v2079_v51 = vld [vmem:[%s6410_s7 + $0x998] sm:$0xff]  ;;  %v2184_v55 = vld [vmem:[%s6410_s7 + $0xce0] sm:$0xff] }
 0x3ac   : > { %2588 = vmatpush2.msra.mxu0 %v1944_v61  ;;  %2659 = vmatpush2.msra.mxu1 %v2168_v62  ;;  %v1848_v56 = vld [vmem:[%s6410_s7 + $0x260] sm:$0xff]  ;;  %v1953_v62 = vld [vmem:[%s6410_s7 + $0x5a8] sm:$0xff] }
 0x3ad   : > { %2589 = vmatprep.subr.mxu0 %v1938_v0  ;;  %2660 = vmatprep.subr.mxu1 %v2162_v1  ;;  %v2072_v61 = vld [vmem:[%s6410_s7 + $0x960] sm:$0xff]  ;;  %v2177_v0 = vld [vmem:[%s6410_s7 + $0xca8] sm:$0xff] }
 0x3ae   : > { %2590 = vmatpush2.msra.mxu0 %v1937_v3  ;;  %2661 = vmatpush2.msra.mxu1 %v2161_v4  ;;  %v1841_v1 = vld [vmem:[%s6410_s7 + $0x228] sm:$0xff]  ;;  %v1946_v4 = vld [vmem:[%s6410_s7 + $0x570] sm:$0xff] }
 0x3af   : > { %2591 = vmatprep.subr.mxu0 %v1931_v17  ;;  %2662 = vmatprep.subr.mxu1 %v2155_v5  ;;  %v2065_v3 = vld [vmem:[%s6410_s7 + $0x928] sm:$0xff]  ;;  %v2170_v17 = vld [vmem:[%s6410_s7 + $0xc70] sm:$0xff] }
 0x3b0   : > { %2592 = vmatpush2.msra.mxu0 %v1930_v6  ;;  %2663 = vmatpush2.msra.mxu1 %v2154_v7  ;;  %v1834_v5 = vld [vmem:[%s6410_s7 + $0x1f0] sm:$0xff]  ;;  %v1939_v7 = vld [vmem:[%s6410_s7 + $0x538] sm:$0xff] }
 0x3b1   : > { %2593 = vmatprep.subr.mxu0 %v1924_v8  ;;  %2664 = vmatprep.subr.mxu1 %v2148_v9  ;;  %v2058_v6 = vld [vmem:[%s6410_s7 + $0x8f0] sm:$0xff]  ;;  %v2163_v8 = vld [vmem:[%s6410_s7 + $0xc38] sm:$0xff] }
 0x3b2   : > { %2594 = vmatpush2.msra.mxu0 %v1923_v11  ;;  %2665 = vmatpush2.msra.mxu1 %v2147_v13  ;;  %v1827_v9 = vld [vmem:[%s6410_s7 + $0x1b8] sm:$0xff]  ;;  %v1932_v13 = vld [vmem:[%s6410_s7 + $0x500] sm:$0xff] }
 0x3b3   : > { %2595 = vmatprep.subr.mxu0 %v1917_v14  ;;  %2666 = vmatprep.subr.mxu1 %v2141_v15  ;;  %v2051_v11 = vld [vmem:[%s6410_s7 + $0x8b8] sm:$0xff]  ;;  %v2156_v14 = vld [vmem:[%s6410_s7 + $0xc00] sm:$0xff] }
 0x3b4   : > { %2596 = vmatpush2.msra.mxu0 %v1916_v16  ;;  %2667 = vmatpush2.msra.mxu1 %v2140_v18  ;;  %v1820_v15 = vld [vmem:[%s6410_s7 + $0x180] sm:$0xff]  ;;  %v1925_v18 = vld [vmem:[%s6410_s7 + $0x4c8] sm:$0xff] }
 0x3b5   : > { %2597 = vmatprep.subr.mxu0 %v1910_v19  ;;  %2668 = vmatprep.subr.mxu1 %v2134_v20  ;;  %v2044_v16 = vld [vmem:[%s6410_s7 + $0x880] sm:$0xff]  ;;  %v2149_v19 = vld [vmem:[%s6410_s7 + $0xbc8] sm:$0xff] }
 0x3b6   : > { %2598 = vmatpush2.msra.mxu0 %v1909_v21  ;;  %2669 = vmatpush2.msra.mxu1 %v2133_v22  ;;  %v1813_v20 = vld [vmem:[%s6410_s7 + $0x148] sm:$0xff]  ;;  %v1918_v22 = vld [vmem:[%s6410_s7 + $0x490] sm:$0xff] }
 0x3b7   : > { %2599 = vmatprep.subr.mxu0 %v1903_v23  ;;  %2670 = vmatprep.subr.mxu1 %v2127_v24  ;;  %v2037_v21 = vld [vmem:[%s6410_s7 + $0x848] sm:$0xff]  ;;  %v2142_v23 = vld [vmem:[%s6410_s7 + $0xb90] sm:$0xff] }
 0x3b8   : > { %2600 = vmatpush2.msra.mxu0 %v1902_v25  ;;  %2671 = vmatpush2.msra.mxu1 %v2126_v26  ;;  %v1806_v24 = vld [vmem:[%s6410_s7 + $0x110] sm:$0xff]  ;;  %v1911_v26 = vld [vmem:[%s6410_s7 + $0x458] sm:$0xff] }
 0x3b9   : > { %2601 = vmatprep.subr.mxu0 %v1896_v27  ;;  %2672 = vmatprep.subr.mxu1 %v2120_v63  ;;  %v2030_v25 = vld [vmem:[%s6410_s7 + $0x810] sm:$0xff]  ;;  %v2135_v27 = vld [vmem:[%s6410_s7 + $0xb58] sm:$0xff] }
 0x3ba   : > { %2602 = vmatpush2.msra.mxu0 %v1895_v28  ;;  %2673 = vmatpush2.msra.mxu1 %v2119_v2  ;;  %v1799_v63 = vld [vmem:[%s6410_s7 + $0xd8] sm:$0xff]  ;;  %v1904_v2 = vld [vmem:[%s6410_s7 + $0x420] sm:$0xff] }
 0x3bb   : > { %2603 = vmatprep.subr.mxu0 %v1889_v29  ;;  %2674 = vmatprep.subr.mxu1 %v2113_v30  ;;  %v2023_v28 = vld [vmem:[%s6410_s7 + $0x7d8] sm:$0xff]  ;;  %v2128_v29 = vld [vmem:[%s6410_s7 + $0xb20] sm:$0xff] }
 0x3bc   : > { %2604 = vmatpush2.msra.mxu0 %v1888_v32  ;;  %2675 = vmatpush2.msra.mxu1 %v2112_v33  ;;  %v1792_v30 = vld [vmem:[%s6410_s7 + $0xa0] sm:$0xff]  ;;  %v1897_v33 = vld [vmem:[%s6410_s7 + $0x3e8] sm:$0xff] }
 0x3bd   : > { %2606 = vmatmul.mubr.f32.vlgmr.msra.gmra.mxu0 %v5355_v59  ;;  %2677 = vmatmul.mubr.f32.vlgmr.msra.gmra.mxu1 %v5357_v60  ;;  %v2016_v32 = vld [vmem:[%s6410_s7 + $0x7a0] sm:$0xff] }
 0x3be   : > { %3020 = vmatprep.subr.mxu0 %v1995_v34  ;;  %3055 = vmatprep.subr.mxu1 %v2219_v35  ;;  %v2121_v34 = vld [vmem:[%s6410_s7 + $0xae8] sm:$0xff] }
 0x3bf   : > { %3021 = vmatpush3.msra.mxu0 %v1883_v36  ;;  %2747 = vmatprep.mubr.f32.mxu0 %v5351_v57  ;;  %v1869_v57 = vld [vmem:[%s6410_s7 + $0x308] sm:$0xff] }
 0x3c0   : > { %3056 = vmatpush3.msra.mxu1 %v2107_v37  ;;  %2817 = vmatprep.mubr.f32.mxu1 %v5353_v58  ;;  %v1974_v58 = vld [vmem:[%s6410_s7 + $0x650] sm:$0xff]  ;;  %v1785_v35 = vld [vmem:[%s6410_s7 + $0x68] sm:$0xff] }
 0x3c1   : > { %3022 = vmatprep.subr.mxu0 %v1988_v38  ;;  %3057 = vmatprep.subr.mxu1 %v2212_v39  ;;  %v2009_v36 = vld [vmem:[%s6410_s7 + $0x768] sm:$0xff]  ;;  %v1890_v37 = vld [vmem:[%s6410_s7 + $0x3b0] sm:$0xff] }
 0x3c2   : > { %3023 = vmatpush3.msra.mxu0 %v1876_v40  ;;  %3058 = vmatpush3.msra.mxu1 %v2100_v41  ;;  %v2114_v38 = vld [vmem:[%s6410_s7 + $0xab0] sm:$0xff]  ;;  %v6332_v41 = vld [vmem:[%s6411_s8] sm:$0x7f] }
 0x3c3   : > { %3024 = vmatprep.subr.mxu0 %v1981_v42  ;;  %3059 = vmatprep.subr.mxu1 %v2205_v43  ;;  %v1778_v39 = vld [vmem:[%s6410_s7 + $0x30] sm:$0xff]  ;;  %v2225_v42 = vrot.slane %v6332_v41, %v4739_v31  ;;  %v2229_v43 = vrot.slane %v6332_v41, %v4745_v12 }
 0x3c4   : > { %3025 = vmatpush3.msra.mxu0 %v1869_v57  ;;  %3060 = vmatpush3.msra.mxu1 %v2093_v44  ;;  %v2002_v40 = vld [vmem:[%s6410_s7 + $0x730] sm:$0xff] }
 0x3c5   : > { %3026 = vmatprep.subr.mxu0 %v1974_v58  ;;  %3061 = vmatprep.subr.mxu1 %v2198_v45 }
 0x3c6   : > { %3027 = vmatpush3.msra.mxu0 %v1862_v46  ;;  %3062 = vmatpush3.msra.mxu1 %v2086_v47 }
 0x3c7   : > { %3028 = vmatprep.subr.mxu0 %v1967_v48  ;;  %3063 = vmatprep.subr.mxu1 %v2191_v49 }
 0x3c8   : > { %3029 = vmatpush3.msra.mxu0 %v1855_v50  ;;  %3064 = vmatpush3.msra.mxu1 %v2079_v51 }
 0x3c9   : > { %3030 = vmatprep.subr.mxu0 %v1960_v52  ;;  %3065 = vmatprep.subr.mxu1 %v2184_v55 }
 0x3ca   : > { %3031 = vmatpush3.msra.mxu0 %v1848_v56  ;;  %3066 = vmatpush3.msra.mxu1 %v2072_v61 }
 0x3cb   : > { %3032 = vmatprep.subr.mxu0 %v1953_v62  ;;  %3067 = vmatprep.subr.mxu1 %v2177_v0  ;;  %v2233_v62 = vrot.slane %v6332_v41, %v4751_v53  ;;  %v2237_v0 = vrot.slane %v6332_v41, %v4754_v54 }
 0x3cc   : > { %3033 = vmatpush3.msra.mxu0 %v1841_v1  ;;  %3068 = vmatpush3.msra.mxu1 %v2065_v3 }
 0x3cd   : > { %3034 = vmatprep.subr.mxu0 %v1946_v4  ;;  %3069 = vmatprep.subr.mxu1 %v2170_v17 }
 0x3ce   : > { %3035 = vmatpush3.msra.mxu0 %v1834_v5  ;;  %3070 = vmatpush3.msra.mxu1 %v2058_v6 }
 0x3cf   : > { %3036 = vmatprep.subr.mxu0 %v1939_v7  ;;  %3071 = vmatprep.subr.mxu1 %v2163_v8 }
 0x3d0   : > { %3037 = vmatpush3.msra.mxu0 %v1827_v9  ;;  %3072 = vmatpush3.msra.mxu1 %v2051_v11 }
 0x3d1   : > { %3038 = vmatprep.subr.mxu0 %v1932_v13  ;;  %3073 = vmatprep.subr.mxu1 %v2156_v14 }
 0x3d2   : > { %3039 = vmatpush3.msra.mxu0 %v1820_v15  ;;  %3074 = vmatpush3.msra.mxu1 %v2044_v16 }
 0x3d3   : > { %3040 = vmatprep.subr.mxu0 %v1925_v18  ;;  %3075 = vmatprep.subr.mxu1 %v2149_v19 }
 0x3d4   : > { %3041 = vmatpush3.msra.mxu0 %v1813_v20  ;;  %3076 = vmatpush3.msra.mxu1 %v2037_v21  ;;  %v2240_v20 = vsub.s32 4, %v4736_v10  ;;  %v2244_v21 = vsub.s32 5, %v4736_v10 }
 0x3d5   : > { %3042 = vmatprep.subr.mxu0 %v1918_v22  ;;  %3077 = vmatprep.subr.mxu1 %v2142_v23 }
 0x3d6   : > { %3043 = vmatpush3.msra.mxu0 %v1806_v24  ;;  %3078 = vmatpush3.msra.mxu1 %v2030_v25  ;;  %v2241_v22 = vrot.slane %v6332_v41, %v2240_v20  ;;  %v2245_v23 = vrot.slane %v6332_v41, %v2244_v21 }
 0x3d7   : > { %3044 = vmatprep.subr.mxu0 %v1911_v26  ;;  %3079 = vmatprep.subr.mxu1 %v2135_v27 }
 0x3d8   : > { %3045 = vmatpush3.msra.mxu0 %v1799_v63  ;;  %3080 = vmatpush3.msra.mxu1 %v2023_v28 }
 0x3d9   : > { %3046 = vmatprep.subr.mxu0 %v1904_v2  ;;  %3081 = vmatprep.subr.mxu1 %v2128_v29 }
 0x3da   : > { %3047 = vmatpush3.msra.mxu0 %v1792_v30  ;;  %3082 = vmatpush3.msra.mxu1 %v2016_v32 }
 0x3db   : > { %3048 = vmatprep.subr.mxu0 %v1897_v33  ;;  %3083 = vmatprep.subr.mxu1 %v2121_v34 }
 0x3dc   : > { %3049 = vmatpush3.msra.mxu0 %v1785_v35  ;;  %3084 = vmatpush3.msra.mxu1 %v2009_v36 }
 0x3dd   : > { %3050 = vmatprep.subr.mxu0 %v1890_v37  ;;  %3085 = vmatprep.subr.mxu1 %v2114_v38 }
 0x3de   : > { %3051 = vmatpush3.msra.mxu0 %v1778_v39  ;;  %3086 = vmatpush3.msra.mxu1 %v2002_v40  ;;  %v2248_v39 = vsub.s32 6, %v4736_v10 }
 0x3df   : > { %2748 = vmatmul.mubr.f32.vlgmr.msra.gmra.mxu0 %v5355_v59  ;;  %2818 = vmatmul.mubr.f32.vlgmr.msra.gmra.mxu1 %v5357_v60 }
 0x3fa   : > { %v2323_v57 = vpop.f32.mrf.mxu0  ;;  %v2394_v44 = vpop.f32.mrf.mxu1 }
 0x3fb   : > { %v2324_v58 = vadd.f32 %v2323_v57, %v2225_v42 }
 0x3fc   : > { %v2325_v45 = vpop.f32.mrf.mxu0  ;;  %v2396_v60 = vpop.f32.mrf.mxu1 }
 0x3fd   : > { %v2395_v46 = vadd.f32 %v2394_v44, %v2324_v58  ;;  %v2326_v59 = vadd.f32 %v2325_v45, %v2229_v43  ;;  %v2249_v43 = vrot.slane %v6332_v41, %v2248_v39 }
 0x3ff   : > { %v2823_v47 = vsub.f32 0.0, %v2395_v46  ;;  %v2397_v48 = vadd.f32 %v2396_v60, %v2326_v59 }
 0x401   : > { %v2830_v49 = vmul.f32 1.442695, %v2823_v47  ;;  %v2824_v50 = vsub.f32 0.0, %v2397_v48 }
 0x403   : > { %3133 = vpow2.f32 %v2830_v49  ;;  %v2832_v51 = vmul.f32 1.442695, %v2824_v50 }
 0x405   : > { %3135 = vpow2.f32 %v2832_v51 }
 0x410   : > { %v3134_v31 = vpop.eup %3133 }
 0x411   : > { %v2844_v52 = vadd.f32 1.0, %v3134_v31 }
 0x412   : > { %v3136_v55 = vpop.eup %3135 }
 0x413   : > { %3137 = vrcp.f32 %v2844_v52  ;;  %v2845_v12 = vadd.f32 1.0, %v3136_v55 }
 0x415   : > { %3139 = vrcp.f32 %v2845_v12 }
 0x420   : > { %v3138_v56 = vpop.eup %3137 }
 0x421   : > { %2858 = vst [vmem:[%s6341_s29] sm:$0xff] %v3138_v56 }
 0x422   : > { %v3140_v61 = vpop.eup %3139 }
 0x423   : > { %2859 = vst [vmem:[%s6341_s29 + $0x8] sm:$0xff] %v3140_v61 }
 0x43b   : > { %v2465_v1 = vpop.f32.mrf.mxu0  ;;  %v2536_v3 = vpop.f32.mrf.mxu1 }
 0x43c   : > { %v2466_v4 = vadd.f32 %v2465_v1, %v2233_v62 }
 0x43d   : > { %v2467_v17 = vpop.f32.mrf.mxu0  ;;  %v2538_v7 = vpop.f32.mrf.mxu1 }
 0x43e   : > { %v2537_v5 = vadd.f32 %v2536_v3, %v2466_v4  ;;  %v2468_v6 = vadd.f32 %v2467_v17, %v2237_v0 }
 0x440   : > { %v2825_v8 = vsub.f32 0.0, %v2537_v5  ;;  %v2539_v9 = vadd.f32 %v2538_v7, %v2468_v6 }
 0x442   : > { %v2834_v11 = vmul.f32 1.442695, %v2825_v8  ;;  %v2826_v13 = vsub.f32 0.0, %v2539_v9 }
 0x444   : > { %3141 = vpow2.f32 %v2834_v11  ;;  %v2836_v14 = vmul.f32 1.442695, %v2826_v13 }
 0x446   : > { %3143 = vpow2.f32 %v2836_v14 }
 0x451   : > { %v3142_v53 = vpop.eup %3141 }
 0x452   : > { %v2846_v15 = vadd.f32 1.0, %v3142_v53 }
 0x453   : > { %v3144_v16 = vpop.eup %3143 }
 0x454   : > { %3145 = vrcp.f32 %v2846_v15  ;;  %v2847_v54 = vadd.f32 1.0, %v3144_v16 }
 0x456   : > { %3147 = vrcp.f32 %v2847_v54 }
 0x461   : > { %v3146_v18 = vpop.eup %3145 }
 0x462   : > { %2860 = vst [vmem:[%s6341_s29 + $0x10] sm:$0xff] %v3146_v18 }
 0x463   : > { %v3148_v19 = vpop.eup %3147 }
 0x464   : > { %2861 = vst [vmem:[%s6341_s29 + $0x18] sm:$0xff] %v3148_v19 }
 0x47d   : > { %v2607_v24 = vpop.f32.mrf.mxu0  ;;  %v2678_v25 = vpop.f32.mrf.mxu1 }
 0x47e   : > { %v2608_v26 = vadd.f32 %v2607_v24, %v2241_v22 }
 0x47f   : > { %v2609_v27 = vpop.f32.mrf.mxu0  ;;  %v2680_v2 = vpop.f32.mrf.mxu1 }
 0x480   : > { %v2679_v63 = vadd.f32 %v2678_v25, %v2608_v26  ;;  %v2610_v28 = vadd.f32 %v2609_v27, %v2245_v23 }
 0x482   : > { %v2827_v29 = vsub.f32 0.0, %v2679_v63  ;;  %v2681_v30 = vadd.f32 %v2680_v2, %v2610_v28 }
 0x484   : > { %v2838_v32 = vmul.f32 1.442695, %v2827_v29  ;;  %v2828_v33 = vsub.f32 0.0, %v2681_v30 }
 0x486   : > { %3149 = vpow2.f32 %v2838_v32  ;;  %v2840_v34 = vmul.f32 1.442695, %v2828_v33 }
 0x488   : > { %3151 = vpow2.f32 %v2840_v34 }
 0x493   : > { %v3150_v35 = vpop.eup %3149 }
 0x494   : > { %v2848_v36 = vadd.f32 1.0, %v3150_v35 }
 0x495   : > { %v3152_v37 = vpop.eup %3151 }
 0x496   : > { %3153 = vrcp.f32 %v2848_v36  ;;  %v2849_v38 = vadd.f32 1.0, %v3152_v37 }
 0x498   : > { %3155 = vrcp.f32 %v2849_v38 }
 0x49f   : > { %v3052_v40 = vpop.f32.mrf.mxu0  ;;  %v3087_v42 = vpop.f32.mrf.mxu1 }
 0x4a1   : > { %v3053_v57 = vpop.f32.mrf.mxu0  ;;  %v3088_v44 = vpop.f32.mrf.mxu1 }
 0x4a2   : > { %v3054_v58 = vadd.f32 %v3053_v57, %v3052_v40  ;;  %v3089_v59 = vadd.f32 %v3088_v44, %v3087_v42 }
 0x4a3   : > { %v3154_v45 = vpop.eup %3153 }
 0x4a4   : > { %2862 = vst [vmem:[%s6341_s29 + $0x20] sm:$0xff] %v3154_v45  ;;  %v2750_v46 = vadd.f32 %v3054_v58, %v2249_v43 }
 0x4a5   : > { %v3156_v60 = vpop.eup %3155 }
 0x4a6   : > { %2863 = vst [vmem:[%s6341_s29 + $0x28] sm:$0xff] %v3156_v60  ;;  %v2820_v47 = vadd.f32 %v3089_v59, %v2750_v46 }
 0x4a8   : > { %v2829_v10 = vsub.f32 0.0, %v2820_v47 }
 0x4aa   : > { %v2842_v48 = vmul.f32 1.442695, %v2829_v10 }
 0x4ac   : > { %3157 = vpow2.f32 %v2842_v48 }
 0x4b9   : > { %v3158_v49 = vpop.eup %3157 }
 0x4ba   : > { %v2850_v41 = vadd.f32 1.0, %v3158_v49 }
 0x4bc   : > { %3159 = vrcp.f32 %v2850_v41 }
 0x4c9   : > { %v3160_v50 = vpop.eup %3159 }
 0x4ca   : > { %2864 = vst.msk [vmem:[%s6341_s29 + $0x30] sm:$0xff] %vm752_vm0, %v3160_v50 }
 0x4cb   : > { %3177 = shalt.err (!%p3174_p3)
}
 0x4cc   : > { %s3178_s16 = scalar_lea.hbm %s6364_s25, 896  ;;  %s3182_s21 = scalar_lea.hbm %s6412_s9, 1792 }
 0x4cd   : > { %p3179_p4 = scmp.ne.s32.totalorder %s6364_s25, %s3178_s16  ;;  %p3183_p9 = scmp.lt.s32.totalorder %s6364_s25, %s6412_s9 }
 0x4ce   : > { %p3184_p10 = scmp.lt.s32.totalorder %s3182_s21, %s3178_s16 }
 0x4cf   : > { %p3180_p7 = pnand %p3179_p4, %p3316_p5 }
 0x4d0   : > { %p3185_p11 = por %p3184_p10, %p3183_p9 }
 0x4d1   : > { %p3181_p8 = pneg %p3180_p7 }
 0x4d3   : > { %p3186_p12 = pnand %p3185_p11, %p3181_p8 }
 0x4d5   : > { %3189 = shalt.err (!%p3186_p12)
}
 0x4d6   : > { %3093 = dma.vmem_to_hbm [thread:$0]  (%p3316_p5), %s2881_s17, 896, %s6364_s25, %s2866_s26  }
 0x4d7 PF: > { %p3099_p13 = scmp.ge.s32.totalorder %s3224_s12, 2  ;;  %s2892_s23 = sand.u32 1, %s3212_s30  }
 0x4d8   : > { %s2893_s27 = scalar_lea.sflag [#allocation3], %s2892_s23 }
 0x4d9   : > { %p3096_p0 = pnand %p3099_p13, %p3320_p6 }
 0x4db   : > { %p3097_p1 = pneg %p3096_p0 }
 0x4dd   : > { %3207 = dma.done.wait (%p3097_p1), %s2893_s27, 896  }
 0x4de   : > { %3209 = vsyncadd (%p3097_p1), %s2893_s27, 4294966400  ;;  %p19_p2 = scmp.ge.s32.totalorder %s3303_s15, 4   ;;  %s6415_s30 = smov %s3216_s10 }
 0x4df   : > { %s6416_s10 = smov %s3220_s11  ;;  %s6417_s11 = smov %s3314_s18 }
 0x4e0   : > { %s6418_s12 = smov %s3303_s15  ;;  %21 = sbr.rel (!%p19_p2) target bundleno = 3 (0x3), region = 91 }
 0x4e5   :  { %2898 = vsyncpa [#allocation3], 1 }
 0x4e6   :  { %2900 = vsyncpa [#allocation3 + $0x1], 1 }

// kernel: tpu_custom_call.1
= control target key start
LH: loop header
LB: loop body
LE: loop exit
PB: predicated region body
PF: predicated region fallthrough
CT: control target
= control target key end

     0   :  { %14 = vsyncpa [#allocation3], 0  ;;  %s6403_s0 = inlined_call_operand.vmem [shape: f32[16,784], index: 0, kind: input, shape index: {}]   ;;  %s6404_s1 = inlined_call_operand.vmem [shape: f32[784,512], index: 1, kind: input, shape index: {}]   ;;  %s6405_s2 = inlined_call_operand.vmem [shape: f32[1,512], index: 2, kind: input, shape index: {}]   ;;  %s6406_s3 = inlined_call_operand.vmem [shape: f32[512,128], index: 3, kind: input, shape index: {}]   ;;  %s6407_s4 = inlined_call_operand.vmem [shape: f32[1,128], index: 4, kind: input, shape index: {}]   ;;  %s6408_s5 = inlined_call_operand.vmem [shape: f32[128,512], index: 5, kind: input, shape index: {}]   ;;  %s6409_s6 = inlined_call_operand.vmem [shape: f32[1,512], index: 6, kind: input, shape index: {}]   ;;  %s6410_s7 = inlined_call_operand.vmem [shape: f32[512,784], index: 7, kind: input, shape index: {}]   ;;  %s6411_s8 = inlined_call_operand.vmem [shape: f32[1,784], index: 8, kind: input, shape index: {}]   ;;  %s6412_s9 = inlined_call_operand.hbm [shape: f32[16,784], index: 9, kind: output, shape index: {}]  }
   0x1   :  { %16 = vsyncpa [#allocation3 + $0x1], 0  ;;  %s3278_s30 = smov 0   ;;  %s3280_s10 = smov 0  }
   0x2   :  { %s3282_s11 = smov 0   ;;  %s3284_s12 = smov 0  }
   0x3 LB: > { %s3299_s13 = sadd.s32 4294967295, %s3224_s12   ;;  %s2939_s14 = sadd.s32 4294967294, %s3224_s12   ;;  %s3224_s12 = sphi %s3284_s12, %s6418_s12   ;;  %s3220_s11 = sphi %s3282_s11, %s6417_s11   ;;  %s3216_s10 = sphi %s3280_s10, %s6416_s10   ;;  %s3212_s30 = sphi %s3278_s30, %s6415_s30  }
   0x4   : > { %s3303_s15 = sadd.s32 1, %s3224_s12   ;;  %s223_s16 = sadd.s32 1, %s3220_s11 }
   0x5   : > { %s220_s17 = ssub.s32 %s3224_s12, %s3303_s15  ;;  %p233_p0 = scmp.ne.s32.totalorder %s3220_s11, %s3216_s10 }
   0x6   : > { %p221_p1 = scmp.eq.s32.totalorder %s220_s17, 0  ;;  %p234_p2 = scmp.eq.s32.totalorder %s3299_s13, 1 }
   0x7   : > { %p239_p3 = scmp.ne.s32.totalorder %s3216_s10, %s3212_s30  ;;  %p240_p4 = scmp.eq.s32.totalorder %s2939_s14, 1 }
   0x8   : > { %s3314_s18 = scalar_select %p221_p1, %s3220_s11, %s223_s16  }
   0x9   : > { %p3316_p5 = por %p234_p2, %p233_p0  ;;  %p3320_p6 = por %p240_p4, %p239_p3 }
   0xa   : > { %p2942_p7 = scmp.ge.s32.totalorder %s3224_s12, 1  ;;  %p290_p8 = scmp.lt.s32.totalorder %s3224_s12, 3 }
   0xc   : > { %p291_p9 = pnand %p2942_p7, %p290_p8 }
   0xd   : > { %p326_p10 = scmp.lt.s32.totalorder (!%p291_p9), %s3299_s13, 1  ;;  %s323_s14 = sand.u32 (!%p291_p9), 1, %s3216_s10  }
   0xe   : > { %294 = sbr.rel (%p291_p9) target bundleno = 1239 (0x4d7), region = 56  ;;  %s2866_s26 = scalar_lea.sflag (!%p291_p9), [#allocation3], %s323_s14 }
   0xf   : > { %s3090_s16 = smul.u32 (!%p291_p9), 56, %s323_s14  ;;  %s3227_s27 = smov (!%p291_p9), [#allocation2]  }
  0x10   : > { %s3092_s21 = smul.u32 (!%p291_p9), 896, %s3299_s13  ;;  %s3168_s28 = sshll.u32 (!%p291_p9), %s3227_s27, 4  ;;  %s3169_s28 = int_to_ptr.vmem [resolvable:$false] %s3168_s28 }
  0x12   : > { %s6364_s25 = scalar_lea.hbm (!%p291_p9), %s6412_s9, %s3092_s21 }
  0x13   : > { %v399_v0 = vld [vmem:[%s6404_s1 + $0x1e8] sm:$0xff]  ;;  %v398_v2 = vld [vmem:[%s6404_s1 + $0x1e0] sm:$0xff]  ;;  %s3648_s29 = scalar_select %p326_p10, %s3299_s13, 1  ;;  %vm752_vm0 = vcmask 130048  }
  0x14   : > { %v527_v1 = vld [vmem:[%s6404_s1 + $0x5e8] sm:$0xff]  ;;  %756 = vmatprep.subr.mxu0 %v399_v0  ;;  %v526_v3 = vld [vmem:[%s6404_s1 + $0x5e0] sm:$0xff]  ;;  %s3170_s13 = scalar_lea.vmem %s3169_s28, 1792 }
  0x15   : > { %827 = vmatprep.subr.mxu1 %v527_v1  ;;  %v395_v4 = vld [vmem:[%s6404_s1 + $0x1c8] sm:$0xff]  ;;  %757 = vmatpush1.msra.mxu0 %v398_v2  ;;  %v394_v6 = vld [vmem:[%s6404_s1 + $0x1c0] sm:$0xff]  ;;  %s3091_s23 = smul.u32 56, %s3648_s29  ;;  %s6341_s29 = scalar_lea.vmem [#allocation2], %s3090_s16 }
  0x16   : > { %v523_v5 = vld [vmem:[%s6404_s1 + $0x5c8] sm:$0xff]  ;;  %828 = vmatpush1.msra.mxu1 %v526_v3  ;;  %v522_v7 = vld [vmem:[%s6404_s1 + $0x5c0] sm:$0xff]  ;;  %758 = vmatprep.subr.mxu0 %v395_v4 }
  0x17   : > { %v391_v8 = vld [vmem:[%s6404_s1 + $0x1a8] sm:$0xff]  ;;  %829 = vmatprep.subr.mxu1 %v523_v5  ;;  %v390_v10 = vld [vmem:[%s6404_s1 + $0x1a0] sm:$0xff]  ;;  %759 = vmatpush1.msra.mxu0 %v394_v6  ;;  %s3702_s17 = scalar_lea.vmem %s6403_s0, %s3091_s23 }
  0x18   : > { %v519_v9 = vld [vmem:[%s6404_s1 + $0x5a8] sm:$0xff]  ;;  %v518_v11 = vld [vmem:[%s6404_s1 + $0x5a0] sm:$0xff]  ;;  %830 = vmatpush1.msra.mxu1 %v522_v7  ;;  %760 = vmatprep.subr.mxu0 %v391_v8 }
  0x19   : > { %v387_v12 = vld [vmem:[%s6404_s1 + $0x188] sm:$0xff]  ;;  %831 = vmatprep.subr.mxu1 %v519_v9  ;;  %v386_v14 = vld [vmem:[%s6404_s1 + $0x180] sm:$0xff]  ;;  %761 = vmatpush1.msra.mxu0 %v390_v10 }
  0x1a   : > { %v515_v13 = vld [vmem:[%s6404_s1 + $0x588] sm:$0xff]  ;;  %v514_v15 = vld [vmem:[%s6404_s1 + $0x580] sm:$0xff]  ;;  %832 = vmatpush1.msra.mxu1 %v518_v11  ;;  %762 = vmatprep.subr.mxu0 %v387_v12 }
  0x1b   : > { %v383_v16 = vld [vmem:[%s6404_s1 + $0x168] sm:$0xff]  ;;  %833 = vmatprep.subr.mxu1 %v515_v13  ;;  %v382_v18 = vld [vmem:[%s6404_s1 + $0x160] sm:$0xff]  ;;  %763 = vmatpush1.msra.mxu0 %v386_v14 }
  0x1c   : > { %v511_v17 = vld [vmem:[%s6404_s1 + $0x568] sm:$0xff]  ;;  %v510_v19 = vld [vmem:[%s6404_s1 + $0x560] sm:$0xff]  ;;  %834 = vmatpush1.msra.mxu1 %v514_v15  ;;  %764 = vmatprep.subr.mxu0 %v383_v16 }
  0x1d   : > { %v379_v20 = vld [vmem:[%s6404_s1 + $0x148] sm:$0xff]  ;;  %835 = vmatprep.subr.mxu1 %v511_v17  ;;  %v378_v22 = vld [vmem:[%s6404_s1 + $0x140] sm:$0xff]  ;;  %765 = vmatpush1.msra.mxu0 %v382_v18 }
  0x1e   : > { %v507_v21 = vld [vmem:[%s6404_s1 + $0x548] sm:$0xff]  ;;  %v506_v23 = vld [vmem:[%s6404_s1 + $0x540] sm:$0xff]  ;;  %836 = vmatpush1.msra.mxu1 %v510_v19  ;;  %766 = vmatprep.subr.mxu0 %v379_v20 }
  0x1f   : > { %v375_v24 = vld [vmem:[%s6404_s1 + $0x128] sm:$0xff]  ;;  %837 = vmatprep.subr.mxu1 %v507_v21  ;;  %v374_v26 = vld [vmem:[%s6404_s1 + $0x120] sm:$0xff]  ;;  %767 = vmatpush1.msra.mxu0 %v378_v22 }
  0x20   : > { %v503_v25 = vld [vmem:[%s6404_s1 + $0x528] sm:$0xff]  ;;  %v502_v27 = vld [vmem:[%s6404_s1 + $0x520] sm:$0xff]  ;;  %838 = vmatpush1.msra.mxu1 %v506_v23  ;;  %768 = vmatprep.subr.mxu0 %v375_v24 }
  0x21   : > { %v371_v28 = vld [vmem:[%s6404_s1 + $0x108] sm:$0xff]  ;;  %839 = vmatprep.subr.mxu1 %v503_v25  ;;  %v370_v30 = vld [vmem:[%s6404_s1 + $0x100] sm:$0xff]  ;;  %769 = vmatpush1.msra.mxu0 %v374_v26 }
  0x22   : > { %v499_v29 = vld [vmem:[%s6404_s1 + $0x508] sm:$0xff]  ;;  %v498_v31 = vld [vmem:[%s6404_s1 + $0x500] sm:$0xff]  ;;  %840 = vmatpush1.msra.mxu1 %v502_v27  ;;  %770 = vmatprep.subr.mxu0 %v371_v28 }
  0x23   : > { %v367_v32 = vld [vmem:[%s6404_s1 + $0xe8] sm:$0xff]  ;;  %841 = vmatprep.subr.mxu1 %v499_v29  ;;  %v366_v34 = vld [vmem:[%s6404_s1 + $0xe0] sm:$0xff]  ;;  %771 = vmatpush1.msra.mxu0 %v370_v30 }
  0x24   : > { %v495_v33 = vld [vmem:[%s6404_s1 + $0x4e8] sm:$0xff]  ;;  %v494_v35 = vld [vmem:[%s6404_s1 + $0x4e0] sm:$0xff]  ;;  %842 = vmatpush1.msra.mxu1 %v498_v31  ;;  %772 = vmatprep.subr.mxu0 %v367_v32 }
  0x25   : > { %v363_v36 = vld [vmem:[%s6404_s1 + $0xc8] sm:$0xff]  ;;  %843 = vmatprep.subr.mxu1 %v495_v33  ;;  %v362_v38 = vld [vmem:[%s6404_s1 + $0xc0] sm:$0xff]  ;;  %773 = vmatpush1.msra.mxu0 %v366_v34 }
  0x26   : > { %v491_v37 = vld [vmem:[%s6404_s1 + $0x4c8] sm:$0xff]  ;;  %v490_v39 = vld [vmem:[%s6404_s1 + $0x4c0] sm:$0xff]  ;;  %844 = vmatpush1.msra.mxu1 %v494_v35  ;;  %774 = vmatprep.subr.mxu0 %v363_v36 }
  0x27   : > { %v359_v40 = vld [vmem:[%s6404_s1 + $0xa8] sm:$0xff]  ;;  %845 = vmatprep.subr.mxu1 %v491_v37  ;;  %v358_v42 = vld [vmem:[%s6404_s1 + $0xa0] sm:$0xff]  ;;  %775 = vmatpush1.msra.mxu0 %v362_v38 }
  0x28   : > { %v487_v41 = vld [vmem:[%s6404_s1 + $0x4a8] sm:$0xff]  ;;  %v486_v43 = vld [vmem:[%s6404_s1 + $0x4a0] sm:$0xff]  ;;  %846 = vmatpush1.msra.mxu1 %v490_v39  ;;  %776 = vmatprep.subr.mxu0 %v359_v40 }
  0x29   : > { %v355_v44 = vld [vmem:[%s6404_s1 + $0x88] sm:$0xff]  ;;  %847 = vmatprep.subr.mxu1 %v487_v41  ;;  %v354_v46 = vld [vmem:[%s6404_s1 + $0x80] sm:$0xff]  ;;  %777 = vmatpush1.msra.mxu0 %v358_v42 }
  0x2a   : > { %v483_v45 = vld [vmem:[%s6404_s1 + $0x488] sm:$0xff]  ;;  %v482_v47 = vld [vmem:[%s6404_s1 + $0x480] sm:$0xff]  ;;  %848 = vmatpush1.msra.mxu1 %v486_v43  ;;  %778 = vmatprep.subr.mxu0 %v355_v44 }
  0x2b   : > { %v351_v48 = vld [vmem:[%s6404_s1 + $0x68] sm:$0xff]  ;;  %849 = vmatprep.subr.mxu1 %v483_v45  ;;  %v350_v50 = vld [vmem:[%s6404_s1 + $0x60] sm:$0xff]  ;;  %779 = vmatpush1.msra.mxu0 %v354_v46 }
  0x2c   : > { %v479_v49 = vld [vmem:[%s6404_s1 + $0x468] sm:$0xff]  ;;  %v478_v51 = vld [vmem:[%s6404_s1 + $0x460] sm:$0xff]  ;;  %850 = vmatpush1.msra.mxu1 %v482_v47  ;;  %780 = vmatprep.subr.mxu0 %v351_v48 }
  0x2d   : > { %v347_v52 = vld [vmem:[%s6404_s1 + $0x48] sm:$0xff]  ;;  %851 = vmatprep.subr.mxu1 %v479_v49  ;;  %v346_v54 = vld [vmem:[%s6404_s1 + $0x40] sm:$0xff]  ;;  %781 = vmatpush1.msra.mxu0 %v350_v50 }
  0x2e   : > { %v475_v53 = vld [vmem:[%s6404_s1 + $0x448] sm:$0xff]  ;;  %v474_v55 = vld [vmem:[%s6404_s1 + $0x440] sm:$0xff]  ;;  %852 = vmatpush1.msra.mxu1 %v478_v51  ;;  %782 = vmatprep.subr.mxu0 %v347_v52 }
  0x2f   : > { %v343_v56 = vld [vmem:[%s6404_s1 + $0x28] sm:$0xff]  ;;  %853 = vmatprep.subr.mxu1 %v475_v53  ;;  %v342_v58 = vld [vmem:[%s6404_s1 + $0x20] sm:$0xff]  ;;  %783 = vmatpush1.msra.mxu0 %v346_v54 }
  0x30   : > { %v471_v57 = vld [vmem:[%s6404_s1 + $0x428] sm:$0xff]  ;;  %v470_v59 = vld [vmem:[%s6404_s1 + $0x420] sm:$0xff]  ;;  %854 = vmatpush1.msra.mxu1 %v474_v55  ;;  %784 = vmatprep.subr.mxu0 %v343_v56 }
  0x31   : > { %v339_v60 = vld [vmem:[%s6404_s1 + $0x8] sm:$0xff]  ;;  %855 = vmatprep.subr.mxu1 %v471_v57  ;;  %v338_v62 = vld [vmem:[%s6404_s1] sm:$0xff]  ;;  %785 = vmatpush1.msra.mxu0 %v342_v58 }
  0x32   : > { %v467_v61 = vld [vmem:[%s6404_s1 + $0x408] sm:$0xff]  ;;  %v466_v63 = vld [vmem:[%s6404_s1 + $0x400] sm:$0xff]  ;;  %856 = vmatpush1.msra.mxu1 %v470_v59  ;;  %786 = vmatprep.subr.mxu0 %v339_v60 }
  0x33   : > { %v463_v0 = vld [vmem:[%s6404_s1 + $0x3e8] sm:$0xff]  ;;  %857 = vmatprep.subr.mxu1 %v467_v61  ;;  %v462_v2 = vld [vmem:[%s6404_s1 + $0x3e0] sm:$0xff]  ;;  %787 = vmatpush1.msra.mxu0 %v338_v62 }
  0x34   : > { %v591_v1 = vld [vmem:[%s6404_s1 + $0x7e8] sm:$0xff]  ;;  %v590_v3 = vld [vmem:[%s6404_s1 + $0x7e0] sm:$0xff]  ;;  %858 = vmatpush1.msra.mxu1 %v466_v63  ;;  %788 = vmatprep.subr.mxu0 %v463_v0 }
  0x35   : > { %v459_v4 = vld [vmem:[%s6404_s1 + $0x3c8] sm:$0xff]  ;;  %859 = vmatprep.subr.mxu1 %v591_v1  ;;  %v458_v6 = vld [vmem:[%s6404_s1 + $0x3c0] sm:$0xff]  ;;  %789 = vmatpush2.msra.mxu0 %v462_v2  ;;  %v334_v1 = vld [vmem:[%s3702_s17 + $0x18] sm:$0xff] }
  0x36   : > { %v587_v5 = vld [vmem:[%s6404_s1 + $0x7c8] sm:$0xff]  ;;  %v586_v7 = vld [vmem:[%s6404_s1 + $0x7c0] sm:$0xff]  ;;  %860 = vmatpush2.msra.mxu1 %v590_v3  ;;  %790 = vmatprep.subr.mxu0 %v459_v4  ;;  %v333_v3 = vld [vmem:[%s3702_s17 + $0x10] sm:$0xff] }
  0x37   : > { %v455_v8 = vld [vmem:[%s6404_s1 + $0x3a8] sm:$0xff]  ;;  %861 = vmatprep.subr.mxu1 %v587_v5  ;;  %v454_v10 = vld [vmem:[%s6404_s1 + $0x3a0] sm:$0xff]  ;;  %791 = vmatpush2.msra.mxu0 %v458_v6 }
  0x38   : > { %v583_v9 = vld [vmem:[%s6404_s1 + $0x7a8] sm:$0xff]  ;;  %v582_v11 = vld [vmem:[%s6404_s1 + $0x7a0] sm:$0xff]  ;;  %862 = vmatpush2.msra.mxu1 %v586_v7  ;;  %792 = vmatprep.subr.mxu0 %v455_v8 }
  0x39   : > { %v451_v12 = vld [vmem:[%s6404_s1 + $0x388] sm:$0xff]  ;;  %863 = vmatprep.subr.mxu1 %v583_v9  ;;  %v450_v14 = vld [vmem:[%s6404_s1 + $0x380] sm:$0xff]  ;;  %793 = vmatpush2.msra.mxu0 %v454_v10 }
  0x3a   : > { %v579_v13 = vld [vmem:[%s6404_s1 + $0x788] sm:$0xff]  ;;  %v578_v15 = vld [vmem:[%s6404_s1 + $0x780] sm:$0xff]  ;;  %864 = vmatpush2.msra.mxu1 %v582_v11  ;;  %794 = vmatprep.subr.mxu0 %v451_v12 }
  0x3b   : > { %v447_v16 = vld [vmem:[%s6404_s1 + $0x368] sm:$0xff]  ;;  %865 = vmatprep.subr.mxu1 %v579_v13  ;;  %v446_v18 = vld [vmem:[%s6404_s1 + $0x360] sm:$0xff]  ;;  %795 = vmatpush2.msra.mxu0 %v450_v14  ;;  %v337_v13 = vld [vmem:[%s3702_s17 + $0x30] sm:$0xff] }
  0x3c   : > { %v575_v17 = vld [vmem:[%s6404_s1 + $0x768] sm:$0xff]  ;;  %v574_v19 = vld [vmem:[%s6404_s1 + $0x760] sm:$0xff]  ;;  %866 = vmatpush2.msra.mxu1 %v578_v15  ;;  %796 = vmatprep.subr.mxu0 %v447_v16  ;;  %v401_v14 = vld [vmem:[%s6404_s1 + $0x1f8] sm:$0xff] }
  0x3d   : > { %v443_v20 = vld [vmem:[%s6404_s1 + $0x348] sm:$0xff]  ;;  %867 = vmatprep.subr.mxu1 %v575_v17  ;;  %v442_v22 = vld [vmem:[%s6404_s1 + $0x340] sm:$0xff]  ;;  %797 = vmatpush2.msra.mxu0 %v446_v18  ;;  %v400_v16 = vld [vmem:[%s6404_s1 + $0x1f0] sm:$0xff]  ;;  %v3226_v17 = vmov 0.0  }
  0x3e   : > { %v571_v21 = vld [vmem:[%s6404_s1 + $0x748] sm:$0xff]  ;;  %v570_v23 = vld [vmem:[%s6404_s1 + $0x740] sm:$0xff]  ;;  %868 = vmatpush2.msra.mxu1 %v574_v19  ;;  %798 = vmatprep.subr.mxu0 %v443_v20  ;;  %v397_v19 = vld [vmem:[%s6404_s1 + $0x1d8] sm:$0xff] }
  0x3f   : > { %v439_v24 = vld [vmem:[%s6404_s1 + $0x328] sm:$0xff]  ;;  %869 = vmatprep.subr.mxu1 %v571_v21  ;;  %v438_v26 = vld [vmem:[%s6404_s1 + $0x320] sm:$0xff]  ;;  %799 = vmatpush2.msra.mxu0 %v442_v22  ;;  %v396_v21 = vld [vmem:[%s6404_s1 + $0x1d0] sm:$0xff] }
  0x40   : > { %v567_v25 = vld [vmem:[%s6404_s1 + $0x728] sm:$0xff]  ;;  %v566_v27 = vld [vmem:[%s6404_s1 + $0x720] sm:$0xff]  ;;  %870 = vmatpush2.msra.mxu1 %v570_v23  ;;  %800 = vmatprep.subr.mxu0 %v439_v24  ;;  %v393_v23 = vld [vmem:[%s6404_s1 + $0x1b8] sm:$0xff] }
  0x41   : > { %v435_v28 = vld [vmem:[%s6404_s1 + $0x308] sm:$0xff]  ;;  %871 = vmatprep.subr.mxu1 %v567_v25  ;;  %v434_v30 = vld [vmem:[%s6404_s1 + $0x300] sm:$0xff]  ;;  %801 = vmatpush2.msra.mxu0 %v438_v26  ;;  %v392_v25 = vld [vmem:[%s6404_s1 + $0x1b0] sm:$0xff] }
  0x42   : > { %v563_v29 = vld [vmem:[%s6404_s1 + $0x708] sm:$0xff]  ;;  %v562_v31 = vld [vmem:[%s6404_s1 + $0x700] sm:$0xff]  ;;  %872 = vmatpush2.msra.mxu1 %v566_v27  ;;  %802 = vmatprep.subr.mxu0 %v435_v28  ;;  %v389_v27 = vld [vmem:[%s6404_s1 + $0x198] sm:$0xff] }
  0x43   : > { %v431_v32 = vld [vmem:[%s6404_s1 + $0x2e8] sm:$0xff]  ;;  %873 = vmatprep.subr.mxu1 %v563_v29  ;;  %v430_v34 = vld [vmem:[%s6404_s1 + $0x2e0] sm:$0xff]  ;;  %803 = vmatpush2.msra.mxu0 %v434_v30  ;;  %v388_v29 = vld [vmem:[%s6404_s1 + $0x190] sm:$0xff] }
  0x44   : > { %v559_v33 = vld [vmem:[%s6404_s1 + $0x6e8] sm:$0xff]  ;;  %v558_v35 = vld [vmem:[%s6404_s1 + $0x6e0] sm:$0xff]  ;;  %874 = vmatpush2.msra.mxu1 %v562_v31  ;;  %804 = vmatprep.subr.mxu0 %v431_v32  ;;  %v385_v31 = vld [vmem:[%s6404_s1 + $0x178] sm:$0xff] }
  0x45   : > { %v427_v36 = vld [vmem:[%s6404_s1 + $0x2c8] sm:$0xff]  ;;  %875 = vmatprep.subr.mxu1 %v559_v33  ;;  %v426_v38 = vld [vmem:[%s6404_s1 + $0x2c0] sm:$0xff]  ;;  %805 = vmatpush2.msra.mxu0 %v430_v34  ;;  %v384_v33 = vld [vmem:[%s6404_s1 + $0x170] sm:$0xff] }
  0x46   : > { %v555_v37 = vld [vmem:[%s6404_s1 + $0x6c8] sm:$0xff]  ;;  %v554_v39 = vld [vmem:[%s6404_s1 + $0x6c0] sm:$0xff]  ;;  %876 = vmatpush2.msra.mxu1 %v558_v35  ;;  %806 = vmatprep.subr.mxu0 %v427_v36  ;;  %v381_v35 = vld [vmem:[%s6404_s1 + $0x158] sm:$0xff] }
  0x47   : > { %v423_v40 = vld [vmem:[%s6404_s1 + $0x2a8] sm:$0xff]  ;;  %877 = vmatprep.subr.mxu1 %v555_v37  ;;  %v422_v42 = vld [vmem:[%s6404_s1 + $0x2a0] sm:$0xff]  ;;  %807 = vmatpush2.msra.mxu0 %v426_v38  ;;  %v380_v37 = vld [vmem:[%s6404_s1 + $0x150] sm:$0xff] }
  0x48   : > { %v551_v41 = vld [vmem:[%s6404_s1 + $0x6a8] sm:$0xff]  ;;  %v550_v43 = vld [vmem:[%s6404_s1 + $0x6a0] sm:$0xff]  ;;  %878 = vmatpush2.msra.mxu1 %v554_v39  ;;  %808 = vmatprep.subr.mxu0 %v423_v40  ;;  %v377_v39 = vld [vmem:[%s6404_s1 + $0x138] sm:$0xff] }
  0x49   : > { %v419_v44 = vld [vmem:[%s6404_s1 + $0x288] sm:$0xff]  ;;  %879 = vmatprep.subr.mxu1 %v551_v41  ;;  %v418_v46 = vld [vmem:[%s6404_s1 + $0x280] sm:$0xff]  ;;  %809 = vmatpush2.msra.mxu0 %v422_v42  ;;  %v376_v41 = vld [vmem:[%s6404_s1 + $0x130] sm:$0xff] }
  0x4a   : > { %v547_v45 = vld [vmem:[%s6404_s1 + $0x688] sm:$0xff]  ;;  %v546_v47 = vld [vmem:[%s6404_s1 + $0x680] sm:$0xff]  ;;  %880 = vmatpush2.msra.mxu1 %v550_v43  ;;  %810 = vmatprep.subr.mxu0 %v419_v44  ;;  %v373_v43 = vld [vmem:[%s6404_s1 + $0x118] sm:$0xff] }
  0x4b   : > { %v415_v48 = vld [vmem:[%s6404_s1 + $0x268] sm:$0xff]  ;;  %881 = vmatprep.subr.mxu1 %v547_v45  ;;  %v414_v50 = vld [vmem:[%s6404_s1 + $0x260] sm:$0xff]  ;;  %811 = vmatpush2.msra.mxu0 %v418_v46  ;;  %v372_v45 = vld [vmem:[%s6404_s1 + $0x110] sm:$0xff] }
  0x4c   : > { %v543_v49 = vld [vmem:[%s6404_s1 + $0x668] sm:$0xff]  ;;  %v542_v51 = vld [vmem:[%s6404_s1 + $0x660] sm:$0xff]  ;;  %882 = vmatpush2.msra.mxu1 %v546_v47  ;;  %812 = vmatprep.subr.mxu0 %v415_v48  ;;  %v369_v47 = vld [vmem:[%s6404_s1 + $0xf8] sm:$0xff] }
  0x4d   : > { %v411_v52 = vld [vmem:[%s6404_s1 + $0x248] sm:$0xff]  ;;  %883 = vmatprep.subr.mxu1 %v543_v49  ;;  %v410_v54 = vld [vmem:[%s6404_s1 + $0x240] sm:$0xff]  ;;  %813 = vmatpush2.msra.mxu0 %v414_v50  ;;  %v368_v49 = vld [vmem:[%s6404_s1 + $0xf0] sm:$0xff] }
  0x4e   : > { %v539_v53 = vld [vmem:[%s6404_s1 + $0x648] sm:$0xff]  ;;  %v538_v55 = vld [vmem:[%s6404_s1 + $0x640] sm:$0xff]  ;;  %884 = vmatpush2.msra.mxu1 %v542_v51  ;;  %814 = vmatprep.subr.mxu0 %v411_v52  ;;  %v365_v51 = vld [vmem:[%s6404_s1 + $0xd8] sm:$0xff] }
  0x4f   : > { %v407_v56 = vld [vmem:[%s6404_s1 + $0x228] sm:$0xff]  ;;  %885 = vmatprep.subr.mxu1 %v539_v53  ;;  %v406_v58 = vld [vmem:[%s6404_s1 + $0x220] sm:$0xff]  ;;  %815 = vmatpush2.msra.mxu0 %v410_v54  ;;  %v364_v53 = vld [vmem:[%s6404_s1 + $0xd0] sm:$0xff] }
  0x50   : > { %v535_v57 = vld [vmem:[%s6404_s1 + $0x628] sm:$0xff]  ;;  %v534_v59 = vld [vmem:[%s6404_s1 + $0x620] sm:$0xff]  ;;  %886 = vmatpush2.msra.mxu1 %v538_v55  ;;  %816 = vmatprep.subr.mxu0 %v407_v56  ;;  %v361_v55 = vld [vmem:[%s6404_s1 + $0xb8] sm:$0xff] }
  0x51   : > { %v403_v60 = vld [vmem:[%s6404_s1 + $0x208] sm:$0xff]  ;;  %887 = vmatprep.subr.mxu1 %v535_v57  ;;  %v402_v62 = vld [vmem:[%s6404_s1 + $0x200] sm:$0xff]  ;;  %817 = vmatpush2.msra.mxu0 %v406_v58  ;;  %v360_v57 = vld [vmem:[%s6404_s1 + $0xb0] sm:$0xff] }
  0x52   : > { %v531_v61 = vld [vmem:[%s6404_s1 + $0x608] sm:$0xff]  ;;  %888 = vmatpush2.msra.mxu1 %v534_v59  ;;  %v530_v0 = vld [vmem:[%s6404_s1 + $0x600] sm:$0xff]  ;;  %818 = vmatprep.subr.mxu0 %v403_v60  ;;  %v357_v59 = vld [vmem:[%s6404_s1 + $0x98] sm:$0xff] }
  0x53   : > { %v3720_v63 = vld [vmem:[%s3702_s17 + $0x8] sm:$0xff]  ;;  %889 = vmatprep.subr.mxu1 %v531_v61  ;;  %v3727_v2 = vld [vmem:[%s3702_s17] sm:$0xff]  ;;  %819 = vmatpush2.msra.mxu0 %v402_v62  ;;  %v356_v61 = vld [vmem:[%s6404_s1 + $0x90] sm:$0xff] }
  0x54   : > { %820 = vmatprep.mubr.f32.mxu0 %v3720_v63  ;;  %v655_v4 = vld [vmem:[%s6404_s1 + $0x9e8] sm:$0xff]  ;;  %890 = vmatpush2.msra.mxu1 %v530_v0  ;;  %v654_v6 = vld [vmem:[%s6404_s1 + $0x9e0] sm:$0xff]  ;;  %v353_v0 = vld [vmem:[%s6404_s1 + $0x78] sm:$0xff] }
  0x55   : > { %v727_v5 = vld [vmem:[%s6404_s1 + $0xc28] sm:$0xff]  ;;  %891 = vmatprep.mubr.f32.mxu1 %v334_v1  ;;  %v726_v7 = vld [vmem:[%s6404_s1 + $0xc20] sm:$0xff]  ;;  %821 = vmatmul.mubr.f32.vlgmr.msra.gmra.mxu0 %v3727_v2 }
  0x56   : > { %892 = vmatmul.mubr.f32.vlgmr.msra.gmra.mxu1 %v333_v3  ;;  %v651_v8 = vld [vmem:[%s6404_s1 + $0x9c8] sm:$0xff]  ;;  %898 = vmatprep.subr.mxu0 %v655_v4  ;;  %v650_v10 = vld [vmem:[%s6404_s1 + $0x9c0] sm:$0xff]  ;;  %v352_v3 = vld [vmem:[%s6404_s1 + $0x70] sm:$0xff] }
  0x57   : > { %v723_v9 = vld [vmem:[%s6404_s1 + $0xc08] sm:$0xff]  ;;  %997 = vmatprep.subr.mxu1 %v727_v5  ;;  %v722_v11 = vld [vmem:[%s6404_s1 + $0xc00] sm:$0xff]  ;;  %899 = vmatpush1.msra.mxu0 %v654_v6  ;;  %v349_v5 = vld [vmem:[%s6404_s1 + $0x58] sm:$0xff] }
  0x58   : > { %998 = vmatpush1.msra.mxu1 %v726_v7  ;;  %v647_v12 = vld [vmem:[%s6404_s1 + $0x9a8] sm:$0xff]  ;;  %900 = vmatprep.subr.mxu0 %v651_v8  ;;  %v646_v15 = vld [vmem:[%s6404_s1 + $0x9a0] sm:$0xff]  ;;  %v348_v7 = vld [vmem:[%s6404_s1 + $0x50] sm:$0xff] }
  0x59   : > { %999 = vmatprep.subr.mxu1 %v723_v9  ;;  %901 = vmatpush1.msra.mxu0 %v650_v10  ;;  %v643_v18 = vld [vmem:[%s6404_s1 + $0x988] sm:$0xff]  ;;  %v642_v20 = vld [vmem:[%s6404_s1 + $0x980] sm:$0xff]  ;;  %v345_v9 = vld [vmem:[%s6404_s1 + $0x38] sm:$0xff] }
  0x5a   : > { %1000 = vmatpush1.msra.mxu1 %v722_v11  ;;  %1033 = vmatprep.mubr.f32.mxu1 %v3226_v17  ;;  %v639_v22 = vld [vmem:[%s6404_s1 + $0x968] sm:$0xff]  ;;  %v638_v24 = vld [vmem:[%s6404_s1 + $0x960] sm:$0xff]  ;;  %v344_v11 = vld [vmem:[%s6404_s1 + $0x30] sm:$0xff] }
  0x5b   : > { %902 = vmatprep.subr.mxu0 %v647_v12  ;;  %2944 = vmatmul.mubr.msk.f32.vlgmr.msra.gmra.mxu1 %vm752_vm0, %v337_v13  ;;  %v635_v26 = vld [vmem:[%s6404_s1 + $0x948] sm:$0xff]  ;;  %v634_v28 = vld [vmem:[%s6404_s1 + $0x940] sm:$0xff]  ;;  %v341_v13 = vld [vmem:[%s6404_s1 + $0x18] sm:$0xff] }
  0x5c   : > { %1040 = vmatprep.subr.mxu1 %v401_v14  ;;  %903 = vmatpush1.msra.mxu0 %v646_v15  ;;  %v631_v30 = vld [vmem:[%s6404_s1 + $0x928] sm:$0xff]  ;;  %v630_v32 = vld [vmem:[%s6404_s1 + $0x920] sm:$0xff]  ;;  %v340_v15 = vld [vmem:[%s6404_s1 + $0x10] sm:$0xff] }
  0x5d   : > { %1041 = vmatpush1.msra.mxu1 %v400_v16  ;;  %904 = vmatprep.subr.mxu0 %v643_v18  ;;  %v627_v34 = vld [vmem:[%s6404_s1 + $0x908] sm:$0xff]  ;;  %v626_v36 = vld [vmem:[%s6404_s1 + $0x900] sm:$0xff]  ;;  %v465_v18 = vld [vmem:[%s6404_s1 + $0x3f8] sm:$0xff] }
  0x5e   : > { %1042 = vmatprep.subr.mxu1 %v397_v19  ;;  %905 = vmatpush1.msra.mxu0 %v642_v20  ;;  %v623_v38 = vld [vmem:[%s6404_s1 + $0x8e8] sm:$0xff]  ;;  %v622_v40 = vld [vmem:[%s6404_s1 + $0x8e0] sm:$0xff]  ;;  %v464_v20 = vld [vmem:[%s6404_s1 + $0x3f0] sm:$0xff] }
  0x5f   : > { %1043 = vmatpush1.msra.mxu1 %v396_v21  ;;  %906 = vmatprep.subr.mxu0 %v639_v22  ;;  %v619_v42 = vld [vmem:[%s6404_s1 + $0x8c8] sm:$0xff]  ;;  %v618_v44 = vld [vmem:[%s6404_s1 + $0x8c0] sm:$0xff]  ;;  %v461_v22 = vld [vmem:[%s6404_s1 + $0x3d8] sm:$0xff] }
  0x60   : > { %1044 = vmatprep.subr.mxu1 %v393_v23  ;;  %907 = vmatpush1.msra.mxu0 %v638_v24  ;;  %v615_v46 = vld [vmem:[%s6404_s1 + $0x8a8] sm:$0xff]  ;;  %v614_v48 = vld [vmem:[%s6404_s1 + $0x8a0] sm:$0xff]  ;;  %v460_v24 = vld [vmem:[%s6404_s1 + $0x3d0] sm:$0xff] }
  0x61   : > { %1045 = vmatpush1.msra.mxu1 %v392_v25  ;;  %908 = vmatprep.subr.mxu0 %v635_v26  ;;  %v611_v50 = vld [vmem:[%s6404_s1 + $0x888] sm:$0xff]  ;;  %v610_v52 = vld [vmem:[%s6404_s1 + $0x880] sm:$0xff]  ;;  %v457_v26 = vld [vmem:[%s6404_s1 + $0x3b8] sm:$0xff] }
  0x62   : > { %1046 = vmatprep.subr.mxu1 %v389_v27  ;;  %909 = vmatpush1.msra.mxu0 %v634_v28  ;;  %v607_v54 = vld [vmem:[%s6404_s1 + $0x868] sm:$0xff]  ;;  %v606_v56 = vld [vmem:[%s6404_s1 + $0x860] sm:$0xff]  ;;  %v456_v28 = vld [vmem:[%s6404_s1 + $0x3b0] sm:$0xff] }
  0x63   : > { %1047 = vmatpush1.msra.mxu1 %v388_v29  ;;  %910 = vmatprep.subr.mxu0 %v631_v30  ;;  %v603_v58 = vld [vmem:[%s6404_s1 + $0x848] sm:$0xff]  ;;  %v602_v60 = vld [vmem:[%s6404_s1 + $0x840] sm:$0xff]  ;;  %v453_v30 = vld [vmem:[%s6404_s1 + $0x398] sm:$0xff] }
  0x64   : > { %1048 = vmatprep.subr.mxu1 %v385_v31  ;;  %911 = vmatpush1.msra.mxu0 %v630_v32  ;;  %v599_v62 = vld [vmem:[%s6404_s1 + $0x828] sm:$0xff]  ;;  %v598_v1 = vld [vmem:[%s6404_s1 + $0x820] sm:$0xff]  ;;  %v452_v32 = vld [vmem:[%s6404_s1 + $0x390] sm:$0xff] }
  0x65   : > { %1049 = vmatpush1.msra.mxu1 %v384_v33  ;;  %912 = vmatprep.subr.mxu0 %v627_v34  ;;  %v595_v4 = vld [vmem:[%s6404_s1 + $0x808] sm:$0xff]  ;;  %v594_v6 = vld [vmem:[%s6404_s1 + $0x800] sm:$0xff]  ;;  %v449_v34 = vld [vmem:[%s6404_s1 + $0x378] sm:$0xff] }
  0x66   : > { %1050 = vmatprep.subr.mxu1 %v381_v35  ;;  %913 = vmatpush1.msra.mxu0 %v626_v36  ;;  %v719_v8 = vld [vmem:[%s6404_s1 + $0xbe8] sm:$0xff]  ;;  %v718_v10 = vld [vmem:[%s6404_s1 + $0xbe0] sm:$0xff]  ;;  %v448_v36 = vld [vmem:[%s6404_s1 + $0x370] sm:$0xff] }
  0x67   : > { %1051 = vmatpush1.msra.mxu1 %v380_v37  ;;  %914 = vmatprep.subr.mxu0 %v623_v38  ;;  %v715_v12 = vld [vmem:[%s6404_s1 + $0xbc8] sm:$0xff]  ;;  %v714_v14 = vld [vmem:[%s6404_s1 + $0xbc0] sm:$0xff]  ;;  %v445_v38 = vld [vmem:[%s6404_s1 + $0x358] sm:$0xff] }
  0x68   : > { %1052 = vmatprep.subr.mxu1 %v377_v39  ;;  %915 = vmatpush1.msra.mxu0 %v622_v40  ;;  %v711_v16 = vld [vmem:[%s6404_s1 + $0xba8] sm:$0xff]  ;;  %v710_v19 = vld [vmem:[%s6404_s1 + $0xba0] sm:$0xff]  ;;  %v444_v40 = vld [vmem:[%s6404_s1 + $0x350] sm:$0xff] }
  0x69   : > { %1053 = vmatpush1.msra.mxu1 %v376_v41  ;;  %916 = vmatprep.subr.mxu0 %v619_v42  ;;  %v707_v21 = vld [vmem:[%s6404_s1 + $0xb88] sm:$0xff]  ;;  %v706_v23 = vld [vmem:[%s6404_s1 + $0xb80] sm:$0xff]  ;;  %v441_v42 = vld [vmem:[%s6404_s1 + $0x338] sm:$0xff] }
  0x6a   : > { %1054 = vmatprep.subr.mxu1 %v373_v43  ;;  %917 = vmatpush1.msra.mxu0 %v618_v44  ;;  %v703_v25 = vld [vmem:[%s6404_s1 + $0xb68] sm:$0xff]  ;;  %v702_v27 = vld [vmem:[%s6404_s1 + $0xb60] sm:$0xff]  ;;  %v440_v44 = vld [vmem:[%s6404_s1 + $0x330] sm:$0xff] }
  0x6b   : > { %1055 = vmatpush1.msra.mxu1 %v372_v45  ;;  %918 = vmatprep.subr.mxu0 %v615_v46  ;;  %v699_v29 = vld [vmem:[%s6404_s1 + $0xb48] sm:$0xff]  ;;  %v698_v31 = vld [vmem:[%s6404_s1 + $0xb40] sm:$0xff]  ;;  %v437_v46 = vld [vmem:[%s6404_s1 + $0x318] sm:$0xff] }
  0x6c   : > { %1056 = vmatprep.subr.mxu1 %v369_v47  ;;  %919 = vmatpush1.msra.mxu0 %v614_v48  ;;  %v695_v33 = vld [vmem:[%s6404_s1 + $0xb28] sm:$0xff]  ;;  %v694_v35 = vld [vmem:[%s6404_s1 + $0xb20] sm:$0xff]  ;;  %v436_v48 = vld [vmem:[%s6404_s1 + $0x310] sm:$0xff] }
  0x6d   : > { %1057 = vmatpush1.msra.mxu1 %v368_v49  ;;  %920 = vmatprep.subr.mxu0 %v611_v50  ;;  %v691_v37 = vld [vmem:[%s6404_s1 + $0xb08] sm:$0xff]  ;;  %v690_v39 = vld [vmem:[%s6404_s1 + $0xb00] sm:$0xff]  ;;  %v433_v50 = vld [vmem:[%s6404_s1 + $0x2f8] sm:$0xff] }
  0x6e   : > { %1058 = vmatprep.subr.mxu1 %v365_v51  ;;  %921 = vmatpush1.msra.mxu0 %v610_v52  ;;  %v687_v41 = vld [vmem:[%s6404_s1 + $0xae8] sm:$0xff]  ;;  %v686_v43 = vld [vmem:[%s6404_s1 + $0xae0] sm:$0xff]  ;;  %v432_v52 = vld [vmem:[%s6404_s1 + $0x2f0] sm:$0xff] }
  0x6f   : > { %1059 = vmatpush1.msra.mxu1 %v364_v53  ;;  %922 = vmatprep.subr.mxu0 %v607_v54  ;;  %v683_v45 = vld [vmem:[%s6404_s1 + $0xac8] sm:$0xff]  ;;  %v682_v47 = vld [vmem:[%s6404_s1 + $0xac0] sm:$0xff]  ;;  %v429_v54 = vld [vmem:[%s6404_s1 + $0x2d8] sm:$0xff] }
  0x70   : > { %1060 = vmatprep.subr.mxu1 %v361_v55  ;;  %923 = vmatpush1.msra.mxu0 %v606_v56  ;;  %v679_v49 = vld [vmem:[%s6404_s1 + $0xaa8] sm:$0xff]  ;;  %v678_v51 = vld [vmem:[%s6404_s1 + $0xaa0] sm:$0xff]  ;;  %v428_v56 = vld [vmem:[%s6404_s1 + $0x2d0] sm:$0xff] }
  0x71   : > { %1061 = vmatpush1.msra.mxu1 %v360_v57  ;;  %924 = vmatprep.subr.mxu0 %v603_v58  ;;  %v675_v53 = vld [vmem:[%s6404_s1 + $0xa88] sm:$0xff]  ;;  %v674_v55 = vld [vmem:[%s6404_s1 + $0xa80] sm:$0xff]  ;;  %v425_v58 = vld [vmem:[%s6404_s1 + $0x2b8] sm:$0xff] }
  0x72   : > { %1062 = vmatprep.subr.mxu1 %v357_v59  ;;  %925 = vmatpush1.msra.mxu0 %v602_v60  ;;  %v671_v57 = vld [vmem:[%s6404_s1 + $0xa68] sm:$0xff]  ;;  %v670_v59 = vld [vmem:[%s6404_s1 + $0xa60] sm:$0xff]  ;;  %v424_v60 = vld [vmem:[%s6404_s1 + $0x2b0] sm:$0xff] }
  0x73   : > { %1063 = vmatpush1.msra.mxu1 %v356_v61  ;;  %926 = vmatprep.subr.mxu0 %v599_v62  ;;  %v667_v61 = vld [vmem:[%s6404_s1 + $0xa48] sm:$0xff]  ;;  %v421_v62 = vld [vmem:[%s6404_s1 + $0x298] sm:$0xff] }
  0x74   : > { %1064 = vmatprep.subr.mxu1 %v353_v0  ;;  %927 = vmatpush1.msra.mxu0 %v598_v1  ;;  %v666_v0 = vld [vmem:[%s6404_s1 + $0xa40] sm:$0xff]  ;;  %v420_v1 = vld [vmem:[%s6404_s1 + $0x290] sm:$0xff] }
  0x75   : > { %1065 = vmatpush1.msra.mxu1 %v352_v3  ;;  %928 = vmatprep.subr.mxu0 %v595_v4  ;;  %v663_v3 = vld [vmem:[%s6404_s1 + $0xa28] sm:$0xff]  ;;  %v417_v4 = vld [vmem:[%s6404_s1 + $0x278] sm:$0xff] }
  0x76   : > { %1066 = vmatprep.subr.mxu1 %v349_v5  ;;  %929 = vmatpush1.msra.mxu0 %v594_v6  ;;  %v662_v5 = vld [vmem:[%s6404_s1 + $0xa20] sm:$0xff]  ;;  %v416_v6 = vld [vmem:[%s6404_s1 + $0x270] sm:$0xff] }
  0x77   : > { %1067 = vmatpush1.msra.mxu1 %v348_v7  ;;  %930 = vmatprep.subr.mxu0 %v719_v8  ;;  %v659_v7 = vld [vmem:[%s6404_s1 + $0xa08] sm:$0xff]  ;;  %v413_v8 = vld [vmem:[%s6404_s1 + $0x258] sm:$0xff] }
  0x78   : > { %1068 = vmatprep.subr.mxu1 %v345_v9  ;;  %931 = vmatpush2.msra.mxu0 %v718_v10  ;;  %v658_v9 = vld [vmem:[%s6404_s1 + $0xa00] sm:$0xff]  ;;  %v4117_v10 = vld [vmem:[%s3702_s17 + $0x28] sm:$0xff] }
  0x79   : > { %1069 = vmatpush1.msra.mxu1 %v344_v11  ;;  %932 = vmatprep.subr.mxu0 %v715_v12  ;;  %v412_v11 = vld [vmem:[%s6404_s1 + $0x250] sm:$0xff]  ;;  %v4123_v12 = vld [vmem:[%s3702_s17 + $0x20] sm:$0xff] }
  0x7a   : > { %1070 = vmatprep.subr.mxu1 %v341_v13  ;;  %933 = vmatpush2.msra.mxu0 %v714_v14  ;;  %v409_v13 = vld [vmem:[%s6404_s1 + $0x238] sm:$0xff] }
  0x7b   : > { %1071 = vmatpush1.msra.mxu1 %v340_v15  ;;  %934 = vmatprep.subr.mxu0 %v711_v16  ;;  %v529_v14 = vld [vmem:[%s6404_s1 + $0x5f8] sm:$0xff]  ;;  %v408_v15 = vld [vmem:[%s6404_s1 + $0x230] sm:$0xff] }
  0x7c   : > { %1072 = vmatprep.subr.mxu1 %v465_v18  ;;  %935 = vmatpush2.msra.mxu0 %v710_v19  ;;  %v528_v16 = vld [vmem:[%s6404_s1 + $0x5f0] sm:$0xff]  ;;  %v405_v18 = vld [vmem:[%s6404_s1 + $0x218] sm:$0xff] }
  0x7d   : > { %1073 = vmatpush2.msra.mxu1 %v464_v20  ;;  %936 = vmatprep.subr.mxu0 %v707_v21  ;;  %v525_v19 = vld [vmem:[%s6404_s1 + $0x5d8] sm:$0xff]  ;;  %v404_v20 = vld [vmem:[%s6404_s1 + $0x210] sm:$0xff] }
  0x7e   : > { %1074 = vmatprep.subr.mxu1 %v461_v22  ;;  %937 = vmatpush2.msra.mxu0 %v706_v23  ;;  %v524_v21 = vld [vmem:[%s6404_s1 + $0x5d0] sm:$0xff]  ;;  %v521_v22 = vld [vmem:[%s6404_s1 + $0x5b8] sm:$0xff] }
  0x7f   : > { %1075 = vmatpush2.msra.mxu1 %v460_v24  ;;  %938 = vmatprep.subr.mxu0 %v703_v25  ;;  %v657_v23 = vld [vmem:[%s6404_s1 + $0x9f8] sm:$0xff]  ;;  %v520_v24 = vld [vmem:[%s6404_s1 + $0x5b0] sm:$0xff] }
  0x80   : > { %1076 = vmatprep.subr.mxu1 %v457_v26  ;;  %939 = vmatpush2.msra.mxu0 %v702_v27  ;;  %v656_v25 = vld [vmem:[%s6404_s1 + $0x9f0] sm:$0xff]  ;;  %v517_v26 = vld [vmem:[%s6404_s1 + $0x598] sm:$0xff] }
  0x81   : > { %1077 = vmatpush2.msra.mxu1 %v456_v28  ;;  %940 = vmatprep.subr.mxu0 %v699_v29  ;;  %v653_v27 = vld [vmem:[%s6404_s1 + $0x9d8] sm:$0xff]  ;;  %v652_v28 = vld [vmem:[%s6404_s1 + $0x9d0] sm:$0xff] }
  0x82   : > { %1078 = vmatprep.subr.mxu1 %v453_v30  ;;  %941 = vmatpush2.msra.mxu0 %v698_v31  ;;  %v649_v29 = vld [vmem:[%s6404_s1 + $0x9b8] sm:$0xff]  ;;  %v512_v30 = vld [vmem:[%s6404_s1 + $0x570] sm:$0xff] }
  0x83   : > { %1079 = vmatpush2.msra.mxu1 %v452_v32  ;;  %942 = vmatprep.subr.mxu0 %v695_v33  ;;  %v648_v31 = vld [vmem:[%s6404_s1 + $0x9b0] sm:$0xff]  ;;  %v509_v32 = vld [vmem:[%s6404_s1 + $0x558] sm:$0xff] }
  0x84   : > { %1080 = vmatprep.subr.mxu1 %v449_v34  ;;  %943 = vmatpush2.msra.mxu0 %v694_v35  ;;  %v645_v33 = vld [vmem:[%s6404_s1 + $0x998] sm:$0xff]  ;;  %v508_v34 = vld [vmem:[%s6404_s1 + $0x550] sm:$0xff] }
  0x85   : > { %1081 = vmatpush2.msra.mxu1 %v448_v36  ;;  %944 = vmatprep.subr.mxu0 %v691_v37  ;;  %v644_v35 = vld [vmem:[%s6404_s1 + $0x990] sm:$0xff]  ;;  %v505_v36 = vld [vmem:[%s6404_s1 + $0x538] sm:$0xff] }
  0x86   : > { %1082 = vmatprep.subr.mxu1 %v445_v38  ;;  %945 = vmatpush2.msra.mxu0 %v690_v39  ;;  %v641_v37 = vld [vmem:[%s6404_s1 + $0x978] sm:$0xff]  ;;  %v504_v38 = vld [vmem:[%s6404_s1 + $0x530] sm:$0xff] }
  0x87   : > { %1083 = vmatpush2.msra.mxu1 %v444_v40  ;;  %946 = vmatprep.subr.mxu0 %v687_v41  ;;  %v640_v39 = vld [vmem:[%s6404_s1 + $0x970] sm:$0xff]  ;;  %v501_v40 = vld [vmem:[%s6404_s1 + $0x518] sm:$0xff] }
  0x88   : > { %1084 = vmatprep.subr.mxu1 %v441_v42  ;;  %947 = vmatpush2.msra.mxu0 %v686_v43  ;;  %v637_v41 = vld [vmem:[%s6404_s1 + $0x958] sm:$0xff]  ;;  %v500_v42 = vld [vmem:[%s6404_s1 + $0x510] sm:$0xff] }
  0x89   : > { %1085 = vmatpush2.msra.mxu1 %v440_v44  ;;  %948 = vmatprep.subr.mxu0 %v683_v45  ;;  %v636_v43 = vld [vmem:[%s6404_s1 + $0x950] sm:$0xff]  ;;  %v497_v44 = vld [vmem:[%s6404_s1 + $0x4f8] sm:$0xff] }
  0x8a   : > { %1086 = vmatprep.subr.mxu1 %v437_v46  ;;  %949 = vmatpush2.msra.mxu0 %v682_v47  ;;  %v633_v45 = vld [vmem:[%s6404_s1 + $0x938] sm:$0xff]  ;;  %v496_v46 = vld [vmem:[%s6404_s1 + $0x4f0] sm:$0xff] }
  0x8b   : > { %1087 = vmatpush2.msra.mxu1 %v436_v48  ;;  %950 = vmatprep.subr.mxu0 %v679_v49  ;;  %v632_v47 = vld [vmem:[%s6404_s1 + $0x930] sm:$0xff]  ;;  %v493_v48 = vld [vmem:[%s6404_s1 + $0x4d8] sm:$0xff] }
  0x8c   : > { %1088 = vmatprep.subr.mxu1 %v433_v50  ;;  %951 = vmatpush2.msra.mxu0 %v678_v51  ;;  %v629_v49 = vld [vmem:[%s6404_s1 + $0x918] sm:$0xff]  ;;  %v492_v50 = vld [vmem:[%s6404_s1 + $0x4d0] sm:$0xff] }
  0x8d   : > { %1089 = vmatpush2.msra.mxu1 %v432_v52  ;;  %952 = vmatprep.subr.mxu0 %v675_v53  ;;  %v628_v51 = vld [vmem:[%s6404_s1 + $0x910] sm:$0xff]  ;;  %v489_v52 = vld [vmem:[%s6404_s1 + $0x4b8] sm:$0xff] }
  0x8e   : > { %1090 = vmatprep.subr.mxu1 %v429_v54  ;;  %953 = vmatpush2.msra.mxu0 %v674_v55  ;;  %v625_v53 = vld [vmem:[%s6404_s1 + $0x8f8] sm:$0xff]  ;;  %v488_v54 = vld [vmem:[%s6404_s1 + $0x4b0] sm:$0xff] }
  0x8f   : > { %1091 = vmatpush2.msra.mxu1 %v428_v56  ;;  %954 = vmatprep.subr.mxu0 %v671_v57  ;;  %v624_v55 = vld [vmem:[%s6404_s1 + $0x8f0] sm:$0xff]  ;;  %v485_v56 = vld [vmem:[%s6404_s1 + $0x498] sm:$0xff] }
  0x90   : > { %1092 = vmatprep.subr.mxu1 %v425_v58  ;;  %955 = vmatpush2.msra.mxu0 %v670_v59  ;;  %v621_v57 = vld [vmem:[%s6404_s1 + $0x8d8] sm:$0xff]  ;;  %v484_v58 = vld [vmem:[%s6404_s1 + $0x490] sm:$0xff] }
  0x91   : > { %1093 = vmatpush2.msra.mxu1 %v424_v60  ;;  %956 = vmatprep.subr.mxu0 %v667_v61  ;;  %v620_v59 = vld [vmem:[%s6404_s1 + $0x8d0] sm:$0xff]  ;;  %v481_v60 = vld [vmem:[%s6404_s1 + $0x478] sm:$0xff] }
  0x92   : > { %1094 = vmatprep.subr.mxu1 %v421_v62  ;;  %957 = vmatpush2.msra.mxu0 %v666_v0  ;;  %v617_v61 = vld [vmem:[%s6404_s1 + $0x8b8] sm:$0xff]  ;;  %v480_v62 = vld [vmem:[%s6404_s1 + $0x470] sm:$0xff] }
  0x93   : > { %1095 = vmatpush2.msra.mxu1 %v420_v1  ;;  %958 = vmatprep.subr.mxu0 %v663_v3  ;;  %v616_v0 = vld [vmem:[%s6404_s1 + $0x8b0] sm:$0xff]  ;;  %v477_v1 = vld [vmem:[%s6404_s1 + $0x458] sm:$0xff] }
  0x94   : > { %1096 = vmatprep.subr.mxu1 %v417_v4  ;;  %959 = vmatpush2.msra.mxu0 %v662_v5  ;;  %v613_v3 = vld [vmem:[%s6404_s1 + $0x898] sm:$0xff]  ;;  %v476_v4 = vld [vmem:[%s6404_s1 + $0x450] sm:$0xff] }
  0x95   : > { %1097 = vmatpush2.msra.mxu1 %v416_v6  ;;  %960 = vmatprep.subr.mxu0 %v659_v7  ;;  %v612_v5 = vld [vmem:[%s6404_s1 + $0x890] sm:$0xff]  ;;  %v473_v6 = vld [vmem:[%s6404_s1 + $0x438] sm:$0xff] }
  0x96   : > { %1098 = vmatprep.subr.mxu1 %v413_v8  ;;  %961 = vmatpush2.msra.mxu0 %v658_v9  ;;  %v609_v7 = vld [vmem:[%s6404_s1 + $0x878] sm:$0xff]  ;;  %v472_v8 = vld [vmem:[%s6404_s1 + $0x430] sm:$0xff] }
  0x97   : > { %962 = vmatprep.mubr.f32.mxu0 %v4117_v10  ;;  %1099 = vmatpush2.msra.mxu1 %v412_v11  ;;  %v608_v9 = vld [vmem:[%s6404_s1 + $0x870] sm:$0xff]  ;;  %v469_v11 = vld [vmem:[%s6404_s1 + $0x418] sm:$0xff] }
  0x98   : > { %963 = vmatmul.mubr.f32.vlgmr.msra.gmra.mxu0 %v4123_v12  ;;  %1100 = vmatprep.subr.mxu1 %v409_v13  ;;  %v605_v13 = vld [vmem:[%s6404_s1 + $0x858] sm:$0xff] }
  0x99   : > { %1111 = vmatprep.subr.mxu0 %v529_v14  ;;  %1101 = vmatpush2.msra.mxu1 %v408_v15  ;;  %v468_v14 = vld [vmem:[%s6404_s1 + $0x410] sm:$0xff] }
  0x9a   : > { %1112 = vmatpush1.msra.mxu0 %v528_v16  ;;  %1102 = vmatprep.subr.mxu1 %v405_v18  ;;  %v604_v15 = vld [vmem:[%s6404_s1 + $0x850] sm:$0xff]  ;;  %v593_v16 = vld [vmem:[%s6404_s1 + $0x7f8] sm:$0xff] }
  0x9b   : > { %1113 = vmatprep.subr.mxu0 %v525_v19  ;;  %1103 = vmatpush2.msra.mxu1 %v404_v20  ;;  %v601_v18 = vld [vmem:[%s6404_s1 + $0x838] sm:$0xff]  ;;  %v592_v19 = vld [vmem:[%s6404_s1 + $0x7f0] sm:$0xff] }
  0x9c   : > { %1104 = vmatprep.mubr.f32.mxu1 %v3720_v63  ;;  %1114 = vmatpush1.msra.mxu0 %v524_v21  ;;  %v516_v63 = vld [vmem:[%s6404_s1 + $0x590] sm:$0xff]  ;;  %v589_v21 = vld [vmem:[%s6404_s1 + $0x7d8] sm:$0xff] }
  0x9d   : > { %1105 = vmatmul.mubr.f32.vlgmr.msra.gmra.mxu1 %v3727_v2  ;;  %1115 = vmatprep.subr.mxu0 %v521_v22  ;;  %v513_v2 = vld [vmem:[%s6404_s1 + $0x578] sm:$0xff]  ;;  %v600_v20 = vld [vmem:[%s6404_s1 + $0x830] sm:$0xff] }
  0x9e   : > { %1182 = vmatprep.subr.mxu1 %v657_v23  ;;  %1116 = vmatpush1.msra.mxu0 %v520_v24  ;;  %v597_v22 = vld [vmem:[%s6404_s1 + $0x818] sm:$0xff]  ;;  %v588_v23 = vld [vmem:[%s6404_s1 + $0x7d0] sm:$0xff] }
  0x9f   : > { %1183 = vmatpush1.msra.mxu1 %v656_v25  ;;  %1117 = vmatprep.subr.mxu0 %v517_v26  ;;  %v596_v24 = vld [vmem:[%s6404_s1 + $0x810] sm:$0xff]  ;;  %v585_v25 = vld [vmem:[%s6404_s1 + $0x7b8] sm:$0xff] }
  0xa0   : > { %1184 = vmatprep.subr.mxu1 %v653_v27  ;;  %1118 = vmatpush1.msra.mxu0 %v516_v63  ;;  %v721_v26 = vld [vmem:[%s6404_s1 + $0xbf8] sm:$0xff]  ;;  %v584_v27 = vld [vmem:[%s6404_s1 + $0x7b0] sm:$0xff] }
  0xa1   : > { %1185 = vmatpush1.msra.mxu1 %v652_v28  ;;  %1119 = vmatprep.subr.mxu0 %v513_v2  ;;  %v720_v63 = vld [vmem:[%s6404_s1 + $0xbf0] sm:$0xff]  ;;  %v581_v28 = vld [vmem:[%s6404_s1 + $0x798] sm:$0xff] }
  0xa2   : > { %1186 = vmatprep.subr.mxu1 %v649_v29  ;;  %1120 = vmatpush1.msra.mxu0 %v512_v30  ;;  %v717_v2 = vld [vmem:[%s6404_s1 + $0xbd8] sm:$0xff]  ;;  %v580_v29 = vld [vmem:[%s6404_s1 + $0x790] sm:$0xff] }
  0xa3   : > { %1187 = vmatpush1.msra.mxu1 %v648_v31  ;;  %1121 = vmatprep.subr.mxu0 %v509_v32  ;;  %v716_v30 = vld [vmem:[%s6404_s1 + $0xbd0] sm:$0xff]  ;;  %v577_v31 = vld [vmem:[%s6404_s1 + $0x778] sm:$0xff] }
  0xa4   : > { %1188 = vmatprep.subr.mxu1 %v645_v33  ;;  %1122 = vmatpush1.msra.mxu0 %v508_v34  ;;  %v713_v32 = vld [vmem:[%s6404_s1 + $0xbb8] sm:$0xff]  ;;  %v576_v33 = vld [vmem:[%s6404_s1 + $0x770] sm:$0xff] }
  0xa5   : > { %1189 = vmatpush1.msra.mxu1 %v644_v35  ;;  %1123 = vmatprep.subr.mxu0 %v505_v36  ;;  %v712_v34 = vld [vmem:[%s6404_s1 + $0xbb0] sm:$0xff]  ;;  %v573_v35 = vld [vmem:[%s6404_s1 + $0x758] sm:$0xff] }
  0xa6   : > { %1190 = vmatprep.subr.mxu1 %v641_v37  ;;  %1124 = vmatpush1.msra.mxu0 %v504_v38  ;;  %v709_v36 = vld [vmem:[%s6404_s1 + $0xb98] sm:$0xff]  ;;  %v572_v37 = vld [vmem:[%s6404_s1 + $0x750] sm:$0xff] }
  0xa7   : > { %1191 = vmatpush1.msra.mxu1 %v640_v39  ;;  %1125 = vmatprep.subr.mxu0 %v501_v40  ;;  %v708_v38 = vld [vmem:[%s6404_s1 + $0xb90] sm:$0xff]  ;;  %v569_v39 = vld [vmem:[%s6404_s1 + $0x738] sm:$0xff] }
  0xa8   : > { %1192 = vmatprep.subr.mxu1 %v637_v41  ;;  %1126 = vmatpush1.msra.mxu0 %v500_v42  ;;  %v705_v40 = vld [vmem:[%s6404_s1 + $0xb78] sm:$0xff]  ;;  %v568_v41 = vld [vmem:[%s6404_s1 + $0x730] sm:$0xff] }
  0xa9   : > { %1193 = vmatpush1.msra.mxu1 %v636_v43  ;;  %1127 = vmatprep.subr.mxu0 %v497_v44  ;;  %v704_v42 = vld [vmem:[%s6404_s1 + $0xb70] sm:$0xff]  ;;  %v565_v43 = vld [vmem:[%s6404_s1 + $0x718] sm:$0xff] }
  0xaa   : > { %1194 = vmatprep.subr.mxu1 %v633_v45  ;;  %1128 = vmatpush1.msra.mxu0 %v496_v46  ;;  %v701_v44 = vld [vmem:[%s6404_s1 + $0xb58] sm:$0xff]  ;;  %v564_v45 = vld [vmem:[%s6404_s1 + $0x710] sm:$0xff] }
  0xab   : > { %1195 = vmatpush1.msra.mxu1 %v632_v47  ;;  %1129 = vmatprep.subr.mxu0 %v493_v48  ;;  %v700_v46 = vld [vmem:[%s6404_s1 + $0xb50] sm:$0xff]  ;;  %v561_v47 = vld [vmem:[%s6404_s1 + $0x6f8] sm:$0xff] }
  0xac   : > { %1196 = vmatprep.subr.mxu1 %v629_v49  ;;  %1130 = vmatpush1.msra.mxu0 %v492_v50  ;;  %v697_v48 = vld [vmem:[%s6404_s1 + $0xb38] sm:$0xff]  ;;  %v560_v49 = vld [vmem:[%s6404_s1 + $0x6f0] sm:$0xff] }
  0xad   : > { %1197 = vmatpush1.msra.mxu1 %v628_v51  ;;  %1131 = vmatprep.subr.mxu0 %v489_v52  ;;  %v696_v50 = vld [vmem:[%s6404_s1 + $0xb30] sm:$0xff]  ;;  %v557_v51 = vld [vmem:[%s6404_s1 + $0x6d8] sm:$0xff] }
  0xae   : > { %1198 = vmatprep.subr.mxu1 %v625_v53  ;;  %1132 = vmatpush1.msra.mxu0 %v488_v54  ;;  %v693_v52 = vld [vmem:[%s6404_s1 + $0xb18] sm:$0xff]  ;;  %v556_v53 = vld [vmem:[%s6404_s1 + $0x6d0] sm:$0xff] }
  0xaf   : > { %1199 = vmatpush1.msra.mxu1 %v624_v55  ;;  %1133 = vmatprep.subr.mxu0 %v485_v56  ;;  %v692_v54 = vld [vmem:[%s6404_s1 + $0xb10] sm:$0xff]  ;;  %v553_v55 = vld [vmem:[%s6404_s1 + $0x6b8] sm:$0xff] }
  0xb0   : > { %1200 = vmatprep.subr.mxu1 %v621_v57  ;;  %1134 = vmatpush1.msra.mxu0 %v484_v58  ;;  %v689_v56 = vld [vmem:[%s6404_s1 + $0xaf8] sm:$0xff]  ;;  %v552_v57 = vld [vmem:[%s6404_s1 + $0x6b0] sm:$0xff] }
  0xb1   : > { %1201 = vmatpush1.msra.mxu1 %v620_v59  ;;  %1135 = vmatprep.subr.mxu0 %v481_v60  ;;  %v688_v58 = vld [vmem:[%s6404_s1 + $0xaf0] sm:$0xff]  ;;  %v549_v59 = vld [vmem:[%s6404_s1 + $0x698] sm:$0xff] }
  0xb2   : > { %1202 = vmatprep.subr.mxu1 %v617_v61  ;;  %1136 = vmatpush1.msra.mxu0 %v480_v62  ;;  %v685_v60 = vld [vmem:[%s6404_s1 + $0xad8] sm:$0xff]  ;;  %v548_v61 = vld [vmem:[%s6404_s1 + $0x690] sm:$0xff] }
  0xb3   : > { %1203 = vmatpush1.msra.mxu1 %v616_v0  ;;  %1137 = vmatprep.subr.mxu0 %v477_v1  ;;  %v684_v62 = vld [vmem:[%s6404_s1 + $0xad0] sm:$0xff]  ;;  %v545_v0 = vld [vmem:[%s6404_s1 + $0x678] sm:$0xff] }
  0xb4   : > { %1204 = vmatprep.subr.mxu1 %v613_v3  ;;  %1138 = vmatpush1.msra.mxu0 %v476_v4  ;;  %v681_v1 = vld [vmem:[%s6404_s1 + $0xab8] sm:$0xff]  ;;  %v544_v3 = vld [vmem:[%s6404_s1 + $0x670] sm:$0xff] }
  0xb5   : > { %1205 = vmatpush1.msra.mxu1 %v612_v5  ;;  %1139 = vmatprep.subr.mxu0 %v473_v6  ;;  %v680_v4 = vld [vmem:[%s6404_s1 + $0xab0] sm:$0xff]  ;;  %v541_v5 = vld [vmem:[%s6404_s1 + $0x658] sm:$0xff] }
  0xb6   : > { %1206 = vmatprep.subr.mxu1 %v609_v7  ;;  %1140 = vmatpush1.msra.mxu0 %v472_v8  ;;  %v677_v6 = vld [vmem:[%s6404_s1 + $0xa98] sm:$0xff]  ;;  %v540_v7 = vld [vmem:[%s6404_s1 + $0x650] sm:$0xff] }
  0xb7   : > { %1207 = vmatpush1.msra.mxu1 %v608_v9  ;;  %1141 = vmatprep.subr.mxu0 %v469_v11  ;;  %v676_v8 = vld [vmem:[%s6404_s1 + $0xa90] sm:$0xff]  ;;  %v537_v9 = vld [vmem:[%s6404_s1 + $0x638] sm:$0xff] }
  0xb8   : > { %1208 = vmatprep.subr.mxu1 %v605_v13  ;;  %1142 = vmatpush1.msra.mxu0 %v468_v14  ;;  %v673_v11 = vld [vmem:[%s6404_s1 + $0xa78] sm:$0xff]  ;;  %v536_v13 = vld [vmem:[%s6404_s1 + $0x630] sm:$0xff] }
  0xb9   : > { %1209 = vmatpush1.msra.mxu1 %v604_v15  ;;  %1143 = vmatprep.subr.mxu0 %v593_v16  ;;  %v672_v14 = vld [vmem:[%s6404_s1 + $0xa70] sm:$0xff]  ;;  %v533_v15 = vld [vmem:[%s6404_s1 + $0x618] sm:$0xff] }
  0xba   : > { %1210 = vmatprep.subr.mxu1 %v601_v18  ;;  %1144 = vmatpush2.msra.mxu0 %v592_v19  ;;  %v669_v16 = vld [vmem:[%s6404_s1 + $0xa58] sm:$0xff]  ;;  %v532_v18 = vld [vmem:[%s6404_s1 + $0x610] sm:$0xff] }
  0xbb   : > { %1211 = vmatpush1.msra.mxu1 %v600_v20  ;;  %1145 = vmatprep.subr.mxu0 %v589_v21  ;;  %v668_v19 = vld [vmem:[%s6404_s1 + $0xa50] sm:$0xff]  ;;  %v665_v20 = vld [vmem:[%s6404_s1 + $0xa38] sm:$0xff] }
  0xbc   : > { %1212 = vmatprep.subr.mxu1 %v597_v22  ;;  %1146 = vmatpush2.msra.mxu0 %v588_v23  ;;  %v729_v21 = vld [vmem:[%s6404_s1 + $0xc38] sm:$0xff]  ;;  %v664_v23 = vld [vmem:[%s6404_s1 + $0xa30] sm:$0xff] }
  0xbd   : > { %1213 = vmatpush1.msra.mxu1 %v596_v24  ;;  %1147 = vmatprep.subr.mxu0 %v585_v25  ;;  %v3161_v22 = vld [vmem:[%s3702_s17 + $0x18] sm:$0xff]  ;;  %v728_v24 = vld [vmem:[%s6404_s1 + $0xc30] sm:$0xff] }
  0xbe   : > { %1214 = vmatprep.subr.mxu1 %v721_v26  ;;  %1148 = vmatpush2.msra.mxu0 %v584_v27  ;;  %v3162_v25 = vld [vmem:[%s3702_s17 + $0x10] sm:$0xff]  ;;  %v661_v26 = vld [vmem:[%s6404_s1 + $0xa18] sm:$0xff] }
  0xbf   : > { %1215 = vmatpush2.msra.mxu1 %v720_v63  ;;  %1149 = vmatprep.subr.mxu0 %v581_v28  ;;  %v725_v27 = vld [vmem:[%s6404_s1 + $0xc18] sm:$0xff]  ;;  %v660_v63 = vld [vmem:[%s6404_s1 + $0xa10] sm:$0xff] }
  0xc0   : > { %1216 = vmatprep.subr.mxu1 %v717_v2  ;;  %1150 = vmatpush2.msra.mxu0 %v580_v29  ;;  %v724_v28 = vld [vmem:[%s6404_s1 + $0xc10] sm:$0xff]  ;;  %v1359_v2 = vld [vmem:[%s6406_s3 + $0xf8] sm:$0xff] }
  0xc1   : > { %1217 = vmatpush2.msra.mxu1 %v716_v30  ;;  %1151 = vmatprep.subr.mxu0 %v577_v31  ;;  %v1343_v29 = vld [vmem:[%s6406_s3 + $0x78] sm:$0xff]  ;;  %v3163_v30 = vld [vmem:[%s3702_s17 + $0x30] sm:$0xff]  ;;  %s2880_s17 = sshll.u32 %s6341_s29, 4  ;;  %s2881_s17 = int_to_ptr.vmem [resolvable:$true] %s2880_s17 }
  0xc2   : > { %1218 = vmatprep.subr.mxu1 %v713_v32  ;;  %1152 = vmatpush2.msra.mxu0 %v576_v33  ;;  %v1342_v31 = vld [vmem:[%s6406_s3 + $0x70] sm:$0xff]  ;;  %v1357_v32 = vld [vmem:[%s6406_s3 + $0xe8] sm:$0xff]  ;;  %v1375_v33 = vld [vmem:[%s6406_s3 + $0x178] sm:$0xff]  ;;  %s3164_s23 = scalar_lea.vmem %s2881_s17, 896  ;;  %p3171_p0 = scmp.lt.s32.totalorder %s2881_s17, %s3169_s28 }
  0xc3   : > { %1219 = vmatpush2.msra.mxu1 %v712_v34  ;;  %1153 = vmatprep.subr.mxu0 %v573_v35  ;;  %v1390_v34 = vld [vmem:[%s6406_s3 + $0x1f0] sm:$0xff]  ;;  %v1341_v35 = vld [vmem:[%s6406_s3 + $0x68] sm:$0xff]  ;;  %p3165_p11 = scmp.ne.s32.totalorder %s2881_s17, %s3164_s23  ;;  %p3172_p1 = scmp.lt.s32.totalorder %s3170_s13, %s3164_s23 }
  0xc4   : > { %1220 = vmatprep.subr.mxu1 %v709_v36  ;;  %1154 = vmatpush2.msra.mxu0 %v572_v37  ;;  %v1374_v36 = vld [vmem:[%s6406_s3 + $0x170] sm:$0xff]  ;;  %v1356_v37 = vld [vmem:[%s6406_s3 + $0xe0] sm:$0xff] }
  0xc5   : > { %1221 = vmatpush2.msra.mxu1 %v708_v38  ;;  %1155 = vmatprep.subr.mxu0 %v569_v39  ;;  %v1389_v38 = vld [vmem:[%s6406_s3 + $0x1e8] sm:$0xff]  ;;  %v1340_v39 = vld [vmem:[%s6406_s3 + $0x60] sm:$0xff]  ;;  %p3166_p12 = pnand %p3165_p11, %p3316_p5  ;;  %p3173_p2 = por %p3172_p1, %p3171_p0 }
  0xc6   : > { %1222 = vmatprep.subr.mxu1 %v705_v40  ;;  %1156 = vmatpush2.msra.mxu0 %v568_v41  ;;  %v1373_v40 = vld [vmem:[%s6406_s3 + $0x168] sm:$0xff]  ;;  %v1355_v41 = vld [vmem:[%s6406_s3 + $0xd8] sm:$0xff] }
  0xc7   : > { %1223 = vmatpush2.msra.mxu1 %v704_v42  ;;  %1157 = vmatprep.subr.mxu0 %v565_v43  ;;  %v1388_v42 = vld [vmem:[%s6406_s3 + $0x1e0] sm:$0xff]  ;;  %v1339_v43 = vld [vmem:[%s6406_s3 + $0x58] sm:$0xff]  ;;  %p3167_p13 = pneg %p3166_p12 }
  0xc8   : > { %1224 = vmatprep.subr.mxu1 %v701_v44  ;;  %1158 = vmatpush2.msra.mxu0 %v564_v45  ;;  %v1372_v44 = vld [vmem:[%s6406_s3 + $0x160] sm:$0xff]  ;;  %v1354_v45 = vld [vmem:[%s6406_s3 + $0xd0] sm:$0xff] }
  0xc9   : > { %1225 = vmatpush2.msra.mxu1 %v700_v46  ;;  %1159 = vmatprep.subr.mxu0 %v561_v47  ;;  %v1387_v46 = vld [vmem:[%s6406_s3 + $0x1d8] sm:$0xff]  ;;  %v1338_v47 = vld [vmem:[%s6406_s3 + $0x50] sm:$0xff]  ;;  %p3174_p3 = pnand %p3173_p2, %p3167_p13 }
  0xca   : > { %1226 = vmatprep.subr.mxu1 %v697_v48  ;;  %1160 = vmatpush2.msra.mxu0 %v560_v49  ;;  %v1371_v48 = vld [vmem:[%s6406_s3 + $0x158] sm:$0xff]  ;;  %v1353_v49 = vld [vmem:[%s6406_s3 + $0xc8] sm:$0xff] }
  0xcb   : > { %1227 = vmatpush2.msra.mxu1 %v696_v50  ;;  %1161 = vmatprep.subr.mxu0 %v557_v51  ;;  %v1386_v50 = vld [vmem:[%s6406_s3 + $0x1d0] sm:$0xff]  ;;  %v1337_v51 = vld [vmem:[%s6406_s3 + $0x48] sm:$0xff] }
  0xcc   : > { %1228 = vmatprep.subr.mxu1 %v693_v52  ;;  %1162 = vmatpush2.msra.mxu0 %v556_v53  ;;  %v1370_v52 = vld [vmem:[%s6406_s3 + $0x150] sm:$0xff]  ;;  %v1352_v53 = vld [vmem:[%s6406_s3 + $0xc0] sm:$0xff] }
  0xcd   : > { %1229 = vmatpush2.msra.mxu1 %v692_v54  ;;  %1163 = vmatprep.subr.mxu0 %v553_v55  ;;  %v1385_v54 = vld [vmem:[%s6406_s3 + $0x1c8] sm:$0xff]  ;;  %v1336_v55 = vld [vmem:[%s6406_s3 + $0x40] sm:$0xff] }
  0xce   : > { %1230 = vmatprep.subr.mxu1 %v689_v56  ;;  %1164 = vmatpush2.msra.mxu0 %v552_v57  ;;  %v1369_v56 = vld [vmem:[%s6406_s3 + $0x148] sm:$0xff]  ;;  %v1351_v57 = vld [vmem:[%s6406_s3 + $0xb8] sm:$0xff] }
  0xcf   : > { %1231 = vmatpush2.msra.mxu1 %v688_v58  ;;  %1165 = vmatprep.subr.mxu0 %v549_v59  ;;  %v1384_v58 = vld [vmem:[%s6406_s3 + $0x1c0] sm:$0xff]  ;;  %v1335_v59 = vld [vmem:[%s6406_s3 + $0x38] sm:$0xff] }
  0xd0   : > { %1232 = vmatprep.subr.mxu1 %v685_v60  ;;  %1166 = vmatpush2.msra.mxu0 %v548_v61  ;;  %v1368_v60 = vld [vmem:[%s6406_s3 + $0x140] sm:$0xff]  ;;  %v1350_v61 = vld [vmem:[%s6406_s3 + $0xb0] sm:$0xff] }
  0xd1   : > { %1233 = vmatpush2.msra.mxu1 %v684_v62  ;;  %1167 = vmatprep.subr.mxu0 %v545_v0  ;;  %v1383_v62 = vld [vmem:[%s6406_s3 + $0x1b8] sm:$0xff]  ;;  %v1334_v0 = vld [vmem:[%s6406_s3 + $0x30] sm:$0xff] }
  0xd2   : > { %1234 = vmatprep.subr.mxu1 %v681_v1  ;;  %1168 = vmatpush2.msra.mxu0 %v544_v3  ;;  %v1367_v1 = vld [vmem:[%s6406_s3 + $0x138] sm:$0xff]  ;;  %v1349_v3 = vld [vmem:[%s6406_s3 + $0xa8] sm:$0xff] }
  0xd3   : > { %1235 = vmatpush2.msra.mxu1 %v680_v4  ;;  %1169 = vmatprep.subr.mxu0 %v541_v5  ;;  %v1333_v4 = vld [vmem:[%s6406_s3 + $0x28] sm:$0xff]  ;;  %v1348_v5 = vld [vmem:[%s6406_s3 + $0xa0] sm:$0xff] }
  0xd4   : > { %1236 = vmatprep.subr.mxu1 %v677_v6  ;;  %1170 = vmatpush2.msra.mxu0 %v540_v7  ;;  %v1332_v6 = vld [vmem:[%s6406_s3 + $0x20] sm:$0xff]  ;;  %v1347_v7 = vld [vmem:[%s6406_s3 + $0x98] sm:$0xff] }
  0xd5   : > { %1237 = vmatpush2.msra.mxu1 %v676_v8  ;;  %1171 = vmatprep.subr.mxu0 %v537_v9  ;;  %v1331_v8 = vld [vmem:[%s6406_s3 + $0x18] sm:$0xff]  ;;  %v1346_v9 = vld [vmem:[%s6406_s3 + $0x90] sm:$0xff] }
  0xd6   : > { %1238 = vmatprep.subr.mxu1 %v673_v11  ;;  %1172 = vmatpush2.msra.mxu0 %v536_v13  ;;  %v1330_v11 = vld [vmem:[%s6406_s3 + $0x10] sm:$0xff]  ;;  %v1345_v13 = vld [vmem:[%s6406_s3 + $0x88] sm:$0xff] }
  0xd7   : > { %1239 = vmatpush2.msra.mxu1 %v672_v14  ;;  %1173 = vmatprep.subr.mxu0 %v533_v15  ;;  %v1329_v14 = vld [vmem:[%s6406_s3 + $0x8] sm:$0xff]  ;;  %v1344_v15 = vld [vmem:[%s6406_s3 + $0x80] sm:$0xff] }
  0xd8   : > { %1240 = vmatprep.subr.mxu1 %v669_v16  ;;  %1174 = vmatpush2.msra.mxu0 %v532_v18  ;;  %v1328_v16 = vld [vmem:[%s6406_s3] sm:$0xff]  ;;  %v1382_v18 = vld [vmem:[%s6406_s3 + $0x1b0] sm:$0xff] }
  0xd9   : > { %1175 = vmatprep.mubr.f32.mxu0 %v3161_v22  ;;  %1241 = vmatpush2.msra.mxu1 %v668_v19  ;;  %v1366_v19 = vld [vmem:[%s6406_s3 + $0x130] sm:$0xff]  ;;  %v1380_v22 = vld [vmem:[%s6406_s3 + $0x1a0] sm:$0xff] }
  0xda   : > { %1176 = vmatmul.mubr.f32.vlgmr.msra.gmra.mxu0 %v3162_v25  ;;  %1242 = vmatprep.subr.mxu1 %v665_v20  ;;  %v1381_v20 = vld [vmem:[%s6406_s3 + $0x1a8] sm:$0xff]  ;;  %v1363_v25 = vld [vmem:[%s6406_s3 + $0x118] sm:$0xff] }
  0xdb   : > { %1281 = vmatprep.subr.mxu0 %v729_v21  ;;  %1243 = vmatpush2.msra.mxu1 %v664_v23  ;;  %v1365_v21 = vld [vmem:[%s6406_s3 + $0x128] sm:$0xff]  ;;  %v1364_v23 = vld [vmem:[%s6406_s3 + $0x120] sm:$0xff] }
  0xdc   : > { %1282 = vmatpush1.msra.mxu0 %v728_v24  ;;  %1244 = vmatprep.subr.mxu1 %v661_v26  ;;  %v1379_v24 = vld [vmem:[%s6406_s3 + $0x198] sm:$0xff]  ;;  %v1378_v26 = vld [vmem:[%s6406_s3 + $0x190] sm:$0xff] }
  0xdd   : > { %1283 = vmatprep.subr.mxu0 %v725_v27  ;;  %1245 = vmatpush2.msra.mxu1 %v660_v63  ;;  %v1362_v27 = vld [vmem:[%s6406_s3 + $0x110] sm:$0xff]  ;;  %v1377_v63 = vld [vmem:[%s6406_s3 + $0x188] sm:$0xff] }
  0xde   : > { %1246 = vmatprep.mubr.f32.mxu1 %v4117_v10  ;;  %1284 = vmatpush1.msra.mxu0 %v724_v28  ;;  %v1358_v10 = vld [vmem:[%s6406_s3 + $0xf0] sm:$0xff]  ;;  %v1361_v28 = vld [vmem:[%s6406_s3 + $0x108] sm:$0xff] }
  0xdf   : > { %1317 = vmatprep.mubr.f32.mxu0 %v3226_v17  ;;  %1247 = vmatmul.mubr.f32.vlgmr.msra.gmra.mxu1 %v4123_v12  ;;  %v1391_v12 = vld [vmem:[%s6406_s3 + $0x1f8] sm:$0xff] }
  0xe0   : > { %2945 = vmatmul.mubr.msk.f32.vlgmr.msra.gmra.mxu0 %vm752_vm0, %v3163_v30  ;;  %2950 = vmatprep.subr.mxu0 %v1359_v2  ;;  %v1376_v2 = vld [vmem:[%s6406_s3 + $0x180] sm:$0xff]  ;;  %v732_v30 = vlaneseq }
  0xe1   : > { %2951 = vmatpush3.msra.mxu0 %v1343_v29  ;;  %2985 = vmatprep.subr.mxu1 %v1391_v12  ;;  %v1360_v29 = vld [vmem:[%s6406_s3 + $0x100] sm:$0xff] }
  0xe2   : > { %2952 = vmatprep.subr.mxu0 %v1358_v10  ;;  %2986 = vmatpush3.msra.mxu1 %v1375_v33  ;;  %v4736_v10 = vshrl.u32 %v732_v30, 7  ;;  %v1590_v30 = vld [vmem:[%s6408_s5 + $0x190] sm:$0xff] }
  0xe3   : > { %2953 = vmatpush3.msra.mxu0 %v1342_v31  ;;  %2987 = vmatprep.subr.mxu1 %v1390_v34 }
  0xe4   : > { %2954 = vmatprep.subr.mxu0 %v1357_v32  ;;  %2988 = vmatpush3.msra.mxu1 %v1374_v36  ;;  %v4739_v31 = vsub.s32 0, %v4736_v10  ;;  %v730_v32 = vld [vmem:[%s6405_s2] sm:$0xf]  ;;  %v4745_v12 = vsub.s32 1, %v4736_v10 }
  0xe5   : > { %2955 = vmatpush3.msra.mxu0 %v1341_v35  ;;  %2989 = vmatprep.subr.mxu1 %v1389_v38 }
  0xe6   : > { %2956 = vmatprep.subr.mxu0 %v1356_v37  ;;  %2990 = vmatpush3.msra.mxu1 %v1373_v40  ;;  %v735_v34 = vrot.slane %v730_v32, %v4739_v31  ;;  %v739_v36 = vrot.slane %v730_v32, %v4745_v12 }
  0xe7   : > { %2957 = vmatpush3.msra.mxu0 %v1340_v39  ;;  %2991 = vmatprep.subr.mxu1 %v1388_v42 }
  0xe8   : > { %2958 = vmatprep.subr.mxu0 %v1355_v41  ;;  %2992 = vmatpush3.msra.mxu1 %v1372_v44 }
  0xe9   : > { %2959 = vmatpush3.msra.mxu0 %v1339_v43  ;;  %2993 = vmatprep.subr.mxu1 %v1387_v46 }
  0xea   : > { %2960 = vmatprep.subr.mxu0 %v1354_v45  ;;  %2994 = vmatpush3.msra.mxu1 %v1371_v48 }
  0xeb   : > { %2961 = vmatpush3.msra.mxu0 %v1338_v47  ;;  %2995 = vmatprep.subr.mxu1 %v1386_v50 }
  0xec   : > { %2962 = vmatprep.subr.mxu0 %v1353_v49  ;;  %2996 = vmatpush3.msra.mxu1 %v1370_v52 }
  0xed   : > { %2963 = vmatpush3.msra.mxu0 %v1337_v51  ;;  %2997 = vmatprep.subr.mxu1 %v1385_v54  ;;  %v4754_v54 = vsub.s32 3, %v4736_v10 }
  0xee   : > { %2964 = vmatprep.subr.mxu0 %v1352_v53  ;;  %2998 = vmatpush3.msra.mxu1 %v1369_v56  ;;  %v4751_v53 = vsub.s32 2, %v4736_v10 }
  0xef   : > { %2965 = vmatpush3.msra.mxu0 %v1336_v55  ;;  %2999 = vmatprep.subr.mxu1 %v1384_v58  ;;  %v747_v58 = vrot.slane %v730_v32, %v4754_v54 }
  0xf0   : > { %2966 = vmatprep.subr.mxu0 %v1351_v57  ;;  %3000 = vmatpush3.msra.mxu1 %v1368_v60  ;;  %v743_v56 = vrot.slane %v730_v32, %v4751_v53  ;;  %v1584_v32 = vld [vmem:[%s6408_s5 + $0x160] sm:$0xff] }
  0xf1   : > { %2967 = vmatpush3.msra.mxu0 %v1335_v59  ;;  %3001 = vmatprep.subr.mxu1 %v1383_v62 }
  0xf2   : > { %2968 = vmatprep.subr.mxu0 %v1350_v61  ;;  %3002 = vmatpush3.msra.mxu1 %v1367_v1 }
  0xf3   : > { %2969 = vmatpush3.msra.mxu0 %v1334_v0  ;;  %3003 = vmatprep.subr.mxu1 %v1382_v18 }
  0xf4   : > { %2970 = vmatprep.subr.mxu0 %v1349_v3  ;;  %3004 = vmatpush3.msra.mxu1 %v1366_v19  ;;  %v1602_v19 = vld [vmem:[%s6408_s5 + $0x1f0] sm:$0xff] }
  0xf5   : > { %2971 = vmatpush3.msra.mxu0 %v1333_v4  ;;  %3005 = vmatprep.subr.mxu1 %v1381_v20  ;;  %v1597_v20 = vld [vmem:[%s6408_s5 + $0x1c8] sm:$0xff] }
  0xf6   : > { %2972 = vmatprep.subr.mxu0 %v1348_v5  ;;  %3006 = vmatpush3.msra.mxu1 %v1365_v21  ;;  %v1599_v21 = vld [vmem:[%s6408_s5 + $0x1d8] sm:$0xff] }
  0xf7   : > { %2973 = vmatpush3.msra.mxu0 %v1332_v6  ;;  %3007 = vmatprep.subr.mxu1 %v1380_v22  ;;  %v1596_v22 = vld [vmem:[%s6408_s5 + $0x1c0] sm:$0xff] }
  0xf8   : > { %2974 = vmatprep.subr.mxu0 %v1347_v7  ;;  %3008 = vmatpush3.msra.mxu1 %v1364_v23  ;;  %v1593_v23 = vld [vmem:[%s6408_s5 + $0x1a8] sm:$0xff] }
  0xf9   : > { %2975 = vmatpush3.msra.mxu0 %v1331_v8  ;;  %3009 = vmatprep.subr.mxu1 %v1379_v24  ;;  %v1598_v24 = vld [vmem:[%s6408_s5 + $0x1d0] sm:$0xff] }
  0xfa   : > { %2976 = vmatprep.subr.mxu0 %v1346_v9  ;;  %3010 = vmatpush3.msra.mxu1 %v1363_v25  ;;  %v1592_v25 = vld [vmem:[%s6408_s5 + $0x1a0] sm:$0xff] }
  0xfb   : > { %2977 = vmatpush3.msra.mxu0 %v1330_v11  ;;  %3011 = vmatprep.subr.mxu1 %v1378_v26  ;;  %v1595_v26 = vld [vmem:[%s6408_s5 + $0x1b8] sm:$0xff] }
  0xfc   : > { %2978 = vmatprep.subr.mxu0 %v1345_v13  ;;  %3012 = vmatpush3.msra.mxu1 %v1362_v27  ;;  %v1589_v27 = vld [vmem:[%s6408_s5 + $0x188] sm:$0xff] }
  0xfd   : > { %2979 = vmatpush3.msra.mxu0 %v1329_v14  ;;  %3013 = vmatprep.subr.mxu1 %v1377_v63  ;;  %v1601_v14 = vld [vmem:[%s6408_s5 + $0x1e8] sm:$0xff]  ;;  %v1594_v63 = vld [vmem:[%s6408_s5 + $0x1b0] sm:$0xff] }
  0xfe   : > { %2980 = vmatprep.subr.mxu0 %v1344_v15  ;;  %3014 = vmatpush3.msra.mxu1 %v1361_v28  ;;  %v1603_v15 = vld [vmem:[%s6408_s5 + $0x1f8] sm:$0xff]  ;;  %v1588_v28 = vld [vmem:[%s6408_s5 + $0x180] sm:$0xff] }
  0xff   : > { %2981 = vmatpush3.msra.mxu0 %v1328_v16  ;;  %3015 = vmatprep.subr.mxu1 %v1376_v2  ;;  %v1600_v16 = vld [vmem:[%s6408_s5 + $0x1e0] sm:$0xff]  ;;  %v1591_v2 = vld [vmem:[%s6408_s5 + $0x198] sm:$0xff] }
 0x100   : > { %3016 = vmatpush3.msra.mxu1 %v1360_v29  ;;  %1626 = vmatprep.subr.mxu0 %v1601_v14  ;;  %v1585_v29 = vld [vmem:[%s6408_s5 + $0x168] sm:$0xff]  ;;  %v1544_v14 = vld [vmem:[%s6408_s5 + $0x20] sm:$0xff] }
 0x101   : > { %1697 = vmatprep.subr.mxu1 %v1603_v15  ;;  %v1546_v15 = vld [vmem:[%s6408_s5 + $0x30] sm:$0xff] }
 0x115   : > { %v822_v33 = vpop.f32.mrf.mxu0 }
 0x116   : > { %v893_v35 = vpop.f32.mrf.mxu1  ;;  %v823_v38 = vadd.f32 %v822_v33, %v735_v34  ;;  %v1587_v33 = vld [vmem:[%s6408_s5 + $0x178] sm:$0xff]  ;;  %v1581_v34 = vld [vmem:[%s6408_s5 + $0x148] sm:$0xff] }
 0x117   : > { %v824_v37 = vpop.f32.mrf.mxu0 }
 0x118   : > { %v895_v39 = vpop.f32.mrf.mxu1  ;;  %v825_v40 = vadd.f32 %v824_v37, %v739_v36  ;;  %v894_v41 = vadd.f32 %v893_v35, %v823_v38  ;;  %v1586_v35 = vld [vmem:[%s6408_s5 + $0x170] sm:$0xff]  ;;  %v1580_v36 = vld [vmem:[%s6408_s5 + $0x140] sm:$0xff]  ;;  %v1583_v37 = vld [vmem:[%s6408_s5 + $0x158] sm:$0xff] }
 0x119   : > { %v1577_v38 = vld [vmem:[%s6408_s5 + $0x128] sm:$0xff] }
 0x11a   : > { %v896_v44 = vadd.f32 %v895_v39, %v825_v40  ;;  %v1582_v39 = vld [vmem:[%s6408_s5 + $0x150] sm:$0xff]  ;;  %v1576_v40 = vld [vmem:[%s6408_s5 + $0x120] sm:$0xff] }
 0x11b   : > { %v1035_v42 = vpop.f32.mrf.mxu1 }
 0x11d   : > { %v1037_v48 = vpop.f32.mrf.mxu1 }
 0x158   : > { %v964_v43 = vpop.f32.mrf.mxu0 }
 0x159   : > { %v965_v45 = vadd.f32 %v964_v43, %v894_v41  ;;  %v1579_v41 = vld [vmem:[%s6408_s5 + $0x138] sm:$0xff]  ;;  %v1578_v43 = vld [vmem:[%s6408_s5 + $0x130] sm:$0xff] }
 0x15a   : > { %v966_v46 = vpop.f32.mrf.mxu0 }
 0x15b   : > { %v967_v47 = vadd.f32 %v966_v46, %v896_v44  ;;  %v1036_v49 = vadd.f32 %v1035_v42, %v965_v45  ;;  %v1573_v42 = vld [vmem:[%s6408_s5 + $0x108] sm:$0xff]  ;;  %v1572_v44 = vld [vmem:[%s6408_s5 + $0x100] sm:$0xff]  ;;  %v1575_v45 = vld [vmem:[%s6408_s5 + $0x118] sm:$0xff] }
 0x15c   : > { %v1569_v46 = vld [vmem:[%s6408_s5 + $0xe8] sm:$0xff] }
 0x15d   : > { %v1038_v50 = vadd.f32 %v1037_v48, %v967_v47  ;;  %v1324_v52 = vmax.f32 %v1036_v49, 0.0  ;;  %v1106_v55 = vpop.f32.mrf.mxu1  ;;  %v1574_v47 = vld [vmem:[%s6408_s5 + $0x110] sm:$0xff]  ;;  %v1568_v48 = vld [vmem:[%s6408_s5 + $0xe0] sm:$0xff]  ;;  %v1571_v49 = vld [vmem:[%s6408_s5 + $0xf8] sm:$0xff] }
 0x15e   : > { %v1107_v61 = vadd.f32 %v1106_v55, %v743_v56  ;;  %v1567_v55 = vld [vmem:[%s6408_s5 + $0xd8] sm:$0xff]  ;;  %v1561_v56 = vld [vmem:[%s6408_s5 + $0xa8] sm:$0xff] }
 0x15f   : > { %v1325_v51 = vmax.f32 %v1038_v50, 0.0  ;;  %v1108_v59 = vpop.f32.mrf.mxu1  ;;  %v1565_v50 = vld [vmem:[%s6408_s5 + $0xc8] sm:$0xff] }
 0x160   : > { %v1109_v62 = vadd.f32 %v1108_v59, %v747_v58  ;;  %v1560_v58 = vld [vmem:[%s6408_s5 + $0xa0] sm:$0xff]  ;;  %v1563_v59 = vld [vmem:[%s6408_s5 + $0xb8] sm:$0xff] }
 0x161   : > { %1463 = vmatprep.mubr.f32.mxu0 %v1325_v51  ;;  %v1570_v51 = vld [vmem:[%s6408_s5 + $0xf0] sm:$0xff] }
 0x162   : > { %1464 = vmatmul.mubr.f32.vlgmr.msra.gmra.mxu0 %v1324_v52  ;;  %v1564_v52 = vld [vmem:[%s6408_s5 + $0xc0] sm:$0xff] }
 0x163   : > { %1690 = vmatprep.mubr.f32.mxu0 %v3226_v17  ;;  %1627 = vmatpush1.msra.mxu0 %v1600_v16  ;;  %v1541_v16 = vld [vmem:[%s6408_s5 + $0x8] sm:$0xff] }
 0x164   : > { %1628 = vmatprep.subr.mxu0 %v1597_v20  ;;  %v1542_v20 = vld [vmem:[%s6408_s5 + $0x10] sm:$0xff] }
 0x165   : > { %1629 = vmatpush1.msra.mxu0 %v1596_v22  ;;  %v2102_v22 = vld [vmem:[%s6410_s7 + $0xa50] sm:$0xff] }
 0x166   : > { %1630 = vmatprep.subr.mxu0 %v1593_v23 }
 0x167   : > { %1631 = vmatpush1.msra.mxu0 %v1592_v25 }
 0x168   : > { %1632 = vmatprep.subr.mxu0 %v1589_v27 }
 0x169   : > { %1633 = vmatpush1.msra.mxu0 %v1588_v28 }
 0x16a   : > { %1634 = vmatprep.subr.mxu0 %v1585_v29 }
 0x16b   : > { %1635 = vmatpush1.msra.mxu0 %v1584_v32  ;;  %v1877_v32 = vld [vmem:[%s6410_s7 + $0x348] sm:$0xff] }
 0x16c   : > { %1636 = vmatprep.subr.mxu0 %v1581_v34  ;;  %v1871_v34 = vld [vmem:[%s6410_s7 + $0x318] sm:$0xff] }
 0x16d   : > { %1637 = vmatpush1.msra.mxu0 %v1580_v36  ;;  %v1870_v36 = vld [vmem:[%s6410_s7 + $0x310] sm:$0xff] }
 0x16e   : > { %1638 = vmatprep.subr.mxu0 %v1577_v38  ;;  %v1864_v38 = vld [vmem:[%s6410_s7 + $0x2e0] sm:$0xff] }
 0x16f   : > { %1639 = vmatpush1.msra.mxu0 %v1576_v40  ;;  %v1863_v40 = vld [vmem:[%s6410_s7 + $0x2d8] sm:$0xff] }
 0x170   : > { %1640 = vmatprep.subr.mxu0 %v1573_v42  ;;  %v1857_v42 = vld [vmem:[%s6410_s7 + $0x2a8] sm:$0xff] }
 0x171   : > { %1641 = vmatpush1.msra.mxu0 %v1572_v44  ;;  %v1856_v44 = vld [vmem:[%s6410_s7 + $0x2a0] sm:$0xff] }
 0x172   : > { %1642 = vmatprep.subr.mxu0 %v1569_v46  ;;  %v1850_v46 = vld [vmem:[%s6410_s7 + $0x270] sm:$0xff] }
 0x173   : > { %1643 = vmatpush1.msra.mxu0 %v1568_v48  ;;  %v1849_v48 = vld [vmem:[%s6410_s7 + $0x268] sm:$0xff] }
 0x174   : > { %1644 = vmatprep.subr.mxu0 %v1565_v50  ;;  %v1843_v50 = vld [vmem:[%s6410_s7 + $0x238] sm:$0xff] }
 0x175   : > { %1645 = vmatpush1.msra.mxu0 %v1564_v52  ;;  %v1842_v52 = vld [vmem:[%s6410_s7 + $0x230] sm:$0xff] }
 0x176   : > { %1646 = vmatprep.subr.mxu0 %v1561_v56  ;;  %v1836_v56 = vld [vmem:[%s6410_s7 + $0x200] sm:$0xff] }
 0x177   : > { %1647 = vmatpush1.msra.mxu0 %v1560_v58  ;;  %v1835_v58 = vld [vmem:[%s6410_s7 + $0x1f8] sm:$0xff] }
 0x19a   : > { %v1177_v57 = vpop.f32.mrf.mxu0 }
 0x19b   : > { %v1178_v0 = vadd.f32 %v1177_v57, %v1107_v61  ;;  %v1566_v57 = vld [vmem:[%s6408_s5 + $0xd0] sm:$0xff] }
 0x19c   : > { %v1179_v60 = vpop.f32.mrf.mxu0  ;;  %v1562_v61 = vld [vmem:[%s6408_s5 + $0xb0] sm:$0xff] }
 0x19d   : > { %v1180_v4 = vadd.f32 %v1179_v60, %v1109_v62  ;;  %v1557_v60 = vld [vmem:[%s6408_s5 + $0x88] sm:$0xff]  ;;  %v1559_v62 = vld [vmem:[%s6408_s5 + $0x98] sm:$0xff] }
 0x19e   : > { %1648 = vmatprep.subr.mxu0 %v1557_v60  ;;  %v1829_v60 = vld [vmem:[%s6410_s7 + $0x1c8] sm:$0xff] }
 0x19f   : > { %v1248_v1 = vpop.f32.mrf.mxu1 }
 0x1a0   : > { %v1319_v3 = vpop.f32.mrf.mxu0  ;;  %v1249_v5 = vadd.f32 %v1248_v1, %v1178_v0  ;;  %v1556_v0 = vld [vmem:[%s6408_s5 + $0x80] sm:$0xff]  ;;  %v1558_v1 = vld [vmem:[%s6408_s5 + $0x90] sm:$0xff] }
 0x1a1   : > { %v1250_v6 = vpop.f32.mrf.mxu1  ;;  %1649 = vmatpush1.msra.mxu0 %v1556_v0  ;;  %v2052_v0 = vld [vmem:[%s6410_s7 + $0x8c0] sm:$0xff] }
 0x1a2   : > { %v1251_v7 = vadd.f32 %v1250_v6, %v1180_v4  ;;  %v1320_v8 = vadd.f32 %v1319_v3, %v1249_v5  ;;  %v1321_v9 = vpop.f32.mrf.mxu0  ;;  %v1553_v3 = vld [vmem:[%s6408_s5 + $0x68] sm:$0xff]  ;;  %v1555_v4 = vld [vmem:[%s6408_s5 + $0x78] sm:$0xff]  ;;  %v1554_v5 = vld [vmem:[%s6408_s5 + $0x70] sm:$0xff] }
 0x1a3   : > { %1650 = vmatprep.subr.mxu0 %v1553_v3  ;;  %v1549_v6 = vld [vmem:[%s6408_s5 + $0x48] sm:$0xff]  ;;  %v2046_v3 = vld [vmem:[%s6410_s7 + $0x890] sm:$0xff] }
 0x1a4   : > { %v1322_v11 = vadd.f32 %v1321_v9, %v1251_v7  ;;  %v1326_v18 = vmax.f32 %v1320_v8, 0.0  ;;  %v1551_v7 = vld [vmem:[%s6408_s5 + $0x58] sm:$0xff]  ;;  %v1548_v8 = vld [vmem:[%s6408_s5 + $0x40] sm:$0xff]  ;;  %v1550_v9 = vld [vmem:[%s6408_s5 + $0x50] sm:$0xff] }
 0x1a6   : > { %v1327_v13 = vmax.f32 %v1322_v11, 0.0  ;;  %v1545_v11 = vld [vmem:[%s6408_s5 + $0x28] sm:$0xff] }
 0x1a8   : > { %1533 = vmatprep.mubr.f32.mxu1 %v1327_v13  ;;  %v1547_v13 = vld [vmem:[%s6408_s5 + $0x38] sm:$0xff] }
 0x1a9   : > { %1534 = vmatmul.mubr.f32.vlgmr.msra.gmra.mxu1 %v1326_v18  ;;  %v1543_v18 = vld [vmem:[%s6408_s5 + $0x18] sm:$0xff] }
 0x1aa   : > { %1698 = vmatpush1.msra.mxu1 %v1602_v19  ;;  %1761 = vmatprep.mubr.f32.mxu1 %v3226_v17  ;;  %v1552_v17 = vld [vmem:[%s6408_s5 + $0x60] sm:$0xff] }
 0x1ab   : > { %1699 = vmatprep.subr.mxu1 %v1599_v21  ;;  %1651 = vmatpush1.msra.mxu0 %v1552_v17  ;;  %v1540_v19 = vld [vmem:[%s6408_s5] sm:$0xff]  ;;  %v1878_v21 = vld [vmem:[%s6410_s7 + $0x350] sm:$0xff]  ;;  %v2045_v17 = vld [vmem:[%s6410_s7 + $0x888] sm:$0xff] }
 0x1ac   : > { %1700 = vmatpush1.msra.mxu1 %v1598_v24  ;;  %1652 = vmatprep.subr.mxu0 %v1549_v6  ;;  %v2039_v6 = vld [vmem:[%s6410_s7 + $0x858] sm:$0xff] }
 0x1ad   : > { %1701 = vmatprep.subr.mxu1 %v1595_v26  ;;  %1653 = vmatpush1.msra.mxu0 %v1548_v8  ;;  %v2946_v26 = vld [vmem:[%s6407_s4] ss:$0 sm:$0xff]  ;;  %v2038_v8 = vld [vmem:[%s6410_s7 + $0x850] sm:$0xff] }
 0x1ae   : > { %1702 = vmatpush1.msra.mxu1 %v1594_v63  ;;  %1654 = vmatprep.subr.mxu0 %v1545_v11  ;;  %v2032_v11 = vld [vmem:[%s6410_s7 + $0x820] sm:$0xff] }
 0x1af   : > { %1703 = vmatprep.subr.mxu1 %v1591_v2  ;;  %1655 = vmatpush1.msra.mxu0 %v1544_v14  ;;  %v2031_v14 = vld [vmem:[%s6410_s7 + $0x818] sm:$0xff] }
 0x1b0   : > { %1704 = vmatpush1.msra.mxu1 %v1590_v30  ;;  %1656 = vmatprep.subr.mxu0 %v1541_v16  ;;  %v2025_v16 = vld [vmem:[%s6410_s7 + $0x7e8] sm:$0xff] }
 0x1b1   : > { %1705 = vmatprep.subr.mxu1 %v1587_v33  ;;  %1657 = vmatpush1.msra.mxu0 %v1540_v19  ;;  %v2101_v33 = vld [vmem:[%s6410_s7 + $0xa48] sm:$0xff]  ;;  %v2024_v19 = vld [vmem:[%s6410_s7 + $0x7e0] sm:$0xff] }
 0x1b2   : > { %1706 = vmatpush1.msra.mxu1 %v1586_v35  ;;  %2257 = vmatprep.subr.mxu0 %v1878_v21  ;;  %v2095_v35 = vld [vmem:[%s6410_s7 + $0xa18] sm:$0xff]  ;;  %v2018_v21 = vld [vmem:[%s6410_s7 + $0x7b0] sm:$0xff] }
 0x1b3   : > { %1707 = vmatprep.subr.mxu1 %v1583_v37  ;;  %v2094_v37 = vld [vmem:[%s6410_s7 + $0xa10] sm:$0xff] }
 0x1b4   : > { %1708 = vmatpush1.msra.mxu1 %v1582_v39  ;;  %v2088_v39 = vld [vmem:[%s6410_s7 + $0x9e0] sm:$0xff] }
 0x1b5   : > { %1709 = vmatprep.subr.mxu1 %v1579_v41  ;;  %v2087_v41 = vld [vmem:[%s6410_s7 + $0x9d8] sm:$0xff] }
 0x1b6   : > { %1710 = vmatpush1.msra.mxu1 %v1578_v43  ;;  %v2081_v43 = vld [vmem:[%s6410_s7 + $0x9a8] sm:$0xff] }
 0x1b7   : > { %1711 = vmatprep.subr.mxu1 %v1575_v45  ;;  %v2080_v45 = vld [vmem:[%s6410_s7 + $0x9a0] sm:$0xff] }
 0x1b8   : > { %1712 = vmatpush1.msra.mxu1 %v1574_v47  ;;  %v2074_v47 = vld [vmem:[%s6410_s7 + $0x970] sm:$0xff] }
 0x1b9   : > { %1713 = vmatprep.subr.mxu1 %v1571_v49  ;;  %v2073_v49 = vld [vmem:[%s6410_s7 + $0x968] sm:$0xff] }
 0x1ba   : > { %1714 = vmatpush1.msra.mxu1 %v1570_v51  ;;  %v2067_v51 = vld [vmem:[%s6410_s7 + $0x938] sm:$0xff] }
 0x1bb   : > { %1715 = vmatprep.subr.mxu1 %v1567_v55  ;;  %v2066_v55 = vld [vmem:[%s6410_s7 + $0x930] sm:$0xff] }
 0x1bc   : > { %1716 = vmatpush1.msra.mxu1 %v1566_v57  ;;  %v2060_v57 = vld [vmem:[%s6410_s7 + $0x900] sm:$0xff] }
 0x1bd   : > { %1717 = vmatprep.subr.mxu1 %v1563_v59  ;;  %v2059_v59 = vld [vmem:[%s6410_s7 + $0x8f8] sm:$0xff] }
 0x1be   : > { %1718 = vmatpush1.msra.mxu1 %v1562_v61  ;;  %v2053_v61 = vld [vmem:[%s6410_s7 + $0x8c8] sm:$0xff] }
 0x1bf   : > { %1719 = vmatprep.subr.mxu1 %v1559_v62  ;;  %v1828_v62 = vld [vmem:[%s6410_s7 + $0x1c0] sm:$0xff] }
 0x1c0   : > { %1720 = vmatpush1.msra.mxu1 %v1558_v1  ;;  %v1822_v1 = vld [vmem:[%s6410_s7 + $0x190] sm:$0xff] }
 0x1c1   : > { %1721 = vmatprep.subr.mxu1 %v1555_v4  ;;  %v1821_v4 = vld [vmem:[%s6410_s7 + $0x188] sm:$0xff] }
 0x1c2   : > { %1722 = vmatpush1.msra.mxu1 %v1554_v5  ;;  %v1815_v5 = vld [vmem:[%s6410_s7 + $0x158] sm:$0xff] }
 0x1c3   : > { %1723 = vmatprep.subr.mxu1 %v1551_v7  ;;  %v1814_v7 = vld [vmem:[%s6410_s7 + $0x150] sm:$0xff] }
 0x1c4   : > { %1724 = vmatpush1.msra.mxu1 %v1550_v9  ;;  %v1808_v9 = vld [vmem:[%s6410_s7 + $0x120] sm:$0xff] }
 0x1c5   : > { %1725 = vmatprep.subr.mxu1 %v1547_v13  ;;  %v1807_v13 = vld [vmem:[%s6410_s7 + $0x118] sm:$0xff] }
 0x1c6   : > { %1726 = vmatpush1.msra.mxu1 %v1546_v15  ;;  %v1801_v15 = vld [vmem:[%s6410_s7 + $0xe8] sm:$0xff] }
 0x1c7   : > { %1727 = vmatprep.subr.mxu1 %v1543_v18  ;;  %v1800_v18 = vld [vmem:[%s6410_s7 + $0xe0] sm:$0xff] }
 0x1c8   : > { %1728 = vmatpush1.msra.mxu1 %v1542_v20  ;;  %v1794_v20 = vld [vmem:[%s6410_s7 + $0xb0] sm:$0xff] }
 0x1c9   : > { %2328 = vmatprep.subr.mxu1 %v2102_v22  ;;  %v1793_v22 = vld [vmem:[%s6410_s7 + $0xa8] sm:$0xff] }
 0x222   : > { %v2982_v23 = vpop.f32.mrf.mxu0 }
 0x224   : > { %v2983_v24 = vpop.f32.mrf.mxu0 }
 0x225   : > { %v2984_v25 = vadd.f32 %v2983_v24, %v2982_v23  ;;  %v2017_v23 = vld [vmem:[%s6410_s7 + $0x7a8] sm:$0xff]  ;;  %v1787_v24 = vld [vmem:[%s6410_s7 + $0x78] sm:$0xff] }
 0x227   : > { %v1466_v28 = vadd.f32 %v2984_v25, %v2946_v26  ;;  %v2011_v25 = vld [vmem:[%s6410_s7 + $0x778] sm:$0xff]  ;;  %v1786_v26 = vld [vmem:[%s6410_s7 + $0x70] sm:$0xff] }
 0x269   : > { %v3017_v27 = vpop.f32.mrf.mxu1 }
 0x26b   : > { %v3018_v63 = vpop.f32.mrf.mxu1 }
 0x26c   : > { %v3019_v2 = vadd.f32 %v3018_v63, %v3017_v27  ;;  %v2010_v27 = vld [vmem:[%s6410_s7 + $0x770] sm:$0xff]  ;;  %v1780_v63 = vld [vmem:[%s6410_s7 + $0x40] sm:$0xff] }
 0x26e   : > { %v1536_v29 = vadd.f32 %v3019_v2, %v1466_v28  ;;  %v2004_v28 = vld [vmem:[%s6410_s7 + $0x740] sm:$0xff]  ;;  %v1779_v2 = vld [vmem:[%s6410_s7 + $0x38] sm:$0xff] }
 0x270   : > { %v1539_v30 = vmax.f32 %v1536_v29, 0.0  ;;  %v2003_v29 = vld [vmem:[%s6410_s7 + $0x738] sm:$0xff] }
 0x272   : > { %1691 = vmatmul.mubr.f32.vlgmr.msra.gmra.mxu0 %v1539_v30  ;;  %1762 = vmatmul.mubr.f32.vlgmr.msra.gmra.mxu1 %v1539_v30  ;;  %v1773_v30 = vld [vmem:[%s6410_s7 + $0x8] sm:$0xff] }
 0x273   : > { %2258 = vmatpush1.msra.mxu0 %v1877_v32  ;;  %2329 = vmatpush1.msra.mxu1 %v2101_v33  ;;  %v1997_v32 = vld [vmem:[%s6410_s7 + $0x708] sm:$0xff]  ;;  %v1772_v33 = vld [vmem:[%s6410_s7] sm:$0xff] }
 0x274   : > { %2259 = vmatprep.subr.mxu0 %v1871_v34  ;;  %2330 = vmatprep.subr.mxu1 %v2095_v35  ;;  %v1996_v34 = vld [vmem:[%s6410_s7 + $0x700] sm:$0xff]  ;;  %v1990_v35 = vld [vmem:[%s6410_s7 + $0x6d0] sm:$0xff] }
 0x275   : > { %2260 = vmatpush1.msra.mxu0 %v1870_v36  ;;  %2331 = vmatpush1.msra.mxu1 %v2094_v37  ;;  %v2214_v36 = vld [vmem:[%s6410_s7 + $0xdd0] sm:$0xff]  ;;  %v1989_v37 = vld [vmem:[%s6410_s7 + $0x6c8] sm:$0xff] }
 0x276   : > { %2261 = vmatprep.subr.mxu0 %v1864_v38  ;;  %2332 = vmatprep.subr.mxu1 %v2088_v39  ;;  %v2213_v38 = vld [vmem:[%s6410_s7 + $0xdc8] sm:$0xff]  ;;  %v1983_v39 = vld [vmem:[%s6410_s7 + $0x698] sm:$0xff] }
 0x277   : > { %2262 = vmatpush1.msra.mxu0 %v1863_v40  ;;  %2333 = vmatpush1.msra.mxu1 %v2087_v41  ;;  %v2207_v40 = vld [vmem:[%s6410_s7 + $0xd98] sm:$0xff]  ;;  %v1982_v41 = vld [vmem:[%s6410_s7 + $0x690] sm:$0xff] }
 0x278   : > { %2263 = vmatprep.subr.mxu0 %v1857_v42  ;;  %2334 = vmatprep.subr.mxu1 %v2081_v43  ;;  %v2206_v42 = vld [vmem:[%s6410_s7 + $0xd90] sm:$0xff]  ;;  %v1976_v43 = vld [vmem:[%s6410_s7 + $0x660] sm:$0xff] }
 0x279   : > { %2264 = vmatpush1.msra.mxu0 %v1856_v44  ;;  %2335 = vmatpush1.msra.mxu1 %v2080_v45  ;;  %v2200_v44 = vld [vmem:[%s6410_s7 + $0xd60] sm:$0xff]  ;;  %v1975_v45 = vld [vmem:[%s6410_s7 + $0x658] sm:$0xff] }
 0x27a   : > { %2265 = vmatprep.subr.mxu0 %v1850_v46  ;;  %2336 = vmatprep.subr.mxu1 %v2074_v47  ;;  %v2199_v46 = vld [vmem:[%s6410_s7 + $0xd58] sm:$0xff]  ;;  %v1969_v47 = vld [vmem:[%s6410_s7 + $0x628] sm:$0xff] }
 0x27b   : > { %2266 = vmatpush1.msra.mxu0 %v1849_v48  ;;  %2337 = vmatpush1.msra.mxu1 %v2073_v49  ;;  %v2193_v48 = vld [vmem:[%s6410_s7 + $0xd28] sm:$0xff]  ;;  %v1968_v49 = vld [vmem:[%s6410_s7 + $0x620] sm:$0xff] }
 0x27c   : > { %2267 = vmatprep.subr.mxu0 %v1843_v50  ;;  %2338 = vmatprep.subr.mxu1 %v2067_v51  ;;  %v2192_v50 = vld [vmem:[%s6410_s7 + $0xd20] sm:$0xff]  ;;  %v1962_v51 = vld [vmem:[%s6410_s7 + $0x5f0] sm:$0xff] }
 0x27d   : > { %2268 = vmatpush1.msra.mxu0 %v1842_v52  ;;  %2339 = vmatpush1.msra.mxu1 %v2066_v55  ;;  %v2186_v52 = vld [vmem:[%s6410_s7 + $0xcf0] sm:$0xff]  ;;  %v1961_v55 = vld [vmem:[%s6410_s7 + $0x5e8] sm:$0xff] }
 0x27e   : > { %2269 = vmatprep.subr.mxu0 %v1836_v56  ;;  %2340 = vmatprep.subr.mxu1 %v2060_v57  ;;  %v2185_v56 = vld [vmem:[%s6410_s7 + $0xce8] sm:$0xff]  ;;  %v1955_v57 = vld [vmem:[%s6410_s7 + $0x5b8] sm:$0xff] }
 0x27f   : > { %2270 = vmatpush1.msra.mxu0 %v1835_v58  ;;  %2341 = vmatpush1.msra.mxu1 %v2059_v59  ;;  %v2179_v58 = vld [vmem:[%s6410_s7 + $0xcb8] sm:$0xff]  ;;  %v1954_v59 = vld [vmem:[%s6410_s7 + $0x5b0] sm:$0xff] }
 0x280   : > { %2271 = vmatprep.subr.mxu0 %v1829_v60  ;;  %2342 = vmatprep.subr.mxu1 %v2053_v61  ;;  %v2178_v60 = vld [vmem:[%s6410_s7 + $0xcb0] sm:$0xff]  ;;  %v1948_v61 = vld [vmem:[%s6410_s7 + $0x580] sm:$0xff] }
 0x281   : > { %2272 = vmatpush1.msra.mxu0 %v1828_v62  ;;  %2343 = vmatpush1.msra.mxu1 %v2052_v0  ;;  %v2172_v62 = vld [vmem:[%s6410_s7 + $0xc80] sm:$0xff]  ;;  %v1947_v0 = vld [vmem:[%s6410_s7 + $0x578] sm:$0xff] }
 0x282   : > { %2273 = vmatprep.subr.mxu0 %v1822_v1  ;;  %2344 = vmatprep.subr.mxu1 %v2046_v3  ;;  %v2171_v1 = vld [vmem:[%s6410_s7 + $0xc78] sm:$0xff]  ;;  %v1941_v3 = vld [vmem:[%s6410_s7 + $0x548] sm:$0xff] }
 0x283   : > { %2274 = vmatpush1.msra.mxu0 %v1821_v4  ;;  %2345 = vmatpush1.msra.mxu1 %v2045_v17  ;;  %v2165_v4 = vld [vmem:[%s6410_s7 + $0xc48] sm:$0xff]  ;;  %v1940_v17 = vld [vmem:[%s6410_s7 + $0x540] sm:$0xff] }
 0x284   : > { %2275 = vmatprep.subr.mxu0 %v1815_v5  ;;  %2346 = vmatprep.subr.mxu1 %v2039_v6  ;;  %v2164_v5 = vld [vmem:[%s6410_s7 + $0xc40] sm:$0xff]  ;;  %v1934_v6 = vld [vmem:[%s6410_s7 + $0x510] sm:$0xff] }
 0x285   : > { %2276 = vmatpush1.msra.mxu0 %v1814_v7  ;;  %2347 = vmatpush1.msra.mxu1 %v2038_v8  ;;  %v2158_v7 = vld [vmem:[%s6410_s7 + $0xc10] sm:$0xff]  ;;  %v1933_v8 = vld [vmem:[%s6410_s7 + $0x508] sm:$0xff] }
 0x286   : > { %2277 = vmatprep.subr.mxu0 %v1808_v9  ;;  %2348 = vmatprep.subr.mxu1 %v2032_v11  ;;  %v2157_v9 = vld [vmem:[%s6410_s7 + $0xc08] sm:$0xff]  ;;  %v1927_v11 = vld [vmem:[%s6410_s7 + $0x4d8] sm:$0xff] }
 0x287   : > { %2278 = vmatpush1.msra.mxu0 %v1807_v13  ;;  %2349 = vmatpush1.msra.mxu1 %v2031_v14  ;;  %v2151_v13 = vld [vmem:[%s6410_s7 + $0xbd8] sm:$0xff]  ;;  %v1926_v14 = vld [vmem:[%s6410_s7 + $0x4d0] sm:$0xff] }
 0x288   : > { %2279 = vmatprep.subr.mxu0 %v1801_v15  ;;  %2350 = vmatprep.subr.mxu1 %v2025_v16  ;;  %v2150_v15 = vld [vmem:[%s6410_s7 + $0xbd0] sm:$0xff]  ;;  %v1920_v16 = vld [vmem:[%s6410_s7 + $0x4a0] sm:$0xff] }
 0x289   : > { %2280 = vmatpush1.msra.mxu0 %v1800_v18  ;;  %2351 = vmatpush1.msra.mxu1 %v2024_v19  ;;  %v2144_v18 = vld [vmem:[%s6410_s7 + $0xba0] sm:$0xff]  ;;  %v1919_v19 = vld [vmem:[%s6410_s7 + $0x498] sm:$0xff] }
 0x28a   : > { %2281 = vmatprep.subr.mxu0 %v1794_v20  ;;  %2352 = vmatprep.subr.mxu1 %v2018_v21  ;;  %v2143_v20 = vld [vmem:[%s6410_s7 + $0xb98] sm:$0xff]  ;;  %v1913_v21 = vld [vmem:[%s6410_s7 + $0x468] sm:$0xff] }
 0x28b   : > { %2282 = vmatpush1.msra.mxu0 %v1793_v22  ;;  %2353 = vmatpush1.msra.mxu1 %v2017_v23  ;;  %v2137_v22 = vld [vmem:[%s6410_s7 + $0xb68] sm:$0xff]  ;;  %v1912_v23 = vld [vmem:[%s6410_s7 + $0x460] sm:$0xff] }
 0x28c   : > { %2283 = vmatprep.subr.mxu0 %v1787_v24  ;;  %2354 = vmatprep.subr.mxu1 %v2011_v25  ;;  %v2136_v24 = vld [vmem:[%s6410_s7 + $0xb60] sm:$0xff]  ;;  %v1906_v25 = vld [vmem:[%s6410_s7 + $0x430] sm:$0xff] }
 0x28d   : > { %2284 = vmatpush1.msra.mxu0 %v1786_v26  ;;  %2355 = vmatpush1.msra.mxu1 %v2010_v27  ;;  %v2130_v26 = vld [vmem:[%s6410_s7 + $0xb30] sm:$0xff]  ;;  %v1905_v27 = vld [vmem:[%s6410_s7 + $0x428] sm:$0xff] }
 0x28e   : > { %2285 = vmatprep.subr.mxu0 %v1780_v63  ;;  %2356 = vmatprep.subr.mxu1 %v2004_v28  ;;  %v2129_v63 = vld [vmem:[%s6410_s7 + $0xb28] sm:$0xff]  ;;  %v1899_v28 = vld [vmem:[%s6410_s7 + $0x3f8] sm:$0xff] }
 0x28f   : > { %2286 = vmatpush1.msra.mxu0 %v1779_v2  ;;  %2357 = vmatpush1.msra.mxu1 %v2003_v29  ;;  %v2123_v2 = vld [vmem:[%s6410_s7 + $0xaf8] sm:$0xff]  ;;  %v1898_v29 = vld [vmem:[%s6410_s7 + $0x3f0] sm:$0xff] }
 0x290   : > { %2287 = vmatprep.subr.mxu0 %v1773_v30  ;;  %2358 = vmatprep.subr.mxu1 %v1997_v32  ;;  %v2122_v30 = vld [vmem:[%s6410_s7 + $0xaf0] sm:$0xff]  ;;  %v1892_v32 = vld [vmem:[%s6410_s7 + $0x3c0] sm:$0xff] }
 0x291   : > { %2288 = vmatpush1.msra.mxu0 %v1772_v33  ;;  %2359 = vmatpush1.msra.mxu1 %v1996_v34  ;;  %v2116_v33 = vld [vmem:[%s6410_s7 + $0xac0] sm:$0xff]  ;;  %v1891_v34 = vld [vmem:[%s6410_s7 + $0x3b8] sm:$0xff] }
 0x292   : > { %2289 = vmatprep.subr.mxu0 %v1990_v35  ;;  %2360 = vmatprep.subr.mxu1 %v2214_v36  ;;  %v2115_v35 = vld [vmem:[%s6410_s7 + $0xab8] sm:$0xff]  ;;  %v1885_v36 = vld [vmem:[%s6410_s7 + $0x388] sm:$0xff] }
 0x293   : > { %2290 = vmatpush2.msra.mxu0 %v1989_v37  ;;  %2361 = vmatpush2.msra.mxu1 %v2213_v38  ;;  %v2109_v37 = vld [vmem:[%s6410_s7 + $0xa88] sm:$0xff]  ;;  %v1884_v38 = vld [vmem:[%s6410_s7 + $0x380] sm:$0xff] }
 0x294   : > { %2291 = vmatprep.subr.mxu0 %v1983_v39  ;;  %2362 = vmatprep.subr.mxu1 %v2207_v40  ;;  %v2108_v39 = vld [vmem:[%s6410_s7 + $0xa80] sm:$0xff] }
 0x295   : > { %2292 = vmatpush2.msra.mxu0 %v1982_v41  ;;  %2363 = vmatpush2.msra.mxu1 %v2206_v42  ;;  %v1880_v40 = vld [vmem:[%s6410_s7 + $0x360] sm:$0xff] }
 0x296   : > { %2293 = vmatprep.subr.mxu0 %v1976_v43  ;;  %2364 = vmatprep.subr.mxu1 %v2200_v44  ;;  %v2104_v41 = vld [vmem:[%s6410_s7 + $0xa60] sm:$0xff] }
 0x297   : > { %2294 = vmatpush2.msra.mxu0 %v1975_v45  ;;  %2365 = vmatpush2.msra.mxu1 %v2199_v46  ;;  %v1604_v42 = vld [vmem:[%s6409_s6] sm:$0xf] }
 0x298   : > { %2295 = vmatprep.subr.mxu0 %v1969_v47  ;;  %2366 = vmatprep.subr.mxu1 %v2193_v48  ;;  %v1609_v43 = vrot.slane %v1604_v42, %v4739_v31  ;;  %v1617_v44 = vrot.slane %v1604_v42, %v4751_v53  ;;  %v1613_v45 = vrot.slane %v1604_v42, %v4745_v12 }
 0x299   : > { %2296 = vmatpush2.msra.mxu0 %v1968_v49  ;;  %2367 = vmatpush2.msra.mxu1 %v2192_v50  ;;  %v1621_v46 = vrot.slane %v1604_v42, %v4754_v54  ;;  %v1803_v42 = vld [vmem:[%s6410_s7 + $0xf8] sm:$0xff] }
 0x29a   : > { %2297 = vmatprep.subr.mxu0 %v1962_v51  ;;  %2368 = vmatprep.subr.mxu1 %v2186_v52 }
 0x29b   : > { %2298 = vmatpush2.msra.mxu0 %v1961_v55  ;;  %2369 = vmatpush2.msra.mxu1 %v2185_v56 }
 0x29c   : > { %2299 = vmatprep.subr.mxu0 %v1955_v57  ;;  %2370 = vmatprep.subr.mxu1 %v2179_v58 }
 0x29d   : > { %2300 = vmatpush2.msra.mxu0 %v1954_v59  ;;  %2371 = vmatpush2.msra.mxu1 %v2178_v60 }
 0x29e   : > { %2301 = vmatprep.subr.mxu0 %v1948_v61  ;;  %2372 = vmatprep.subr.mxu1 %v2172_v62  ;;  %v1879_v61 = vld [vmem:[%s6410_s7 + $0x358] sm:$0xff] }
 0x29f   : > { %2302 = vmatpush2.msra.mxu0 %v1947_v0  ;;  %2373 = vmatpush2.msra.mxu1 %v2171_v1  ;;  %v2103_v62 = vld [vmem:[%s6410_s7 + $0xa58] sm:$0xff]  ;;  %v1873_v0 = vld [vmem:[%s6410_s7 + $0x328] sm:$0xff] }
 0x2a0   : > { %2303 = vmatprep.subr.mxu0 %v1941_v3  ;;  %2374 = vmatprep.subr.mxu1 %v2165_v4  ;;  %v2097_v1 = vld [vmem:[%s6410_s7 + $0xa28] sm:$0xff]  ;;  %v1872_v3 = vld [vmem:[%s6410_s7 + $0x320] sm:$0xff] }
 0x2a1   : > { %2304 = vmatpush2.msra.mxu0 %v1940_v17  ;;  %2375 = vmatpush2.msra.mxu1 %v2164_v5  ;;  %v2096_v4 = vld [vmem:[%s6410_s7 + $0xa20] sm:$0xff]  ;;  %v1866_v17 = vld [vmem:[%s6410_s7 + $0x2f0] sm:$0xff] }
 0x2a2   : > { %2305 = vmatprep.subr.mxu0 %v1934_v6  ;;  %2376 = vmatprep.subr.mxu1 %v2158_v7  ;;  %v2090_v5 = vld [vmem:[%s6410_s7 + $0x9f0] sm:$0xff]  ;;  %v1865_v6 = vld [vmem:[%s6410_s7 + $0x2e8] sm:$0xff] }
 0x2a3   : > { %2306 = vmatpush2.msra.mxu0 %v1933_v8  ;;  %2377 = vmatpush2.msra.mxu1 %v2157_v9  ;;  %v2089_v7 = vld [vmem:[%s6410_s7 + $0x9e8] sm:$0xff]  ;;  %v1859_v8 = vld [vmem:[%s6410_s7 + $0x2b8] sm:$0xff] }
 0x2a4   : > { %2307 = vmatprep.subr.mxu0 %v1927_v11  ;;  %2378 = vmatprep.subr.mxu1 %v2151_v13  ;;  %v2083_v9 = vld [vmem:[%s6410_s7 + $0x9b8] sm:$0xff]  ;;  %v1858_v11 = vld [vmem:[%s6410_s7 + $0x2b0] sm:$0xff] }
 0x2a5   : > { %2308 = vmatpush2.msra.mxu0 %v1926_v14  ;;  %2379 = vmatpush2.msra.mxu1 %v2150_v15  ;;  %v2082_v13 = vld [vmem:[%s6410_s7 + $0x9b0] sm:$0xff]  ;;  %v1852_v14 = vld [vmem:[%s6410_s7 + $0x280] sm:$0xff] }
 0x2a6   : > { %2309 = vmatprep.subr.mxu0 %v1920_v16  ;;  %2380 = vmatprep.subr.mxu1 %v2144_v18  ;;  %v2076_v15 = vld [vmem:[%s6410_s7 + $0x980] sm:$0xff]  ;;  %v1851_v16 = vld [vmem:[%s6410_s7 + $0x278] sm:$0xff] }
 0x2a7   : > { %2310 = vmatpush2.msra.mxu0 %v1919_v19  ;;  %2381 = vmatpush2.msra.mxu1 %v2143_v20  ;;  %v2075_v18 = vld [vmem:[%s6410_s7 + $0x978] sm:$0xff]  ;;  %v1845_v19 = vld [vmem:[%s6410_s7 + $0x248] sm:$0xff] }
 0x2a8   : > { %2311 = vmatprep.subr.mxu0 %v1913_v21  ;;  %2382 = vmatprep.subr.mxu1 %v2137_v22  ;;  %v2069_v20 = vld [vmem:[%s6410_s7 + $0x948] sm:$0xff]  ;;  %v1844_v21 = vld [vmem:[%s6410_s7 + $0x240] sm:$0xff] }
 0x2a9   : > { %2312 = vmatpush2.msra.mxu0 %v1912_v23  ;;  %2383 = vmatpush2.msra.mxu1 %v2136_v24  ;;  %v2068_v22 = vld [vmem:[%s6410_s7 + $0x940] sm:$0xff]  ;;  %v1838_v23 = vld [vmem:[%s6410_s7 + $0x210] sm:$0xff] }
 0x2aa   : > { %2313 = vmatprep.subr.mxu0 %v1906_v25  ;;  %2384 = vmatprep.subr.mxu1 %v2130_v26  ;;  %v2062_v24 = vld [vmem:[%s6410_s7 + $0x910] sm:$0xff]  ;;  %v1837_v25 = vld [vmem:[%s6410_s7 + $0x208] sm:$0xff] }
 0x2ab   : > { %2314 = vmatpush2.msra.mxu0 %v1905_v27  ;;  %2385 = vmatpush2.msra.mxu1 %v2129_v63  ;;  %v2061_v26 = vld [vmem:[%s6410_s7 + $0x908] sm:$0xff]  ;;  %v1831_v27 = vld [vmem:[%s6410_s7 + $0x1d8] sm:$0xff] }
 0x2ac   : > { %2315 = vmatprep.subr.mxu0 %v1899_v28  ;;  %2386 = vmatprep.subr.mxu1 %v2123_v2  ;;  %v2055_v63 = vld [vmem:[%s6410_s7 + $0x8d8] sm:$0xff]  ;;  %v1830_v28 = vld [vmem:[%s6410_s7 + $0x1d0] sm:$0xff] }
 0x2ad   : > { %2316 = vmatpush2.msra.mxu0 %v1898_v29  ;;  %2387 = vmatpush2.msra.mxu1 %v2122_v30  ;;  %v2054_v2 = vld [vmem:[%s6410_s7 + $0x8d0] sm:$0xff]  ;;  %v1824_v29 = vld [vmem:[%s6410_s7 + $0x1a0] sm:$0xff] }
 0x2ae   : > { %2317 = vmatprep.subr.mxu0 %v1892_v32  ;;  %2388 = vmatprep.subr.mxu1 %v2116_v33  ;;  %v2048_v30 = vld [vmem:[%s6410_s7 + $0x8a0] sm:$0xff]  ;;  %v1823_v32 = vld [vmem:[%s6410_s7 + $0x198] sm:$0xff] }
 0x2af   : > { %2318 = vmatpush2.msra.mxu0 %v1891_v34  ;;  %2389 = vmatpush2.msra.mxu1 %v2115_v35  ;;  %v2047_v33 = vld [vmem:[%s6410_s7 + $0x898] sm:$0xff]  ;;  %v1817_v34 = vld [vmem:[%s6410_s7 + $0x168] sm:$0xff] }
 0x2b0   : > { %2319 = vmatprep.subr.mxu0 %v1885_v36  ;;  %2390 = vmatprep.subr.mxu1 %v2109_v37  ;;  %v2041_v35 = vld [vmem:[%s6410_s7 + $0x868] sm:$0xff]  ;;  %v1816_v36 = vld [vmem:[%s6410_s7 + $0x160] sm:$0xff] }
 0x2b1   : > { %2320 = vmatpush2.msra.mxu0 %v1884_v38  ;;  %2391 = vmatpush2.msra.mxu1 %v2108_v39  ;;  %v2040_v37 = vld [vmem:[%s6410_s7 + $0x860] sm:$0xff]  ;;  %v1810_v38 = vld [vmem:[%s6410_s7 + $0x130] sm:$0xff] }
 0x2b2   : > { %2399 = vmatprep.subr.mxu0 %v1880_v40  ;;  %2470 = vmatprep.subr.mxu1 %v2104_v41  ;;  %v2034_v39 = vld [vmem:[%s6410_s7 + $0x830] sm:$0xff]  ;;  %v1809_v40 = vld [vmem:[%s6410_s7 + $0x128] sm:$0xff] }
 0x2b3   : > { %v2033_v41 = vld [vmem:[%s6410_s7 + $0x828] sm:$0xff] }
 0x332   : > { %v1692_v47 = vpop.f32.mrf.mxu0  ;;  %v1763_v48 = vpop.f32.mrf.mxu1 }
 0x333   : > { %v1693_v49 = vadd.f32 %v1692_v47, %v1609_v43  ;;  %v1764_v50 = vadd.f32 %v1763_v48, %v1617_v44  ;;  %v2027_v43 = vld [vmem:[%s6410_s7 + $0x7f8] sm:$0xff]  ;;  %v1802_v44 = vld [vmem:[%s6410_s7 + $0xf0] sm:$0xff]  ;;  %v2020_v47 = vld [vmem:[%s6410_s7 + $0x7c0] sm:$0xff] }
 0x334   : > { %v1694_v51 = vpop.f32.mrf.mxu0  ;;  %v1765_v52 = vpop.f32.mrf.mxu1  ;;  %v1795_v48 = vld [vmem:[%s6410_s7 + $0xb8] sm:$0xff] }
 0x335   : > { %v1695_v55 = vadd.f32 %v1694_v51, %v1613_v45  ;;  %v1766_v56 = vadd.f32 %v1765_v52, %v1621_v46  ;;  %v5355_v59 = vmax.f32 %v1693_v49, 0.0  ;;  %v5357_v60 = vmax.f32 %v1764_v50, 0.0  ;;  %v2026_v45 = vld [vmem:[%s6410_s7 + $0x7f0] sm:$0xff]  ;;  %v1796_v46 = vld [vmem:[%s6410_s7 + $0xc0] sm:$0xff]  ;;  %v2019_v49 = vld [vmem:[%s6410_s7 + $0x7b8] sm:$0xff] }
 0x336   : > { %v1789_v50 = vld [vmem:[%s6410_s7 + $0x88] sm:$0xff]  ;;  %v1788_v52 = vld [vmem:[%s6410_s7 + $0x80] sm:$0xff] }
 0x337   : > { %v5351_v57 = vmax.f32 %v1695_v55, 0.0  ;;  %v5353_v58 = vmax.f32 %v1766_v56, 0.0  ;;  %v2013_v51 = vld [vmem:[%s6410_s7 + $0x788] sm:$0xff]  ;;  %v2012_v55 = vld [vmem:[%s6410_s7 + $0x780] sm:$0xff]  ;;  %v1782_v56 = vld [vmem:[%s6410_s7 + $0x50] sm:$0xff] }
 0x339   : > { %2321 = vmatprep.mubr.f32.mxu0 %v5351_v57  ;;  %2392 = vmatprep.mubr.f32.mxu1 %v5353_v58 }
 0x33a   : > { %2322 = vmatmul.mubr.f32.vlgmr.msra.gmra.mxu0 %v5355_v59  ;;  %2393 = vmatmul.mubr.f32.vlgmr.msra.gmra.mxu1 %v5357_v60 }
 0x33b   : > { %2400 = vmatpush1.msra.mxu0 %v1879_v61  ;;  %2471 = vmatpush1.msra.mxu1 %v2103_v62  ;;  %v2006_v61 = vld [vmem:[%s6410_s7 + $0x750] sm:$0xff]  ;;  %v1781_v62 = vld [vmem:[%s6410_s7 + $0x48] sm:$0xff] }
 0x33c   : > { %2401 = vmatprep.subr.mxu0 %v1873_v0  ;;  %2463 = vmatprep.mubr.f32.mxu0 %v5351_v57  ;;  %v2005_v0 = vld [vmem:[%s6410_s7 + $0x748] sm:$0xff] }
 0x33d   : > { %2472 = vmatprep.subr.mxu1 %v2097_v1  ;;  %2534 = vmatprep.mubr.f32.mxu1 %v5353_v58  ;;  %v1775_v1 = vld [vmem:[%s6410_s7 + $0x18] sm:$0xff] }
 0x33e   : > { %2402 = vmatpush1.msra.mxu0 %v1872_v3  ;;  %2473 = vmatpush1.msra.mxu1 %v2096_v4  ;;  %v1999_v3 = vld [vmem:[%s6410_s7 + $0x718] sm:$0xff]  ;;  %v1774_v4 = vld [vmem:[%s6410_s7 + $0x10] sm:$0xff] }
 0x33f   : > { %2403 = vmatprep.subr.mxu0 %v1866_v17  ;;  %2474 = vmatprep.subr.mxu1 %v2090_v5  ;;  %v1998_v17 = vld [vmem:[%s6410_s7 + $0x710] sm:$0xff]  ;;  %v1992_v5 = vld [vmem:[%s6410_s7 + $0x6e0] sm:$0xff] }
 0x340   : > { %2404 = vmatpush1.msra.mxu0 %v1865_v6  ;;  %2475 = vmatpush1.msra.mxu1 %v2089_v7  ;;  %v2216_v6 = vld [vmem:[%s6410_s7 + $0xde0] sm:$0xff]  ;;  %v1991_v7 = vld [vmem:[%s6410_s7 + $0x6d8] sm:$0xff] }
 0x341   : > { %2405 = vmatprep.subr.mxu0 %v1859_v8  ;;  %2476 = vmatprep.subr.mxu1 %v2083_v9  ;;  %v2215_v8 = vld [vmem:[%s6410_s7 + $0xdd8] sm:$0xff]  ;;  %v1985_v9 = vld [vmem:[%s6410_s7 + $0x6a8] sm:$0xff] }
 0x342   : > { %2406 = vmatpush1.msra.mxu0 %v1858_v11  ;;  %2477 = vmatpush1.msra.mxu1 %v2082_v13  ;;  %v2209_v11 = vld [vmem:[%s6410_s7 + $0xda8] sm:$0xff]  ;;  %v1984_v13 = vld [vmem:[%s6410_s7 + $0x6a0] sm:$0xff] }
 0x343   : > { %2407 = vmatprep.subr.mxu0 %v1852_v14  ;;  %2478 = vmatprep.subr.mxu1 %v2076_v15  ;;  %v2208_v14 = vld [vmem:[%s6410_s7 + $0xda0] sm:$0xff]  ;;  %v1978_v15 = vld [vmem:[%s6410_s7 + $0x670] sm:$0xff] }
 0x344   : > { %2408 = vmatpush1.msra.mxu0 %v1851_v16  ;;  %2479 = vmatpush1.msra.mxu1 %v2075_v18  ;;  %v2202_v16 = vld [vmem:[%s6410_s7 + $0xd70] sm:$0xff]  ;;  %v1977_v18 = vld [vmem:[%s6410_s7 + $0x668] sm:$0xff] }
 0x345   : > { %2409 = vmatprep.subr.mxu0 %v1845_v19  ;;  %2480 = vmatprep.subr.mxu1 %v2069_v20  ;;  %v2201_v19 = vld [vmem:[%s6410_s7 + $0xd68] sm:$0xff]  ;;  %v1971_v20 = vld [vmem:[%s6410_s7 + $0x638] sm:$0xff] }
 0x346   : > { %2410 = vmatpush1.msra.mxu0 %v1844_v21  ;;  %2481 = vmatpush1.msra.mxu1 %v2068_v22  ;;  %v2195_v21 = vld [vmem:[%s6410_s7 + $0xd38] sm:$0xff]  ;;  %v1970_v22 = vld [vmem:[%s6410_s7 + $0x630] sm:$0xff] }
 0x347   : > { %2411 = vmatprep.subr.mxu0 %v1838_v23  ;;  %2482 = vmatprep.subr.mxu1 %v2062_v24  ;;  %v2194_v23 = vld [vmem:[%s6410_s7 + $0xd30] sm:$0xff]  ;;  %v1964_v24 = vld [vmem:[%s6410_s7 + $0x600] sm:$0xff] }
 0x348   : > { %2412 = vmatpush1.msra.mxu0 %v1837_v25  ;;  %2483 = vmatpush1.msra.mxu1 %v2061_v26  ;;  %v2188_v25 = vld [vmem:[%s6410_s7 + $0xd00] sm:$0xff]  ;;  %v1963_v26 = vld [vmem:[%s6410_s7 + $0x5f8] sm:$0xff] }
 0x349   : > { %2413 = vmatprep.subr.mxu0 %v1831_v27  ;;  %2484 = vmatprep.subr.mxu1 %v2055_v63  ;;  %v2187_v27 = vld [vmem:[%s6410_s7 + $0xcf8] sm:$0xff]  ;;  %v1957_v63 = vld [vmem:[%s6410_s7 + $0x5c8] sm:$0xff] }
 0x34a   : > { %2414 = vmatpush1.msra.mxu0 %v1830_v28  ;;  %2485 = vmatpush1.msra.mxu1 %v2054_v2  ;;  %v2181_v28 = vld [vmem:[%s6410_s7 + $0xcc8] sm:$0xff]  ;;  %v1956_v2 = vld [vmem:[%s6410_s7 + $0x5c0] sm:$0xff] }
 0x34b   : > { %2415 = vmatprep.subr.mxu0 %v1824_v29  ;;  %2486 = vmatprep.subr.mxu1 %v2048_v30  ;;  %v2180_v29 = vld [vmem:[%s6410_s7 + $0xcc0] sm:$0xff]  ;;  %v1950_v30 = vld [vmem:[%s6410_s7 + $0x590] sm:$0xff] }
 0x34c   : > { %2416 = vmatpush1.msra.mxu0 %v1823_v32  ;;  %2487 = vmatpush1.msra.mxu1 %v2047_v33  ;;  %v2174_v32 = vld [vmem:[%s6410_s7 + $0xc90] sm:$0xff]  ;;  %v1949_v33 = vld [vmem:[%s6410_s7 + $0x588] sm:$0xff] }
 0x34d   : > { %2417 = vmatprep.subr.mxu0 %v1817_v34  ;;  %2488 = vmatprep.subr.mxu1 %v2041_v35  ;;  %v2173_v34 = vld [vmem:[%s6410_s7 + $0xc88] sm:$0xff]  ;;  %v1943_v35 = vld [vmem:[%s6410_s7 + $0x558] sm:$0xff] }
 0x34e   : > { %2418 = vmatpush1.msra.mxu0 %v1816_v36  ;;  %2489 = vmatpush1.msra.mxu1 %v2040_v37  ;;  %v2167_v36 = vld [vmem:[%s6410_s7 + $0xc58] sm:$0xff]  ;;  %v1942_v37 = vld [vmem:[%s6410_s7 + $0x550] sm:$0xff] }
 0x34f   : > { %2419 = vmatprep.subr.mxu0 %v1810_v38  ;;  %2490 = vmatprep.subr.mxu1 %v2034_v39  ;;  %v2166_v38 = vld [vmem:[%s6410_s7 + $0xc50] sm:$0xff]  ;;  %v1936_v39 = vld [vmem:[%s6410_s7 + $0x520] sm:$0xff] }
 0x350   : > { %2420 = vmatpush1.msra.mxu0 %v1809_v40  ;;  %2491 = vmatpush1.msra.mxu1 %v2033_v41  ;;  %v2160_v40 = vld [vmem:[%s6410_s7 + $0xc20] sm:$0xff]  ;;  %v1935_v41 = vld [vmem:[%s6410_s7 + $0x518] sm:$0xff] }
 0x351   : > { %2421 = vmatprep.subr.mxu0 %v1803_v42  ;;  %2492 = vmatprep.subr.mxu1 %v2027_v43  ;;  %v2159_v42 = vld [vmem:[%s6410_s7 + $0xc18] sm:$0xff]  ;;  %v1929_v43 = vld [vmem:[%s6410_s7 + $0x4e8] sm:$0xff] }
 0x352   : > { %2422 = vmatpush1.msra.mxu0 %v1802_v44  ;;  %2493 = vmatpush1.msra.mxu1 %v2026_v45  ;;  %v2153_v44 = vld [vmem:[%s6410_s7 + $0xbe8] sm:$0xff]  ;;  %v1928_v45 = vld [vmem:[%s6410_s7 + $0x4e0] sm:$0xff] }
 0x353   : > { %2423 = vmatprep.subr.mxu0 %v1796_v46  ;;  %2494 = vmatprep.subr.mxu1 %v2020_v47  ;;  %v2152_v46 = vld [vmem:[%s6410_s7 + $0xbe0] sm:$0xff]  ;;  %v1922_v47 = vld [vmem:[%s6410_s7 + $0x4b0] sm:$0xff] }
 0x354   : > { %2424 = vmatpush1.msra.mxu0 %v1795_v48  ;;  %2495 = vmatpush1.msra.mxu1 %v2019_v49  ;;  %v2146_v48 = vld [vmem:[%s6410_s7 + $0xbb0] sm:$0xff]  ;;  %v1921_v49 = vld [vmem:[%s6410_s7 + $0x4a8] sm:$0xff] }
 0x355   : > { %2425 = vmatprep.subr.mxu0 %v1789_v50  ;;  %2496 = vmatprep.subr.mxu1 %v2013_v51  ;;  %v2145_v50 = vld [vmem:[%s6410_s7 + $0xba8] sm:$0xff]  ;;  %v1915_v51 = vld [vmem:[%s6410_s7 + $0x478] sm:$0xff] }
 0x356   : > { %2426 = vmatpush1.msra.mxu0 %v1788_v52  ;;  %2497 = vmatpush1.msra.mxu1 %v2012_v55  ;;  %v2139_v52 = vld [vmem:[%s6410_s7 + $0xb78] sm:$0xff]  ;;  %v1914_v55 = vld [vmem:[%s6410_s7 + $0x470] sm:$0xff] }
 0x357   : > { %2427 = vmatprep.subr.mxu0 %v1782_v56  ;;  %2498 = vmatprep.subr.mxu1 %v2006_v61  ;;  %v2138_v56 = vld [vmem:[%s6410_s7 + $0xb70] sm:$0xff]  ;;  %v1908_v61 = vld [vmem:[%s6410_s7 + $0x440] sm:$0xff] }
 0x358   : > { %2428 = vmatpush1.msra.mxu0 %v1781_v62  ;;  %2499 = vmatpush1.msra.mxu1 %v2005_v0  ;;  %v2132_v62 = vld [vmem:[%s6410_s7 + $0xb40] sm:$0xff]  ;;  %v1907_v0 = vld [vmem:[%s6410_s7 + $0x438] sm:$0xff] }
 0x359   : > { %2429 = vmatprep.subr.mxu0 %v1775_v1  ;;  %2500 = vmatprep.subr.mxu1 %v1999_v3  ;;  %v2131_v1 = vld [vmem:[%s6410_s7 + $0xb38] sm:$0xff]  ;;  %v1901_v3 = vld [vmem:[%s6410_s7 + $0x408] sm:$0xff] }
 0x35a   : > { %2430 = vmatpush1.msra.mxu0 %v1774_v4  ;;  %2501 = vmatpush1.msra.mxu1 %v1998_v17  ;;  %v2125_v4 = vld [vmem:[%s6410_s7 + $0xb08] sm:$0xff]  ;;  %v1900_v17 = vld [vmem:[%s6410_s7 + $0x400] sm:$0xff] }
 0x35b   : > { %2431 = vmatprep.subr.mxu0 %v1992_v5  ;;  %2502 = vmatprep.subr.mxu1 %v2216_v6  ;;  %v2124_v5 = vld [vmem:[%s6410_s7 + $0xb00] sm:$0xff]  ;;  %v1894_v6 = vld [vmem:[%s6410_s7 + $0x3d0] sm:$0xff] }
 0x35c   : > { %2432 = vmatpush2.msra.mxu0 %v1991_v7  ;;  %2503 = vmatpush2.msra.mxu1 %v2215_v8  ;;  %v2118_v7 = vld [vmem:[%s6410_s7 + $0xad0] sm:$0xff]  ;;  %v1893_v8 = vld [vmem:[%s6410_s7 + $0x3c8] sm:$0xff] }
 0x35d   : > { %2433 = vmatprep.subr.mxu0 %v1985_v9  ;;  %2504 = vmatprep.subr.mxu1 %v2209_v11  ;;  %v2117_v9 = vld [vmem:[%s6410_s7 + $0xac8] sm:$0xff]  ;;  %v1887_v11 = vld [vmem:[%s6410_s7 + $0x398] sm:$0xff] }
 0x35e   : > { %2434 = vmatpush2.msra.mxu0 %v1984_v13  ;;  %2505 = vmatpush2.msra.mxu1 %v2208_v14  ;;  %v2111_v13 = vld [vmem:[%s6410_s7 + $0xa98] sm:$0xff]  ;;  %v1886_v14 = vld [vmem:[%s6410_s7 + $0x390] sm:$0xff] }
 0x35f   : > { %2435 = vmatprep.subr.mxu0 %v1978_v15  ;;  %2506 = vmatprep.subr.mxu1 %v2202_v16  ;;  %v2110_v15 = vld [vmem:[%s6410_s7 + $0xa90] sm:$0xff] }
 0x360   : > { %2436 = vmatpush2.msra.mxu0 %v1977_v18  ;;  %2507 = vmatpush2.msra.mxu1 %v2201_v19  ;;  %v1882_v16 = vld [vmem:[%s6410_s7 + $0x370] sm:$0xff]  ;;  %v1881_v19 = vld [vmem:[%s6410_s7 + $0x368] sm:$0xff] }
 0x361   : > { %2437 = vmatprep.subr.mxu0 %v1971_v20  ;;  %2508 = vmatprep.subr.mxu1 %v2195_v21  ;;  %v2106_v18 = vld [vmem:[%s6410_s7 + $0xa70] sm:$0xff]  ;;  %v2105_v20 = vld [vmem:[%s6410_s7 + $0xa68] sm:$0xff]  ;;  %v1875_v21 = vld [vmem:[%s6410_s7 + $0x338] sm:$0xff] }
 0x362   : > { %2438 = vmatpush2.msra.mxu0 %v1970_v22  ;;  %2509 = vmatpush2.msra.mxu1 %v2194_v23  ;;  %v2099_v22 = vld [vmem:[%s6410_s7 + $0xa38] sm:$0xff]  ;;  %v1874_v23 = vld [vmem:[%s6410_s7 + $0x330] sm:$0xff] }
 0x363   : > { %2439 = vmatprep.subr.mxu0 %v1964_v24  ;;  %2510 = vmatprep.subr.mxu1 %v2188_v25  ;;  %v2098_v24 = vld [vmem:[%s6410_s7 + $0xa30] sm:$0xff]  ;;  %v1868_v25 = vld [vmem:[%s6410_s7 + $0x300] sm:$0xff] }
 0x364   : > { %2440 = vmatpush2.msra.mxu0 %v1963_v26  ;;  %2511 = vmatpush2.msra.mxu1 %v2187_v27  ;;  %v2092_v26 = vld [vmem:[%s6410_s7 + $0xa00] sm:$0xff]  ;;  %v1867_v27 = vld [vmem:[%s6410_s7 + $0x2f8] sm:$0xff] }
 0x365   : > { %2441 = vmatprep.subr.mxu0 %v1957_v63  ;;  %2512 = vmatprep.subr.mxu1 %v2181_v28  ;;  %v2091_v63 = vld [vmem:[%s6410_s7 + $0x9f8] sm:$0xff]  ;;  %v1861_v28 = vld [vmem:[%s6410_s7 + $0x2c8] sm:$0xff] }
 0x366   : > { %2442 = vmatpush2.msra.mxu0 %v1956_v2  ;;  %2513 = vmatpush2.msra.mxu1 %v2180_v29  ;;  %v2085_v2 = vld [vmem:[%s6410_s7 + $0x9c8] sm:$0xff]  ;;  %v1860_v29 = vld [vmem:[%s6410_s7 + $0x2c0] sm:$0xff] }
 0x367   : > { %2443 = vmatprep.subr.mxu0 %v1950_v30  ;;  %2514 = vmatprep.subr.mxu1 %v2174_v32  ;;  %v2084_v30 = vld [vmem:[%s6410_s7 + $0x9c0] sm:$0xff]  ;;  %v1854_v32 = vld [vmem:[%s6410_s7 + $0x290] sm:$0xff] }
 0x368   : > { %2444 = vmatpush2.msra.mxu0 %v1949_v33  ;;  %2515 = vmatpush2.msra.mxu1 %v2173_v34  ;;  %v2078_v33 = vld [vmem:[%s6410_s7 + $0x990] sm:$0xff]  ;;  %v1853_v34 = vld [vmem:[%s6410_s7 + $0x288] sm:$0xff] }
 0x369   : > { %2445 = vmatprep.subr.mxu0 %v1943_v35  ;;  %2516 = vmatprep.subr.mxu1 %v2167_v36  ;;  %v2077_v35 = vld [vmem:[%s6410_s7 + $0x988] sm:$0xff]  ;;  %v1847_v36 = vld [vmem:[%s6410_s7 + $0x258] sm:$0xff] }
 0x36a   : > { %2446 = vmatpush2.msra.mxu0 %v1942_v37  ;;  %2517 = vmatpush2.msra.mxu1 %v2166_v38  ;;  %v2071_v37 = vld [vmem:[%s6410_s7 + $0x958] sm:$0xff]  ;;  %v1846_v38 = vld [vmem:[%s6410_s7 + $0x250] sm:$0xff] }
 0x36b   : > { %2447 = vmatprep.subr.mxu0 %v1936_v39  ;;  %2518 = vmatprep.subr.mxu1 %v2160_v40  ;;  %v2070_v39 = vld [vmem:[%s6410_s7 + $0x950] sm:$0xff]  ;;  %v1840_v40 = vld [vmem:[%s6410_s7 + $0x220] sm:$0xff] }
 0x36c   : > { %2448 = vmatpush2.msra.mxu0 %v1935_v41  ;;  %2519 = vmatpush2.msra.mxu1 %v2159_v42  ;;  %v2064_v41 = vld [vmem:[%s6410_s7 + $0x920] sm:$0xff]  ;;  %v1839_v42 = vld [vmem:[%s6410_s7 + $0x218] sm:$0xff] }
 0x36d   : > { %2449 = vmatprep.subr.mxu0 %v1929_v43  ;;  %2520 = vmatprep.subr.mxu1 %v2153_v44  ;;  %v2063_v43 = vld [vmem:[%s6410_s7 + $0x918] sm:$0xff]  ;;  %v1833_v44 = vld [vmem:[%s6410_s7 + $0x1e8] sm:$0xff] }
 0x36e   : > { %2450 = vmatpush2.msra.mxu0 %v1928_v45  ;;  %2521 = vmatpush2.msra.mxu1 %v2152_v46  ;;  %v2057_v45 = vld [vmem:[%s6410_s7 + $0x8e8] sm:$0xff]  ;;  %v1832_v46 = vld [vmem:[%s6410_s7 + $0x1e0] sm:$0xff] }
 0x36f   : > { %2451 = vmatprep.subr.mxu0 %v1922_v47  ;;  %2522 = vmatprep.subr.mxu1 %v2146_v48  ;;  %v2056_v47 = vld [vmem:[%s6410_s7 + $0x8e0] sm:$0xff]  ;;  %v1826_v48 = vld [vmem:[%s6410_s7 + $0x1b0] sm:$0xff] }
 0x370   : > { %2452 = vmatpush2.msra.mxu0 %v1921_v49  ;;  %2523 = vmatpush2.msra.mxu1 %v2145_v50  ;;  %v2050_v49 = vld [vmem:[%s6410_s7 + $0x8b0] sm:$0xff]  ;;  %v1825_v50 = vld [vmem:[%s6410_s7 + $0x1a8] sm:$0xff] }
 0x371   : > { %2453 = vmatprep.subr.mxu0 %v1915_v51  ;;  %2524 = vmatprep.subr.mxu1 %v2139_v52  ;;  %v2049_v51 = vld [vmem:[%s6410_s7 + $0x8a8] sm:$0xff]  ;;  %v1819_v52 = vld [vmem:[%s6410_s7 + $0x178] sm:$0xff] }
 0x372   : > { %2454 = vmatpush2.msra.mxu0 %v1914_v55  ;;  %2525 = vmatpush2.msra.mxu1 %v2138_v56  ;;  %v2043_v55 = vld [vmem:[%s6410_s7 + $0x878] sm:$0xff]  ;;  %v1818_v56 = vld [vmem:[%s6410_s7 + $0x170] sm:$0xff] }
 0x373   : > { %2455 = vmatprep.subr.mxu0 %v1908_v61  ;;  %2526 = vmatprep.subr.mxu1 %v2132_v62  ;;  %v2042_v61 = vld [vmem:[%s6410_s7 + $0x870] sm:$0xff]  ;;  %v1812_v62 = vld [vmem:[%s6410_s7 + $0x140] sm:$0xff] }
 0x374   : > { %2456 = vmatpush2.msra.mxu0 %v1907_v0  ;;  %2527 = vmatpush2.msra.mxu1 %v2131_v1  ;;  %v2036_v0 = vld [vmem:[%s6410_s7 + $0x840] sm:$0xff]  ;;  %v1811_v1 = vld [vmem:[%s6410_s7 + $0x138] sm:$0xff] }
 0x375   : > { %2457 = vmatprep.subr.mxu0 %v1901_v3  ;;  %2528 = vmatprep.subr.mxu1 %v2125_v4  ;;  %v2035_v3 = vld [vmem:[%s6410_s7 + $0x838] sm:$0xff]  ;;  %v1805_v4 = vld [vmem:[%s6410_s7 + $0x108] sm:$0xff] }
 0x376   : > { %2458 = vmatpush2.msra.mxu0 %v1900_v17  ;;  %2529 = vmatpush2.msra.mxu1 %v2124_v5  ;;  %v2029_v17 = vld [vmem:[%s6410_s7 + $0x808] sm:$0xff]  ;;  %v1804_v5 = vld [vmem:[%s6410_s7 + $0x100] sm:$0xff] }
 0x377   : > { %2459 = vmatprep.subr.mxu0 %v1894_v6  ;;  %2530 = vmatprep.subr.mxu1 %v2118_v7  ;;  %v2028_v6 = vld [vmem:[%s6410_s7 + $0x800] sm:$0xff]  ;;  %v1798_v7 = vld [vmem:[%s6410_s7 + $0xd0] sm:$0xff] }
 0x378   : > { %2460 = vmatpush2.msra.mxu0 %v1893_v8  ;;  %2531 = vmatpush2.msra.mxu1 %v2117_v9  ;;  %v2022_v8 = vld [vmem:[%s6410_s7 + $0x7d0] sm:$0xff]  ;;  %v1797_v9 = vld [vmem:[%s6410_s7 + $0xc8] sm:$0xff] }
 0x379   : > { %2461 = vmatprep.subr.mxu0 %v1887_v11  ;;  %2532 = vmatprep.subr.mxu1 %v2111_v13  ;;  %v2021_v11 = vld [vmem:[%s6410_s7 + $0x7c8] sm:$0xff]  ;;  %v1791_v13 = vld [vmem:[%s6410_s7 + $0x98] sm:$0xff] }
 0x37a   : > { %2462 = vmatpush2.msra.mxu0 %v1886_v14  ;;  %2533 = vmatpush2.msra.mxu1 %v2110_v15  ;;  %v2015_v14 = vld [vmem:[%s6410_s7 + $0x798] sm:$0xff]  ;;  %v1790_v15 = vld [vmem:[%s6410_s7 + $0x90] sm:$0xff] }
 0x37b   : > { %2464 = vmatmul.mubr.f32.vlgmr.msra.gmra.mxu0 %v5355_v59  ;;  %2535 = vmatmul.mubr.f32.vlgmr.msra.gmra.mxu1 %v5357_v60 }
 0x37c   : > { %2541 = vmatprep.subr.mxu0 %v1882_v16  ;;  %2612 = vmatprep.subr.mxu1 %v2106_v18  ;;  %v2014_v16 = vld [vmem:[%s6410_s7 + $0x790] sm:$0xff]  ;;  %v1784_v18 = vld [vmem:[%s6410_s7 + $0x60] sm:$0xff] }
 0x37d   : > { %2542 = vmatpush1.msra.mxu0 %v1881_v19  ;;  %2605 = vmatprep.mubr.f32.mxu0 %v5351_v57  ;;  %v2008_v19 = vld [vmem:[%s6410_s7 + $0x760] sm:$0xff] }
 0x37e   : > { %2613 = vmatpush1.msra.mxu1 %v2105_v20  ;;  %2676 = vmatprep.mubr.f32.mxu1 %v5353_v58  ;;  %v1783_v20 = vld [vmem:[%s6410_s7 + $0x58] sm:$0xff] }
 0x37f   : > { %2543 = vmatprep.subr.mxu0 %v1875_v21  ;;  %2614 = vmatprep.subr.mxu1 %v2099_v22  ;;  %v2007_v21 = vld [vmem:[%s6410_s7 + $0x758] sm:$0xff]  ;;  %v1777_v22 = vld [vmem:[%s6410_s7 + $0x28] sm:$0xff] }
 0x380   : > { %2544 = vmatpush1.msra.mxu0 %v1874_v23  ;;  %2615 = vmatpush1.msra.mxu1 %v2098_v24  ;;  %v2001_v23 = vld [vmem:[%s6410_s7 + $0x728] sm:$0xff]  ;;  %v1776_v24 = vld [vmem:[%s6410_s7 + $0x20] sm:$0xff] }
 0x381   : > { %2545 = vmatprep.subr.mxu0 %v1868_v25  ;;  %2616 = vmatprep.subr.mxu1 %v2092_v26  ;;  %v2000_v25 = vld [vmem:[%s6410_s7 + $0x720] sm:$0xff]  ;;  %v1994_v26 = vld [vmem:[%s6410_s7 + $0x6f0] sm:$0xff] }
 0x382   : > { %2546 = vmatpush1.msra.mxu0 %v1867_v27  ;;  %2617 = vmatpush1.msra.mxu1 %v2091_v63  ;;  %v2218_v27 = vld [vmem:[%s6410_s7 + $0xdf0] sm:$0xff]  ;;  %v1993_v63 = vld [vmem:[%s6410_s7 + $0x6e8] sm:$0xff] }
 0x383   : > { %2547 = vmatprep.subr.mxu0 %v1861_v28  ;;  %2618 = vmatprep.subr.mxu1 %v2085_v2  ;;  %v2217_v28 = vld [vmem:[%s6410_s7 + $0xde8] sm:$0xff]  ;;  %v1987_v2 = vld [vmem:[%s6410_s7 + $0x6b8] sm:$0xff] }
 0x384   : > { %2548 = vmatpush1.msra.mxu0 %v1860_v29  ;;  %2619 = vmatpush1.msra.mxu1 %v2084_v30  ;;  %v2211_v29 = vld [vmem:[%s6410_s7 + $0xdb8] sm:$0xff]  ;;  %v1986_v30 = vld [vmem:[%s6410_s7 + $0x6b0] sm:$0xff] }
 0x385   : > { %2549 = vmatprep.subr.mxu0 %v1854_v32  ;;  %2620 = vmatprep.subr.mxu1 %v2078_v33  ;;  %v2210_v32 = vld [vmem:[%s6410_s7 + $0xdb0] sm:$0xff]  ;;  %v1980_v33 = vld [vmem:[%s6410_s7 + $0x680] sm:$0xff] }
 0x386   : > { %2550 = vmatpush1.msra.mxu0 %v1853_v34  ;;  %2621 = vmatpush1.msra.mxu1 %v2077_v35  ;;  %v2204_v34 = vld [vmem:[%s6410_s7 + $0xd80] sm:$0xff]  ;;  %v1979_v35 = vld [vmem:[%s6410_s7 + $0x678] sm:$0xff] }
 0x387   : > { %2551 = vmatprep.subr.mxu0 %v1847_v36  ;;  %2622 = vmatprep.subr.mxu1 %v2071_v37  ;;  %v2203_v36 = vld [vmem:[%s6410_s7 + $0xd78] sm:$0xff]  ;;  %v1973_v37 = vld [vmem:[%s6410_s7 + $0x648] sm:$0xff] }
 0x388   : > { %2552 = vmatpush1.msra.mxu0 %v1846_v38  ;;  %2623 = vmatpush1.msra.mxu1 %v2070_v39  ;;  %v2197_v38 = vld [vmem:[%s6410_s7 + $0xd48] sm:$0xff]  ;;  %v1972_v39 = vld [vmem:[%s6410_s7 + $0x640] sm:$0xff] }
 0x389   : > { %2553 = vmatprep.subr.mxu0 %v1840_v40  ;;  %2624 = vmatprep.subr.mxu1 %v2064_v41  ;;  %v2196_v40 = vld [vmem:[%s6410_s7 + $0xd40] sm:$0xff]  ;;  %v1966_v41 = vld [vmem:[%s6410_s7 + $0x610] sm:$0xff] }
 0x38a   : > { %2554 = vmatpush1.msra.mxu0 %v1839_v42  ;;  %2625 = vmatpush1.msra.mxu1 %v2063_v43  ;;  %v2190_v42 = vld [vmem:[%s6410_s7 + $0xd10] sm:$0xff]  ;;  %v1965_v43 = vld [vmem:[%s6410_s7 + $0x608] sm:$0xff] }
 0x38b   : > { %2555 = vmatprep.subr.mxu0 %v1833_v44  ;;  %2626 = vmatprep.subr.mxu1 %v2057_v45  ;;  %v2189_v44 = vld [vmem:[%s6410_s7 + $0xd08] sm:$0xff]  ;;  %v1959_v45 = vld [vmem:[%s6410_s7 + $0x5d8] sm:$0xff] }
 0x38c   : > { %2556 = vmatpush1.msra.mxu0 %v1832_v46  ;;  %2627 = vmatpush1.msra.mxu1 %v2056_v47  ;;  %v2183_v46 = vld [vmem:[%s6410_s7 + $0xcd8] sm:$0xff]  ;;  %v1958_v47 = vld [vmem:[%s6410_s7 + $0x5d0] sm:$0xff] }
 0x38d   : > { %2557 = vmatprep.subr.mxu0 %v1826_v48  ;;  %2628 = vmatprep.subr.mxu1 %v2050_v49  ;;  %v2182_v48 = vld [vmem:[%s6410_s7 + $0xcd0] sm:$0xff]  ;;  %v1952_v49 = vld [vmem:[%s6410_s7 + $0x5a0] sm:$0xff] }
 0x38e   : > { %2558 = vmatpush1.msra.mxu0 %v1825_v50  ;;  %2629 = vmatpush1.msra.mxu1 %v2049_v51  ;;  %v2176_v50 = vld [vmem:[%s6410_s7 + $0xca0] sm:$0xff]  ;;  %v1951_v51 = vld [vmem:[%s6410_s7 + $0x598] sm:$0xff] }
 0x38f   : > { %2559 = vmatprep.subr.mxu0 %v1819_v52  ;;  %2630 = vmatprep.subr.mxu1 %v2043_v55  ;;  %v2175_v52 = vld [vmem:[%s6410_s7 + $0xc98] sm:$0xff]  ;;  %v1945_v55 = vld [vmem:[%s6410_s7 + $0x568] sm:$0xff] }
 0x390   : > { %2560 = vmatpush1.msra.mxu0 %v1818_v56  ;;  %2631 = vmatpush1.msra.mxu1 %v2042_v61  ;;  %v2169_v56 = vld [vmem:[%s6410_s7 + $0xc68] sm:$0xff]  ;;  %v1944_v61 = vld [vmem:[%s6410_s7 + $0x560] sm:$0xff] }
 0x391   : > { %2561 = vmatprep.subr.mxu0 %v1812_v62  ;;  %2632 = vmatprep.subr.mxu1 %v2036_v0  ;;  %v2168_v62 = vld [vmem:[%s6410_s7 + $0xc60] sm:$0xff]  ;;  %v1938_v0 = vld [vmem:[%s6410_s7 + $0x530] sm:$0xff] }
 0x392   : > { %2562 = vmatpush1.msra.mxu0 %v1811_v1  ;;  %2633 = vmatpush1.msra.mxu1 %v2035_v3  ;;  %v2162_v1 = vld [vmem:[%s6410_s7 + $0xc30] sm:$0xff]  ;;  %v1937_v3 = vld [vmem:[%s6410_s7 + $0x528] sm:$0xff] }
 0x393   : > { %2563 = vmatprep.subr.mxu0 %v1805_v4  ;;  %2634 = vmatprep.subr.mxu1 %v2029_v17  ;;  %v2161_v4 = vld [vmem:[%s6410_s7 + $0xc28] sm:$0xff]  ;;  %v1931_v17 = vld [vmem:[%s6410_s7 + $0x4f8] sm:$0xff] }
 0x394   : > { %2564 = vmatpush1.msra.mxu0 %v1804_v5  ;;  %2635 = vmatpush1.msra.mxu1 %v2028_v6  ;;  %v2155_v5 = vld [vmem:[%s6410_s7 + $0xbf8] sm:$0xff]  ;;  %v1930_v6 = vld [vmem:[%s6410_s7 + $0x4f0] sm:$0xff] }
 0x395   : > { %2565 = vmatprep.subr.mxu0 %v1798_v7  ;;  %2636 = vmatprep.subr.mxu1 %v2022_v8  ;;  %v2154_v7 = vld [vmem:[%s6410_s7 + $0xbf0] sm:$0xff]  ;;  %v1924_v8 = vld [vmem:[%s6410_s7 + $0x4c0] sm:$0xff] }
 0x396   : > { %2566 = vmatpush1.msra.mxu0 %v1797_v9  ;;  %2637 = vmatpush1.msra.mxu1 %v2021_v11  ;;  %v2148_v9 = vld [vmem:[%s6410_s7 + $0xbc0] sm:$0xff]  ;;  %v1923_v11 = vld [vmem:[%s6410_s7 + $0x4b8] sm:$0xff] }
 0x397   : > { %2567 = vmatprep.subr.mxu0 %v1791_v13  ;;  %2638 = vmatprep.subr.mxu1 %v2015_v14  ;;  %v2147_v13 = vld [vmem:[%s6410_s7 + $0xbb8] sm:$0xff]  ;;  %v1917_v14 = vld [vmem:[%s6410_s7 + $0x488] sm:$0xff] }
 0x398   : > { %2568 = vmatpush1.msra.mxu0 %v1790_v15  ;;  %2639 = vmatpush1.msra.mxu1 %v2014_v16  ;;  %v2141_v15 = vld [vmem:[%s6410_s7 + $0xb88] sm:$0xff]  ;;  %v1916_v16 = vld [vmem:[%s6410_s7 + $0x480] sm:$0xff] }
 0x399   : > { %2569 = vmatprep.subr.mxu0 %v1784_v18  ;;  %2640 = vmatprep.subr.mxu1 %v2008_v19  ;;  %v2140_v18 = vld [vmem:[%s6410_s7 + $0xb80] sm:$0xff]  ;;  %v1910_v19 = vld [vmem:[%s6410_s7 + $0x450] sm:$0xff] }
 0x39a   : > { %2570 = vmatpush1.msra.mxu0 %v1783_v20  ;;  %2641 = vmatpush1.msra.mxu1 %v2007_v21  ;;  %v2134_v20 = vld [vmem:[%s6410_s7 + $0xb50] sm:$0xff]  ;;  %v1909_v21 = vld [vmem:[%s6410_s7 + $0x448] sm:$0xff] }
 0x39b   : > { %2571 = vmatprep.subr.mxu0 %v1777_v22  ;;  %2642 = vmatprep.subr.mxu1 %v2001_v23  ;;  %v2133_v22 = vld [vmem:[%s6410_s7 + $0xb48] sm:$0xff]  ;;  %v1903_v23 = vld [vmem:[%s6410_s7 + $0x418] sm:$0xff] }
 0x39c   : > { %2572 = vmatpush1.msra.mxu0 %v1776_v24  ;;  %2643 = vmatpush1.msra.mxu1 %v2000_v25  ;;  %v2127_v24 = vld [vmem:[%s6410_s7 + $0xb18] sm:$0xff]  ;;  %v1902_v25 = vld [vmem:[%s6410_s7 + $0x410] sm:$0xff] }
 0x39d   : > { %2573 = vmatprep.subr.mxu0 %v1994_v26  ;;  %2644 = vmatprep.subr.mxu1 %v2218_v27  ;;  %v2126_v26 = vld [vmem:[%s6410_s7 + $0xb10] sm:$0xff]  ;;  %v1896_v27 = vld [vmem:[%s6410_s7 + $0x3e0] sm:$0xff] }
 0x39e   : > { %2574 = vmatpush2.msra.mxu0 %v1993_v63  ;;  %2645 = vmatpush2.msra.mxu1 %v2217_v28  ;;  %v2120_v63 = vld [vmem:[%s6410_s7 + $0xae0] sm:$0xff]  ;;  %v1895_v28 = vld [vmem:[%s6410_s7 + $0x3d8] sm:$0xff] }
 0x39f   : > { %2575 = vmatprep.subr.mxu0 %v1987_v2  ;;  %2646 = vmatprep.subr.mxu1 %v2211_v29  ;;  %v2119_v2 = vld [vmem:[%s6410_s7 + $0xad8] sm:$0xff]  ;;  %v1889_v29 = vld [vmem:[%s6410_s7 + $0x3a8] sm:$0xff] }
 0x3a0   : > { %2576 = vmatpush2.msra.mxu0 %v1986_v30  ;;  %2647 = vmatpush2.msra.mxu1 %v2210_v32  ;;  %v2113_v30 = vld [vmem:[%s6410_s7 + $0xaa8] sm:$0xff]  ;;  %v1888_v32 = vld [vmem:[%s6410_s7 + $0x3a0] sm:$0xff] }
 0x3a1   : > { %2577 = vmatprep.subr.mxu0 %v1980_v33  ;;  %2648 = vmatprep.subr.mxu1 %v2204_v34  ;;  %v2112_v33 = vld [vmem:[%s6410_s7 + $0xaa0] sm:$0xff]  ;;  %v1995_v34 = vld [vmem:[%s6410_s7 + $0x6f8] sm:$0xff] }
 0x3a2   : > { %2578 = vmatpush2.msra.mxu0 %v1979_v35  ;;  %2649 = vmatpush2.msra.mxu1 %v2203_v36  ;;  %v2219_v35 = vld [vmem:[%s6410_s7 + $0xdf8] sm:$0xff] }
 0x3a3   : > { %2579 = vmatprep.subr.mxu0 %v1973_v37  ;;  %2650 = vmatprep.subr.mxu1 %v2197_v38  ;;  %v1883_v36 = vld [vmem:[%s6410_s7 + $0x378] sm:$0xff]  ;;  %v1988_v38 = vld [vmem:[%s6410_s7 + $0x6c0] sm:$0xff] }
 0x3a4   : > { %2580 = vmatpush2.msra.mxu0 %v1972_v39  ;;  %2651 = vmatpush2.msra.mxu1 %v2196_v40  ;;  %v2107_v37 = vld [vmem:[%s6410_s7 + $0xa78] sm:$0xff]  ;;  %v2212_v39 = vld [vmem:[%s6410_s7 + $0xdc0] sm:$0xff] }
 0x3a5   : > { %2581 = vmatprep.subr.mxu0 %v1966_v41  ;;  %2652 = vmatprep.subr.mxu1 %v2190_v42  ;;  %v1876_v40 = vld [vmem:[%s6410_s7 + $0x340] sm:$0xff]  ;;  %v1981_v42 = vld [vmem:[%s6410_s7 + $0x688] sm:$0xff] }
 0x3a6   : > { %2582 = vmatpush2.msra.mxu0 %v1965_v43  ;;  %2653 = vmatpush2.msra.mxu1 %v2189_v44  ;;  %v2100_v41 = vld [vmem:[%s6410_s7 + $0xa40] sm:$0xff]  ;;  %v2205_v43 = vld [vmem:[%s6410_s7 + $0xd88] sm:$0xff] }
 0x3a7   : > { %2583 = vmatprep.subr.mxu0 %v1959_v45  ;;  %2654 = vmatprep.subr.mxu1 %v2183_v46  ;;  %v2093_v44 = vld [vmem:[%s6410_s7 + $0xa08] sm:$0xff]  ;;  %v2198_v45 = vld [vmem:[%s6410_s7 + $0xd50] sm:$0xff] }
 0x3a8   : > { %2584 = vmatpush2.msra.mxu0 %v1958_v47  ;;  %2655 = vmatpush2.msra.mxu1 %v2182_v48  ;;  %v1862_v46 = vld [vmem:[%s6410_s7 + $0x2d0] sm:$0xff]  ;;  %v1967_v48 = vld [vmem:[%s6410_s7 + $0x618] sm:$0xff] }
 0x3a9   : > { %2585 = vmatprep.subr.mxu0 %v1952_v49  ;;  %2656 = vmatprep.subr.mxu1 %v2176_v50  ;;  %v2086_v47 = vld [vmem:[%s6410_s7 + $0x9d0] sm:$0xff]  ;;  %v2191_v49 = vld [vmem:[%s6410_s7 + $0xd18] sm:$0xff] }
 0x3aa   : > { %2586 = vmatpush2.msra.mxu0 %v1951_v51  ;;  %2657 = vmatpush2.msra.mxu1 %v2175_v52  ;;  %v1855_v50 = vld [vmem:[%s6410_s7 + $0x298] sm:$0xff]  ;;  %v1960_v52 = vld [vmem:[%s6410_s7 + $0x5e0] sm:$0xff] }
 0x3ab   : > { %2587 = vmatprep.subr.mxu0 %v1945_v55  ;;  %2658 = vmatprep.subr.mxu1 %v2169_v56  ;;  %v2079_v51 = vld [vmem:[%s6410_s7 + $0x998] sm:$0xff]  ;;  %v2184_v55 = vld [vmem:[%s6410_s7 + $0xce0] sm:$0xff] }
 0x3ac   : > { %2588 = vmatpush2.msra.mxu0 %v1944_v61  ;;  %2659 = vmatpush2.msra.mxu1 %v2168_v62  ;;  %v1848_v56 = vld [vmem:[%s6410_s7 + $0x260] sm:$0xff]  ;;  %v1953_v62 = vld [vmem:[%s6410_s7 + $0x5a8] sm:$0xff] }
 0x3ad   : > { %2589 = vmatprep.subr.mxu0 %v1938_v0  ;;  %2660 = vmatprep.subr.mxu1 %v2162_v1  ;;  %v2072_v61 = vld [vmem:[%s6410_s7 + $0x960] sm:$0xff]  ;;  %v2177_v0 = vld [vmem:[%s6410_s7 + $0xca8] sm:$0xff] }
 0x3ae   : > { %2590 = vmatpush2.msra.mxu0 %v1937_v3  ;;  %2661 = vmatpush2.msra.mxu1 %v2161_v4  ;;  %v1841_v1 = vld [vmem:[%s6410_s7 + $0x228] sm:$0xff]  ;;  %v1946_v4 = vld [vmem:[%s6410_s7 + $0x570] sm:$0xff] }
 0x3af   : > { %2591 = vmatprep.subr.mxu0 %v1931_v17  ;;  %2662 = vmatprep.subr.mxu1 %v2155_v5  ;;  %v2065_v3 = vld [vmem:[%s6410_s7 + $0x928] sm:$0xff]  ;;  %v2170_v17 = vld [vmem:[%s6410_s7 + $0xc70] sm:$0xff] }
 0x3b0   : > { %2592 = vmatpush2.msra.mxu0 %v1930_v6  ;;  %2663 = vmatpush2.msra.mxu1 %v2154_v7  ;;  %v1834_v5 = vld [vmem:[%s6410_s7 + $0x1f0] sm:$0xff]  ;;  %v1939_v7 = vld [vmem:[%s6410_s7 + $0x538] sm:$0xff] }
 0x3b1   : > { %2593 = vmatprep.subr.mxu0 %v1924_v8  ;;  %2664 = vmatprep.subr.mxu1 %v2148_v9  ;;  %v2058_v6 = vld [vmem:[%s6410_s7 + $0x8f0] sm:$0xff]  ;;  %v2163_v8 = vld [vmem:[%s6410_s7 + $0xc38] sm:$0xff] }
 0x3b2   : > { %2594 = vmatpush2.msra.mxu0 %v1923_v11  ;;  %2665 = vmatpush2.msra.mxu1 %v2147_v13  ;;  %v1827_v9 = vld [vmem:[%s6410_s7 + $0x1b8] sm:$0xff]  ;;  %v1932_v13 = vld [vmem:[%s6410_s7 + $0x500] sm:$0xff] }
 0x3b3   : > { %2595 = vmatprep.subr.mxu0 %v1917_v14  ;;  %2666 = vmatprep.subr.mxu1 %v2141_v15  ;;  %v2051_v11 = vld [vmem:[%s6410_s7 + $0x8b8] sm:$0xff]  ;;  %v2156_v14 = vld [vmem:[%s6410_s7 + $0xc00] sm:$0xff] }
 0x3b4   : > { %2596 = vmatpush2.msra.mxu0 %v1916_v16  ;;  %2667 = vmatpush2.msra.mxu1 %v2140_v18  ;;  %v1820_v15 = vld [vmem:[%s6410_s7 + $0x180] sm:$0xff]  ;;  %v1925_v18 = vld [vmem:[%s6410_s7 + $0x4c8] sm:$0xff] }
 0x3b5   : > { %2597 = vmatprep.subr.mxu0 %v1910_v19  ;;  %2668 = vmatprep.subr.mxu1 %v2134_v20  ;;  %v2044_v16 = vld [vmem:[%s6410_s7 + $0x880] sm:$0xff]  ;;  %v2149_v19 = vld [vmem:[%s6410_s7 + $0xbc8] sm:$0xff] }
 0x3b6   : > { %2598 = vmatpush2.msra.mxu0 %v1909_v21  ;;  %2669 = vmatpush2.msra.mxu1 %v2133_v22  ;;  %v1813_v20 = vld [vmem:[%s6410_s7 + $0x148] sm:$0xff]  ;;  %v1918_v22 = vld [vmem:[%s6410_s7 + $0x490] sm:$0xff] }
 0x3b7   : > { %2599 = vmatprep.subr.mxu0 %v1903_v23  ;;  %2670 = vmatprep.subr.mxu1 %v2127_v24  ;;  %v2037_v21 = vld [vmem:[%s6410_s7 + $0x848] sm:$0xff]  ;;  %v2142_v23 = vld [vmem:[%s6410_s7 + $0xb90] sm:$0xff] }
 0x3b8   : > { %2600 = vmatpush2.msra.mxu0 %v1902_v25  ;;  %2671 = vmatpush2.msra.mxu1 %v2126_v26  ;;  %v1806_v24 = vld [vmem:[%s6410_s7 + $0x110] sm:$0xff]  ;;  %v1911_v26 = vld [vmem:[%s6410_s7 + $0x458] sm:$0xff] }
 0x3b9   : > { %2601 = vmatprep.subr.mxu0 %v1896_v27  ;;  %2672 = vmatprep.subr.mxu1 %v2120_v63  ;;  %v2030_v25 = vld [vmem:[%s6410_s7 + $0x810] sm:$0xff]  ;;  %v2135_v27 = vld [vmem:[%s6410_s7 + $0xb58] sm:$0xff] }
 0x3ba   : > { %2602 = vmatpush2.msra.mxu0 %v1895_v28  ;;  %2673 = vmatpush2.msra.mxu1 %v2119_v2  ;;  %v1799_v63 = vld [vmem:[%s6410_s7 + $0xd8] sm:$0xff]  ;;  %v1904_v2 = vld [vmem:[%s6410_s7 + $0x420] sm:$0xff] }
 0x3bb   : > { %2603 = vmatprep.subr.mxu0 %v1889_v29  ;;  %2674 = vmatprep.subr.mxu1 %v2113_v30  ;;  %v2023_v28 = vld [vmem:[%s6410_s7 + $0x7d8] sm:$0xff]  ;;  %v2128_v29 = vld [vmem:[%s6410_s7 + $0xb20] sm:$0xff] }
 0x3bc   : > { %2604 = vmatpush2.msra.mxu0 %v1888_v32  ;;  %2675 = vmatpush2.msra.mxu1 %v2112_v33  ;;  %v1792_v30 = vld [vmem:[%s6410_s7 + $0xa0] sm:$0xff]  ;;  %v1897_v33 = vld [vmem:[%s6410_s7 + $0x3e8] sm:$0xff] }
 0x3bd   : > { %2606 = vmatmul.mubr.f32.vlgmr.msra.gmra.mxu0 %v5355_v59  ;;  %2677 = vmatmul.mubr.f32.vlgmr.msra.gmra.mxu1 %v5357_v60  ;;  %v2016_v32 = vld [vmem:[%s6410_s7 + $0x7a0] sm:$0xff] }
 0x3be   : > { %3020 = vmatprep.subr.mxu0 %v1995_v34  ;;  %3055 = vmatprep.subr.mxu1 %v2219_v35  ;;  %v2121_v34 = vld [vmem:[%s6410_s7 + $0xae8] sm:$0xff] }
 0x3bf   : > { %3021 = vmatpush3.msra.mxu0 %v1883_v36  ;;  %2747 = vmatprep.mubr.f32.mxu0 %v5351_v57  ;;  %v1869_v57 = vld [vmem:[%s6410_s7 + $0x308] sm:$0xff] }
 0x3c0   : > { %3056 = vmatpush3.msra.mxu1 %v2107_v37  ;;  %2817 = vmatprep.mubr.f32.mxu1 %v5353_v58  ;;  %v1974_v58 = vld [vmem:[%s6410_s7 + $0x650] sm:$0xff]  ;;  %v1785_v35 = vld [vmem:[%s6410_s7 + $0x68] sm:$0xff] }
 0x3c1   : > { %3022 = vmatprep.subr.mxu0 %v1988_v38  ;;  %3057 = vmatprep.subr.mxu1 %v2212_v39  ;;  %v2009_v36 = vld [vmem:[%s6410_s7 + $0x768] sm:$0xff]  ;;  %v1890_v37 = vld [vmem:[%s6410_s7 + $0x3b0] sm:$0xff] }
 0x3c2   : > { %3023 = vmatpush3.msra.mxu0 %v1876_v40  ;;  %3058 = vmatpush3.msra.mxu1 %v2100_v41  ;;  %v2114_v38 = vld [vmem:[%s6410_s7 + $0xab0] sm:$0xff]  ;;  %v6332_v41 = vld [vmem:[%s6411_s8] sm:$0x7f] }
 0x3c3   : > { %3024 = vmatprep.subr.mxu0 %v1981_v42  ;;  %3059 = vmatprep.subr.mxu1 %v2205_v43  ;;  %v1778_v39 = vld [vmem:[%s6410_s7 + $0x30] sm:$0xff]  ;;  %v2225_v42 = vrot.slane %v6332_v41, %v4739_v31  ;;  %v2229_v43 = vrot.slane %v6332_v41, %v4745_v12 }
 0x3c4   : > { %3025 = vmatpush3.msra.mxu0 %v1869_v57  ;;  %3060 = vmatpush3.msra.mxu1 %v2093_v44  ;;  %v2002_v40 = vld [vmem:[%s6410_s7 + $0x730] sm:$0xff] }
 0x3c5   : > { %3026 = vmatprep.subr.mxu0 %v1974_v58  ;;  %3061 = vmatprep.subr.mxu1 %v2198_v45 }
 0x3c6   : > { %3027 = vmatpush3.msra.mxu0 %v1862_v46  ;;  %3062 = vmatpush3.msra.mxu1 %v2086_v47 }
 0x3c7   : > { %3028 = vmatprep.subr.mxu0 %v1967_v48  ;;  %3063 = vmatprep.subr.mxu1 %v2191_v49 }
 0x3c8   : > { %3029 = vmatpush3.msra.mxu0 %v1855_v50  ;;  %3064 = vmatpush3.msra.mxu1 %v2079_v51 }
 0x3c9   : > { %3030 = vmatprep.subr.mxu0 %v1960_v52  ;;  %3065 = vmatprep.subr.mxu1 %v2184_v55 }
 0x3ca   : > { %3031 = vmatpush3.msra.mxu0 %v1848_v56  ;;  %3066 = vmatpush3.msra.mxu1 %v2072_v61 }
 0x3cb   : > { %3032 = vmatprep.subr.mxu0 %v1953_v62  ;;  %3067 = vmatprep.subr.mxu1 %v2177_v0  ;;  %v2233_v62 = vrot.slane %v6332_v41, %v4751_v53  ;;  %v2237_v0 = vrot.slane %v6332_v41, %v4754_v54 }
 0x3cc   : > { %3033 = vmatpush3.msra.mxu0 %v1841_v1  ;;  %3068 = vmatpush3.msra.mxu1 %v2065_v3 }
 0x3cd   : > { %3034 = vmatprep.subr.mxu0 %v1946_v4  ;;  %3069 = vmatprep.subr.mxu1 %v2170_v17 }
 0x3ce   : > { %3035 = vmatpush3.msra.mxu0 %v1834_v5  ;;  %3070 = vmatpush3.msra.mxu1 %v2058_v6 }
 0x3cf   : > { %3036 = vmatprep.subr.mxu0 %v1939_v7  ;;  %3071 = vmatprep.subr.mxu1 %v2163_v8 }
 0x3d0   : > { %3037 = vmatpush3.msra.mxu0 %v1827_v9  ;;  %3072 = vmatpush3.msra.mxu1 %v2051_v11 }
 0x3d1   : > { %3038 = vmatprep.subr.mxu0 %v1932_v13  ;;  %3073 = vmatprep.subr.mxu1 %v2156_v14 }
 0x3d2   : > { %3039 = vmatpush3.msra.mxu0 %v1820_v15  ;;  %3074 = vmatpush3.msra.mxu1 %v2044_v16 }
 0x3d3   : > { %3040 = vmatprep.subr.mxu0 %v1925_v18  ;;  %3075 = vmatprep.subr.mxu1 %v2149_v19 }
 0x3d4   : > { %3041 = vmatpush3.msra.mxu0 %v1813_v20  ;;  %3076 = vmatpush3.msra.mxu1 %v2037_v21  ;;  %v2240_v20 = vsub.s32 4, %v4736_v10  ;;  %v2244_v21 = vsub.s32 5, %v4736_v10 }
 0x3d5   : > { %3042 = vmatprep.subr.mxu0 %v1918_v22  ;;  %3077 = vmatprep.subr.mxu1 %v2142_v23 }
 0x3d6   : > { %3043 = vmatpush3.msra.mxu0 %v1806_v24  ;;  %3078 = vmatpush3.msra.mxu1 %v2030_v25  ;;  %v2241_v22 = vrot.slane %v6332_v41, %v2240_v20  ;;  %v2245_v23 = vrot.slane %v6332_v41, %v2244_v21 }
 0x3d7   : > { %3044 = vmatprep.subr.mxu0 %v1911_v26  ;;  %3079 = vmatprep.subr.mxu1 %v2135_v27 }
 0x3d8   : > { %3045 = vmatpush3.msra.mxu0 %v1799_v63  ;;  %3080 = vmatpush3.msra.mxu1 %v2023_v28 }
 0x3d9   : > { %3046 = vmatprep.subr.mxu0 %v1904_v2  ;;  %3081 = vmatprep.subr.mxu1 %v2128_v29 }
 0x3da   : > { %3047 = vmatpush3.msra.mxu0 %v1792_v30  ;;  %3082 = vmatpush3.msra.mxu1 %v2016_v32 }
 0x3db   : > { %3048 = vmatprep.subr.mxu0 %v1897_v33  ;;  %3083 = vmatprep.subr.mxu1 %v2121_v34 }
 0x3dc   : > { %3049 = vmatpush3.msra.mxu0 %v1785_v35  ;;  %3084 = vmatpush3.msra.mxu1 %v2009_v36 }
 0x3dd   : > { %3050 = vmatprep.subr.mxu0 %v1890_v37  ;;  %3085 = vmatprep.subr.mxu1 %v2114_v38 }
 0x3de   : > { %3051 = vmatpush3.msra.mxu0 %v1778_v39  ;;  %3086 = vmatpush3.msra.mxu1 %v2002_v40  ;;  %v2248_v39 = vsub.s32 6, %v4736_v10 }
 0x3df   : > { %2748 = vmatmul.mubr.f32.vlgmr.msra.gmra.mxu0 %v5355_v59  ;;  %2818 = vmatmul.mubr.f32.vlgmr.msra.gmra.mxu1 %v5357_v60 }
 0x3fa   : > { %v2323_v57 = vpop.f32.mrf.mxu0  ;;  %v2394_v44 = vpop.f32.mrf.mxu1 }
 0x3fb   : > { %v2324_v58 = vadd.f32 %v2323_v57, %v2225_v42 }
 0x3fc   : > { %v2325_v45 = vpop.f32.mrf.mxu0  ;;  %v2396_v60 = vpop.f32.mrf.mxu1 }
 0x3fd   : > { %v2395_v46 = vadd.f32 %v2394_v44, %v2324_v58  ;;  %v2326_v59 = vadd.f32 %v2325_v45, %v2229_v43  ;;  %v2249_v43 = vrot.slane %v6332_v41, %v2248_v39 }
 0x3ff   : > { %v2823_v47 = vsub.f32 0.0, %v2395_v46  ;;  %v2397_v48 = vadd.f32 %v2396_v60, %v2326_v59 }
 0x401   : > { %v2830_v49 = vmul.f32 1.442695, %v2823_v47  ;;  %v2824_v50 = vsub.f32 0.0, %v2397_v48 }
 0x403   : > { %3133 = vpow2.f32 %v2830_v49  ;;  %v2832_v51 = vmul.f32 1.442695, %v2824_v50 }
 0x405   : > { %3135 = vpow2.f32 %v2832_v51 }
 0x410   : > { %v3134_v31 = vpop.eup %3133 }
 0x411   : > { %v2844_v52 = vadd.f32 1.0, %v3134_v31 }
 0x412   : > { %v3136_v55 = vpop.eup %3135 }
 0x413   : > { %3137 = vrcp.f32 %v2844_v52  ;;  %v2845_v12 = vadd.f32 1.0, %v3136_v55 }
 0x415   : > { %3139 = vrcp.f32 %v2845_v12 }
 0x420   : > { %v3138_v56 = vpop.eup %3137 }
 0x421   : > { %2858 = vst [vmem:[%s6341_s29] sm:$0xff] %v3138_v56 }
 0x422   : > { %v3140_v61 = vpop.eup %3139 }
 0x423   : > { %2859 = vst [vmem:[%s6341_s29 + $0x8] sm:$0xff] %v3140_v61 }
 0x43b   : > { %v2465_v1 = vpop.f32.mrf.mxu0  ;;  %v2536_v3 = vpop.f32.mrf.mxu1 }
 0x43c   : > { %v2466_v4 = vadd.f32 %v2465_v1, %v2233_v62 }
 0x43d   : > { %v2467_v17 = vpop.f32.mrf.mxu0  ;;  %v2538_v7 = vpop.f32.mrf.mxu1 }
 0x43e   : > { %v2537_v5 = vadd.f32 %v2536_v3, %v2466_v4  ;;  %v2468_v6 = vadd.f32 %v2467_v17, %v2237_v0 }
 0x440   : > { %v2825_v8 = vsub.f32 0.0, %v2537_v5  ;;  %v2539_v9 = vadd.f32 %v2538_v7, %v2468_v6 }
 0x442   : > { %v2834_v11 = vmul.f32 1.442695, %v2825_v8  ;;  %v2826_v13 = vsub.f32 0.0, %v2539_v9 }
 0x444   : > { %3141 = vpow2.f32 %v2834_v11  ;;  %v2836_v14 = vmul.f32 1.442695, %v2826_v13 }
 0x446   : > { %3143 = vpow2.f32 %v2836_v14 }
 0x451   : > { %v3142_v53 = vpop.eup %3141 }
 0x452   : > { %v2846_v15 = vadd.f32 1.0, %v3142_v53 }
 0x453   : > { %v3144_v16 = vpop.eup %3143 }
 0x454   : > { %3145 = vrcp.f32 %v2846_v15  ;;  %v2847_v54 = vadd.f32 1.0, %v3144_v16 }
 0x456   : > { %3147 = vrcp.f32 %v2847_v54 }
 0x461   : > { %v3146_v18 = vpop.eup %3145 }
 0x462   : > { %2860 = vst [vmem:[%s6341_s29 + $0x10] sm:$0xff] %v3146_v18 }
 0x463   : > { %v3148_v19 = vpop.eup %3147 }
 0x464   : > { %2861 = vst [vmem:[%s6341_s29 + $0x18] sm:$0xff] %v3148_v19 }
 0x47d   : > { %v2607_v24 = vpop.f32.mrf.mxu0  ;;  %v2678_v25 = vpop.f32.mrf.mxu1 }
 0x47e   : > { %v2608_v26 = vadd.f32 %v2607_v24, %v2241_v22 }
 0x47f   : > { %v2609_v27 = vpop.f32.mrf.mxu0  ;;  %v2680_v2 = vpop.f32.mrf.mxu1 }
 0x480   : > { %v2679_v63 = vadd.f32 %v2678_v25, %v2608_v26  ;;  %v2610_v28 = vadd.f32 %v2609_v27, %v2245_v23 }
 0x482   : > { %v2827_v29 = vsub.f32 0.0, %v2679_v63  ;;  %v2681_v30 = vadd.f32 %v2680_v2, %v2610_v28 }
 0x484   : > { %v2838_v32 = vmul.f32 1.442695, %v2827_v29  ;;  %v2828_v33 = vsub.f32 0.0, %v2681_v30 }
 0x486   : > { %3149 = vpow2.f32 %v2838_v32  ;;  %v2840_v34 = vmul.f32 1.442695, %v2828_v33 }
 0x488   : > { %3151 = vpow2.f32 %v2840_v34 }
 0x493   : > { %v3150_v35 = vpop.eup %3149 }
 0x494   : > { %v2848_v36 = vadd.f32 1.0, %v3150_v35 }
 0x495   : > { %v3152_v37 = vpop.eup %3151 }
 0x496   : > { %3153 = vrcp.f32 %v2848_v36  ;;  %v2849_v38 = vadd.f32 1.0, %v3152_v37 }
 0x498   : > { %3155 = vrcp.f32 %v2849_v38 }
 0x49f   : > { %v3052_v40 = vpop.f32.mrf.mxu0  ;;  %v3087_v42 = vpop.f32.mrf.mxu1 }
 0x4a1   : > { %v3053_v57 = vpop.f32.mrf.mxu0  ;;  %v3088_v44 = vpop.f32.mrf.mxu1 }
 0x4a2   : > { %v3054_v58 = vadd.f32 %v3053_v57, %v3052_v40  ;;  %v3089_v59 = vadd.f32 %v3088_v44, %v3087_v42 }
 0x4a3   : > { %v3154_v45 = vpop.eup %3153 }
 0x4a4   : > { %2862 = vst [vmem:[%s6341_s29 + $0x20] sm:$0xff] %v3154_v45  ;;  %v2750_v46 = vadd.f32 %v3054_v58, %v2249_v43 }
 0x4a5   : > { %v3156_v60 = vpop.eup %3155 }
 0x4a6   : > { %2863 = vst [vmem:[%s6341_s29 + $0x28] sm:$0xff] %v3156_v60  ;;  %v2820_v47 = vadd.f32 %v3089_v59, %v2750_v46 }
 0x4a8   : > { %v2829_v10 = vsub.f32 0.0, %v2820_v47 }
 0x4aa   : > { %v2842_v48 = vmul.f32 1.442695, %v2829_v10 }
 0x4ac   : > { %3157 = vpow2.f32 %v2842_v48 }
 0x4b9   : > { %v3158_v49 = vpop.eup %3157 }
 0x4ba   : > { %v2850_v41 = vadd.f32 1.0, %v3158_v49 }
 0x4bc   : > { %3159 = vrcp.f32 %v2850_v41 }
 0x4c9   : > { %v3160_v50 = vpop.eup %3159 }
 0x4ca   : > { %2864 = vst.msk [vmem:[%s6341_s29 + $0x30] sm:$0xff] %vm752_vm0, %v3160_v50 }
 0x4cb   : > { %3177 = shalt.err (!%p3174_p3)
}
 0x4cc   : > { %s3178_s16 = scalar_lea.hbm %s6364_s25, 896  ;;  %s3182_s21 = scalar_lea.hbm %s6412_s9, 1792 }
 0x4cd   : > { %p3179_p4 = scmp.ne.s32.totalorder %s6364_s25, %s3178_s16  ;;  %p3183_p9 = scmp.lt.s32.totalorder %s6364_s25, %s6412_s9 }
 0x4ce   : > { %p3184_p10 = scmp.lt.s32.totalorder %s3182_s21, %s3178_s16 }
 0x4cf   : > { %p3180_p7 = pnand %p3179_p4, %p3316_p5 }
 0x4d0   : > { %p3185_p11 = por %p3184_p10, %p3183_p9 }
 0x4d1   : > { %p3181_p8 = pneg %p3180_p7 }
 0x4d3   : > { %p3186_p12 = pnand %p3185_p11, %p3181_p8 }
 0x4d5   : > { %3189 = shalt.err (!%p3186_p12)
}
 0x4d6   : > { %3093 = dma.vmem_to_hbm [thread:$0]  (%p3316_p5), %s2881_s17, 896, %s6364_s25, %s2866_s26  }
 0x4d7 PF: > { %p3099_p13 = scmp.ge.s32.totalorder %s3224_s12, 2  ;;  %s2892_s23 = sand.u32 1, %s3212_s30  }
 0x4d8   : > { %s2893_s27 = scalar_lea.sflag [#allocation3], %s2892_s23 }
 0x4d9   : > { %p3096_p0 = pnand %p3099_p13, %p3320_p6 }
 0x4db   : > { %p3097_p1 = pneg %p3096_p0 }
 0x4dd   : > { %3207 = dma.done.wait (%p3097_p1), %s2893_s27, 896  }
 0x4de   : > { %3209 = vsyncadd (%p3097_p1), %s2893_s27, 4294966400  ;;  %p19_p2 = scmp.ge.s32.totalorder %s3303_s15, 4   ;;  %s6415_s30 = smov %s3216_s10 }
 0x4df   : > { %s6416_s10 = smov %s3220_s11  ;;  %s6417_s11 = smov %s3314_s18 }
 0x4e0   : > { %s6418_s12 = smov %s3303_s15  ;;  %21 = sbr.rel (!%p19_p2) target bundleno = 3 (0x3), region = 91 }
 0x4e5   :  { %2898 = vsyncpa [#allocation3], 1 }
 0x4e6   :  { %2900 = vsyncpa [#allocation3 + $0x1], 1 }

</bundles_post_ra>
